<compile_context>
chip_gen: v7x
topology: tpu7x:2x2x1
jax: 0.10.0
libtpu: 0.0.40
codegen_flags: <defaults>
</compile_context>

<pallas_src>
import functools
import math

import jax
import jax.numpy as jnp
from jax.experimental import pallas as pl
from jax.experimental.pallas import tpu as pltpu

MAXDISP = 16          # multiple of 16 so hourglass stride-2 down/up sampling round-trips
BN_EPS = 1e-5
VMEM_LIMIT = 32 * 1024 * 1024   # well under v7x's 64 MiB physical VMEM


# ---------------------------------------------------------------------------
# Pallas kernel 1: matmul with resident weights + fused BN scale/bias
#                  (+ optional residual add) (+ optional ReLU)
# ---------------------------------------------------------------------------
def _mm_bn_kernel(a_ref, b_ref, s_ref, c_ref, o_ref, *, relu):
    acc = jnp.dot(a_ref[...], b_ref[...], preferred_element_type=jnp.float32)
    y = acc * s_ref[...] + c_ref[...]
    if relu:
        y = jnp.maximum(y, 0.0)
    o_ref[...] = y.astype(o_ref.dtype)


def _mm_bn_res_kernel(a_ref, b_ref, s_ref, c_ref, r_ref, o_ref, *, relu):
    acc = jnp.dot(a_ref[...], b_ref[...], preferred_element_type=jnp.float32)
    y = acc * s_ref[...] + c_ref[...] + r_ref[...].astype(jnp.float32)
    if relu:
        y = jnp.maximum(y, 0.0)
    o_ref[...] = y.astype(o_ref.dtype)


def matmul_bn_relu(a, b, scale, bias, *, relu, res=None, out_dtype=jnp.bfloat16):
    """(M,K) @ (K,N) in bf16 (f32 accumulation), fused scale/bias (+res) (+ReLU).

    Weights / scale / bias are kept fully resident in VMEM (N <= 64 here), the grid
    runs over M only with 512-row tiles, and K is passed un-padded as a full-dim block.
    """
    M, K = a.shape
    _, N = b.shape
    a = a.astype(jnp.bfloat16)
    b = b.astype(jnp.bfloat16)
    scale = scale.reshape(1, N).astype(jnp.float32)
    bias = bias.reshape(1, N).astype(jnp.float32)

    tm = 512 if M >= 512 else M            # full-dim block when M is small
    grid_m = pl.cdiv(M, tm)

    in_specs = [
        pl.BlockSpec((tm, K), lambda i: (i, 0)),     # A: streamed over M
        pl.BlockSpec((K, N), lambda i: (0, 0)),      # B: resident (constant index)
        pl.BlockSpec((1, N), lambda i: (0, 0)),      # scale: resident
        pl.BlockSpec((1, N), lambda i: (0, 0)),      # bias:  resident
    ]
    args = [a, b, scale, bias]
    if res is not None:
        in_specs.append(pl.BlockSpec((tm, N), lambda i: (i, 0)))
        args.append(res)
        kernel = functools.partial(_mm_bn_res_kernel, relu=relu)
    else:
        kernel = functools.partial(_mm_bn_kernel, relu=relu)

    return pl.pallas_call(
        kernel,
        out_shape=jax.ShapeDtypeStruct((M, N), out_dtype),
        grid_spec=pltpu.PrefetchScalarGridSpec(
            num_scalar_prefetch=0,
            grid=(grid_m,),
            in_specs=in_specs,
            out_specs=pl.BlockSpec((tm, N), lambda i: (i, 0)),
        ),
        compiler_params=pltpu.CompilerParams(
            dimension_semantics=("parallel",),
            vmem_limit_bytes=VMEM_LIMIT),
    )(*args)


# ---------------------------------------------------------------------------
# Pallas kernel 2: fused disparity-axis upsample (x4, align_corners) + softmax
#                  over disparity + disparity regression.  Pixels on the lane axis.
# ---------------------------------------------------------------------------
def _softmax_reg_kernel(x_ref, u_ref, o_ref):
    x4 = x_ref[...]                                                # (D4, TN)  f32
    u = u_ref[...]                                                 # (D,  D4)  f32
    c = jnp.dot(u, x4, preferred_element_type=jnp.float32)         # (D,  TN)
    m = jnp.max(c, axis=0, keepdims=True)
    e = jnp.exp(c - m)
    s = jnp.sum(e, axis=0, keepdims=True)
    d = jax.lax.broadcasted_iota(jnp.int32, e.shape, 0).astype(jnp.float32)
    num = jnp.sum(e * d, axis=0, keepdims=True)
    o_ref[...] = num / s                                           # (1, TN) lane-dense


def _d_upsample_matrix(d4, d):
    """(d, d4) linear-interpolation matrix, align_corners=True."""
    if d4 == 1:
        return jnp.ones((d, 1), jnp.float32)
    pos = jnp.arange(d, dtype=jnp.float32) * (d4 - 1) / (d - 1)
    lo = jnp.clip(jnp.floor(pos).astype(jnp.int32), 0, d4 - 2)
    frac = pos - lo.astype(jnp.float32)
    return (jax.nn.one_hot(lo, d4, dtype=jnp.float32) * (1.0 - frac)[:, None]
            + jax.nn.one_hot(lo + 1, d4, dtype=jnp.float32) * frac[:, None])


def softmax_disparity_regression_upsampled(cost4, maxdisp):
    """cost4: [B, D4, H, W] (already spatially upsampled) -> [B, H, W]."""
    B, D4, H, W = cost4.shape
    D = maxdisp
    x = jnp.transpose(cost4, (1, 0, 2, 3)).reshape(D4, B * H * W).astype(jnp.float32)
    N = B * H * W
    TN = 512 if N >= 512 else N
    U = _d_upsample_matrix(D4, D)

    out = pl.pallas_call(
        _softmax_reg_kernel,
        out_shape=jax.ShapeDtypeStruct((1, N), jnp.float32),
        grid_spec=pltpu.PrefetchScalarGridSpec(
            num_scalar_prefetch=0,
            grid=(pl.cdiv(N, TN),),
            in_specs=[
                pl.BlockSpec((D4, TN), lambda i: (0, i)),
                pl.BlockSpec((D, D4), lambda i: (0, 0)),
            ],
            out_specs=pl.BlockSpec((1, TN), lambda i: (0, i)),
        ),
        compiler_params=pltpu.CompilerParams(
            dimension_semantics=("parallel",),
            vmem_limit_bytes=VMEM_LIMIT),
    )(x, U)
    return out.reshape(B, H, W)


# ---------------------------------------------------------------------------
# Convolutions via im2col (bf16 JAX glue) + Pallas matmul (hot path)
# ---------------------------------------------------------------------------
def conv3d_bn(x, layer, *, k=(3, 3, 3), stride=(1, 1, 1), pad=(1, 1, 1),
              relu=False, res=None, out_dtype=jnp.bfloat16):
    """x: [B, D, H, W, Cin] (bf16).  layer['w']: pre-transposed (K, Cout) bf16 matrix."""
    Wm, scale, bias = layer['w'], layer['scale'], layer['bias']
    B, D, H, W, Cin = x.shape
    kd, kh, kw = k
    sd, sh, sw = stride
    pd, ph, pw = pad
    Cout = Wm.shape[1]
    xp = jnp.pad(x, ((0, 0), (pd, pd), (ph, ph), (pw, pw), (0, 0)))
    Do = (D + 2 * pd - kd) // sd + 1
    Ho = (H + 2 * ph - kh) // sh + 1
    Wo = (W + 2 * pw - kw) // sw + 1
    cols = []
    for a in range(kd):
        for b in range(kh):
            for c in range(kw):
                cols.append(xp[:, a:a + sd * (Do - 1) + 1:sd,
                               b:b + sh * (Ho - 1) + 1:sh,
                               c:c + sw * (Wo - 1) + 1:sw, :])
    A = jnp.concatenate(cols, axis=-1).reshape(B * Do * Ho * Wo, kd * kh * kw * Cin)
    r = None if res is None else res.reshape(B * Do * Ho * Wo, Cout)
    y = matmul_bn_relu(A, Wm, scale, bias, relu=relu, res=r, out_dtype=out_dtype)
    return y.reshape(B, Do, Ho, Wo, Cout)


def _deconv_taps(parity):
    """(input offset, kernel index) pairs for ConvTranspose(k=3, s=2, p=1, op=1)
    contributing to output positions of the given parity along one axis."""
    return ((0, 1),) if parity == 0 else ((0, 2), (1, 0))


def conv_transpose3d_bn(x, layer, *, relu=False, res=None, out_dtype=jnp.bfloat16):
    """Sub-pixel ConvTranspose3d(k=3, s=2, p=1, op=1) + folded BN (+res) (+ReLU).

    The output is decomposed into 8 parity phases; each phase is a small dense conv
    (1/2/4/8 taps) computed with the fused Pallas matmul and interleaved at the end.
    Optional residual is phase-sliced so the add+ReLU stays fused in the epilogue.
    """
    B, D, H, W, Cin = x.shape
    Cout = layer['phase_w'][0].shape[1]
    xp = jnp.pad(x, ((0, 0), (0, 1), (0, 1), (0, 1), (0, 0)))   # high-side zero for +1 taps
    outs = []
    idx = 0
    for ed in (0, 1):
        for eh in (0, 1):
            for ew in (0, 1):
                cols = []
                for od, _ in _deconv_taps(ed):
                    for oh, _ in _deconv_taps(eh):
                        for ow, _ in _deconv_taps(ew):
                            cols.append(xp[:, od:od + D, oh:oh + H, ow:ow + W, :])
                A = jnp.concatenate(cols, axis=-1).reshape(B * D * H * W, -1)
                r = None
                if res is not None:
                    r = res[:, ed::2, eh::2, ew::2, :].reshape(B * D * H * W, Cout)
                y = matmul_bn_relu(A, layer['phase_w'][idx], layer['scale'],
                                   layer['bias'], relu=relu, res=r, out_dtype=out_dtype)
                outs.append(y.reshape(B, D, H, W, Cout))
                idx += 1
    y = jnp.stack(outs, axis=0).reshape(2, 2, 2, B, D, H, W, Cout)
    y = jnp.transpose(y, (3, 4, 0, 5, 1, 6, 2, 7)).reshape(B, 2 * D, 2 * H, 2 * W, Cout)
    return y


# ---------------------------------------------------------------------------
# Parameter initialisation (deterministic, matmul-form weights built once)
# ---------------------------------------------------------------------------
def _bn_fold(c):
    gamma = jnp.ones((c,), jnp.float32)
    beta = jnp.zeros((c,), jnp.float32)
    mean = jnp.zeros((c,), jnp.float32)
    var = jnp.ones((c,), jnp.float32)
    scale = gamma / jnp.sqrt(var + BN_EPS)
    bias = beta - mean * scale
    return scale, bias


def _init_convbn(key, cin, cout, k=(3, 3, 3), with_bn=True):
    kd, kh, kw = k
    n = kd * kh * kw * cout
    std = math.sqrt(2.0 / n)
    w = std * jax.random.normal(key, (cout, cin, kd, kh, kw), jnp.float32)
    # pre-transpose once: rows ordered (kd, kh, kw, cin) to match im2col column order
    Wm = jnp.transpose(w, (2, 3, 4, 1, 0)).reshape(kd * kh * kw * cin, cout)
    if with_bn:
        scale, bias = _bn_fold(cout)
    else:
        scale, bias = jnp.ones((cout,), jnp.float32), jnp.zeros((cout,), jnp.float32)
    return {'w': Wm.astype(jnp.bfloat16),
            'scale': scale.reshape(1, cout), 'bias': bias.reshape(1, cout)}


def _init_deconvbn3d(key, cin, cout):
    std = math.sqrt(2.0 / (27 * cout))
    w = std * jax.random.normal(key, (cin, cout, 3, 3, 3), jnp.float32)  # torch layout
    scale, bias = _bn_fold(cout)
    phase_w = []
    for ed in (0, 1):
        for eh in (0, 1):
            for ew in (0, 1):
                mats = []
                for _, kd in _deconv_taps(ed):
                    for _, kh in _deconv_taps(eh):
                        for _, kw in _deconv_taps(ew):
                            mats.append(w[:, :, kd, kh, kw])          # (Cin, Cout)
                phase_w.append(jnp.concatenate(mats, axis=0).astype(jnp.bfloat16))
    return {'phase_w': phase_w,
            'scale': scale.reshape(1, cout), 'bias': bias.reshape(1, cout)}


def init_params(key):
    keys = iter(jax.random.split(key, 40))

    def nk():
        return next(keys)

    def hourglass_params(inplanes):
        return {
            'conv1': _init_convbn(nk(), inplanes, inplanes * 2),
            'conv2': _init_convbn(nk(), inplanes * 2, inplanes * 2),
            'conv3': _init_convbn(nk(), inplanes * 2, inplanes * 2),
            'conv4': _init_convbn(nk(), inplanes * 2, inplanes * 2),
            'conv5': _init_deconvbn3d(nk(), inplanes * 2, inplanes * 2),
            'conv6': _init_deconvbn3d(nk(), inplanes * 2, inplanes),
        }

    return {
        # minimal feature-extraction stand-in (see TODO at top of file)
        'fe1': _init_convbn(nk(), 3, 16, k=(1, 3, 3)),
        'fe2': _init_convbn(nk(), 16, 32, k=(1, 3, 3)),
        'fe3': _init_convbn(nk(), 32, 32, k=(1, 3, 3), with_bn=False),
        'dres0': [_init_convbn(nk(), 64, 32), _init_convbn(nk(), 32, 32)],
        'dres1': [_init_convbn(nk(), 32, 32), _init_convbn(nk(), 32, 32)],
        'dres2': hourglass_params(32),
        'dres3': hourglass_params(32),
        'dres4': hourglass_params(32),
        'classif1': [_init_convbn(nk(), 32, 32), _init_convbn(nk(), 32, 1, with_bn=False)],
        'classif2': [_init_convbn(nk(), 32, 32), _init_convbn(nk(), 32, 1, with_bn=False)],
        'classif3': [_init_convbn(nk(), 32, 32), _init_convbn(nk(), 32, 1, with_bn=False)],
    }


# ---------------------------------------------------------------------------
# Network forward (eval path)
# ---------------------------------------------------------------------------
def feature_extraction(params, img_nchw):
    x = jnp.transpose(img_nchw, (0, 2, 3, 1)).astype(jnp.bfloat16)[:, None]  # [B,1,H,W,3]
    x = conv3d_bn(x, params['fe1'], k=(1, 3, 3), stride=(1, 2, 2), pad=(0, 1, 1), relu=True)
    x = conv3d_bn(x, params['fe2'], k=(1, 3, 3), stride=(1, 2, 2), pad=(0, 1, 1), relu=True)
    x = conv3d_bn(x, params['fe3'], k=(1, 3, 3), stride=(1, 1, 1), pad=(0, 1, 1), relu=False)
    return x[:, 0]                                                 # [B, H/4, W/4, 32]


def build_cv(featL, featR, maxdisp):
    """featL/featR: [B, H4, W4, C] -> cost [B, D4, H4, W4, 2C] (channels-last, bf16)."""
    B, H4, W4, C = featL.shape
    D4 = maxdisp // 4
    col = jnp.arange(W4)
    zero = jnp.zeros((), featL.dtype)
    slices = []
    for i in range(D4):
        if i == 0:
            l, r = featL, featR
        else:
            mask = (col >= i)[None, None, :, None]
            l = jnp.where(mask, featL, zero)
            r = jnp.pad(featR[:, :, :W4 - i, :], ((0, 0), (0, 0), (i, 0), (0, 0)))
        slices.append(jnp.concatenate([l, r], axis=-1))
    return jnp.stack(slices, axis=1)


def hourglass_forward(p, x, presqu, postsqu, res_out):
    out = conv3d_bn(x, p['conv1'], stride=(2, 2, 2), relu=True)
    # conv2: BN (+ postsqu if given) + ReLU, all fused in the matmul epilogue
    pre = conv3d_bn(out, p['conv2'], stride=(1, 1, 1), relu=True, res=postsqu)
    out = conv3d_bn(pre, p['conv3'], stride=(2, 2, 2), relu=True)
    out = conv3d_bn(out, p['conv4'], stride=(1, 1, 1), relu=True)
    post = conv_transpose3d_bn(out, p['conv5'], relu=True,
                               res=(presqu if presqu is not None else pre))
    # conv6: BN + (caller's residual, e.g. cost0) fused, no ReLU
    out = conv_transpose3d_bn(post, p['conv6'], relu=False, res=res_out)
    return out, pre, post


def cost_regularization(params, cost):
    cost0 = conv3d_bn(cost, params['dres0'][0], relu=True)
    cost0 = conv3d_bn(cost0, params['dres0'][1], relu=True)
    tmp = conv3d_bn(cost0, params['dres1'][0], relu=True)
    cost0 = conv3d_bn(tmp, params['dres1'][1], relu=False, res=cost0)   # dres1(x) + x

    out1, pre1, post1 = hourglass_forward(params['dres2'], cost0, None, None, cost0)
    out2, pre2, post2 = hourglass_forward(params['dres3'], out1, pre1, post1, cost0)
    out3, pre3, post3 = hourglass_forward(params['dres4'], out2, pre1, post2, cost0)

    def classif(layers, x, res=None):
        h = conv3d_bn(x, layers[0], relu=True)
        return conv3d_bn(h, layers[1], relu=False, res=res, out_dtype=jnp.float32)

    cost1 = classif(params['classif1'], out1)
    cost2 = classif(params['classif2'], out2, res=cost1)
    cost3 = classif(params['classif3'], out3, res=cost2)

    c3 = jnp.squeeze(cost3, -1)                                    # [B, D4, H4, W4] f32
    # spatial (H, W) x4 bilinear upsample (align_corners=True) on the small D4 volume;
    # the disparity-axis x4 upsample is fused inside the softmax/regression kernel.
    c3 = upsample_ac(c3, axis=2, factor=4)
    c3 = upsample_ac(c3, axis=3, factor=4)                         # [B, D4, H, W]
    return softmax_disparity_regression_upsampled(c3, MAXDISP)     # [B, H, W]


def upsample_ac(x, axis, factor):
    """1-D linear interpolation, align_corners=True, along `axis` (x scale `factor`)."""
    n_in = x.shape[axis]
    n_out = n_in * factor
    if n_in == 1:
        return jnp.repeat(x, n_out, axis=axis)
    pos = jnp.arange(n_out, dtype=jnp.float32) * (n_in - 1) / (n_out - 1)
    lo = jnp.clip(jnp.floor(pos).astype(jnp.int32), 0, n_in - 2)
    frac = pos - lo.astype(jnp.float32)
    x_lo = jnp.take(x, lo, axis=axis)
    x_hi = jnp.take(x, lo + 1, axis=axis)
    shape = [1] * x.ndim
    shape[axis] = n_out
    frac = frac.reshape(shape)
    return x_lo * (1.0 - frac) + x_hi * frac


def psmnet_forward(params, imgL, imgR):
    featL = feature_extraction(params, imgL)
    featR = feature_extraction(params, imgR)
    cost = build_cv(featL, featR, MAXDISP)
    return cost_regularization(params, cost)


if __name__ == "__main__":
    key = jax.random.PRNGKey(0)
    k_l, k_r, k_p = jax.random.split(key, 3)
    B, H, W = 2, 16, 16
    imgL = jax.random.normal(k_l, (B, 3, H, W), jnp.float32)   # NCHW, PyTorch convention
    imgR = jax.random.normal(k_r, (B, 3, H, W), jnp.float32)
    params = init_params(k_p)

    pred3 = jax.jit(psmnet_forward)(params, imgL, imgR)
    pred3 = jax.block_until_ready(pred3)
    assert pred3.shape == (B, H, W), pred3.shape
    assert bool(jnp.all(jnp.isfinite(pred3)))
    print("KERNEL_OK")
</pallas_src>

<mosaic_0001>
module attributes {stable_mosaic.version = 11 : i64} {
  func.func @_mm_bn_kernel(%arg0: i32, %arg1: memref<128x27xbf16, #tpu.memory_space<vmem>>, %arg2: memref<27x16xbf16, #tpu.memory_space<vmem>>, %arg3: memref<1x16xf32, #tpu.memory_space<vmem>>, %arg4: memref<1x16xf32, #tpu.memory_space<vmem>>, %arg5: memref<128x16xbf16, #tpu.memory_space<vmem>>) attributes {dimension_semantics = [#tpu.dimension_semantics<parallel>], iteration_bounds = array<i64: 1>, scalar_prefetch = 0 : i64, scratch_operands = 0 : i64, tpu.core_type = #tpu.core_type<tc>, window_params = [{transform_indices = @transform_0, window_bounds = array<i64: 128, 27>}, {pipeline_mode = #tpu.pipeline_mode<synchronous>, transform_indices = @transform_1, window_bounds = array<i64: 27, 16>}, {pipeline_mode = #tpu.pipeline_mode<synchronous>, transform_indices = @transform_2, window_bounds = array<i64: 1, 16>}, {pipeline_mode = #tpu.pipeline_mode<synchronous>, transform_indices = @transform_3, window_bounds = array<i64: 1, 16>}, {transform_indices = @transform_4, window_bounds = array<i64: 128, 16>}]} {
    %c0 = arith.constant 0 : index
    %c0_0 = arith.constant 0 : index
    %0 = vector.load %arg1[%c0, %c0_0] : memref<128x27xbf16, #tpu.memory_space<vmem>>, vector<128x27xbf16>
    %c0_1 = arith.constant 0 : index
    %c0_2 = arith.constant 0 : index
    %1 = vector.load %arg2[%c0_1, %c0_2] : memref<27x16xbf16, #tpu.memory_space<vmem>>, vector<27x16xbf16>
    %cst = arith.constant dense<0.000000e+00> : vector<128x16xf32>
    %2 = tpu.matmul %0, %1, %cst {dimension_numbers = #tpu.dot_dimension_numbers<[1], [0], [0], [1], [0, 0, 1, 1], [], []>} : vector<128x27xbf16>, vector<27x16xbf16>, vector<128x16xf32> -> vector<128x16xf32>
    %c0_3 = arith.constant 0 : index
    %c0_4 = arith.constant 0 : index
    %3 = vector.load %arg3[%c0_3, %c0_4] : memref<1x16xf32, #tpu.memory_space<vmem>>, vector<1x16xf32>
    %4 = vector.broadcast %3 : vector<1x16xf32> to vector<128x16xf32>
    %5 = arith.mulf %2, %4 : vector<128x16xf32>
    %c0_5 = arith.constant 0 : index
    %c0_6 = arith.constant 0 : index
    %6 = vector.load %arg4[%c0_5, %c0_6] : memref<1x16xf32, #tpu.memory_space<vmem>>, vector<1x16xf32>
    %7 = vector.broadcast %6 : vector<1x16xf32> to vector<128x16xf32>
    %8 = arith.addf %5, %7 : vector<128x16xf32>
    %cst_7 = arith.constant 0.000000e+00 : f32
    %9 = vector.broadcast %cst_7 : f32 to vector<128x16xf32>
    %10 = arith.maximumf %8, %9 : vector<128x16xf32>
    %11 = arith.truncf %10 : vector<128x16xf32> to vector<128x16xbf16>
    %c0_8 = arith.constant 0 : index
    %c0_9 = arith.constant 0 : index
    %12 = vector.load %arg5[%c0_8, %c0_9] : memref<128x16xbf16, #tpu.memory_space<vmem>>, vector<128x16xbf16>
    tpu.vector_store %arg5[%c0_8, %c0_9], %11 {strides = array<i32>} : memref<128x16xbf16, #tpu.memory_space<vmem>>, vector<128x16xbf16>,
    return
  }
  func.func @transform_0(%arg0: i32) -> (i32, i32) {
    %c0_i32 = arith.constant 0 : i32
    %c0_i32_0 = arith.constant 0 : i32
    return %arg0, %c0_i32 : i32, i32
  }
  func.func @transform_1(%arg0: i32) -> (i32, i32) {
    %c0_i32 = arith.constant 0 : i32
    %c0_i32_0 = arith.constant 0 : i32
    %c0_i32_1 = arith.constant 0 : i32
    return %c0_i32, %c0_i32_0 : i32, i32
  }
  func.func @transform_2(%arg0: i32) -> (i32, i32) {
    %c0_i32 = arith.constant 0 : i32
    %c0_i32_0 = arith.constant 0 : i32
    %c0_i32_1 = arith.constant 0 : i32
    return %c0_i32, %c0_i32_0 : i32, i32
  }
  func.func @transform_3(%arg0: i32) -> (i32, i32) {
    %c0_i32 = arith.constant 0 : i32
    %c0_i32_0 = arith.constant 0 : i32
    %c0_i32_1 = arith.constant 0 : i32
    return %c0_i32, %c0_i32_0 : i32, i32
  }
  func.func @transform_4(%arg0: i32) -> (i32, i32) {
    %c0_i32 = arith.constant 0 : i32
    %c0_i32_0 = arith.constant 0 : i32
    return %arg0, %c0_i32 : i32, i32
  }
}

module attributes {stable_mosaic.version = 11 : i64} {
  func.func @_mm_bn_kernel(%arg0: i32, %arg1: memref<32x144xbf16, #tpu.memory_space<vmem>>, %arg2: memref<144x32xbf16, #tpu.memory_space<vmem>>, %arg3: memref<1x32xf32, #tpu.memory_space<vmem>>, %arg4: memref<1x32xf32, #tpu.memory_space<vmem>>, %arg5: memref<32x32xbf16, #tpu.memory_space<vmem>>) attributes {dimension_semantics = [#tpu.dimension_semantics<parallel>], iteration_bounds = array<i64: 1>, scalar_prefetch = 0 : i64, scratch_operands = 0 : i64, tpu.core_type = #tpu.core_type<tc>, window_params = [{transform_indices = @transform_0, window_bounds = array<i64: 32, 144>}, {pipeline_mode = #tpu.pipeline_mode<synchronous>, transform_indices = @transform_1, window_bounds = array<i64: 144, 32>}, {pipeline_mode = #tpu.pipeline_mode<synchronous>, transform_indices = @transform_2, window_bounds = array<i64: 1, 32>}, {pipeline_mode = #tpu.pipeline_mode<synchronous>, transform_indices = @transform_3, window_bounds = array<i64: 1, 32>}, {transform_indices = @transform_4, window_bounds = array<i64: 32, 32>}]} {
    %c0 = arith.constant 0 : index
    %c0_0 = arith.constant 0 : index
    %0 = vector.load %arg1[%c0, %c0_0] : memref<32x144xbf16, #tpu.memory_space<vmem>>, vector<32x144xbf16>
    %c0_1 = arith.constant 0 : index
    %c0_2 = arith.constant 0 : index
    %1 = vector.load %arg2[%c0_1, %c0_2] : memref<144x32xbf16, #tpu.memory_space<vmem>>, vector<144x32xbf16>
    %cst = arith.constant dense<0.000000e+00> : vector<32x32xf32>
    %2 = tpu.matmul %0, %1, %cst {dimension_numbers = #tpu.dot_dimension_numbers<[1], [0], [0], [1], [0, 0, 1, 1], [], []>} : vector<32x144xbf16>, vector<144x32xbf16>, vector<32x32xf32> -> vector<32x32xf32>
    %c0_3 = arith.constant 0 : index
    %c0_4 = arith.constant 0 : index
    %3 = vector.load %arg3[%c0_3, %c0_4] : memref<1x32xf32, #tpu.memory_space<vmem>>, vector<1x32xf32>
    %4 = vector.broadcast %3 : vector<1x32xf32> to vector<32x32xf32>
    %5 = arith.mulf %2, %4 : vector<32x32xf32>
    %c0_5 = arith.constant 0 : index
    %c0_6 = arith.constant 0 : index
    %6 = vector.load %arg4[%c0_5, %c0_6] : memref<1x32xf32, #tpu.memory_space<vmem>>, vector<1x32xf32>
    %7 = vector.broadcast %6 : vector<1x32xf32> to vector<32x32xf32>
    %8 = arith.addf %5, %7 : vector<32x32xf32>
    %cst_7 = arith.constant 0.000000e+00 : f32
    %9 = vector.broadcast %cst_7 : f32 to vector<32x32xf32>
    %10 = arith.maximumf %8, %9 : vector<32x32xf32>
    %11 = arith.truncf %10 : vector<32x32xf32> to vector<32x32xbf16>
    %c0_8 = arith.constant 0 : index
    %c0_9 = arith.constant 0 : index
    %12 = vector.load %arg5[%c0_8, %c0_9] : memref<32x32xbf16, #tpu.memory_space<vmem>>, vector<32x32xbf16>
    tpu.vector_store %arg5[%c0_8, %c0_9], %11 {strides = array<i32>} : memref<32x32xbf16, #tpu.memory_space<vmem>>, vector<32x32xbf16>,
    return
  }
  func.func @transform_0(%arg0: i32) -> (i32, i32) {
    %c0_i32 = arith.constant 0 : i32
    %c0_i32_0 = arith.constant 0 : i32
    return %arg0, %c0_i32 : i32, i32
  }
  func.func @transform_1(%arg0: i32) -> (i32, i32) {
    %c0_i32 = arith.constant 0 : i32
    %c0_i32_0 = arith.constant 0 : i32
    %c0_i32_1 = arith.constant 0 : i32
    return %c0_i32, %c0_i32_0 : i32, i32
  }
  func.func @transform_2(%arg0: i32) -> (i32, i32) {
    %c0_i32 = arith.constant 0 : i32
    %c0_i32_0 = arith.constant 0 : i32
    %c0_i32_1 = arith.constant 0 : i32
    return %c0_i32, %c0_i32_0 : i32, i32
  }
  func.func @transform_3(%arg0: i32) -> (i32, i32) {
    %c0_i32 = arith.constant 0 : i32
    %c0_i32_0 = arith.constant 0 : i32
    %c0_i32_1 = arith.constant 0 : i32
    return %c0_i32, %c0_i32_0 : i32, i32
  }
  func.func @transform_4(%arg0: i32) -> (i32, i32) {
    %c0_i32 = arith.constant 0 : i32
    %c0_i32_0 = arith.constant 0 : i32
    return %arg0, %c0_i32 : i32, i32
  }
}

module attributes {stable_mosaic.version = 11 : i64} {
  func.func @_mm_bn_kernel(%arg0: i32, %arg1: memref<32x288xbf16, #tpu.memory_space<vmem>>, %arg2: memref<288x32xbf16, #tpu.memory_space<vmem>>, %arg3: memref<1x32xf32, #tpu.memory_space<vmem>>, %arg4: memref<1x32xf32, #tpu.memory_space<vmem>>, %arg5: memref<32x32xbf16, #tpu.memory_space<vmem>>) attributes {dimension_semantics = [#tpu.dimension_semantics<parallel>], iteration_bounds = array<i64: 1>, scalar_prefetch = 0 : i64, scratch_operands = 0 : i64, tpu.core_type = #tpu.core_type<tc>, window_params = [{transform_indices = @transform_0, window_bounds = array<i64: 32, 288>}, {pipeline_mode = #tpu.pipeline_mode<synchronous>, transform_indices = @transform_1, window_bounds = array<i64: 288, 32>}, {pipeline_mode = #tpu.pipeline_mode<synchronous>, transform_indices = @transform_2, window_bounds = array<i64: 1, 32>}, {pipeline_mode = #tpu.pipeline_mode<synchronous>, transform_indices = @transform_3, window_bounds = array<i64: 1, 32>}, {transform_indices = @transform_4, window_bounds = array<i64: 32, 32>}]} {
    %c0 = arith.constant 0 : index
    %c0_0 = arith.constant 0 : index
    %0 = vector.load %arg1[%c0, %c0_0] : memref<32x288xbf16, #tpu.memory_space<vmem>>, vector<32x288xbf16>
    %c0_1 = arith.constant 0 : index
    %c0_2 = arith.constant 0 : index
    %1 = vector.load %arg2[%c0_1, %c0_2] : memref<288x32xbf16, #tpu.memory_space<vmem>>, vector<288x32xbf16>
    %cst = arith.constant dense<0.000000e+00> : vector<32x32xf32>
    %2 = tpu.matmul %0, %1, %cst {dimension_numbers = #tpu.dot_dimension_numbers<[1], [0], [0], [1], [0, 0, 1, 1], [], []>} : vector<32x288xbf16>, vector<288x32xbf16>, vector<32x32xf32> -> vector<32x32xf32>
    %c0_3 = arith.constant 0 : index
    %c0_4 = arith.constant 0 : index
    %3 = vector.load %arg3[%c0_3, %c0_4] : memref<1x32xf32, #tpu.memory_space<vmem>>, vector<1x32xf32>
    %4 = vector.broadcast %3 : vector<1x32xf32> to vector<32x32xf32>
    %5 = arith.mulf %2, %4 : vector<32x32xf32>
    %c0_5 = arith.constant 0 : index
    %c0_6 = arith.constant 0 : index
    %6 = vector.load %arg4[%c0_5, %c0_6] : memref<1x32xf32, #tpu.memory_space<vmem>>, vector<1x32xf32>
    %7 = vector.broadcast %6 : vector<1x32xf32> to vector<32x32xf32>
    %8 = arith.addf %5, %7 : vector<32x32xf32>
    %9 = arith.truncf %8 : vector<32x32xf32> to vector<32x32xbf16>
    %c0_7 = arith.constant 0 : index
    %c0_8 = arith.constant 0 : index
    %10 = vector.load %arg5[%c0_7, %c0_8] : memref<32x32xbf16, #tpu.memory_space<vmem>>, vector<32x32xbf16>
    tpu.vector_store %arg5[%c0_7, %c0_8], %9 {strides = array<i32>} : memref<32x32xbf16, #tpu.memory_space<vmem>>, vector<32x32xbf16>,
    return
  }
  func.func @transform_0(%arg0: i32) -> (i32, i32) {
    %c0_i32 = arith.constant 0 : i32
    %c0_i32_0 = arith.constant 0 : i32
    return %arg0, %c0_i32 : i32, i32
  }
  func.func @transform_1(%arg0: i32) -> (i32, i32) {
    %c0_i32 = arith.constant 0 : i32
    %c0_i32_0 = arith.constant 0 : i32
    %c0_i32_1 = arith.constant 0 : i32
    return %c0_i32, %c0_i32_0 : i32, i32
  }
  func.func @transform_2(%arg0: i32) -> (i32, i32) {
    %c0_i32 = arith.constant 0 : i32
    %c0_i32_0 = arith.constant 0 : i32
    %c0_i32_1 = arith.constant 0 : i32
    return %c0_i32, %c0_i32_0 : i32, i32
  }
  func.func @transform_3(%arg0: i32) -> (i32, i32) {
    %c0_i32 = arith.constant 0 : i32
    %c0_i32_0 = arith.constant 0 : i32
    %c0_i32_1 = arith.constant 0 : i32
    return %c0_i32, %c0_i32_0 : i32, i32
  }
  func.func @transform_4(%arg0: i32) -> (i32, i32) {
    %c0_i32 = arith.constant 0 : i32
    %c0_i32_0 = arith.constant 0 : i32
    return %arg0, %c0_i32 : i32, i32
  }
}

module attributes {stable_mosaic.version = 11 : i64} {
  func.func @_mm_bn_kernel(%arg0: i32, %arg1: memref<128x1728xbf16, #tpu.memory_space<vmem>>, %arg2: memref<1728x32xbf16, #tpu.memory_space<vmem>>, %arg3: memref<1x32xf32, #tpu.memory_space<vmem>>, %arg4: memref<1x32xf32, #tpu.memory_space<vmem>>, %arg5: memref<128x32xbf16, #tpu.memory_space<vmem>>) attributes {dimension_semantics = [#tpu.dimension_semantics<parallel>], iteration_bounds = array<i64: 1>, scalar_prefetch = 0 : i64, scratch_operands = 0 : i64, tpu.core_type = #tpu.core_type<tc>, window_params = [{transform_indices = @transform_0, window_bounds = array<i64: 128, 1728>}, {pipeline_mode = #tpu.pipeline_mode<synchronous>, transform_indices = @transform_1, window_bounds = array<i64: 1728, 32>}, {pipeline_mode = #tpu.pipeline_mode<synchronous>, transform_indices = @transform_2, window_bounds = array<i64: 1, 32>}, {pipeline_mode = #tpu.pipeline_mode<synchronous>, transform_indices = @transform_3, window_bounds = array<i64: 1, 32>}, {transform_indices = @transform_4, window_bounds = array<i64: 128, 32>}]} {
    %c0 = arith.constant 0 : index
    %c0_0 = arith.constant 0 : index
    %0 = vector.load %arg1[%c0, %c0_0] : memref<128x1728xbf16, #tpu.memory_space<vmem>>, vector<128x1728xbf16>
    %c0_1 = arith.constant 0 : index
    %c0_2 = arith.constant 0 : index
    %1 = vector.load %arg2[%c0_1, %c0_2] : memref<1728x32xbf16, #tpu.memory_space<vmem>>, vector<1728x32xbf16>
    %cst = arith.constant dense<0.000000e+00> : vector<128x32xf32>
    %2 = tpu.matmul %0, %1, %cst {dimension_numbers = #tpu.dot_dimension_numbers<[1], [0], [0], [1], [0, 0, 1, 1], [], []>} : vector<128x1728xbf16>, vector<1728x32xbf16>, vector<128x32xf32> -> vector<128x32xf32>
    %c0_3 = arith.constant 0 : index
    %c0_4 = arith.constant 0 : index
    %3 = vector.load %arg3[%c0_3, %c0_4] : memref<1x32xf32, #tpu.memory_space<vmem>>, vector<1x32xf32>
    %4 = vector.broadcast %3 : vector<1x32xf32> to vector<128x32xf32>
    %5 = arith.mulf %2, %4 : vector<128x32xf32>
    %c0_5 = arith.constant 0 : index
    %c0_6 = arith.constant 0 : index
    %6 = vector.load %arg4[%c0_5, %c0_6] : memref<1x32xf32, #tpu.memory_space<vmem>>, vector<1x32xf32>
    %7 = vector.broadcast %6 : vector<1x32xf32> to vector<128x32xf32>
    %8 = arith.addf %5, %7 : vector<128x32xf32>
    %cst_7 = arith.constant 0.000000e+00 : f32
    %9 = vector.broadcast %cst_7 : f32 to vector<128x32xf32>
    %10 = arith.maximumf %8, %9 : vector<128x32xf32>
    %11 = arith.truncf %10 : vector<128x32xf32> to vector<128x32xbf16>
    %c0_8 = arith.constant 0 : index
    %c0_9 = arith.constant 0 : index
    %12 = vector.load %arg5[%c0_8, %c0_9] : memref<128x32xbf16, #tpu.memory_space<vmem>>, vector<128x32xbf16>
    tpu.vector_store %arg5[%c0_8, %c0_9], %11 {strides = array<i32>} : memref<128x32xbf16, #tpu.memory_space<vmem>>, vector<128x32xbf16>,
    return
  }
  func.func @transform_0(%arg0: i32) -> (i32, i32) {
    %c0_i32 = arith.constant 0 : i32
    %c0_i32_0 = arith.constant 0 : i32
    return %arg0, %c0_i32 : i32, i32
  }
  func.func @transform_1(%arg0: i32) -> (i32, i32) {
    %c0_i32 = arith.constant 0 : i32
    %c0_i32_0 = arith.constant 0 : i32
    %c0_i32_1 = arith.constant 0 : i32
    return %c0_i32, %c0_i32_0 : i32, i32
  }
  func.func @transform_2(%arg0: i32) -> (i32, i32) {
    %c0_i32 = arith.constant 0 : i32
    %c0_i32_0 = arith.constant 0 : i32
    %c0_i32_1 = arith.constant 0 : i32
    return %c0_i32, %c0_i32_0 : i32, i32
  }
  func.func @transform_3(%arg0: i32) -> (i32, i32) {
    %c0_i32 = arith.constant 0 : i32
    %c0_i32_0 = arith.constant 0 : i32
    %c0_i32_1 = arith.constant 0 : i32
    return %c0_i32, %c0_i32_0 : i32, i32
  }
  func.func @transform_4(%arg0: i32) -> (i32, i32) {
    %c0_i32 = arith.constant 0 : i32
    %c0_i32_0 = arith.constant 0 : i32
    return %arg0, %c0_i32 : i32, i32
  }
}

module attributes {stable_mosaic.version = 11 : i64} {
  func.func @_mm_bn_kernel(%arg0: i32, %arg1: memref<128x864xbf16, #tpu.memory_space<vmem>>, %arg2: memref<864x32xbf16, #tpu.memory_space<vmem>>, %arg3: memref<1x32xf32, #tpu.memory_space<vmem>>, %arg4: memref<1x32xf32, #tpu.memory_space<vmem>>, %arg5: memref<128x32xbf16, #tpu.memory_space<vmem>>) attributes {dimension_semantics = [#tpu.dimension_semantics<parallel>], iteration_bounds = array<i64: 1>, scalar_prefetch = 0 : i64, scratch_operands = 0 : i64, tpu.core_type = #tpu.core_type<tc>, window_params = [{transform_indices = @transform_0, window_bounds = array<i64: 128, 864>}, {pipeline_mode = #tpu.pipeline_mode<synchronous>, transform_indices = @transform_1, window_bounds = array<i64: 864, 32>}, {pipeline_mode = #tpu.pipeline_mode<synchronous>, transform_indices = @transform_2, window_bounds = array<i64: 1, 32>}, {pipeline_mode = #tpu.pipeline_mode<synchronous>, transform_indices = @transform_3, window_bounds = array<i64: 1, 32>}, {transform_indices = @transform_4, window_bounds = array<i64: 128, 32>}]} {
    %c0 = arith.constant 0 : index
    %c0_0 = arith.constant 0 : index
    %0 = vector.load %arg1[%c0, %c0_0] : memref<128x864xbf16, #tpu.memory_space<vmem>>, vector<128x864xbf16>
    %c0_1 = arith.constant 0 : index
    %c0_2 = arith.constant 0 : index
    %1 = vector.load %arg2[%c0_1, %c0_2] : memref<864x32xbf16, #tpu.memory_space<vmem>>, vector<864x32xbf16>
    %cst = arith.constant dense<0.000000e+00> : vector<128x32xf32>
    %2 = tpu.matmul %0, %1, %cst {dimension_numbers = #tpu.dot_dimension_numbers<[1], [0], [0], [1], [0, 0, 1, 1], [], []>} : vector<128x864xbf16>, vector<864x32xbf16>, vector<128x32xf32> -> vector<128x32xf32>
    %c0_3 = arith.constant 0 : index
    %c0_4 = arith.constant 0 : index
    %3 = vector.load %arg3[%c0_3, %c0_4] : memref<1x32xf32, #tpu.memory_space<vmem>>, vector<1x32xf32>
    %4 = vector.broadcast %3 : vector<1x32xf32> to vector<128x32xf32>
    %5 = arith.mulf %2, %4 : vector<128x32xf32>
    %c0_5 = arith.constant 0 : index
    %c0_6 = arith.constant 0 : index
    %6 = vector.load %arg4[%c0_5, %c0_6] : memref<1x32xf32, #tpu.memory_space<vmem>>, vector<1x32xf32>
    %7 = vector.broadcast %6 : vector<1x32xf32> to vector<128x32xf32>
    %8 = arith.addf %5, %7 : vector<128x32xf32>
    %cst_7 = arith.constant 0.000000e+00 : f32
    %9 = vector.broadcast %cst_7 : f32 to vector<128x32xf32>
    %10 = arith.maximumf %8, %9 : vector<128x32xf32>
    %11 = arith.truncf %10 : vector<128x32xf32> to vector<128x32xbf16>
    %c0_8 = arith.constant 0 : index
    %c0_9 = arith.constant 0 : index
    %12 = vector.load %arg5[%c0_8, %c0_9] : memref<128x32xbf16, #tpu.memory_space<vmem>>, vector<128x32xbf16>
    tpu.vector_store %arg5[%c0_8, %c0_9], %11 {strides = array<i32>} : memref<128x32xbf16, #tpu.memory_space<vmem>>, vector<128x32xbf16>,
    return
  }
  func.func @transform_0(%arg0: i32) -> (i32, i32) {
    %c0_i32 = arith.constant 0 : i32
    %c0_i32_0 = arith.constant 0 : i32
    return %arg0, %c0_i32 : i32, i32
  }
  func.func @transform_1(%arg0: i32) -> (i32, i32) {
    %c0_i32 = arith.constant 0 : i32
    %c0_i32_0 = arith.constant 0 : i32
    %c0_i32_1 = arith.constant 0 : i32
    return %c0_i32, %c0_i32_0 : i32, i32
  }
  func.func @transform_2(%arg0: i32) -> (i32, i32) {
    %c0_i32 = arith.constant 0 : i32
    %c0_i32_0 = arith.constant 0 : i32
    %c0_i32_1 = arith.constant 0 : i32
    return %c0_i32, %c0_i32_0 : i32, i32
  }
  func.func @transform_3(%arg0: i32) -> (i32, i32) {
    %c0_i32 = arith.constant 0 : i32
    %c0_i32_0 = arith.constant 0 : i32
    %c0_i32_1 = arith.constant 0 : i32
    return %c0_i32, %c0_i32_0 : i32, i32
  }
  func.func @transform_4(%arg0: i32) -> (i32, i32) {
    %c0_i32 = arith.constant 0 : i32
    %c0_i32_0 = arith.constant 0 : i32
    return %arg0, %c0_i32 : i32, i32
  }
}

module attributes {stable_mosaic.version = 11 : i64} {
  func.func @_mm_bn_res_kernel(%arg0: i32, %arg1: memref<128x864xbf16, #tpu.memory_space<vmem>>, %arg2: memref<864x32xbf16, #tpu.memory_space<vmem>>, %arg3: memref<1x32xf32, #tpu.memory_space<vmem>>, %arg4: memref<1x32xf32, #tpu.memory_space<vmem>>, %arg5: memref<128x32xbf16, #tpu.memory_space<vmem>>, %arg6: memref<128x32xbf16, #tpu.memory_space<vmem>>) attributes {dimension_semantics = [#tpu.dimension_semantics<parallel>], iteration_bounds = array<i64: 1>, scalar_prefetch = 0 : i64, scratch_operands = 0 : i64, tpu.core_type = #tpu.core_type<tc>, window_params = [{transform_indices = @transform_0, window_bounds = array<i64: 128, 864>}, {pipeline_mode = #tpu.pipeline_mode<synchronous>, transform_indices = @transform_1, window_bounds = array<i64: 864, 32>}, {pipeline_mode = #tpu.pipeline_mode<synchronous>, transform_indices = @transform_2, window_bounds = array<i64: 1, 32>}, {pipeline_mode = #tpu.pipeline_mode<synchronous>, transform_indices = @transform_3, window_bounds = array<i64: 1, 32>}, {transform_indices = @transform_4, window_bounds = array<i64: 128, 32>}, {transform_indices = @transform_5, window_bounds = array<i64: 128, 32>}]} {
    %c0 = arith.constant 0 : index
    %c0_0 = arith.constant 0 : index
    %0 = vector.load %arg1[%c0, %c0_0] : memref<128x864xbf16, #tpu.memory_space<vmem>>, vector<128x864xbf16>
    %c0_1 = arith.constant 0 : index
    %c0_2 = arith.constant 0 : index
    %1 = vector.load %arg2[%c0_1, %c0_2] : memref<864x32xbf16, #tpu.memory_space<vmem>>, vector<864x32xbf16>
    %cst = arith.constant dense<0.000000e+00> : vector<128x32xf32>
    %2 = tpu.matmul %0, %1, %cst {dimension_numbers = #tpu.dot_dimension_numbers<[1], [0], [0], [1], [0, 0, 1, 1], [], []>} : vector<128x864xbf16>, vector<864x32xbf16>, vector<128x32xf32> -> vector<128x32xf32>
    %c0_3 = arith.constant 0 : index
    %c0_4 = arith.constant 0 : index
    %3 = vector.load %arg3[%c0_3, %c0_4] : memref<1x32xf32, #tpu.memory_space<vmem>>, vector<1x32xf32>
    %4 = vector.broadcast %3 : vector<1x32xf32> to vector<128x32xf32>
    %5 = arith.mulf %2, %4 : vector<128x32xf32>
    %c0_5 = arith.constant 0 : index
    %c0_6 = arith.constant 0 : index
    %6 = vector.load %arg4[%c0_5, %c0_6] : memref<1x32xf32, #tpu.memory_space<vmem>>, vector<1x32xf32>
    %7 = vector.broadcast %6 : vector<1x32xf32> to vector<128x32xf32>
    %8 = arith.addf %5, %7 : vector<128x32xf32>
    %c0_7 = arith.constant 0 : index
    %c0_8 = arith.constant 0 : index
    %9 = vector.load %arg5[%c0_7, %c0_8] : memref<128x32xbf16, #tpu.memory_space<vmem>>, vector<128x32xbf16>
    %10 = arith.extf %9 : vector<128x32xbf16> to vector<128x32xf32>
    %11 = arith.addf %8, %10 : vector<128x32xf32>
    %12 = arith.truncf %11 : vector<128x32xf32> to vector<128x32xbf16>
    %c0_9 = arith.constant 0 : index
    %c0_10 = arith.constant 0 : index
    %13 = vector.load %arg6[%c0_9, %c0_10] : memref<128x32xbf16, #tpu.memory_space<vmem>>, vector<128x32xbf16>
    tpu.vector_store %arg6[%c0_9, %c0_10], %12 {strides = array<i32>} : memref<128x32xbf16, #tpu.memory_space<vmem>>, vector<128x32xbf16>,
    return
  }
  func.func @transform_0(%arg0: i32) -> (i32, i32) {
    %c0_i32 = arith.constant 0 : i32
    %c0_i32_0 = arith.constant 0 : i32
    return %arg0, %c0_i32 : i32, i32
  }
  func.func @transform_1(%arg0: i32) -> (i32, i32) {
    %c0_i32 = arith.constant 0 : i32
    %c0_i32_0 = arith.constant 0 : i32
    %c0_i32_1 = arith.constant 0 : i32
    return %c0_i32, %c0_i32_0 : i32, i32
  }
  func.func @transform_2(%arg0: i32) -> (i32, i32) {
    %c0_i32 = arith.constant 0 : i32
    %c0_i32_0 = arith.constant 0 : i32
    %c0_i32_1 = arith.constant 0 : i32
    return %c0_i32, %c0_i32_0 : i32, i32
  }
  func.func @transform_3(%arg0: i32) -> (i32, i32) {
    %c0_i32 = arith.constant 0 : i32
    %c0_i32_0 = arith.constant 0 : i32
    %c0_i32_1 = arith.constant 0 : i32
    return %c0_i32, %c0_i32_0 : i32, i32
  }
  func.func @transform_4(%arg0: i32) -> (i32, i32) {
    %c0_i32 = arith.constant 0 : i32
    %c0_i32_0 = arith.constant 0 : i32
    return %arg0, %c0_i32 : i32, i32
  }
  func.func @transform_5(%arg0: i32) -> (i32, i32) {
    %c0_i32 = arith.constant 0 : i32
    %c0_i32_0 = arith.constant 0 : i32
    return %arg0, %c0_i32 : i32, i32
  }
}

module attributes {stable_mosaic.version = 11 : i64} {
  func.func @_mm_bn_kernel(%arg0: i32, %arg1: memref<16x864xbf16, #tpu.memory_space<vmem>>, %arg2: memref<864x64xbf16, #tpu.memory_space<vmem>>, %arg3: memref<1x64xf32, #tpu.memory_space<vmem>>, %arg4: memref<1x64xf32, #tpu.memory_space<vmem>>, %arg5: memref<16x64xbf16, #tpu.memory_space<vmem>>) attributes {dimension_semantics = [#tpu.dimension_semantics<parallel>], iteration_bounds = array<i64: 1>, scalar_prefetch = 0 : i64, scratch_operands = 0 : i64, tpu.core_type = #tpu.core_type<tc>, window_params = [{transform_indices = @transform_0, window_bounds = array<i64: 16, 864>}, {pipeline_mode = #tpu.pipeline_mode<synchronous>, transform_indices = @transform_1, window_bounds = array<i64: 864, 64>}, {pipeline_mode = #tpu.pipeline_mode<synchronous>, transform_indices = @transform_2, window_bounds = array<i64: 1, 64>}, {pipeline_mode = #tpu.pipeline_mode<synchronous>, transform_indices = @transform_3, window_bounds = array<i64: 1, 64>}, {transform_indices = @transform_4, window_bounds = array<i64: 16, 64>}]} {
    %c0 = arith.constant 0 : index
    %c0_0 = arith.constant 0 : index
    %0 = vector.load %arg1[%c0, %c0_0] : memref<16x864xbf16, #tpu.memory_space<vmem>>, vector<16x864xbf16>
    %c0_1 = arith.constant 0 : index
    %c0_2 = arith.constant 0 : index
    %1 = vector.load %arg2[%c0_1, %c0_2] : memref<864x64xbf16, #tpu.memory_space<vmem>>, vector<864x64xbf16>
    %cst = arith.constant dense<0.000000e+00> : vector<16x64xf32>
    %2 = tpu.matmul %0, %1, %cst {dimension_numbers = #tpu.dot_dimension_numbers<[1], [0], [0], [1], [0, 0, 1, 1], [], []>} : vector<16x864xbf16>, vector<864x64xbf16>, vector<16x64xf32> -> vector<16x64xf32>
    %c0_3 = arith.constant 0 : index
    %c0_4 = arith.constant 0 : index
    %3 = vector.load %arg3[%c0_3, %c0_4] : memref<1x64xf32, #tpu.memory_space<vmem>>, vector<1x64xf32>
    %4 = vector.broadcast %3 : vector<1x64xf32> to vector<16x64xf32>
    %5 = arith.mulf %2, %4 : vector<16x64xf32>
    %c0_5 = arith.constant 0 : index
    %c0_6 = arith.constant 0 : index
    %6 = vector.load %arg4[%c0_5, %c0_6] : memref<1x64xf32, #tpu.memory_space<vmem>>, vector<1x64xf32>
    %7 = vector.broadcast %6 : vector<1x64xf32> to vector<16x64xf32>
    %8 = arith.addf %5, %7 : vector<16x64xf32>
    %cst_7 = arith.constant 0.000000e+00 : f32
    %9 = vector.broadcast %cst_7 : f32 to vector<16x64xf32>
    %10 = arith.maximumf %8, %9 : vector<16x64xf32>
    %11 = arith.truncf %10 : vector<16x64xf32> to vector<16x64xbf16>
    %c0_8 = arith.constant 0 : index
    %c0_9 = arith.constant 0 : index
    %12 = vector.load %arg5[%c0_8, %c0_9] : memref<16x64xbf16, #tpu.memory_space<vmem>>, vector<16x64xbf16>
    tpu.vector_store %arg5[%c0_8, %c0_9], %11 {strides = array<i32>} : memref<16x64xbf16, #tpu.memory_space<vmem>>, vector<16x64xbf16>,
    return
  }
  func.func @transform_0(%arg0: i32) -> (i32, i32) {
    %c0_i32 = arith.constant 0 : i32
    %c0_i32_0 = arith.constant 0 : i32
    return %arg0, %c0_i32 : i32, i32
  }
  func.func @transform_1(%arg0: i32) -> (i32, i32) {
    %c0_i32 = arith.constant 0 : i32
    %c0_i32_0 = arith.constant 0 : i32
    %c0_i32_1 = arith.constant 0 : i32
    return %c0_i32, %c0_i32_0 : i32, i32
  }
  func.func @transform_2(%arg0: i32) -> (i32, i32) {
    %c0_i32 = arith.constant 0 : i32
    %c0_i32_0 = arith.constant 0 : i32
    %c0_i32_1 = arith.constant 0 : i32
    return %c0_i32, %c0_i32_0 : i32, i32
  }
  func.func @transform_3(%arg0: i32) -> (i32, i32) {
    %c0_i32 = arith.constant 0 : i32
    %c0_i32_0 = arith.constant 0 : i32
    %c0_i32_1 = arith.constant 0 : i32
    return %c0_i32, %c0_i32_0 : i32, i32
  }
  func.func @transform_4(%arg0: i32) -> (i32, i32) {
    %c0_i32 = arith.constant 0 : i32
    %c0_i32_0 = arith.constant 0 : i32
    return %arg0, %c0_i32 : i32, i32
  }
}

module attributes {stable_mosaic.version = 11 : i64} {
  func.func @_mm_bn_kernel(%arg0: i32, %arg1: memref<16x1728xbf16, #tpu.memory_space<vmem>>, %arg2: memref<1728x64xbf16, #tpu.memory_space<vmem>>, %arg3: memref<1x64xf32, #tpu.memory_space<vmem>>, %arg4: memref<1x64xf32, #tpu.memory_space<vmem>>, %arg5: memref<16x64xbf16, #tpu.memory_space<vmem>>) attributes {dimension_semantics = [#tpu.dimension_semantics<parallel>], iteration_bounds = array<i64: 1>, scalar_prefetch = 0 : i64, scratch_operands = 0 : i64, tpu.core_type = #tpu.core_type<tc>, window_params = [{transform_indices = @transform_0, window_bounds = array<i64: 16, 1728>}, {pipeline_mode = #tpu.pipeline_mode<synchronous>, transform_indices = @transform_1, window_bounds = array<i64: 1728, 64>}, {pipeline_mode = #tpu.pipeline_mode<synchronous>, transform_indices = @transform_2, window_bounds = array<i64: 1, 64>}, {pipeline_mode = #tpu.pipeline_mode<synchronous>, transform_indices = @transform_3, window_bounds = array<i64: 1, 64>}, {transform_indices = @transform_4, window_bounds = array<i64: 16, 64>}]} {
    %c0 = arith.constant 0 : index
    %c0_0 = arith.constant 0 : index
    %0 = vector.load %arg1[%c0, %c0_0] : memref<16x1728xbf16, #tpu.memory_space<vmem>>, vector<16x1728xbf16>
    %c0_1 = arith.constant 0 : index
    %c0_2 = arith.constant 0 : index
    %1 = vector.load %arg2[%c0_1, %c0_2] : memref<1728x64xbf16, #tpu.memory_space<vmem>>, vector<1728x64xbf16>
    %cst = arith.constant dense<0.000000e+00> : vector<16x64xf32>
    %2 = tpu.matmul %0, %1, %cst {dimension_numbers = #tpu.dot_dimension_numbers<[1], [0], [0], [1], [0, 0, 1, 1], [], []>} : vector<16x1728xbf16>, vector<1728x64xbf16>, vector<16x64xf32> -> vector<16x64xf32>
    %c0_3 = arith.constant 0 : index
    %c0_4 = arith.constant 0 : index
    %3 = vector.load %arg3[%c0_3, %c0_4] : memref<1x64xf32, #tpu.memory_space<vmem>>, vector<1x64xf32>
    %4 = vector.broadcast %3 : vector<1x64xf32> to vector<16x64xf32>
    %5 = arith.mulf %2, %4 : vector<16x64xf32>
    %c0_5 = arith.constant 0 : index
    %c0_6 = arith.constant 0 : index
    %6 = vector.load %arg4[%c0_5, %c0_6] : memref<1x64xf32, #tpu.memory_space<vmem>>, vector<1x64xf32>
    %7 = vector.broadcast %6 : vector<1x64xf32> to vector<16x64xf32>
    %8 = arith.addf %5, %7 : vector<16x64xf32>
    %cst_7 = arith.constant 0.000000e+00 : f32
    %9 = vector.broadcast %cst_7 : f32 to vector<16x64xf32>
    %10 = arith.maximumf %8, %9 : vector<16x64xf32>
    %11 = arith.truncf %10 : vector<16x64xf32> to vector<16x64xbf16>
    %c0_8 = arith.constant 0 : index
    %c0_9 = arith.constant 0 : index
    %12 = vector.load %arg5[%c0_8, %c0_9] : memref<16x64xbf16, #tpu.memory_space<vmem>>, vector<16x64xbf16>
    tpu.vector_store %arg5[%c0_8, %c0_9], %11 {strides = array<i32>} : memref<16x64xbf16, #tpu.memory_space<vmem>>, vector<16x64xbf16>,
    return
  }
  func.func @transform_0(%arg0: i32) -> (i32, i32) {
    %c0_i32 = arith.constant 0 : i32
    %c0_i32_0 = arith.constant 0 : i32
    return %arg0, %c0_i32 : i32, i32
  }
  func.func @transform_1(%arg0: i32) -> (i32, i32) {
    %c0_i32 = arith.constant 0 : i32
    %c0_i32_0 = arith.constant 0 : i32
    %c0_i32_1 = arith.constant 0 : i32
    return %c0_i32, %c0_i32_0 : i32, i32
  }
  func.func @transform_2(%arg0: i32) -> (i32, i32) {
    %c0_i32 = arith.constant 0 : i32
    %c0_i32_0 = arith.constant 0 : i32
    %c0_i32_1 = arith.constant 0 : i32
    return %c0_i32, %c0_i32_0 : i32, i32
  }
  func.func @transform_3(%arg0: i32) -> (i32, i32) {
    %c0_i32 = arith.constant 0 : i32
    %c0_i32_0 = arith.constant 0 : i32
    %c0_i32_1 = arith.constant 0 : i32
    return %c0_i32, %c0_i32_0 : i32, i32
  }
  func.func @transform_4(%arg0: i32) -> (i32, i32) {
    %c0_i32 = arith.constant 0 : i32
    %c0_i32_0 = arith.constant 0 : i32
    return %arg0, %c0_i32 : i32, i32
  }
}

module attributes {stable_mosaic.version = 11 : i64} {
  func.func @_mm_bn_kernel(%arg0: i32, %arg1: memref<2x1728xbf16, #tpu.memory_space<vmem>>, %arg2: memref<1728x64xbf16, #tpu.memory_space<vmem>>, %arg3: memref<1x64xf32, #tpu.memory_space<vmem>>, %arg4: memref<1x64xf32, #tpu.memory_space<vmem>>, %arg5: memref<2x64xbf16, #tpu.memory_space<vmem>>) attributes {dimension_semantics = [#tpu.dimension_semantics<parallel>], iteration_bounds = array<i64: 1>, scalar_prefetch = 0 : i64, scratch_operands = 0 : i64, tpu.core_type = #tpu.core_type<tc>, window_params = [{transform_indices = @transform_0, window_bounds = array<i64: 2, 1728>}, {pipeline_mode = #tpu.pipeline_mode<synchronous>, transform_indices = @transform_1, window_bounds = array<i64: 1728, 64>}, {pipeline_mode = #tpu.pipeline_mode<synchronous>, transform_indices = @transform_2, window_bounds = array<i64: 1, 64>}, {pipeline_mode = #tpu.pipeline_mode<synchronous>, transform_indices = @transform_3, window_bounds = array<i64: 1, 64>}, {transform_indices = @transform_4, window_bounds = array<i64: 2, 64>}]} {
    %c0 = arith.constant 0 : index
    %c0_0 = arith.constant 0 : index
    %0 = vector.load %arg1[%c0, %c0_0] : memref<2x1728xbf16, #tpu.memory_space<vmem>>, vector<2x1728xbf16>
    %c0_1 = arith.constant 0 : index
    %c0_2 = arith.constant 0 : index
    %1 = vector.load %arg2[%c0_1, %c0_2] : memref<1728x64xbf16, #tpu.memory_space<vmem>>, vector<1728x64xbf16>
    %cst = arith.constant dense<0.000000e+00> : vector<2x64xf32>
    %2 = tpu.matmul %0, %1, %cst {dimension_numbers = #tpu.dot_dimension_numbers<[1], [0], [0], [1], [0, 0, 1, 1], [], []>} : vector<2x1728xbf16>, vector<1728x64xbf16>, vector<2x64xf32> -> vector<2x64xf32>
    %c0_3 = arith.constant 0 : index
    %c0_4 = arith.constant 0 : index
    %3 = vector.load %arg3[%c0_3, %c0_4] : memref<1x64xf32, #tpu.memory_space<vmem>>, vector<1x64xf32>
    %4 = vector.broadcast %3 : vector<1x64xf32> to vector<2x64xf32>
    %5 = arith.mulf %2, %4 : vector<2x64xf32>
    %c0_5 = arith.constant 0 : index
    %c0_6 = arith.constant 0 : index
    %6 = vector.load %arg4[%c0_5, %c0_6] : memref<1x64xf32, #tpu.memory_space<vmem>>, vector<1x64xf32>
    %7 = vector.broadcast %6 : vector<1x64xf32> to vector<2x64xf32>
    %8 = arith.addf %5, %7 : vector<2x64xf32>
    %cst_7 = arith.constant 0.000000e+00 : f32
    %9 = vector.broadcast %cst_7 : f32 to vector<2x64xf32>
    %10 = arith.maximumf %8, %9 : vector<2x64xf32>
    %11 = arith.truncf %10 : vector<2x64xf32> to vector<2x64xbf16>
    %c0_8 = arith.constant 0 : index
    %c0_9 = arith.constant 0 : index
    %12 = vector.load %arg5[%c0_8, %c0_9] : memref<2x64xbf16, #tpu.memory_space<vmem>>, vector<2x64xbf16>
    tpu.vector_store %arg5[%c0_8, %c0_9], %11 {strides = array<i32>} : memref<2x64xbf16, #tpu.memory_space<vmem>>, vector<2x64xbf16>,
    return
  }
  func.func @transform_0(%arg0: i32) -> (i32, i32) {
    %c0_i32 = arith.constant 0 : i32
    %c0_i32_0 = arith.constant 0 : i32
    return %arg0, %c0_i32 : i32, i32
  }
  func.func @transform_1(%arg0: i32) -> (i32, i32) {
    %c0_i32 = arith.constant 0 : i32
    %c0_i32_0 = arith.constant 0 : i32
    %c0_i32_1 = arith.constant 0 : i32
    return %c0_i32, %c0_i32_0 : i32, i32
  }
  func.func @transform_2(%arg0: i32) -> (i32, i32) {
    %c0_i32 = arith.constant 0 : i32
    %c0_i32_0 = arith.constant 0 : i32
    %c0_i32_1 = arith.constant 0 : i32
    return %c0_i32, %c0_i32_0 : i32, i32
  }
  func.func @transform_3(%arg0: i32) -> (i32, i32) {
    %c0_i32 = arith.constant 0 : i32
    %c0_i32_0 = arith.constant 0 : i32
    %c0_i32_1 = arith.constant 0 : i32
    return %c0_i32, %c0_i32_0 : i32, i32
  }
  func.func @transform_4(%arg0: i32) -> (i32, i32) {
    %c0_i32 = arith.constant 0 : i32
    %c0_i32_0 = arith.constant 0 : i32
    return %arg0, %c0_i32 : i32, i32
  }
}

module attributes {stable_mosaic.version = 11 : i64} {
  func.func @_mm_bn_res_kernel(%arg0: i32, %arg1: memref<2x64xbf16, #tpu.memory_space<vmem>>, %arg2: memref<64x64xbf16, #tpu.memory_space<vmem>>, %arg3: memref<1x64xf32, #tpu.memory_space<vmem>>, %arg4: memref<1x64xf32, #tpu.memory_space<vmem>>, %arg5: memref<2x64xbf16, #tpu.memory_space<vmem>>, %arg6: memref<2x64xbf16, #tpu.memory_space<vmem>>) attributes {dimension_semantics = [#tpu.dimension_semantics<parallel>], iteration_bounds = array<i64: 1>, scalar_prefetch = 0 : i64, scratch_operands = 0 : i64, tpu.core_type = #tpu.core_type<tc>, window_params = [{transform_indices = @transform_0, window_bounds = array<i64: 2, 64>}, {pipeline_mode = #tpu.pipeline_mode<synchronous>, transform_indices = @transform_1, window_bounds = array<i64: 64, 64>}, {pipeline_mode = #tpu.pipeline_mode<synchronous>, transform_indices = @transform_2, window_bounds = array<i64: 1, 64>}, {pipeline_mode = #tpu.pipeline_mode<synchronous>, transform_indices = @transform_3, window_bounds = array<i64: 1, 64>}, {transform_indices = @transform_4, window_bounds = array<i64: 2, 64>}, {transform_indices = @transform_5, window_bounds = array<i64: 2, 64>}]} {
    %c0 = arith.constant 0 : index
    %c0_0 = arith.constant 0 : index
    %0 = vector.load %arg1[%c0, %c0_0] : memref<2x64xbf16, #tpu.memory_space<vmem>>, vector<2x64xbf16>
    %c0_1 = arith.constant 0 : index
    %c0_2 = arith.constant 0 : index
    %1 = vector.load %arg2[%c0_1, %c0_2] : memref<64x64xbf16, #tpu.memory_space<vmem>>, vector<64x64xbf16>
    %cst = arith.constant dense<0.000000e+00> : vector<2x64xf32>
    %2 = tpu.matmul %0, %1, %cst {dimension_numbers = #tpu.dot_dimension_numbers<[1], [0], [0], [1], [0, 0, 1, 1], [], []>} : vector<2x64xbf16>, vector<64x64xbf16>, vector<2x64xf32> -> vector<2x64xf32>
    %c0_3 = arith.constant 0 : index
    %c0_4 = arith.constant 0 : index
    %3 = vector.load %arg3[%c0_3, %c0_4] : memref<1x64xf32, #tpu.memory_space<vmem>>, vector<1x64xf32>
    %4 = vector.broadcast %3 : vector<1x64xf32> to vector<2x64xf32>
    %5 = arith.mulf %2, %4 : vector<2x64xf32>
    %c0_5 = arith.constant 0 : index
    %c0_6 = arith.constant 0 : index
    %6 = vector.load %arg4[%c0_5, %c0_6] : memref<1x64xf32, #tpu.memory_space<vmem>>, vector<1x64xf32>
    %7 = vector.broadcast %6 : vector<1x64xf32> to vector<2x64xf32>
    %8 = arith.addf %5, %7 : vector<2x64xf32>
    %c0_7 = arith.constant 0 : index
    %c0_8 = arith.constant 0 : index
    %9 = vector.load %arg5[%c0_7, %c0_8] : memref<2x64xbf16, #tpu.memory_space<vmem>>, vector<2x64xbf16>
    %10 = arith.extf %9 : vector<2x64xbf16> to vector<2x64xf32>
    %11 = arith.addf %8, %10 : vector<2x64xf32>
    %cst_9 = arith.constant 0.000000e+00 : f32
    %12 = vector.broadcast %cst_9 : f32 to vector<2x64xf32>
    %13 = arith.maximumf %11, %12 : vector<2x64xf32>
    %14 = arith.truncf %13 : vector<2x64xf32> to vector<2x64xbf16>
    %c0_10 = arith.constant 0 : index
    %c0_11 = arith.constant 0 : index
    %15 = vector.load %arg6[%c0_10, %c0_11] : memref<2x64xbf16, #tpu.memory_space<vmem>>, vector<2x64xbf16>
    tpu.vector_store %arg6[%c0_10, %c0_11], %14 {strides = array<i32>} : memref<2x64xbf16, #tpu.memory_space<vmem>>, vector<2x64xbf16>,
    return
  }
  func.func @transform_0(%arg0: i32) -> (i32, i32) {
    %c0_i32 = arith.constant 0 : i32
    %c0_i32_0 = arith.constant 0 : i32
    return %arg0, %c0_i32 : i32, i32
  }
  func.func @transform_1(%arg0: i32) -> (i32, i32) {
    %c0_i32 = arith.constant 0 : i32
    %c0_i32_0 = arith.constant 0 : i32
    %c0_i32_1 = arith.constant 0 : i32
    return %c0_i32, %c0_i32_0 : i32, i32
  }
  func.func @transform_2(%arg0: i32) -> (i32, i32) {
    %c0_i32 = arith.constant 0 : i32
    %c0_i32_0 = arith.constant 0 : i32
    %c0_i32_1 = arith.constant 0 : i32
    return %c0_i32, %c0_i32_0 : i32, i32
  }
  func.func @transform_3(%arg0: i32) -> (i32, i32) {
    %c0_i32 = arith.constant 0 : i32
    %c0_i32_0 = arith.constant 0 : i32
    %c0_i32_1 = arith.constant 0 : i32
    return %c0_i32, %c0_i32_0 : i32, i32
  }
  func.func @transform_4(%arg0: i32) -> (i32, i32) {
    %c0_i32 = arith.constant 0 : i32
    %c0_i32_0 = arith.constant 0 : i32
    return %arg0, %c0_i32 : i32, i32
  }
  func.func @transform_5(%arg0: i32) -> (i32, i32) {
    %c0_i32 = arith.constant 0 : i32
    %c0_i32_0 = arith.constant 0 : i32
    return %arg0, %c0_i32 : i32, i32
  }
}

module attributes {stable_mosaic.version = 11 : i64} {
  func.func @_mm_bn_res_kernel(%arg0: i32, %arg1: memref<2x128xbf16, #tpu.memory_space<vmem>>, %arg2: memref<128x64xbf16, #tpu.memory_space<vmem>>, %arg3: memref<1x64xf32, #tpu.memory_space<vmem>>, %arg4: memref<1x64xf32, #tpu.memory_space<vmem>>, %arg5: memref<2x64xbf16, #tpu.memory_space<vmem>>, %arg6: memref<2x64xbf16, #tpu.memory_space<vmem>>) attributes {dimension_semantics = [#tpu.dimension_semantics<parallel>], iteration_bounds = array<i64: 1>, scalar_prefetch = 0 : i64, scratch_operands = 0 : i64, tpu.core_type = #tpu.core_type<tc>, window_params = [{transform_indices = @transform_0, window_bounds = array<i64: 2, 128>}, {pipeline_mode = #tpu.pipeline_mode<synchronous>, transform_indices = @transform_1, window_bounds = array<i64: 128, 64>}, {pipeline_mode = #tpu.pipeline_mode<synchronous>, transform_indices = @transform_2, window_bounds = array<i64: 1, 64>}, {pipeline_mode = #tpu.pipeline_mode<synchronous>, transform_indices = @transform_3, window_bounds = array<i64: 1, 64>}, {transform_indices = @transform_4, window_bounds = array<i64: 2, 64>}, {transform_indices = @transform_5, window_bounds = array<i64: 2, 64>}]} {
    %c0 = arith.constant 0 : index
    %c0_0 = arith.constant 0 : index
    %0 = vector.load %arg1[%c0, %c0_0] : memref<2x128xbf16, #tpu.memory_space<vmem>>, vector<2x128xbf16>
    %c0_1 = arith.constant 0 : index
    %c0_2 = arith.constant 0 : index
    %1 = vector.load %arg2[%c0_1, %c0_2] : memref<128x64xbf16, #tpu.memory_space<vmem>>, vector<128x64xbf16>
    %cst = arith.constant dense<0.000000e+00> : vector<2x64xf32>
    %2 = tpu.matmul %0, %1, %cst {dimension_numbers = #tpu.dot_dimension_numbers<[1], [0], [0], [1], [0, 0, 1, 1], [], []>} : vector<2x128xbf16>, vector<128x64xbf16>, vector<2x64xf32> -> vector<2x64xf32>
    %c0_3 = arith.constant 0 : index
    %c0_4 = arith.constant 0 : index
    %3 = vector.load %arg3[%c0_3, %c0_4] : memref<1x64xf32, #tpu.memory_space<vmem>>, vector<1x64xf32>
    %4 = vector.broadcast %3 : vector<1x64xf32> to vector<2x64xf32>
    %5 = arith.mulf %2, %4 : vector<2x64xf32>
    %c0_5 = arith.constant 0 : index
    %c0_6 = arith.constant 0 : index
    %6 = vector.load %arg4[%c0_5, %c0_6] : memref<1x64xf32, #tpu.memory_space<vmem>>, vector<1x64xf32>
    %7 = vector.broadcast %6 : vector<1x64xf32> to vector<2x64xf32>
    %8 = arith.addf %5, %7 : vector<2x64xf32>
    %c0_7 = arith.constant 0 : index
    %c0_8 = arith.constant 0 : index
    %9 = vector.load %arg5[%c0_7, %c0_8] : memref<2x64xbf16, #tpu.memory_space<vmem>>, vector<2x64xbf16>
    %10 = arith.extf %9 : vector<2x64xbf16> to vector<2x64xf32>
    %11 = arith.addf %8, %10 : vector<2x64xf32>
    %cst_9 = arith.constant 0.000000e+00 : f32
    %12 = vector.broadcast %cst_9 : f32 to vector<2x64xf32>
    %13 = arith.maximumf %11, %12 : vector<2x64xf32>
    %14 = arith.truncf %13 : vector<2x64xf32> to vector<2x64xbf16>
    %c0_10 = arith.constant 0 : index
    %c0_11 = arith.constant 0 : index
    %15 = vector.load %arg6[%c0_10, %c0_11] : memref<2x64xbf16, #tpu.memory_space<vmem>>, vector<2x64xbf16>
    tpu.vector_store %arg6[%c0_10, %c0_11], %14 {strides = array<i32>} : memref<2x64xbf16, #tpu.memory_space<vmem>>, vector<2x64xbf16>,
    return
  }
  func.func @transform_0(%arg0: i32) -> (i32, i32) {
    %c0_i32 = arith.constant 0 : i32
    %c0_i32_0 = arith.constant 0 : i32
    return %arg0, %c0_i32 : i32, i32
  }
  func.func @transform_1(%arg0: i32) -> (i32, i32) {
    %c0_i32 = arith.constant 0 : i32
    %c0_i32_0 = arith.constant 0 : i32
    %c0_i32_1 = arith.constant 0 : i32
    return %c0_i32, %c0_i32_0 : i32, i32
  }
  func.func @transform_2(%arg0: i32) -> (i32, i32) {
    %c0_i32 = arith.constant 0 : i32
    %c0_i32_0 = arith.constant 0 : i32
    %c0_i32_1 = arith.constant 0 : i32
    return %c0_i32, %c0_i32_0 : i32, i32
  }
  func.func @transform_3(%arg0: i32) -> (i32, i32) {
    %c0_i32 = arith.constant 0 : i32
    %c0_i32_0 = arith.constant 0 : i32
    %c0_i32_1 = arith.constant 0 : i32
    return %c0_i32, %c0_i32_0 : i32, i32
  }
  func.func @transform_4(%arg0: i32) -> (i32, i32) {
    %c0_i32 = arith.constant 0 : i32
    %c0_i32_0 = arith.constant 0 : i32
    return %arg0, %c0_i32 : i32, i32
  }
  func.func @transform_5(%arg0: i32) -> (i32, i32) {
    %c0_i32 = arith.constant 0 : i32
    %c0_i32_0 = arith.constant 0 : i32
    return %arg0, %c0_i32 : i32, i32
  }
}

module attributes {stable_mosaic.version = 11 : i64} {
  func.func @_mm_bn_res_kernel(%arg0: i32, %arg1: memref<2x128xbf16, #tpu.memory_space<vmem>>, %arg2: memref<128x64xbf16, #tpu.memory_space<vmem>>, %arg3: memref<1x64xf32, #tpu.memory_space<vmem>>, %arg4: memref<1x64xf32, #tpu.memory_space<vmem>>, %arg5: memref<2x64xbf16, #tpu.memory_space<vmem>>, %arg6: memref<2x64xbf16, #tpu.memory_space<vmem>>) attributes {dimension_semantics = [#tpu.dimension_semantics<parallel>], iteration_bounds = array<i64: 1>, scalar_prefetch = 0 : i64, scratch_operands = 0 : i64, tpu.core_type = #tpu.core_type<tc>, window_params = [{transform_indices = @transform_0, window_bounds = array<i64: 2, 128>}, {pipeline_mode = #tpu.pipeline_mode<synchronous>, transform_indices = @transform_1, window_bounds = array<i64: 128, 64>}, {pipeline_mode = #tpu.pipeline_mode<synchronous>, transform_indices = @transform_2, window_bounds = array<i64: 1, 64>}, {pipeline_mode = #tpu.pipeline_mode<synchronous>, transform_indices = @transform_3, window_bounds = array<i64: 1, 64>}, {transform_indices = @transform_4, window_bounds = array<i64: 2, 64>}, {transform_indices = @transform_5, window_bounds = array<i64: 2, 64>}]} {
    %c0 = arith.constant 0 : index
    %c0_0 = arith.constant 0 : index
    %0 = vector.load %arg1[%c0, %c0_0] : memref<2x128xbf16, #tpu.memory_space<vmem>>, vector<2x128xbf16>
    %c0_1 = arith.constant 0 : index
    %c0_2 = arith.constant 0 : index
    %1 = vector.load %arg2[%c0_1, %c0_2] : memref<128x64xbf16, #tpu.memory_space<vmem>>, vector<128x64xbf16>
    %cst = arith.constant dense<0.000000e+00> : vector<2x64xf32>
    %2 = tpu.matmul %0, %1, %cst {dimension_numbers = #tpu.dot_dimension_numbers<[1], [0], [0], [1], [0, 0, 1, 1], [], []>} : vector<2x128xbf16>, vector<128x64xbf16>, vector<2x64xf32> -> vector<2x64xf32>
    %c0_3 = arith.constant 0 : index
    %c0_4 = arith.constant 0 : index
    %3 = vector.load %arg3[%c0_3, %c0_4] : memref<1x64xf32, #tpu.memory_space<vmem>>, vector<1x64xf32>
    %4 = vector.broadcast %3 : vector<1x64xf32> to vector<2x64xf32>
    %5 = arith.mulf %2, %4 : vector<2x64xf32>
    %c0_5 = arith.constant 0 : index
    %c0_6 = arith.constant 0 : index
    %6 = vector.load %arg4[%c0_5, %c0_6] : memref<1x64xf32, #tpu.memory_space<vmem>>, vector<1x64xf32>
    %7 = vector.broadcast %6 : vector<1x64xf32> to vector<2x64xf32>
    %8 = arith.addf %5, %7 : vector<2x64xf32>
    %c0_7 = arith.constant 0 : index
    %c0_8 = arith.constant 0 : index
    %9 = vector.load %arg5[%c0_7, %c0_8] : memref<2x64xbf16, #tpu.memory_space<vmem>>, vector<2x64xbf16>
    %10 = arith.extf %9 : vector<2x64xbf16> to vector<2x64xf32>
    %11 = arith.addf %8, %10 : vector<2x64xf32>
    %cst_9 = arith.constant 0.000000e+00 : f32
    %12 = vector.broadcast %cst_9 : f32 to vector<2x64xf32>
    %13 = arith.maximumf %11, %12 : vector<2x64xf32>
    %14 = arith.truncf %13 : vector<2x64xf32> to vector<2x64xbf16>
    %c0_10 = arith.constant 0 : index
    %c0_11 = arith.constant 0 : index
    %15 = vector.load %arg6[%c0_10, %c0_11] : memref<2x64xbf16, #tpu.memory_space<vmem>>, vector<2x64xbf16>
    tpu.vector_store %arg6[%c0_10, %c0_11], %14 {strides = array<i32>} : memref<2x64xbf16, #tpu.memory_space<vmem>>, vector<2x64xbf16>,
    return
  }
  func.func @transform_0(%arg0: i32) -> (i32, i32) {
    %c0_i32 = arith.constant 0 : i32
    %c0_i32_0 = arith.constant 0 : i32
    return %arg0, %c0_i32 : i32, i32
  }
  func.func @transform_1(%arg0: i32) -> (i32, i32) {
    %c0_i32 = arith.constant 0 : i32
    %c0_i32_0 = arith.constant 0 : i32
    %c0_i32_1 = arith.constant 0 : i32
    return %c0_i32, %c0_i32_0 : i32, i32
  }
  func.func @transform_2(%arg0: i32) -> (i32, i32) {
    %c0_i32 = arith.constant 0 : i32
    %c0_i32_0 = arith.constant 0 : i32
    %c0_i32_1 = arith.constant 0 : i32
    return %c0_i32, %c0_i32_0 : i32, i32
  }
  func.func @transform_3(%arg0: i32) -> (i32, i32) {
    %c0_i32 = arith.constant 0 : i32
    %c0_i32_0 = arith.constant 0 : i32
    %c0_i32_1 = arith.constant 0 : i32
    return %c0_i32, %c0_i32_0 : i32, i32
  }
  func.func @transform_4(%arg0: i32) -> (i32, i32) {
    %c0_i32 = arith.constant 0 : i32
    %c0_i32_0 = arith.constant 0 : i32
    return %arg0, %c0_i32 : i32, i32
  }
  func.func @transform_5(%arg0: i32) -> (i32, i32) {
    %c0_i32 = arith.constant 0 : i32
    %c0_i32_0 = arith.constant 0 : i32
    return %arg0, %c0_i32 : i32, i32
  }
}

module attributes {stable_mosaic.version = 11 : i64} {
  func.func @_mm_bn_res_kernel(%arg0: i32, %arg1: memref<2x128xbf16, #tpu.memory_space<vmem>>, %arg2: memref<128x64xbf16, #tpu.memory_space<vmem>>, %arg3: memref<1x64xf32, #tpu.memory_space<vmem>>, %arg4: memref<1x64xf32, #tpu.memory_space<vmem>>, %arg5: memref<2x64xbf16, #tpu.memory_space<vmem>>, %arg6: memref<2x64xbf16, #tpu.memory_space<vmem>>) attributes {dimension_semantics = [#tpu.dimension_semantics<parallel>], iteration_bounds = array<i64: 1>, scalar_prefetch = 0 : i64, scratch_operands = 0 : i64, tpu.core_type = #tpu.core_type<tc>, window_params = [{transform_indices = @transform_0, window_bounds = array<i64: 2, 128>}, {pipeline_mode = #tpu.pipeline_mode<synchronous>, transform_indices = @transform_1, window_bounds = array<i64: 128, 64>}, {pipeline_mode = #tpu.pipeline_mode<synchronous>, transform_indices = @transform_2, window_bounds = array<i64: 1, 64>}, {pipeline_mode = #tpu.pipeline_mode<synchronous>, transform_indices = @transform_3, window_bounds = array<i64: 1, 64>}, {transform_indices = @transform_4, window_bounds = array<i64: 2, 64>}, {transform_indices = @transform_5, window_bounds = array<i64: 2, 64>}]} {
    %c0 = arith.constant 0 : index
    %c0_0 = arith.constant 0 : index
    %0 = vector.load %arg1[%c0, %c0_0] : memref<2x128xbf16, #tpu.memory_space<vmem>>, vector<2x128xbf16>
    %c0_1 = arith.constant 0 : index
    %c0_2 = arith.constant 0 : index
    %1 = vector.load %arg2[%c0_1, %c0_2] : memref<128x64xbf16, #tpu.memory_space<vmem>>, vector<128x64xbf16>
    %cst = arith.constant dense<0.000000e+00> : vector<2x64xf32>
    %2 = tpu.matmul %0, %1, %cst {dimension_numbers = #tpu.dot_dimension_numbers<[1], [0], [0], [1], [0, 0, 1, 1], [], []>} : vector<2x128xbf16>, vector<128x64xbf16>, vector<2x64xf32> -> vector<2x64xf32>
    %c0_3 = arith.constant 0 : index
    %c0_4 = arith.constant 0 : index
    %3 = vector.load %arg3[%c0_3, %c0_4] : memref<1x64xf32, #tpu.memory_space<vmem>>, vector<1x64xf32>
    %4 = vector.broadcast %3 : vector<1x64xf32> to vector<2x64xf32>
    %5 = arith.mulf %2, %4 : vector<2x64xf32>
    %c0_5 = arith.constant 0 : index
    %c0_6 = arith.constant 0 : index
    %6 = vector.load %arg4[%c0_5, %c0_6] : memref<1x64xf32, #tpu.memory_space<vmem>>, vector<1x64xf32>
    %7 = vector.broadcast %6 : vector<1x64xf32> to vector<2x64xf32>
    %8 = arith.addf %5, %7 : vector<2x64xf32>
    %c0_7 = arith.constant 0 : index
    %c0_8 = arith.constant 0 : index
    %9 = vector.load %arg5[%c0_7, %c0_8] : memref<2x64xbf16, #tpu.memory_space<vmem>>, vector<2x64xbf16>
    %10 = arith.extf %9 : vector<2x64xbf16> to vector<2x64xf32>
    %11 = arith.addf %8, %10 : vector<2x64xf32>
    %cst_9 = arith.constant 0.000000e+00 : f32
    %12 = vector.broadcast %cst_9 : f32 to vector<2x64xf32>
    %13 = arith.maximumf %11, %12 : vector<2x64xf32>
    %14 = arith.truncf %13 : vector<2x64xf32> to vector<2x64xbf16>
    %c0_10 = arith.constant 0 : index
    %c0_11 = arith.constant 0 : index
    %15 = vector.load %arg6[%c0_10, %c0_11] : memref<2x64xbf16, #tpu.memory_space<vmem>>, vector<2x64xbf16>
    tpu.vector_store %arg6[%c0_10, %c0_11], %14 {strides = array<i32>} : memref<2x64xbf16, #tpu.memory_space<vmem>>, vector<2x64xbf16>,
    return
  }
  func.func @transform_0(%arg0: i32) -> (i32, i32) {
    %c0_i32 = arith.constant 0 : i32
    %c0_i32_0 = arith.constant 0 : i32
    return %arg0, %c0_i32 : i32, i32
  }
  func.func @transform_1(%arg0: i32) -> (i32, i32) {
    %c0_i32 = arith.constant 0 : i32
    %c0_i32_0 = arith.constant 0 : i32
    %c0_i32_1 = arith.constant 0 : i32
    return %c0_i32, %c0_i32_0 : i32, i32
  }
  func.func @transform_2(%arg0: i32) -> (i32, i32) {
    %c0_i32 = arith.constant 0 : i32
    %c0_i32_0 = arith.constant 0 : i32
    %c0_i32_1 = arith.constant 0 : i32
    return %c0_i32, %c0_i32_0 : i32, i32
  }
  func.func @transform_3(%arg0: i32) -> (i32, i32) {
    %c0_i32 = arith.constant 0 : i32
    %c0_i32_0 = arith.constant 0 : i32
    %c0_i32_1 = arith.constant 0 : i32
    return %c0_i32, %c0_i32_0 : i32, i32
  }
  func.func @transform_4(%arg0: i32) -> (i32, i32) {
    %c0_i32 = arith.constant 0 : i32
    %c0_i32_0 = arith.constant 0 : i32
    return %arg0, %c0_i32 : i32, i32
  }
  func.func @transform_5(%arg0: i32) -> (i32, i32) {
    %c0_i32 = arith.constant 0 : i32
    %c0_i32_0 = arith.constant 0 : i32
    return %arg0, %c0_i32 : i32, i32
  }
}

module attributes {stable_mosaic.version = 11 : i64} {
  func.func @_mm_bn_res_kernel(%arg0: i32, %arg1: memref<2x256xbf16, #tpu.memory_space<vmem>>, %arg2: memref<256x64xbf16, #tpu.memory_space<vmem>>, %arg3: memref<1x64xf32, #tpu.memory_space<vmem>>, %arg4: memref<1x64xf32, #tpu.memory_space<vmem>>, %arg5: memref<2x64xbf16, #tpu.memory_space<vmem>>, %arg6: memref<2x64xbf16, #tpu.memory_space<vmem>>) attributes {dimension_semantics = [#tpu.dimension_semantics<parallel>], iteration_bounds = array<i64: 1>, scalar_prefetch = 0 : i64, scratch_operands = 0 : i64, tpu.core_type = #tpu.core_type<tc>, window_params = [{transform_indices = @transform_0, window_bounds = array<i64: 2, 256>}, {pipeline_mode = #tpu.pipeline_mode<synchronous>, transform_indices = @transform_1, window_bounds = array<i64: 256, 64>}, {pipeline_mode = #tpu.pipeline_mode<synchronous>, transform_indices = @transform_2, window_bounds = array<i64: 1, 64>}, {pipeline_mode = #tpu.pipeline_mode<synchronous>, transform_indices = @transform_3, window_bounds = array<i64: 1, 64>}, {transform_indices = @transform_4, window_bounds = array<i64: 2, 64>}, {transform_indices = @transform_5, window_bounds = array<i64: 2, 64>}]} {
    %c0 = arith.constant 0 : index
    %c0_0 = arith.constant 0 : index
    %0 = vector.load %arg1[%c0, %c0_0] : memref<2x256xbf16, #tpu.memory_space<vmem>>, vector<2x256xbf16>
    %c0_1 = arith.constant 0 : index
    %c0_2 = arith.constant 0 : index
    %1 = vector.load %arg2[%c0_1, %c0_2] : memref<256x64xbf16, #tpu.memory_space<vmem>>, vector<256x64xbf16>
    %cst = arith.constant dense<0.000000e+00> : vector<2x64xf32>
    %2 = tpu.matmul %0, %1, %cst {dimension_numbers = #tpu.dot_dimension_numbers<[1], [0], [0], [1], [0, 0, 1, 1], [], []>} : vector<2x256xbf16>, vector<256x64xbf16>, vector<2x64xf32> -> vector<2x64xf32>
    %c0_3 = arith.constant 0 : index
    %c0_4 = arith.constant 0 : index
    %3 = vector.load %arg3[%c0_3, %c0_4] : memref<1x64xf32, #tpu.memory_space<vmem>>, vector<1x64xf32>
    %4 = vector.broadcast %3 : vector<1x64xf32> to vector<2x64xf32>
    %5 = arith.mulf %2, %4 : vector<2x64xf32>
    %c0_5 = arith.constant 0 : index
    %c0_6 = arith.constant 0 : index
    %6 = vector.load %arg4[%c0_5, %c0_6] : memref<1x64xf32, #tpu.memory_space<vmem>>, vector<1x64xf32>
    %7 = vector.broadcast %6 : vector<1x64xf32> to vector<2x64xf32>
    %8 = arith.addf %5, %7 : vector<2x64xf32>
    %c0_7 = arith.constant 0 : index
    %c0_8 = arith.constant 0 : index
    %9 = vector.load %arg5[%c0_7, %c0_8] : memref<2x64xbf16, #tpu.memory_space<vmem>>, vector<2x64xbf16>
    %10 = arith.extf %9 : vector<2x64xbf16> to vector<2x64xf32>
    %11 = arith.addf %8, %10 : vector<2x64xf32>
    %cst_9 = arith.constant 0.000000e+00 : f32
    %12 = vector.broadcast %cst_9 : f32 to vector<2x64xf32>
    %13 = arith.maximumf %11, %12 : vector<2x64xf32>
    %14 = arith.truncf %13 : vector<2x64xf32> to vector<2x64xbf16>
    %c0_10 = arith.constant 0 : index
    %c0_11 = arith.constant 0 : index
    %15 = vector.load %arg6[%c0_10, %c0_11] : memref<2x64xbf16, #tpu.memory_space<vmem>>, vector<2x64xbf16>
    tpu.vector_store %arg6[%c0_10, %c0_11], %14 {strides = array<i32>} : memref<2x64xbf16, #tpu.memory_space<vmem>>, vector<2x64xbf16>,
    return
  }
  func.func @transform_0(%arg0: i32) -> (i32, i32) {
    %c0_i32 = arith.constant 0 : i32
    %c0_i32_0 = arith.constant 0 : i32
    return %arg0, %c0_i32 : i32, i32
  }
  func.func @transform_1(%arg0: i32) -> (i32, i32) {
    %c0_i32 = arith.constant 0 : i32
    %c0_i32_0 = arith.constant 0 : i32
    %c0_i32_1 = arith.constant 0 : i32
    return %c0_i32, %c0_i32_0 : i32, i32
  }
  func.func @transform_2(%arg0: i32) -> (i32, i32) {
    %c0_i32 = arith.constant 0 : i32
    %c0_i32_0 = arith.constant 0 : i32
    %c0_i32_1 = arith.constant 0 : i32
    return %c0_i32, %c0_i32_0 : i32, i32
  }
  func.func @transform_3(%arg0: i32) -> (i32, i32) {
    %c0_i32 = arith.constant 0 : i32
    %c0_i32_0 = arith.constant 0 : i32
    %c0_i32_1 = arith.constant 0 : i32
    return %c0_i32, %c0_i32_0 : i32, i32
  }
  func.func @transform_4(%arg0: i32) -> (i32, i32) {
    %c0_i32 = arith.constant 0 : i32
    %c0_i32_0 = arith.constant 0 : i32
    return %arg0, %c0_i32 : i32, i32
  }
  func.func @transform_5(%arg0: i32) -> (i32, i32) {
    %c0_i32 = arith.constant 0 : i32
    %c0_i32_0 = arith.constant 0 : i32
    return %arg0, %c0_i32 : i32, i32
  }
}

module attributes {stable_mosaic.version = 11 : i64} {
  func.func @_mm_bn_res_kernel(%arg0: i32, %arg1: memref<2x256xbf16, #tpu.memory_space<vmem>>, %arg2: memref<256x64xbf16, #tpu.memory_space<vmem>>, %arg3: memref<1x64xf32, #tpu.memory_space<vmem>>, %arg4: memref<1x64xf32, #tpu.memory_space<vmem>>, %arg5: memref<2x64xbf16, #tpu.memory_space<vmem>>, %arg6: memref<2x64xbf16, #tpu.memory_space<vmem>>) attributes {dimension_semantics = [#tpu.dimension_semantics<parallel>], iteration_bounds = array<i64: 1>, scalar_prefetch = 0 : i64, scratch_operands = 0 : i64, tpu.core_type = #tpu.core_type<tc>, window_params = [{transform_indices = @transform_0, window_bounds = array<i64: 2, 256>}, {pipeline_mode = #tpu.pipeline_mode<synchronous>, transform_indices = @transform_1, window_bounds = array<i64: 256, 64>}, {pipeline_mode = #tpu.pipeline_mode<synchronous>, transform_indices = @transform_2, window_bounds = array<i64: 1, 64>}, {pipeline_mode = #tpu.pipeline_mode<synchronous>, transform_indices = @transform_3, window_bounds = array<i64: 1, 64>}, {transform_indices = @transform_4, window_bounds = array<i64: 2, 64>}, {transform_indices = @transform_5, window_bounds = array<i64: 2, 64>}]} {
    %c0 = arith.constant 0 : index
    %c0_0 = arith.constant 0 : index
    %0 = vector.load %arg1[%c0, %c0_0] : memref<2x256xbf16, #tpu.memory_space<vmem>>, vector<2x256xbf16>
    %c0_1 = arith.constant 0 : index
    %c0_2 = arith.constant 0 : index
    %1 = vector.load %arg2[%c0_1, %c0_2] : memref<256x64xbf16, #tpu.memory_space<vmem>>, vector<256x64xbf16>
    %cst = arith.constant dense<0.000000e+00> : vector<2x64xf32>
    %2 = tpu.matmul %0, %1, %cst {dimension_numbers = #tpu.dot_dimension_numbers<[1], [0], [0], [1], [0, 0, 1, 1], [], []>} : vector<2x256xbf16>, vector<256x64xbf16>, vector<2x64xf32> -> vector<2x64xf32>
    %c0_3 = arith.constant 0 : index
    %c0_4 = arith.constant 0 : index
    %3 = vector.load %arg3[%c0_3, %c0_4] : memref<1x64xf32, #tpu.memory_space<vmem>>, vector<1x64xf32>
    %4 = vector.broadcast %3 : vector<1x64xf32> to vector<2x64xf32>
    %5 = arith.mulf %2, %4 : vector<2x64xf32>
    %c0_5 = arith.constant 0 : index
    %c0_6 = arith.constant 0 : index
    %6 = vector.load %arg4[%c0_5, %c0_6] : memref<1x64xf32, #tpu.memory_space<vmem>>, vector<1x64xf32>
    %7 = vector.broadcast %6 : vector<1x64xf32> to vector<2x64xf32>
    %8 = arith.addf %5, %7 : vector<2x64xf32>
    %c0_7 = arith.constant 0 : index
    %c0_8 = arith.constant 0 : index
    %9 = vector.load %arg5[%c0_7, %c0_8] : memref<2x64xbf16, #tpu.memory_space<vmem>>, vector<2x64xbf16>
    %10 = arith.extf %9 : vector<2x64xbf16> to vector<2x64xf32>
    %11 = arith.addf %8, %10 : vector<2x64xf32>
    %cst_9 = arith.constant 0.000000e+00 : f32
    %12 = vector.broadcast %cst_9 : f32 to vector<2x64xf32>
    %13 = arith.maximumf %11, %12 : vector<2x64xf32>
    %14 = arith.truncf %13 : vector<2x64xf32> to vector<2x64xbf16>
    %c0_10 = arith.constant 0 : index
    %c0_11 = arith.constant 0 : index
    %15 = vector.load %arg6[%c0_10, %c0_11] : memref<2x64xbf16, #tpu.memory_space<vmem>>, vector<2x64xbf16>
    tpu.vector_store %arg6[%c0_10, %c0_11], %14 {strides = array<i32>} : memref<2x64xbf16, #tpu.memory_space<vmem>>, vector<2x64xbf16>,
    return
  }
  func.func @transform_0(%arg0: i32) -> (i32, i32) {
    %c0_i32 = arith.constant 0 : i32
    %c0_i32_0 = arith.constant 0 : i32
    return %arg0, %c0_i32 : i32, i32
  }
  func.func @transform_1(%arg0: i32) -> (i32, i32) {
    %c0_i32 = arith.constant 0 : i32
    %c0_i32_0 = arith.constant 0 : i32
    %c0_i32_1 = arith.constant 0 : i32
    return %c0_i32, %c0_i32_0 : i32, i32
  }
  func.func @transform_2(%arg0: i32) -> (i32, i32) {
    %c0_i32 = arith.constant 0 : i32
    %c0_i32_0 = arith.constant 0 : i32
    %c0_i32_1 = arith.constant 0 : i32
    return %c0_i32, %c0_i32_0 : i32, i32
  }
  func.func @transform_3(%arg0: i32) -> (i32, i32) {
    %c0_i32 = arith.constant 0 : i32
    %c0_i32_0 = arith.constant 0 : i32
    %c0_i32_1 = arith.constant 0 : i32
    return %c0_i32, %c0_i32_0 : i32, i32
  }
  func.func @transform_4(%arg0: i32) -> (i32, i32) {
    %c0_i32 = arith.constant 0 : i32
    %c0_i32_0 = arith.constant 0 : i32
    return %arg0, %c0_i32 : i32, i32
  }
  func.func @transform_5(%arg0: i32) -> (i32, i32) {
    %c0_i32 = arith.constant 0 : i32
    %c0_i32_0 = arith.constant 0 : i32
    return %arg0, %c0_i32 : i32, i32
  }
}

module attributes {stable_mosaic.version = 11 : i64} {
  func.func @_mm_bn_res_kernel(%arg0: i32, %arg1: memref<2x256xbf16, #tpu.memory_space<vmem>>, %arg2: memref<256x64xbf16, #tpu.memory_space<vmem>>, %arg3: memref<1x64xf32, #tpu.memory_space<vmem>>, %arg4: memref<1x64xf32, #tpu.memory_space<vmem>>, %arg5: memref<2x64xbf16, #tpu.memory_space<vmem>>, %arg6: memref<2x64xbf16, #tpu.memory_space<vmem>>) attributes {dimension_semantics = [#tpu.dimension_semantics<parallel>], iteration_bounds = array<i64: 1>, scalar_prefetch = 0 : i64, scratch_operands = 0 : i64, tpu.core_type = #tpu.core_type<tc>, window_params = [{transform_indices = @transform_0, window_bounds = array<i64: 2, 256>}, {pipeline_mode = #tpu.pipeline_mode<synchronous>, transform_indices = @transform_1, window_bounds = array<i64: 256, 64>}, {pipeline_mode = #tpu.pipeline_mode<synchronous>, transform_indices = @transform_2, window_bounds = array<i64: 1, 64>}, {pipeline_mode = #tpu.pipeline_mode<synchronous>, transform_indices = @transform_3, window_bounds = array<i64: 1, 64>}, {transform_indices = @transform_4, window_bounds = array<i64: 2, 64>}, {transform_indices = @transform_5, window_bounds = array<i64: 2, 64>}]} {
    %c0 = arith.constant 0 : index
    %c0_0 = arith.constant 0 : index
    %0 = vector.load %arg1[%c0, %c0_0] : memref<2x256xbf16, #tpu.memory_space<vmem>>, vector<2x256xbf16>
    %c0_1 = arith.constant 0 : index
    %c0_2 = arith.constant 0 : index
    %1 = vector.load %arg2[%c0_1, %c0_2] : memref<256x64xbf16, #tpu.memory_space<vmem>>, vector<256x64xbf16>
    %cst = arith.constant dense<0.000000e+00> : vector<2x64xf32>
    %2 = tpu.matmul %0, %1, %cst {dimension_numbers = #tpu.dot_dimension_numbers<[1], [0], [0], [1], [0, 0, 1, 1], [], []>} : vector<2x256xbf16>, vector<256x64xbf16>, vector<2x64xf32> -> vector<2x64xf32>
    %c0_3 = arith.constant 0 : index
    %c0_4 = arith.constant 0 : index
    %3 = vector.load %arg3[%c0_3, %c0_4] : memref<1x64xf32, #tpu.memory_space<vmem>>, vector<1x64xf32>
    %4 = vector.broadcast %3 : vector<1x64xf32> to vector<2x64xf32>
    %5 = arith.mulf %2, %4 : vector<2x64xf32>
    %c0_5 = arith.constant 0 : index
    %c0_6 = arith.constant 0 : index
    %6 = vector.load %arg4[%c0_5, %c0_6] : memref<1x64xf32, #tpu.memory_space<vmem>>, vector<1x64xf32>
    %7 = vector.broadcast %6 : vector<1x64xf32> to vector<2x64xf32>
    %8 = arith.addf %5, %7 : vector<2x64xf32>
    %c0_7 = arith.constant 0 : index
    %c0_8 = arith.constant 0 : index
    %9 = vector.load %arg5[%c0_7, %c0_8] : memref<2x64xbf16, #tpu.memory_space<vmem>>, vector<2x64xbf16>
    %10 = arith.extf %9 : vector<2x64xbf16> to vector<2x64xf32>
    %11 = arith.addf %8, %10 : vector<2x64xf32>
    %cst_9 = arith.constant 0.000000e+00 : f32
    %12 = vector.broadcast %cst_9 : f32 to vector<2x64xf32>
    %13 = arith.maximumf %11, %12 : vector<2x64xf32>
    %14 = arith.truncf %13 : vector<2x64xf32> to vector<2x64xbf16>
    %c0_10 = arith.constant 0 : index
    %c0_11 = arith.constant 0 : index
    %15 = vector.load %arg6[%c0_10, %c0_11] : memref<2x64xbf16, #tpu.memory_space<vmem>>, vector<2x64xbf16>
    tpu.vector_store %arg6[%c0_10, %c0_11], %14 {strides = array<i32>} : memref<2x64xbf16, #tpu.memory_space<vmem>>, vector<2x64xbf16>,
    return
  }
  func.func @transform_0(%arg0: i32) -> (i32, i32) {
    %c0_i32 = arith.constant 0 : i32
    %c0_i32_0 = arith.constant 0 : i32
    return %arg0, %c0_i32 : i32, i32
  }
  func.func @transform_1(%arg0: i32) -> (i32, i32) {
    %c0_i32 = arith.constant 0 : i32
    %c0_i32_0 = arith.constant 0 : i32
    %c0_i32_1 = arith.constant 0 : i32
    return %c0_i32, %c0_i32_0 : i32, i32
  }
  func.func @transform_2(%arg0: i32) -> (i32, i32) {
    %c0_i32 = arith.constant 0 : i32
    %c0_i32_0 = arith.constant 0 : i32
    %c0_i32_1 = arith.constant 0 : i32
    return %c0_i32, %c0_i32_0 : i32, i32
  }
  func.func @transform_3(%arg0: i32) -> (i32, i32) {
    %c0_i32 = arith.constant 0 : i32
    %c0_i32_0 = arith.constant 0 : i32
    %c0_i32_1 = arith.constant 0 : i32
    return %c0_i32, %c0_i32_0 : i32, i32
  }
  func.func @transform_4(%arg0: i32) -> (i32, i32) {
    %c0_i32 = arith.constant 0 : i32
    %c0_i32_0 = arith.constant 0 : i32
    return %arg0, %c0_i32 : i32, i32
  }
  func.func @transform_5(%arg0: i32) -> (i32, i32) {
    %c0_i32 = arith.constant 0 : i32
    %c0_i32_0 = arith.constant 0 : i32
    return %arg0, %c0_i32 : i32, i32
  }
}

module attributes {stable_mosaic.version = 11 : i64} {
  func.func @_mm_bn_res_kernel(%arg0: i32, %arg1: memref<2x512xbf16, #tpu.memory_space<vmem>>, %arg2: memref<512x64xbf16, #tpu.memory_space<vmem>>, %arg3: memref<1x64xf32, #tpu.memory_space<vmem>>, %arg4: memref<1x64xf32, #tpu.memory_space<vmem>>, %arg5: memref<2x64xbf16, #tpu.memory_space<vmem>>, %arg6: memref<2x64xbf16, #tpu.memory_space<vmem>>) attributes {dimension_semantics = [#tpu.dimension_semantics<parallel>], iteration_bounds = array<i64: 1>, scalar_prefetch = 0 : i64, scratch_operands = 0 : i64, tpu.core_type = #tpu.core_type<tc>, window_params = [{transform_indices = @transform_0, window_bounds = array<i64: 2, 512>}, {pipeline_mode = #tpu.pipeline_mode<synchronous>, transform_indices = @transform_1, window_bounds = array<i64: 512, 64>}, {pipeline_mode = #tpu.pipeline_mode<synchronous>, transform_indices = @transform_2, window_bounds = array<i64: 1, 64>}, {pipeline_mode = #tpu.pipeline_mode<synchronous>, transform_indices = @transform_3, window_bounds = array<i64: 1, 64>}, {transform_indices = @transform_4, window_bounds = array<i64: 2, 64>}, {transform_indices = @transform_5, window_bounds = array<i64: 2, 64>}]} {
    %c0 = arith.constant 0 : index
    %c0_0 = arith.constant 0 : index
    %0 = vector.load %arg1[%c0, %c0_0] : memref<2x512xbf16, #tpu.memory_space<vmem>>, vector<2x512xbf16>
    %c0_1 = arith.constant 0 : index
    %c0_2 = arith.constant 0 : index
    %1 = vector.load %arg2[%c0_1, %c0_2] : memref<512x64xbf16, #tpu.memory_space<vmem>>, vector<512x64xbf16>
    %cst = arith.constant dense<0.000000e+00> : vector<2x64xf32>
    %2 = tpu.matmul %0, %1, %cst {dimension_numbers = #tpu.dot_dimension_numbers<[1], [0], [0], [1], [0, 0, 1, 1], [], []>} : vector<2x512xbf16>, vector<512x64xbf16>, vector<2x64xf32> -> vector<2x64xf32>
    %c0_3 = arith.constant 0 : index
    %c0_4 = arith.constant 0 : index
    %3 = vector.load %arg3[%c0_3, %c0_4] : memref<1x64xf32, #tpu.memory_space<vmem>>, vector<1x64xf32>
    %4 = vector.broadcast %3 : vector<1x64xf32> to vector<2x64xf32>
    %5 = arith.mulf %2, %4 : vector<2x64xf32>
    %c0_5 = arith.constant 0 : index
    %c0_6 = arith.constant 0 : index
    %6 = vector.load %arg4[%c0_5, %c0_6] : memref<1x64xf32, #tpu.memory_space<vmem>>, vector<1x64xf32>
    %7 = vector.broadcast %6 : vector<1x64xf32> to vector<2x64xf32>
    %8 = arith.addf %5, %7 : vector<2x64xf32>
    %c0_7 = arith.constant 0 : index
    %c0_8 = arith.constant 0 : index
    %9 = vector.load %arg5[%c0_7, %c0_8] : memref<2x64xbf16, #tpu.memory_space<vmem>>, vector<2x64xbf16>
    %10 = arith.extf %9 : vector<2x64xbf16> to vector<2x64xf32>
    %11 = arith.addf %8, %10 : vector<2x64xf32>
    %cst_9 = arith.constant 0.000000e+00 : f32
    %12 = vector.broadcast %cst_9 : f32 to vector<2x64xf32>
    %13 = arith.maximumf %11, %12 : vector<2x64xf32>
    %14 = arith.truncf %13 : vector<2x64xf32> to vector<2x64xbf16>
    %c0_10 = arith.constant 0 : index
    %c0_11 = arith.constant 0 : index
    %15 = vector.load %arg6[%c0_10, %c0_11] : memref<2x64xbf16, #tpu.memory_space<vmem>>, vector<2x64xbf16>
    tpu.vector_store %arg6[%c0_10, %c0_11], %14 {strides = array<i32>} : memref<2x64xbf16, #tpu.memory_space<vmem>>, vector<2x64xbf16>,
    return
  }
  func.func @transform_0(%arg0: i32) -> (i32, i32) {
    %c0_i32 = arith.constant 0 : i32
    %c0_i32_0 = arith.constant 0 : i32
    return %arg0, %c0_i32 : i32, i32
  }
  func.func @transform_1(%arg0: i32) -> (i32, i32) {
    %c0_i32 = arith.constant 0 : i32
    %c0_i32_0 = arith.constant 0 : i32
    %c0_i32_1 = arith.constant 0 : i32
    return %c0_i32, %c0_i32_0 : i32, i32
  }
  func.func @transform_2(%arg0: i32) -> (i32, i32) {
    %c0_i32 = arith.constant 0 : i32
    %c0_i32_0 = arith.constant 0 : i32
    %c0_i32_1 = arith.constant 0 : i32
    return %c0_i32, %c0_i32_0 : i32, i32
  }
  func.func @transform_3(%arg0: i32) -> (i32, i32) {
    %c0_i32 = arith.constant 0 : i32
    %c0_i32_0 = arith.constant 0 : i32
    %c0_i32_1 = arith.constant 0 : i32
    return %c0_i32, %c0_i32_0 : i32, i32
  }
  func.func @transform_4(%arg0: i32) -> (i32, i32) {
    %c0_i32 = arith.constant 0 : i32
    %c0_i32_0 = arith.constant 0 : i32
    return %arg0, %c0_i32 : i32, i32
  }
  func.func @transform_5(%arg0: i32) -> (i32, i32) {
    %c0_i32 = arith.constant 0 : i32
    %c0_i32_0 = arith.constant 0 : i32
    return %arg0, %c0_i32 : i32, i32
  }
}

module attributes {stable_mosaic.version = 11 : i64} {
  func.func @_mm_bn_res_kernel(%arg0: i32, %arg1: memref<16x512xbf16, #tpu.memory_space<vmem>>, %arg2: memref<512x32xbf16, #tpu.memory_space<vmem>>, %arg3: memref<1x32xf32, #tpu.memory_space<vmem>>, %arg4: memref<1x32xf32, #tpu.memory_space<vmem>>, %arg5: memref<16x32xbf16, #tpu.memory_space<vmem>>, %arg6: memref<16x32xbf16, #tpu.memory_space<vmem>>) attributes {dimension_semantics = [#tpu.dimension_semantics<parallel>], iteration_bounds = array<i64: 1>, scalar_prefetch = 0 : i64, scratch_operands = 0 : i64, tpu.core_type = #tpu.core_type<tc>, window_params = [{transform_indices = @transform_0, window_bounds = array<i64: 16, 512>}, {pipeline_mode = #tpu.pipeline_mode<synchronous>, transform_indices = @transform_1, window_bounds = array<i64: 512, 32>}, {pipeline_mode = #tpu.pipeline_mode<synchronous>, transform_indices = @transform_2, window_bounds = array<i64: 1, 32>}, {pipeline_mode = #tpu.pipeline_mode<synchronous>, transform_indices = @transform_3, window_bounds = array<i64: 1, 32>}, {transform_indices = @transform_4, window_bounds = array<i64: 16, 32>}, {transform_indices = @transform_5, window_bounds = array<i64: 16, 32>}]} {
    %c0 = arith.constant 0 : index
    %c0_0 = arith.constant 0 : index
    %0 = vector.load %arg1[%c0, %c0_0] : memref<16x512xbf16, #tpu.memory_space<vmem>>, vector<16x512xbf16>
    %c0_1 = arith.constant 0 : index
    %c0_2 = arith.constant 0 : index
    %1 = vector.load %arg2[%c0_1, %c0_2] : memref<512x32xbf16, #tpu.memory_space<vmem>>, vector<512x32xbf16>
    %cst = arith.constant dense<0.000000e+00> : vector<16x32xf32>
    %2 = tpu.matmul %0, %1, %cst {dimension_numbers = #tpu.dot_dimension_numbers<[1], [0], [0], [1], [0, 0, 1, 1], [], []>} : vector<16x512xbf16>, vector<512x32xbf16>, vector<16x32xf32> -> vector<16x32xf32>
    %c0_3 = arith.constant 0 : index
    %c0_4 = arith.constant 0 : index
    %3 = vector.load %arg3[%c0_3, %c0_4] : memref<1x32xf32, #tpu.memory_space<vmem>>, vector<1x32xf32>
    %4 = vector.broadcast %3 : vector<1x32xf32> to vector<16x32xf32>
    %5 = arith.mulf %2, %4 : vector<16x32xf32>
    %c0_5 = arith.constant 0 : index
    %c0_6 = arith.constant 0 : index
    %6 = vector.load %arg4[%c0_5, %c0_6] : memref<1x32xf32, #tpu.memory_space<vmem>>, vector<1x32xf32>
    %7 = vector.broadcast %6 : vector<1x32xf32> to vector<16x32xf32>
    %8 = arith.addf %5, %7 : vector<16x32xf32>
    %c0_7 = arith.constant 0 : index
    %c0_8 = arith.constant 0 : index
    %9 = vector.load %arg5[%c0_7, %c0_8] : memref<16x32xbf16, #tpu.memory_space<vmem>>, vector<16x32xbf16>
    %10 = arith.extf %9 : vector<16x32xbf16> to vector<16x32xf32>
    %11 = arith.addf %8, %10 : vector<16x32xf32>
    %12 = arith.truncf %11 : vector<16x32xf32> to vector<16x32xbf16>
    %c0_9 = arith.constant 0 : index
    %c0_10 = arith.constant 0 : index
    %13 = vector.load %arg6[%c0_9, %c0_10] : memref<16x32xbf16, #tpu.memory_space<vmem>>, vector<16x32xbf16>
    tpu.vector_store %arg6[%c0_9, %c0_10], %12 {strides = array<i32>} : memref<16x32xbf16, #tpu.memory_space<vmem>>, vector<16x32xbf16>,
    return
  }
  func.func @transform_0(%arg0: i32) -> (i32, i32) {
    %c0_i32 = arith.constant 0 : i32
    %c0_i32_0 = arith.constant 0 : i32
    return %arg0, %c0_i32 : i32, i32
  }
  func.func @transform_1(%arg0: i32) -> (i32, i32) {
    %c0_i32 = arith.constant 0 : i32
    %c0_i32_0 = arith.constant 0 : i32
    %c0_i32_1 = arith.constant 0 : i32
    return %c0_i32, %c0_i32_0 : i32, i32
  }
  func.func @transform_2(%arg0: i32) -> (i32, i32) {
    %c0_i32 = arith.constant 0 : i32
    %c0_i32_0 = arith.constant 0 : i32
    %c0_i32_1 = arith.constant 0 : i32
    return %c0_i32, %c0_i32_0 : i32, i32
  }
  func.func @transform_3(%arg0: i32) -> (i32, i32) {
    %c0_i32 = arith.constant 0 : i32
    %c0_i32_0 = arith.constant 0 : i32
    %c0_i32_1 = arith.constant 0 : i32
    return %c0_i32, %c0_i32_0 : i32, i32
  }
  func.func @transform_4(%arg0: i32) -> (i32, i32) {
    %c0_i32 = arith.constant 0 : i32
    %c0_i32_0 = arith.constant 0 : i32
    return %arg0, %c0_i32 : i32, i32
  }
  func.func @transform_5(%arg0: i32) -> (i32, i32) {
    %c0_i32 = arith.constant 0 : i32
    %c0_i32_0 = arith.constant 0 : i32
    return %arg0, %c0_i32 : i32, i32
  }
}

module attributes {stable_mosaic.version = 11 : i64} {
  func.func @_mm_bn_res_kernel(%arg0: i32, %arg1: memref<16x256xbf16, #tpu.memory_space<vmem>>, %arg2: memref<256x32xbf16, #tpu.memory_space<vmem>>, %arg3: memref<1x32xf32, #tpu.memory_space<vmem>>, %arg4: memref<1x32xf32, #tpu.memory_space<vmem>>, %arg5: memref<16x32xbf16, #tpu.memory_space<vmem>>, %arg6: memref<16x32xbf16, #tpu.memory_space<vmem>>) attributes {dimension_semantics = [#tpu.dimension_semantics<parallel>], iteration_bounds = array<i64: 1>, scalar_prefetch = 0 : i64, scratch_operands = 0 : i64, tpu.core_type = #tpu.core_type<tc>, window_params = [{transform_indices = @transform_0, window_bounds = array<i64: 16, 256>}, {pipeline_mode = #tpu.pipeline_mode<synchronous>, transform_indices = @transform_1, window_bounds = array<i64: 256, 32>}, {pipeline_mode = #tpu.pipeline_mode<synchronous>, transform_indices = @transform_2, window_bounds = array<i64: 1, 32>}, {pipeline_mode = #tpu.pipeline_mode<synchronous>, transform_indices = @transform_3, window_bounds = array<i64: 1, 32>}, {transform_indices = @transform_4, window_bounds = array<i64: 16, 32>}, {transform_indices = @transform_5, window_bounds = array<i64: 16, 32>}]} {
    %c0 = arith.constant 0 : index
    %c0_0 = arith.constant 0 : index
    %0 = vector.load %arg1[%c0, %c0_0] : memref<16x256xbf16, #tpu.memory_space<vmem>>, vector<16x256xbf16>
    %c0_1 = arith.constant 0 : index
    %c0_2 = arith.constant 0 : index
    %1 = vector.load %arg2[%c0_1, %c0_2] : memref<256x32xbf16, #tpu.memory_space<vmem>>, vector<256x32xbf16>
    %cst = arith.constant dense<0.000000e+00> : vector<16x32xf32>
    %2 = tpu.matmul %0, %1, %cst {dimension_numbers = #tpu.dot_dimension_numbers<[1], [0], [0], [1], [0, 0, 1, 1], [], []>} : vector<16x256xbf16>, vector<256x32xbf16>, vector<16x32xf32> -> vector<16x32xf32>
    %c0_3 = arith.constant 0 : index
    %c0_4 = arith.constant 0 : index
    %3 = vector.load %arg3[%c0_3, %c0_4] : memref<1x32xf32, #tpu.memory_space<vmem>>, vector<1x32xf32>
    %4 = vector.broadcast %3 : vector<1x32xf32> to vector<16x32xf32>
    %5 = arith.mulf %2, %4 : vector<16x32xf32>
    %c0_5 = arith.constant 0 : index
    %c0_6 = arith.constant 0 : index
    %6 = vector.load %arg4[%c0_5, %c0_6] : memref<1x32xf32, #tpu.memory_space<vmem>>, vector<1x32xf32>
    %7 = vector.broadcast %6 : vector<1x32xf32> to vector<16x32xf32>
    %8 = arith.addf %5, %7 : vector<16x32xf32>
    %c0_7 = arith.constant 0 : index
    %c0_8 = arith.constant 0 : index
    %9 = vector.load %arg5[%c0_7, %c0_8] : memref<16x32xbf16, #tpu.memory_space<vmem>>, vector<16x32xbf16>
    %10 = arith.extf %9 : vector<16x32xbf16> to vector<16x32xf32>
    %11 = arith.addf %8, %10 : vector<16x32xf32>
    %12 = arith.truncf %11 : vector<16x32xf32> to vector<16x32xbf16>
    %c0_9 = arith.constant 0 : index
    %c0_10 = arith.constant 0 : index
    %13 = vector.load %arg6[%c0_9, %c0_10] : memref<16x32xbf16, #tpu.memory_space<vmem>>, vector<16x32xbf16>
    tpu.vector_store %arg6[%c0_9, %c0_10], %12 {strides = array<i32>} : memref<16x32xbf16, #tpu.memory_space<vmem>>, vector<16x32xbf16>,
    return
  }
  func.func @transform_0(%arg0: i32) -> (i32, i32) {
    %c0_i32 = arith.constant 0 : i32
    %c0_i32_0 = arith.constant 0 : i32
    return %arg0, %c0_i32 : i32, i32
  }
  func.func @transform_1(%arg0: i32) -> (i32, i32) {
    %c0_i32 = arith.constant 0 : i32
    %c0_i32_0 = arith.constant 0 : i32
    %c0_i32_1 = arith.constant 0 : i32
    return %c0_i32, %c0_i32_0 : i32, i32
  }
  func.func @transform_2(%arg0: i32) -> (i32, i32) {
    %c0_i32 = arith.constant 0 : i32
    %c0_i32_0 = arith.constant 0 : i32
    %c0_i32_1 = arith.constant 0 : i32
    return %c0_i32, %c0_i32_0 : i32, i32
  }
  func.func @transform_3(%arg0: i32) -> (i32, i32) {
    %c0_i32 = arith.constant 0 : i32
    %c0_i32_0 = arith.constant 0 : i32
    %c0_i32_1 = arith.constant 0 : i32
    return %c0_i32, %c0_i32_0 : i32, i32
  }
  func.func @transform_4(%arg0: i32) -> (i32, i32) {
    %c0_i32 = arith.constant 0 : i32
    %c0_i32_0 = arith.constant 0 : i32
    return %arg0, %c0_i32 : i32, i32
  }
  func.func @transform_5(%arg0: i32) -> (i32, i32) {
    %c0_i32 = arith.constant 0 : i32
    %c0_i32_0 = arith.constant 0 : i32
    return %arg0, %c0_i32 : i32, i32
  }
}

module attributes {stable_mosaic.version = 11 : i64} {
  func.func @_mm_bn_res_kernel(%arg0: i32, %arg1: memref<16x128xbf16, #tpu.memory_space<vmem>>, %arg2: memref<128x32xbf16, #tpu.memory_space<vmem>>, %arg3: memref<1x32xf32, #tpu.memory_space<vmem>>, %arg4: memref<1x32xf32, #tpu.memory_space<vmem>>, %arg5: memref<16x32xbf16, #tpu.memory_space<vmem>>, %arg6: memref<16x32xbf16, #tpu.memory_space<vmem>>) attributes {dimension_semantics = [#tpu.dimension_semantics<parallel>], iteration_bounds = array<i64: 1>, scalar_prefetch = 0 : i64, scratch_operands = 0 : i64, tpu.core_type = #tpu.core_type<tc>, window_params = [{transform_indices = @transform_0, window_bounds = array<i64: 16, 128>}, {pipeline_mode = #tpu.pipeline_mode<synchronous>, transform_indices = @transform_1, window_bounds = array<i64: 128, 32>}, {pipeline_mode = #tpu.pipeline_mode<synchronous>, transform_indices = @transform_2, window_bounds = array<i64: 1, 32>}, {pipeline_mode = #tpu.pipeline_mode<synchronous>, transform_indices = @transform_3, window_bounds = array<i64: 1, 32>}, {transform_indices = @transform_4, window_bounds = array<i64: 16, 32>}, {transform_indices = @transform_5, window_bounds = array<i64: 16, 32>}]} {
    %c0 = arith.constant 0 : index
    %c0_0 = arith.constant 0 : index
    %0 = vector.load %arg1[%c0, %c0_0] : memref<16x128xbf16, #tpu.memory_space<vmem>>, vector<16x128xbf16>
    %c0_1 = arith.constant 0 : index
    %c0_2 = arith.constant 0 : index
    %1 = vector.load %arg2[%c0_1, %c0_2] : memref<128x32xbf16, #tpu.memory_space<vmem>>, vector<128x32xbf16>
    %cst = arith.constant dense<0.000000e+00> : vector<16x32xf32>
    %2 = tpu.matmul %0, %1, %cst {dimension_numbers = #tpu.dot_dimension_numbers<[1], [0], [0], [1], [0, 0, 1, 1], [], []>} : vector<16x128xbf16>, vector<128x32xbf16>, vector<16x32xf32> -> vector<16x32xf32>
    %c0_3 = arith.constant 0 : index
    %c0_4 = arith.constant 0 : index
    %3 = vector.load %arg3[%c0_3, %c0_4] : memref<1x32xf32, #tpu.memory_space<vmem>>, vector<1x32xf32>
    %4 = vector.broadcast %3 : vector<1x32xf32> to vector<16x32xf32>
    %5 = arith.mulf %2, %4 : vector<16x32xf32>
    %c0_5 = arith.constant 0 : index
    %c0_6 = arith.constant 0 : index
    %6 = vector.load %arg4[%c0_5, %c0_6] : memref<1x32xf32, #tpu.memory_space<vmem>>, vector<1x32xf32>
    %7 = vector.broadcast %6 : vector<1x32xf32> to vector<16x32xf32>
    %8 = arith.addf %5, %7 : vector<16x32xf32>
    %c0_7 = arith.constant 0 : index
    %c0_8 = arith.constant 0 : index
    %9 = vector.load %arg5[%c0_7, %c0_8] : memref<16x32xbf16, #tpu.memory_space<vmem>>, vector<16x32xbf16>
    %10 = arith.extf %9 : vector<16x32xbf16> to vector<16x32xf32>
    %11 = arith.addf %8, %10 : vector<16x32xf32>
    %12 = arith.truncf %11 : vector<16x32xf32> to vector<16x32xbf16>
    %c0_9 = arith.constant 0 : index
    %c0_10 = arith.constant 0 : index
    %13 = vector.load %arg6[%c0_9, %c0_10] : memref<16x32xbf16, #tpu.memory_space<vmem>>, vector<16x32xbf16>
    tpu.vector_store %arg6[%c0_9, %c0_10], %12 {strides = array<i32>} : memref<16x32xbf16, #tpu.memory_space<vmem>>, vector<16x32xbf16>,
    return
  }
  func.func @transform_0(%arg0: i32) -> (i32, i32) {
    %c0_i32 = arith.constant 0 : i32
    %c0_i32_0 = arith.constant 0 : i32
    return %arg0, %c0_i32 : i32, i32
  }
  func.func @transform_1(%arg0: i32) -> (i32, i32) {
    %c0_i32 = arith.constant 0 : i32
    %c0_i32_0 = arith.constant 0 : i32
    %c0_i32_1 = arith.constant 0 : i32
    return %c0_i32, %c0_i32_0 : i32, i32
  }
  func.func @transform_2(%arg0: i32) -> (i32, i32) {
    %c0_i32 = arith.constant 0 : i32
    %c0_i32_0 = arith.constant 0 : i32
    %c0_i32_1 = arith.constant 0 : i32
    return %c0_i32, %c0_i32_0 : i32, i32
  }
  func.func @transform_3(%arg0: i32) -> (i32, i32) {
    %c0_i32 = arith.constant 0 : i32
    %c0_i32_0 = arith.constant 0 : i32
    %c0_i32_1 = arith.constant 0 : i32
    return %c0_i32, %c0_i32_0 : i32, i32
  }
  func.func @transform_4(%arg0: i32) -> (i32, i32) {
    %c0_i32 = arith.constant 0 : i32
    %c0_i32_0 = arith.constant 0 : i32
    return %arg0, %c0_i32 : i32, i32
  }
  func.func @transform_5(%arg0: i32) -> (i32, i32) {
    %c0_i32 = arith.constant 0 : i32
    %c0_i32_0 = arith.constant 0 : i32
    return %arg0, %c0_i32 : i32, i32
  }
}

module attributes {stable_mosaic.version = 11 : i64} {
  func.func @_mm_bn_res_kernel(%arg0: i32, %arg1: memref<16x64xbf16, #tpu.memory_space<vmem>>, %arg2: memref<64x32xbf16, #tpu.memory_space<vmem>>, %arg3: memref<1x32xf32, #tpu.memory_space<vmem>>, %arg4: memref<1x32xf32, #tpu.memory_space<vmem>>, %arg5: memref<16x32xbf16, #tpu.memory_space<vmem>>, %arg6: memref<16x32xbf16, #tpu.memory_space<vmem>>) attributes {dimension_semantics = [#tpu.dimension_semantics<parallel>], iteration_bounds = array<i64: 1>, scalar_prefetch = 0 : i64, scratch_operands = 0 : i64, tpu.core_type = #tpu.core_type<tc>, window_params = [{transform_indices = @transform_0, window_bounds = array<i64: 16, 64>}, {pipeline_mode = #tpu.pipeline_mode<synchronous>, transform_indices = @transform_1, window_bounds = array<i64: 64, 32>}, {pipeline_mode = #tpu.pipeline_mode<synchronous>, transform_indices = @transform_2, window_bounds = array<i64: 1, 32>}, {pipeline_mode = #tpu.pipeline_mode<synchronous>, transform_indices = @transform_3, window_bounds = array<i64: 1, 32>}, {transform_indices = @transform_4, window_bounds = array<i64: 16, 32>}, {transform_indices = @transform_5, window_bounds = array<i64: 16, 32>}]} {
    %c0 = arith.constant 0 : index
    %c0_0 = arith.constant 0 : index
    %0 = vector.load %arg1[%c0, %c0_0] : memref<16x64xbf16, #tpu.memory_space<vmem>>, vector<16x64xbf16>
    %c0_1 = arith.constant 0 : index
    %c0_2 = arith.constant 0 : index
    %1 = vector.load %arg2[%c0_1, %c0_2] : memref<64x32xbf16, #tpu.memory_space<vmem>>, vector<64x32xbf16>
    %cst = arith.constant dense<0.000000e+00> : vector<16x32xf32>
    %2 = tpu.matmul %0, %1, %cst {dimension_numbers = #tpu.dot_dimension_numbers<[1], [0], [0], [1], [0, 0, 1, 1], [], []>} : vector<16x64xbf16>, vector<64x32xbf16>, vector<16x32xf32> -> vector<16x32xf32>
    %c0_3 = arith.constant 0 : index
    %c0_4 = arith.constant 0 : index
    %3 = vector.load %arg3[%c0_3, %c0_4] : memref<1x32xf32, #tpu.memory_space<vmem>>, vector<1x32xf32>
    %4 = vector.broadcast %3 : vector<1x32xf32> to vector<16x32xf32>
    %5 = arith.mulf %2, %4 : vector<16x32xf32>
    %c0_5 = arith.constant 0 : index
    %c0_6 = arith.constant 0 : index
    %6 = vector.load %arg4[%c0_5, %c0_6] : memref<1x32xf32, #tpu.memory_space<vmem>>, vector<1x32xf32>
    %7 = vector.broadcast %6 : vector<1x32xf32> to vector<16x32xf32>
    %8 = arith.addf %5, %7 : vector<16x32xf32>
    %c0_7 = arith.constant 0 : index
    %c0_8 = arith.constant 0 : index
    %9 = vector.load %arg5[%c0_7, %c0_8] : memref<16x32xbf16, #tpu.memory_space<vmem>>, vector<16x32xbf16>
    %10 = arith.extf %9 : vector<16x32xbf16> to vector<16x32xf32>
    %11 = arith.addf %8, %10 : vector<16x32xf32>
    %12 = arith.truncf %11 : vector<16x32xf32> to vector<16x32xbf16>
    %c0_9 = arith.constant 0 : index
    %c0_10 = arith.constant 0 : index
    %13 = vector.load %arg6[%c0_9, %c0_10] : memref<16x32xbf16, #tpu.memory_space<vmem>>, vector<16x32xbf16>
    tpu.vector_store %arg6[%c0_9, %c0_10], %12 {strides = array<i32>} : memref<16x32xbf16, #tpu.memory_space<vmem>>, vector<16x32xbf16>,
    return
  }
  func.func @transform_0(%arg0: i32) -> (i32, i32) {
    %c0_i32 = arith.constant 0 : i32
    %c0_i32_0 = arith.constant 0 : i32
    return %arg0, %c0_i32 : i32, i32
  }
  func.func @transform_1(%arg0: i32) -> (i32, i32) {
    %c0_i32 = arith.constant 0 : i32
    %c0_i32_0 = arith.constant 0 : i32
    %c0_i32_1 = arith.constant 0 : i32
    return %c0_i32, %c0_i32_0 : i32, i32
  }
  func.func @transform_2(%arg0: i32) -> (i32, i32) {
    %c0_i32 = arith.constant 0 : i32
    %c0_i32_0 = arith.constant 0 : i32
    %c0_i32_1 = arith.constant 0 : i32
    return %c0_i32, %c0_i32_0 : i32, i32
  }
  func.func @transform_3(%arg0: i32) -> (i32, i32) {
    %c0_i32 = arith.constant 0 : i32
    %c0_i32_0 = arith.constant 0 : i32
    %c0_i32_1 = arith.constant 0 : i32
    return %c0_i32, %c0_i32_0 : i32, i32
  }
  func.func @transform_4(%arg0: i32) -> (i32, i32) {
    %c0_i32 = arith.constant 0 : i32
    %c0_i32_0 = arith.constant 0 : i32
    return %arg0, %c0_i32 : i32, i32
  }
  func.func @transform_5(%arg0: i32) -> (i32, i32) {
    %c0_i32 = arith.constant 0 : i32
    %c0_i32_0 = arith.constant 0 : i32
    return %arg0, %c0_i32 : i32, i32
  }
}

module attributes {stable_mosaic.version = 11 : i64} {
  func.func @_mm_bn_kernel(%arg0: i32, %arg1: memref<128x864xbf16, #tpu.memory_space<vmem>>, %arg2: memref<864x1xbf16, #tpu.memory_space<vmem>>, %arg3: memref<1x1xf32, #tpu.memory_space<vmem>>, %arg4: memref<1x1xf32, #tpu.memory_space<vmem>>, %arg5: memref<128x1xf32, #tpu.memory_space<vmem>>) attributes {dimension_semantics = [#tpu.dimension_semantics<parallel>], iteration_bounds = array<i64: 1>, scalar_prefetch = 0 : i64, scratch_operands = 0 : i64, tpu.core_type = #tpu.core_type<tc>, window_params = [{transform_indices = @transform_0, window_bounds = array<i64: 128, 864>}, {pipeline_mode = #tpu.pipeline_mode<synchronous>, transform_indices = @transform_1, window_bounds = array<i64: 864, 1>}, {pipeline_mode = #tpu.pipeline_mode<synchronous>, transform_indices = @transform_2, window_bounds = array<i64: 1, 1>}, {pipeline_mode = #tpu.pipeline_mode<synchronous>, transform_indices = @transform_3, window_bounds = array<i64: 1, 1>}, {transform_indices = @transform_4, window_bounds = array<i64: 128, 1>}]} {
    %c0 = arith.constant 0 : index
    %c0_0 = arith.constant 0 : index
    %0 = vector.load %arg1[%c0, %c0_0] : memref<128x864xbf16, #tpu.memory_space<vmem>>, vector<128x864xbf16>
    %c0_1 = arith.constant 0 : index
    %c0_2 = arith.constant 0 : index
    %1 = vector.load %arg2[%c0_1, %c0_2] : memref<864x1xbf16, #tpu.memory_space<vmem>>, vector<864x1xbf16>
    %cst = arith.constant dense<0.000000e+00> : vector<128x1xf32>
    %2 = tpu.matmul %0, %1, %cst {dimension_numbers = #tpu.dot_dimension_numbers<[1], [0], [0], [1], [0, 0, 1, 1], [], []>} : vector<128x864xbf16>, vector<864x1xbf16>, vector<128x1xf32> -> vector<128x1xf32>
    %c0_3 = arith.constant 0 : index
    %c0_4 = arith.constant 0 : index
    %3 = vector.load %arg3[%c0_3, %c0_4] : memref<1x1xf32, #tpu.memory_space<vmem>>, vector<1x1xf32>
    %4 = vector.broadcast %3 : vector<1x1xf32> to vector<128x1xf32>
    %5 = arith.mulf %2, %4 : vector<128x1xf32>
    %c0_5 = arith.constant 0 : index
    %c0_6 = arith.constant 0 : index
    %6 = vector.load %arg4[%c0_5, %c0_6] : memref<1x1xf32, #tpu.memory_space<vmem>>, vector<1x1xf32>
    %7 = vector.broadcast %6 : vector<1x1xf32> to vector<128x1xf32>
    %8 = arith.addf %5, %7 : vector<128x1xf32>
    %c0_7 = arith.constant 0 : index
    %c0_8 = arith.constant 0 : index
    %9 = vector.load %arg5[%c0_7, %c0_8] : memref<128x1xf32, #tpu.memory_space<vmem>>, vector<128x1xf32>
    tpu.vector_store %arg5[%c0_7, %c0_8], %8 {strides = array<i32>} : memref<128x1xf32, #tpu.memory_space<vmem>>, vector<128x1xf32>,
    return
  }
  func.func @transform_0(%arg0: i32) -> (i32, i32) {
    %c0_i32 = arith.constant 0 : i32
    %c0_i32_0 = arith.constant 0 : i32
    return %arg0, %c0_i32 : i32, i32
  }
  func.func @transform_1(%arg0: i32) -> (i32, i32) {
    %c0_i32 = arith.constant 0 : i32
    %c0_i32_0 = arith.constant 0 : i32
    %c0_i32_1 = arith.constant 0 : i32
    return %c0_i32, %c0_i32_0 : i32, i32
  }
  func.func @transform_2(%arg0: i32) -> (i32, i32) {
    %c0_i32 = arith.constant 0 : i32
    %c0_i32_0 = arith.constant 0 : i32
    %c0_i32_1 = arith.constant 0 : i32
    return %c0_i32, %c0_i32_0 : i32, i32
  }
  func.func @transform_3(%arg0: i32) -> (i32, i32) {
    %c0_i32 = arith.constant 0 : i32
    %c0_i32_0 = arith.constant 0 : i32
    %c0_i32_1 = arith.constant 0 : i32
    return %c0_i32, %c0_i32_0 : i32, i32
  }
  func.func @transform_4(%arg0: i32) -> (i32, i32) {
    %c0_i32 = arith.constant 0 : i32
    %c0_i32_0 = arith.constant 0 : i32
    return %arg0, %c0_i32 : i32, i32
  }
}

module attributes {stable_mosaic.version = 11 : i64} {
  func.func @_mm_bn_res_kernel(%arg0: i32, %arg1: memref<16x1728xbf16, #tpu.memory_space<vmem>>, %arg2: memref<1728x64xbf16, #tpu.memory_space<vmem>>, %arg3: memref<1x64xf32, #tpu.memory_space<vmem>>, %arg4: memref<1x64xf32, #tpu.memory_space<vmem>>, %arg5: memref<16x64xbf16, #tpu.memory_space<vmem>>, %arg6: memref<16x64xbf16, #tpu.memory_space<vmem>>) attributes {dimension_semantics = [#tpu.dimension_semantics<parallel>], iteration_bounds = array<i64: 1>, scalar_prefetch = 0 : i64, scratch_operands = 0 : i64, tpu.core_type = #tpu.core_type<tc>, window_params = [{transform_indices = @transform_0, window_bounds = array<i64: 16, 1728>}, {pipeline_mode = #tpu.pipeline_mode<synchronous>, transform_indices = @transform_1, window_bounds = array<i64: 1728, 64>}, {pipeline_mode = #tpu.pipeline_mode<synchronous>, transform_indices = @transform_2, window_bounds = array<i64: 1, 64>}, {pipeline_mode = #tpu.pipeline_mode<synchronous>, transform_indices = @transform_3, window_bounds = array<i64: 1, 64>}, {transform_indices = @transform_4, window_bounds = array<i64: 16, 64>}, {transform_indices = @transform_5, window_bounds = array<i64: 16, 64>}]} {
    %c0 = arith.constant 0 : index
    %c0_0 = arith.constant 0 : index
    %0 = vector.load %arg1[%c0, %c0_0] : memref<16x1728xbf16, #tpu.memory_space<vmem>>, vector<16x1728xbf16>
    %c0_1 = arith.constant 0 : index
    %c0_2 = arith.constant 0 : index
    %1 = vector.load %arg2[%c0_1, %c0_2] : memref<1728x64xbf16, #tpu.memory_space<vmem>>, vector<1728x64xbf16>
    %cst = arith.constant dense<0.000000e+00> : vector<16x64xf32>
    %2 = tpu.matmul %0, %1, %cst {dimension_numbers = #tpu.dot_dimension_numbers<[1], [0], [0], [1], [0, 0, 1, 1], [], []>} : vector<16x1728xbf16>, vector<1728x64xbf16>, vector<16x64xf32> -> vector<16x64xf32>
    %c0_3 = arith.constant 0 : index
    %c0_4 = arith.constant 0 : index
    %3 = vector.load %arg3[%c0_3, %c0_4] : memref<1x64xf32, #tpu.memory_space<vmem>>, vector<1x64xf32>
    %4 = vector.broadcast %3 : vector<1x64xf32> to vector<16x64xf32>
    %5 = arith.mulf %2, %4 : vector<16x64xf32>
    %c0_5 = arith.constant 0 : index
    %c0_6 = arith.constant 0 : index
    %6 = vector.load %arg4[%c0_5, %c0_6] : memref<1x64xf32, #tpu.memory_space<vmem>>, vector<1x64xf32>
    %7 = vector.broadcast %6 : vector<1x64xf32> to vector<16x64xf32>
    %8 = arith.addf %5, %7 : vector<16x64xf32>
    %c0_7 = arith.constant 0 : index
    %c0_8 = arith.constant 0 : index
    %9 = vector.load %arg5[%c0_7, %c0_8] : memref<16x64xbf16, #tpu.memory_space<vmem>>, vector<16x64xbf16>
    %10 = arith.extf %9 : vector<16x64xbf16> to vector<16x64xf32>
    %11 = arith.addf %8, %10 : vector<16x64xf32>
    %cst_9 = arith.constant 0.000000e+00 : f32
    %12 = vector.broadcast %cst_9 : f32 to vector<16x64xf32>
    %13 = arith.maximumf %11, %12 : vector<16x64xf32>
    %14 = arith.truncf %13 : vector<16x64xf32> to vector<16x64xbf16>
    %c0_10 = arith.constant 0 : index
    %c0_11 = arith.constant 0 : index
    %15 = vector.load %arg6[%c0_10, %c0_11] : memref<16x64xbf16, #tpu.memory_space<vmem>>, vector<16x64xbf16>
    tpu.vector_store %arg6[%c0_10, %c0_11], %14 {strides = array<i32>} : memref<16x64xbf16, #tpu.memory_space<vmem>>, vector<16x64xbf16>,
    return
  }
  func.func @transform_0(%arg0: i32) -> (i32, i32) {
    %c0_i32 = arith.constant 0 : i32
    %c0_i32_0 = arith.constant 0 : i32
    return %arg0, %c0_i32 : i32, i32
  }
  func.func @transform_1(%arg0: i32) -> (i32, i32) {
    %c0_i32 = arith.constant 0 : i32
    %c0_i32_0 = arith.constant 0 : i32
    %c0_i32_1 = arith.constant 0 : i32
    return %c0_i32, %c0_i32_0 : i32, i32
  }
  func.func @transform_2(%arg0: i32) -> (i32, i32) {
    %c0_i32 = arith.constant 0 : i32
    %c0_i32_0 = arith.constant 0 : i32
    %c0_i32_1 = arith.constant 0 : i32
    return %c0_i32, %c0_i32_0 : i32, i32
  }
  func.func @transform_3(%arg0: i32) -> (i32, i32) {
    %c0_i32 = arith.constant 0 : i32
    %c0_i32_0 = arith.constant 0 : i32
    %c0_i32_1 = arith.constant 0 : i32
    return %c0_i32, %c0_i32_0 : i32, i32
  }
  func.func @transform_4(%arg0: i32) -> (i32, i32) {
    %c0_i32 = arith.constant 0 : i32
    %c0_i32_0 = arith.constant 0 : i32
    return %arg0, %c0_i32 : i32, i32
  }
  func.func @transform_5(%arg0: i32) -> (i32, i32) {
    %c0_i32 = arith.constant 0 : i32
    %c0_i32_0 = arith.constant 0 : i32
    return %arg0, %c0_i32 : i32, i32
  }
}

module attributes {stable_mosaic.version = 11 : i64} {
  func.func @_mm_bn_res_kernel(%arg0: i32, %arg1: memref<128x864xbf16, #tpu.memory_space<vmem>>, %arg2: memref<864x1xbf16, #tpu.memory_space<vmem>>, %arg3: memref<1x1xf32, #tpu.memory_space<vmem>>, %arg4: memref<1x1xf32, #tpu.memory_space<vmem>>, %arg5: memref<128x1xf32, #tpu.memory_space<vmem>>, %arg6: memref<128x1xf32, #tpu.memory_space<vmem>>) attributes {dimension_semantics = [#tpu.dimension_semantics<parallel>], iteration_bounds = array<i64: 1>, scalar_prefetch = 0 : i64, scratch_operands = 0 : i64, tpu.core_type = #tpu.core_type<tc>, window_params = [{transform_indices = @transform_0, window_bounds = array<i64: 128, 864>}, {pipeline_mode = #tpu.pipeline_mode<synchronous>, transform_indices = @transform_1, window_bounds = array<i64: 864, 1>}, {pipeline_mode = #tpu.pipeline_mode<synchronous>, transform_indices = @transform_2, window_bounds = array<i64: 1, 1>}, {pipeline_mode = #tpu.pipeline_mode<synchronous>, transform_indices = @transform_3, window_bounds = array<i64: 1, 1>}, {transform_indices = @transform_4, window_bounds = array<i64: 128, 1>}, {transform_indices = @transform_5, window_bounds = array<i64: 128, 1>}]} {
    %c0 = arith.constant 0 : index
    %c0_0 = arith.constant 0 : index
    %0 = vector.load %arg1[%c0, %c0_0] : memref<128x864xbf16, #tpu.memory_space<vmem>>, vector<128x864xbf16>
    %c0_1 = arith.constant 0 : index
    %c0_2 = arith.constant 0 : index
    %1 = vector.load %arg2[%c0_1, %c0_2] : memref<864x1xbf16, #tpu.memory_space<vmem>>, vector<864x1xbf16>
    %cst = arith.constant dense<0.000000e+00> : vector<128x1xf32>
    %2 = tpu.matmul %0, %1, %cst {dimension_numbers = #tpu.dot_dimension_numbers<[1], [0], [0], [1], [0, 0, 1, 1], [], []>} : vector<128x864xbf16>, vector<864x1xbf16>, vector<128x1xf32> -> vector<128x1xf32>
    %c0_3 = arith.constant 0 : index
    %c0_4 = arith.constant 0 : index
    %3 = vector.load %arg3[%c0_3, %c0_4] : memref<1x1xf32, #tpu.memory_space<vmem>>, vector<1x1xf32>
    %4 = vector.broadcast %3 : vector<1x1xf32> to vector<128x1xf32>
    %5 = arith.mulf %2, %4 : vector<128x1xf32>
    %c0_5 = arith.constant 0 : index
    %c0_6 = arith.constant 0 : index
    %6 = vector.load %arg4[%c0_5, %c0_6] : memref<1x1xf32, #tpu.memory_space<vmem>>, vector<1x1xf32>
    %7 = vector.broadcast %6 : vector<1x1xf32> to vector<128x1xf32>
    %8 = arith.addf %5, %7 : vector<128x1xf32>
    %c0_7 = arith.constant 0 : index
    %c0_8 = arith.constant 0 : index
    %9 = vector.load %arg5[%c0_7, %c0_8] : memref<128x1xf32, #tpu.memory_space<vmem>>, vector<128x1xf32>
    %10 = arith.addf %8, %9 : vector<128x1xf32>
    %c0_9 = arith.constant 0 : index
    %c0_10 = arith.constant 0 : index
    %11 = vector.load %arg6[%c0_9, %c0_10] : memref<128x1xf32, #tpu.memory_space<vmem>>, vector<128x1xf32>
    tpu.vector_store %arg6[%c0_9, %c0_10], %10 {strides = array<i32>} : memref<128x1xf32, #tpu.memory_space<vmem>>, vector<128x1xf32>,
    return
  }
  func.func @transform_0(%arg0: i32) -> (i32, i32) {
    %c0_i32 = arith.constant 0 : i32
    %c0_i32_0 = arith.constant 0 : i32
    return %arg0, %c0_i32 : i32, i32
  }
  func.func @transform_1(%arg0: i32) -> (i32, i32) {
    %c0_i32 = arith.constant 0 : i32
    %c0_i32_0 = arith.constant 0 : i32
    %c0_i32_1 = arith.constant 0 : i32
    return %c0_i32, %c0_i32_0 : i32, i32
  }
  func.func @transform_2(%arg0: i32) -> (i32, i32) {
    %c0_i32 = arith.constant 0 : i32
    %c0_i32_0 = arith.constant 0 : i32
    %c0_i32_1 = arith.constant 0 : i32
    return %c0_i32, %c0_i32_0 : i32, i32
  }
  func.func @transform_3(%arg0: i32) -> (i32, i32) {
    %c0_i32 = arith.constant 0 : i32
    %c0_i32_0 = arith.constant 0 : i32
    %c0_i32_1 = arith.constant 0 : i32
    return %c0_i32, %c0_i32_0 : i32, i32
  }
  func.func @transform_4(%arg0: i32) -> (i32, i32) {
    %c0_i32 = arith.constant 0 : i32
    %c0_i32_0 = arith.constant 0 : i32
    return %arg0, %c0_i32 : i32, i32
  }
  func.func @transform_5(%arg0: i32) -> (i32, i32) {
    %c0_i32 = arith.constant 0 : i32
    %c0_i32_0 = arith.constant 0 : i32
    return %arg0, %c0_i32 : i32, i32
  }
}

module attributes {stable_mosaic.version = 11 : i64} {
  func.func @_softmax_reg_kernel(%arg0: i32, %arg1: memref<4x512xf32, #tpu.memory_space<vmem>>, %arg2: memref<16x4xf32, #tpu.memory_space<vmem>>, %arg3: memref<1x512xf32, #tpu.memory_space<vmem>>) attributes {dimension_semantics = [#tpu.dimension_semantics<parallel>], iteration_bounds = array<i64: 1>, scalar_prefetch = 0 : i64, scratch_operands = 0 : i64, tpu.core_type = #tpu.core_type<tc>, window_params = [{transform_indices = @transform_0, window_bounds = array<i64: 4, 512>}, {pipeline_mode = #tpu.pipeline_mode<synchronous>, transform_indices = @transform_1, window_bounds = array<i64: 16, 4>}, {transform_indices = @transform_2, window_bounds = array<i64: 1, 512>}]} {
    %c0 = arith.constant 0 : index
    %c0_0 = arith.constant 0 : index
    %0 = vector.load %arg1[%c0, %c0_0] : memref<4x512xf32, #tpu.memory_space<vmem>>, vector<4x512xf32>
    %c0_1 = arith.constant 0 : index
    %c0_2 = arith.constant 0 : index
    %1 = vector.load %arg2[%c0_1, %c0_2] : memref<16x4xf32, #tpu.memory_space<vmem>>, vector<16x4xf32>
    %cst = arith.constant dense<0.000000e+00> : vector<16x512xf32>
    %2 = tpu.matmul %1, %0, %cst {dimension_numbers = #tpu.dot_dimension_numbers<[1], [0], [0], [1], [0, 0, 1, 1], [], []>} : vector<16x4xf32>, vector<4x512xf32>, vector<16x512xf32> -> vector<16x512xf32>
    %cst_3 = arith.constant dense<0xFF800000> : vector<512xf32>
    %3 = vector.multi_reduction <maximumf>, %2, %cst_3 [0] : vector<16x512xf32> to vector<512xf32>
    %4 = vector.shape_cast %3 : vector<512xf32> to vector<1x512xf32>
    %5 = vector.broadcast %4 : vector<1x512xf32> to vector<16x512xf32>
    %6 = arith.subf %2, %5 : vector<16x512xf32>
    %7 = math.exp %6 : vector<16x512xf32>
    %cst_4 = arith.constant dense<0.000000e+00> : vector<512xf32>
    %8 = vector.multi_reduction <add>, %7, %cst_4 [0] : vector<16x512xf32> to vector<512xf32>
    %9 = vector.shape_cast %8 : vector<512xf32> to vector<1x512xf32>
    %10 = tpu.iota {dimensions = array<i32: 0>} : vector<16x512xi32>
    %11 = arith.sitofp %10 : vector<16x512xi32> to vector<16x512xf32>
    %12 = arith.mulf %7, %11 : vector<16x512xf32>
    %cst_5 = arith.constant dense<0.000000e+00> : vector<512xf32>
    %13 = vector.multi_reduction <add>, %12, %cst_5 [0] : vector<16x512xf32> to vector<512xf32>
    %14 = vector.shape_cast %13 : vector<512xf32> to vector<1x512xf32>
    %15 = arith.divf %14, %9 : vector<1x512xf32>
    %c0_6 = arith.constant 0 : index
    %c0_7 = arith.constant 0 : index
    %16 = vector.load %arg3[%c0_6, %c0_7] : memref<1x512xf32, #tpu.memory_space<vmem>>, vector<1x512xf32>
    tpu.vector_store %arg3[%c0_6, %c0_7], %15 {strides = array<i32>} : memref<1x512xf32, #tpu.memory_space<vmem>>, vector<1x512xf32>,
    return
  }
  func.func @transform_0(%arg0: i32) -> (i32, i32) {
    %c0_i32 = arith.constant 0 : i32
    %c0_i32_0 = arith.constant 0 : i32
    return %c0_i32, %arg0 : i32, i32
  }
  func.func @transform_1(%arg0: i32) -> (i32, i32) {
    %c0_i32 = arith.constant 0 : i32
    %c0_i32_0 = arith.constant 0 : i32
    %c0_i32_1 = arith.constant 0 : i32
    return %c0_i32, %c0_i32_0 : i32, i32
  }
  func.func @transform_2(%arg0: i32) -> (i32, i32) {
    %c0_i32 = arith.constant 0 : i32
    %c0_i32_0 = arith.constant 0 : i32
    return %c0_i32, %arg0 : i32, i32
  }
}

</mosaic_0001>

<bundles_post_ra>
// kernel: psmnet_forward.98
= control target key start
LH: loop header
LB: loop body
LE: loop exit
PB: predicated region body
PF: predicated region fallthrough
CT: control target
= control target key end

     0   :  { %vm114_vm0 = vcmask 1044480   ;;  %vm115_vm1 = vcmask 1045504   ;;  %vm89_vm2 = vcmask 220160   ;;  %v462_v1 = vmov 65535   ;;  %s632_s1 = inlined_call_operand.vmem [shape: bf16[27,16], index: 1, kind: input, shape index: {}]   ;;  %s633_s0 = inlined_call_operand.vmem [shape: bf16[128,27], index: 0, kind: input, shape index: {}]   ;;  %s634_s2 = inlined_call_operand.vmem [shape: f32[1,16], index: 2, kind: input, shape index: {}]   ;;  %s635_s3 = inlined_call_operand.vmem [shape: f32[1,16], index: 3, kind: input, shape index: {}]   ;;  %s636_s4 = inlined_call_operand.vmem [shape: bf16[128,16], index: 4, kind: output, shape index: {}]  }
   0x1   :  { %v452_v0 = vld [vmem:[%s632_s1] sm:$0xff]   ;;  %v116_v2 = vsel %vm114_vm0, 4294967295, %v462_v1  ;;  %v453_v3 = vld [vmem:[%s632_s1 + $0x8] sm:$0x3f]   ;;  %v458_v10 = vld [vmem:[%s633_s0 + $0x10] sm:$0xff]   ;;  %vm344_vm3 = vcmask 125952  }
   0x2   :  { %427 = vmatprep.subr.bf16.mxu0 %v452_v0  ;;  %447 = vmatprep.subr.bf16.mxu1 %v452_v0  ;;  %v117_v4 = vsel %vm115_vm1, %v116_v2, 0  ;;  %v454_v5 = vld [vmem:[%s633_s0] sm:$0xff]   ;;  %v456_v8 = vld [vmem:[%s633_s0 + $0x8] sm:$0xff]   ;;  %v459_v11 = vld [vmem:[%s633_s0 + $0x30] sm:$0xff]  }
   0x3   :  { %428 = vmatpush3.bf16.msra.mxu0 %v452_v0  ;;  %449 = vmatpush3.bf16.msra.mxu1 %v452_v0  ;;  %v119_v6 = vand.u32 %v453_v3, %v117_v4  ;;  %v455_v7 = vld [vmem:[%s633_s0 + $0x20] sm:$0xff]   ;;  %v457_v9 = vld [vmem:[%s633_s0 + $0x28] sm:$0xff]   ;;  %v460_v12 = vld [vmem:[%s633_s0 + $0x18] sm:$0xff]  }
   0x4   :  { %431 = vmatprep.mubr.msk.bf16.mxu0 %vm89_vm2, %v454_v5  ;;  %439 = vmatprep.mubr.msk.bf16.mxu1 %vm89_vm2, %v455_v7  ;;  %v461_v13 = vld [vmem:[%s633_s0 + $0x38] sm:$0xff]   ;;  %v529_v14 = vld [vmem:[%s634_s2] ss:$0 sm:$0xff] }
   0x5   :  { %429 = vmatprep.subr.bf16.mxu0 %v119_v6  ;;  %448 = vmatprep.subr.bf16.mxu1 %v119_v6  ;;  %v534_v16 = vld [vmem:[%s635_s3] ss:$0 sm:$0xff] }
   0x7   :  { %430 = vmatpush3.bf16.msra.mxu0 %v119_v6  ;;  %450 = vmatpush3.bf16.msra.mxu1 %v119_v6 }
   0xa   :  { %432 = vmatmul.mubr.msk.bf16.vlgmr.msra.gmra.mrb[0].mxu0 %vm89_vm2, %v456_v8  ;;  %440 = vmatmul.mubr.msk.bf16.vlgmr.msra.gmra.mrb[0].mxu1 %vm89_vm2, %v457_v9 }
   0xb   :  { %435 = vmatprep.mubr.msk.bf16.mxu0 %vm89_vm2, %v458_v10  ;;  %443 = vmatprep.mubr.msk.bf16.mxu1 %vm89_vm2, %v459_v11 }
  0x12   :  { %436 = vmatmul.mubr.msk.bf16.gmra.mrb[4].mxu0 %vm89_vm2, %v460_v12  ;;  %444 = vmatmul.mubr.msk.bf16.gmra.mrb[4].mxu1 %vm89_vm2, %v461_v13 }
  0xdd   :  { %v433_v15 = vpop.f32.mrb[0].mxu0  ;;  %v441_v17 = vpop.f32.mrb[0].mxu1 }
  0xde   :  { %v227_v18 = vmul.f32 %v433_v15, %v529_v14  ;;  %v235_v19 = vmul.f32 %v441_v17, %v529_v14  ;;  %v155_v20 = vpop.f32.mrb[1].mxu0  ;;  %v187_v21 = vpop.f32.mrb[1].mxu1 }
  0xdf   :  { %v225_v22 = vmul.f32 %v529_v14, %v155_v20  ;;  %v233_v23 = vmul.f32 %v529_v14, %v187_v21  ;;  %v434_v24 = vpop.f32.mrb[2].mxu0  ;;  %v442_v25 = vpop.f32.mrb[2].mxu1 }
  0xe0   :  { %v250_v26 = vadd.f32 %v534_v16, %v227_v18  ;;  %v258_v27 = vadd.f32 %v534_v16, %v235_v19  ;;  %v228_v28 = vmul.f32 %v434_v24, %v529_v14  ;;  %v236_v29 = vmul.f32 %v442_v25, %v529_v14  ;;  %v158_v30 = vpop.f32.mrb[3].mxu0  ;;  %v190_v31 = vpop.f32.mrb[3].mxu1 }
  0xe1   :  { %v248_v32 = vadd.f32 %v534_v16, %v225_v22  ;;  %v256_v33 = vadd.f32 %v534_v16, %v233_v23  ;;  %v226_v34 = vmul.f32 %v529_v14, %v158_v30  ;;  %v234_v35 = vmul.f32 %v529_v14, %v190_v31 }
  0xe2   :  { %v266_v36 = vmax.f32 %v250_v26, 0.0  ;;  %v274_v37 = vmax.f32 %v258_v27, 0.0  ;;  %v251_v38 = vadd.f32 %v534_v16, %v228_v28  ;;  %v259_v39 = vadd.f32 %v534_v16, %v236_v29 }
  0xe3   :  { %v264_v40 = vmax.f32 %v248_v32, 0.0  ;;  %v272_v41 = vmax.f32 %v256_v33, 0.0  ;;  %v249_v42 = vadd.f32 %v534_v16, %v226_v34  ;;  %v257_v43 = vadd.f32 %v534_v16, %v234_v35 }
  0xe4   :  { %v403_v44 = vpack.c.bf16 %v266_v36, %v266_v36  ;;  %v411_v45 = vpack.c.bf16 %v274_v37, %v274_v37  ;;  %v267_v46 = vmax.f32 %v251_v38, 0.0  ;;  %v275_v47 = vmax.f32 %v259_v39, 0.0 }
  0xe5   :  { %v401_v48 = vpack.c.bf16 %v264_v40, %v264_v40  ;;  %v409_v49 = vpack.c.bf16 %v272_v41, %v272_v41  ;;  %v265_v50 = vmax.f32 %v249_v42, 0.0  ;;  %v273_v51 = vmax.f32 %v257_v43, 0.0  ;;  %v437_v52 = vpop.f32.mrb[4].mxu0  ;;  %v445_v53 = vpop.f32.mrb[4].mxu1 }
  0xe6   :  { %347 = vst.msk [vmem:[%s636_s4 + $0x8] sm:$0xf] %vm344_vm3, %v403_v44  ;;  %355 = vst.msk [vmem:[%s636_s4 + $0x28] sm:$0xf] %vm344_vm3, %v411_v45  ;;  %v404_v54 = vpack.c.bf16 %v267_v46, %v267_v46  ;;  %v412_v55 = vpack.c.bf16 %v275_v47, %v275_v47  ;;  %v231_v56 = vmul.f32 %v437_v52, %v529_v14  ;;  %v171_v58 = vpop.f32.mrb[5].mxu0  ;;  %v203_v59 = vpop.f32.mrb[5].mxu1 }
  0xe7   :  { %v239_v57 = vmul.f32 %v445_v53, %v529_v14  ;;  %345 = vst.msk [vmem:[%s636_s4] sm:$0xf] %vm344_vm3, %v401_v48  ;;  %353 = vst.msk [vmem:[%s636_s4 + $0x20] sm:$0xf] %vm344_vm3, %v409_v49  ;;  %v402_v60 = vpack.c.bf16 %v265_v50, %v265_v50  ;;  %v410_v61 = vpack.c.bf16 %v273_v51, %v273_v51  ;;  %v438_v0 = vpop.f32.mrb[6].mxu0  ;;  %v446_v1 = vpop.f32.mrb[6].mxu1 }
  0xe8   :  { %v229_v62 = vmul.f32 %v529_v14, %v171_v58  ;;  %v237_v63 = vmul.f32 %v529_v14, %v203_v59  ;;  %348 = vst.msk [vmem:[%s636_s4 + $0xc] sm:$0xf] %vm344_vm3, %v404_v54  ;;  %356 = vst.msk [vmem:[%s636_s4 + $0x2c] sm:$0xf] %vm344_vm3, %v412_v55  ;;  %v254_v2 = vadd.f32 %v534_v16, %v231_v56  ;;  %v174_v6 = vpop.f32.mrb[7].mxu0  ;;  %v206_v7 = vpop.f32.mrb[7].mxu1 }
  0xe9   :  { %v262_v3 = vadd.f32 %v534_v16, %v239_v57  ;;  %v232_v4 = vmul.f32 %v438_v0, %v529_v14  ;;  %v240_v5 = vmul.f32 %v446_v1, %v529_v14  ;;  %346 = vst.msk [vmem:[%s636_s4 + $0x4] sm:$0xf] %vm344_vm3, %v402_v60  ;;  %354 = vst.msk [vmem:[%s636_s4 + $0x24] sm:$0xf] %vm344_vm3, %v410_v61 }
  0xea   :  { %v252_v8 = vadd.f32 %v534_v16, %v229_v62  ;;  %v260_v9 = vadd.f32 %v534_v16, %v237_v63  ;;  %v230_v10 = vmul.f32 %v529_v14, %v174_v6  ;;  %v238_v11 = vmul.f32 %v529_v14, %v206_v7 }
  0xeb   :  { %v270_v12 = vmax.f32 %v254_v2, 0.0  ;;  %v278_v13 = vmax.f32 %v262_v3, 0.0  ;;  %v255_v15 = vadd.f32 %v534_v16, %v232_v4  ;;  %v263_v17 = vadd.f32 %v534_v16, %v240_v5 }
  0xec   :  { %v268_v18 = vmax.f32 %v252_v8, 0.0  ;;  %v276_v19 = vmax.f32 %v260_v9, 0.0  ;;  %v253_v20 = vadd.f32 %v534_v16, %v230_v10  ;;  %v261_v21 = vadd.f32 %v534_v16, %v238_v11 }
  0xed   :  { %v407_v22 = vpack.c.bf16 %v270_v12, %v270_v12  ;;  %v415_v23 = vpack.c.bf16 %v278_v13, %v278_v13  ;;  %v271_v24 = vmax.f32 %v255_v15, 0.0  ;;  %v279_v25 = vmax.f32 %v263_v17, 0.0 }
  0xee   :  { %v405_v26 = vpack.c.bf16 %v268_v18, %v268_v18  ;;  %v413_v27 = vpack.c.bf16 %v276_v19, %v276_v19  ;;  %v269_v28 = vmax.f32 %v253_v20, 0.0  ;;  %v277_v14 = vmax.f32 %v261_v21, 0.0 }
  0xef   :  { %351 = vst.msk [vmem:[%s636_s4 + $0x18] sm:$0xf] %vm344_vm3, %v407_v22  ;;  %359 = vst.msk [vmem:[%s636_s4 + $0x38] sm:$0xf] %vm344_vm3, %v415_v23  ;;  %v408_v29 = vpack.c.bf16 %v271_v24, %v271_v24  ;;  %v416_v16 = vpack.c.bf16 %v279_v25, %v279_v25 }
  0xf0   :  { %349 = vst.msk [vmem:[%s636_s4 + $0x10] sm:$0xf] %vm344_vm3, %v405_v26  ;;  %357 = vst.msk [vmem:[%s636_s4 + $0x30] sm:$0xf] %vm344_vm3, %v413_v27  ;;  %v406_v30 = vpack.c.bf16 %v269_v28, %v269_v28  ;;  %v414_v31 = vpack.c.bf16 %v277_v14, %v277_v14 }
  0xf1   :  { %352 = vst.msk [vmem:[%s636_s4 + $0x1c] sm:$0xf] %vm344_vm3, %v408_v29  ;;  %360 = vst.msk [vmem:[%s636_s4 + $0x3c] sm:$0xf] %vm344_vm3, %v416_v16 }
  0xf2   :  { %350 = vst.msk [vmem:[%s636_s4 + $0x14] sm:$0xf] %vm344_vm3, %v406_v30  ;;  %358 = vst.msk [vmem:[%s636_s4 + $0x34] sm:$0xf] %vm344_vm3, %v414_v31 }

// kernel: psmnet_forward.99
= control target key start
LH: loop header
LB: loop body
LE: loop exit
PB: predicated region body
PF: predicated region fallthrough
CT: control target
= control target key end

     0   :  { %v278_v0 = vmov 0   ;;  %vm112_vm0 = vcmask 130048   ;;  %vm210_vm1 = vcmask 257024   ;;  %s361_s1 = inlined_call_operand.vmem [shape: bf16[144,32], index: 1, kind: input, shape index: {}]   ;;  %s362_s0 = inlined_call_operand.vmem [shape: bf16[32,144], index: 0, kind: input, shape index: {}]   ;;  %s363_s2 = inlined_call_operand.vmem [shape: f32[1,32], index: 2, kind: input, shape index: {}]   ;;  %s364_s3 = inlined_call_operand.vmem [shape: f32[1,32], index: 3, kind: input, shape index: {}]   ;;  %s365_s4 = inlined_call_operand.vmem [shape: bf16[32,32], index: 4, kind: output, shape index: {}]  }
   0x1   :  { %119 = vmatprep.subr.bf16.mxu0 %v278_v0  ;;  %244 = vmatprep.subr.bf16.mxu1 %v278_v0  ;;  %v263_v1 = vld [vmem:[%s361_s1] sm:$0xff]   ;;  %v264_v2 = vld [vmem:[%s361_s1 + $0x8] sm:$0xff]   ;;  %v265_v3 = vld [vmem:[%s361_s1 + $0x10] sm:$0xff]  }
   0x2   :  { %120 = vmatpush1.bf16.msra.mxu0 %v263_v1  ;;  %253 = vmatpush1.bf16.msra.mxu1 %v263_v1  ;;  %v266_v4 = vld [vmem:[%s361_s1 + $0x18] sm:$0xff]   ;;  %v274_v5 = vld [vmem:[%s362_s0 + $0x4] ss:$8 sps:$4 sm:$0xff]   ;;  %v269_v9 = vld [vmem:[%s361_s1 + $0x30] sm:$0xff]  }
   0x3   :  { %121 = vmatprep.subr.bf16.mxu0 %v278_v0  ;;  %245 = vmatprep.subr.bf16.mxu1 %v278_v0  ;;  %v277_v6 = vld [vmem:[%s362_s0 + $0x14] ss:$8 sps:$4 sm:$0xff]   ;;  %v267_v7 = vld [vmem:[%s361_s1 + $0x20] sm:$0xff]   ;;  %v268_v8 = vld [vmem:[%s361_s1 + $0x28] sm:$0xff]  }
   0x4   :  { %232 = vmatprep.mubr.msk.bf16.mxu0 %vm112_vm0, %v274_v5  ;;  %233 = vmatprep.mubr.msk.bf16.mxu1 %vm112_vm0, %v277_v6  ;;  %v270_v10 = vld [vmem:[%s361_s1 + $0x38] sm:$0xff]   ;;  %v271_v11 = vld [vmem:[%s361_s1 + $0x40] sm:$0xff]  }
   0x5   :  { %v272_v12 = vld [vmem:[%s362_s0] ss:$8 sps:$4 sm:$0xff]   ;;  %v275_v13 = vld [vmem:[%s362_s0 + $0x10] ss:$8 sps:$4 sm:$0xff]  }
   0x6   :  { %122 = vmatpush1.bf16.msra.mxu0 %v264_v2  ;;  %254 = vmatpush1.bf16.msra.mxu1 %v264_v2  ;;  %v234_v14 = vld [vmem:[%s363_s2] ss:$0 sm:$0xff] }
   0x7   :  { %123 = vmatprep.subr.bf16.mxu0 %v278_v0  ;;  %246 = vmatprep.subr.bf16.mxu1 %v278_v0  ;;  %v235_v16 = vld [vmem:[%s364_s3] ss:$0 sm:$0xff] }
   0xa   :  { %124 = vmatpush1.bf16.msra.mxu0 %v265_v3  ;;  %255 = vmatpush1.bf16.msra.mxu1 %v265_v3 }
   0xb   :  { %125 = vmatprep.subr.bf16.mxu0 %v278_v0  ;;  %247 = vmatprep.subr.bf16.mxu1 %v278_v0 }
   0xe   :  { %126 = vmatpush1.bf16.msra.mxu0 %v266_v4  ;;  %256 = vmatpush1.bf16.msra.mxu1 %v266_v4 }
   0xf   :  { %127 = vmatprep.subr.bf16.mxu0 %v278_v0  ;;  %248 = vmatprep.subr.bf16.mxu1 %v278_v0 }
  0x12   :  { %128 = vmatpush1.bf16.msra.mxu0 %v267_v7  ;;  %257 = vmatpush1.bf16.msra.mxu1 %v267_v7 }
  0x13   :  { %129 = vmatprep.subr.bf16.mxu0 %v278_v0  ;;  %249 = vmatprep.subr.bf16.mxu1 %v278_v0 }
  0x16   :  { %130 = vmatpush1.bf16.msra.mxu0 %v268_v8  ;;  %258 = vmatpush1.bf16.msra.mxu1 %v268_v8 }
  0x17   :  { %131 = vmatprep.subr.bf16.mxu0 %v278_v0  ;;  %250 = vmatprep.subr.bf16.mxu1 %v278_v0 }
  0x1a   :  { %132 = vmatpush1.bf16.msra.mxu0 %v269_v9  ;;  %259 = vmatpush1.bf16.msra.mxu1 %v269_v9 }
  0x1b   :  { %133 = vmatprep.subr.bf16.mxu0 %v278_v0  ;;  %251 = vmatprep.subr.bf16.mxu1 %v278_v0 }
  0x1e   :  { %134 = vmatpush1.bf16.msra.mxu0 %v270_v10  ;;  %260 = vmatpush1.bf16.msra.mxu1 %v270_v10 }
  0x1f   :  { %135 = vmatprep.subr.bf16.mxu0 %v278_v0  ;;  %252 = vmatprep.subr.bf16.mxu1 %v278_v0 }
  0x22   :  { %136 = vmatpush1.bf16.msra.mxu0 %v271_v11  ;;  %261 = vmatpush1.bf16.msra.mxu1 %v271_v11 }
  0x25   :  { %152 = vmatmul.mubr.bf16.vlgmr.msra.gmra.mrb[0].mxu0 %v272_v12  ;;  %160 = vmatmul.mubr.bf16.vlgmr.msra.gmra.mrb[0].mxu1 %v275_v13 }
  0xf8   :  { %v153_v15 = vpop.f32.mrb[0].mxu0  ;;  %v161_v17 = vpop.f32.mrb[0].mxu1 }
  0xf9   :  { %v175_v18 = vmul.f32 %v234_v14, %v153_v15  ;;  %v177_v19 = vmul.f32 %v234_v14, %v161_v17  ;;  %v155_v20 = vpop.f32.mrb[1].mxu0  ;;  %v163_v21 = vpop.f32.mrb[1].mxu1 }
  0xfa   :  { %v156_v22 = vpop.f32.mrb[2].mxu0  ;;  %v164_v23 = vpop.f32.mrb[2].mxu1 }
  0xfb   :  { %v186_v24 = vadd.f32 %v235_v16, %v175_v18  ;;  %v188_v25 = vadd.f32 %v235_v16, %v177_v19  ;;  %v176_v26 = vmul.f32 %v234_v14, %v156_v22  ;;  %v178_v27 = vmul.f32 %v234_v14, %v164_v23  ;;  %v158_v28 = vpop.f32.mrb[3].mxu0  ;;  %v166_v29 = vpop.f32.mrb[3].mxu1 }
  0xfd   :  { %v190_v30 = vmax.f32 %v186_v24, 0.0  ;;  %v192_v31 = vmax.f32 %v188_v25, 0.0  ;;  %v187_v32 = vadd.f32 %v235_v16, %v176_v26  ;;  %v189_v33 = vadd.f32 %v235_v16, %v178_v27 }
  0xff   :  { %v240_v34 = vpack.c.bf16 %v190_v30, %v190_v30  ;;  %v242_v35 = vpack.c.bf16 %v192_v31, %v192_v31  ;;  %v191_v36 = vmax.f32 %v187_v32, 0.0  ;;  %v193_v37 = vmax.f32 %v189_v33, 0.0 }
 0x101   :  { %211 = vst.msk [vmem:[%s365_s4] sm:$0xf] %vm210_vm1, %v240_v34  ;;  %213 = vst.msk [vmem:[%s365_s4 + $0x8] sm:$0xf] %vm210_vm1, %v242_v35  ;;  %v241_v38 = vpack.c.bf16 %v191_v36, %v191_v36  ;;  %v243_v39 = vpack.c.bf16 %v193_v37, %v193_v37 }
 0x103   :  { %212 = vst.msk [vmem:[%s365_s4 + $0x4] sm:$0xf] %vm210_vm1, %v241_v38  ;;  %214 = vst.msk [vmem:[%s365_s4 + $0xc] sm:$0xf] %vm210_vm1, %v243_v39 }

// kernel: psmnet_forward.100
= control target key start
LH: loop header
LB: loop body
LE: loop exit
PB: predicated region body
PF: predicated region fallthrough
CT: control target
= control target key end

     0   :  { %vm200_vm0 = vcmask 261120   ;;  %vm343_vm1 = vcmask 257024   ;;  %s573_s1 = inlined_call_operand.vmem [shape: bf16[288,32], index: 1, kind: input, shape index: {}]   ;;  %s574_s0 = inlined_call_operand.vmem [shape: bf16[32,288], index: 0, kind: input, shape index: {}]   ;;  %s575_s2 = inlined_call_operand.vmem [shape: f32[1,32], index: 2, kind: input, shape index: {}]   ;;  %s576_s3 = inlined_call_operand.vmem [shape: f32[1,32], index: 3, kind: input, shape index: {}]   ;;  %s577_s4 = inlined_call_operand.vmem [shape: bf16[32,32], index: 4, kind: output, shape index: {}]  }
   0x1   :  { %v428_v0 = vld [vmem:[%s573_s1 + $0x40] sm:$0xff]   ;;  %v430_v2 = vld [vmem:[%s573_s1 + $0x48] sm:$0xff]   ;;  %v432_v4 = vld [vmem:[%s573_s1 + $0x50] sm:$0xff]  }
   0x2   :  { %v429_v1 = vld [vmem:[%s573_s1] sm:$0xff]   ;;  %388 = vmatprep.subr.bf16.mxu0 %v428_v0  ;;  %v431_v3 = vld [vmem:[%s573_s1 + $0x8] sm:$0xff]   ;;  %v433_v5 = vld [vmem:[%s573_s1 + $0x10] sm:$0xff]  }
   0x3   :  { %389 = vmatpush3.bf16.msra.mxu0 %v429_v1  ;;  %v434_v6 = vld [vmem:[%s573_s1 + $0x58] sm:$0xff]   ;;  %v436_v8 = vld [vmem:[%s573_s1 + $0x60] sm:$0xff]   ;;  %v438_v11 = vld [vmem:[%s573_s1 + $0x68] sm:$0xff]  }
   0x4   :  { %390 = vmatprep.subr.bf16.mxu0 %v430_v2  ;;  %v435_v7 = vld [vmem:[%s573_s1 + $0x18] sm:$0xff]   ;;  %v442_v9 = vld [vmem:[%s573_s1 + $0x80] sm:$0xff]   ;;  %v439_v12 = vld [vmem:[%s573_s1 + $0x28] sm:$0xff]  }
   0x5   :  { %v437_v10 = vld [vmem:[%s573_s1 + $0x20] sm:$0xff]   ;;  %420 = vmatprep.subr.bf16.mxu1 %v442_v9  ;;  %v445_v13 = vld [vmem:[%s573_s1 + $0x88] sm:$0xff]   ;;  %v440_v14 = vld [vmem:[%s573_s1 + $0x70] sm:$0xff]  }
   0x6   :  { %421 = vmatpush3.bf16.msra.mxu1 %v442_v9  ;;  %v448_v15 = vld [vmem:[%s574_s0 + $0x4] ss:$12 sps:$4 sm:$0xff]   ;;  %v449_v16 = vld [vmem:[%s574_s0 + $0x8] ss:$12 sps:$4 sm:$0xff]   ;;  %v450_v17 = vld [vmem:[%s574_s0 + $0x20] ss:$12 sps:$4 sm:$0xff]  }
   0x7   :  { %391 = vmatpush3.bf16.msra.mxu0 %v431_v3  ;;  %422 = vmatprep.subr.bf16.mxu1 %v445_v13  ;;  %v441_v18 = vld [vmem:[%s573_s1 + $0x30] sm:$0xff]   ;;  %v443_v19 = vld [vmem:[%s573_s1 + $0x78] sm:$0xff]   ;;  %v446_v21 = vld [vmem:[%s574_s0] ss:$12 sps:$4 sm:$0xff]  }
   0x8   :  { %392 = vmatprep.subr.bf16.mxu0 %v432_v4  ;;  %239 = vmatprep.mubr.bf16.mxu0 %v448_v15  ;;  %v444_v20 = vld [vmem:[%s573_s1 + $0x38] sm:$0xff]   ;;  %v378_v33 = vld [vmem:[%s575_s2] ss:$0 sm:$0xff] }
   0x9   :  { %424 = vmatprep.mubr.msk.bf16.mxu1 %vm200_vm0, %v449_v16  ;;  %v451_v22 = vld [vmem:[%s574_s0 + $0x1c] ss:$12 sps:$4 sm:$0xff]   ;;  %v453_v23 = vld [vmem:[%s574_s0 + $0x18] ss:$12 sps:$4 sm:$0xff]   ;;  %v379_v36 = vld [vmem:[%s576_s3] ss:$0 sm:$0xff] }
   0xa   :  { %423 = vmatpush3.bf16.msra.mxu1 %v445_v13 }
   0xb   :  { %393 = vmatpush3.bf16.msra.mxu0 %v433_v5 }
   0xc   :  { %394 = vmatprep.subr.bf16.mxu0 %v434_v6 }
   0xd   :  { %425 = vmatmul.mubr.msk.bf16.vlgmr.msra.gmra.mrb[0].mxu1 %vm200_vm0, %v450_v17 }
   0xf   :  { %395 = vmatpush3.bf16.msra.mxu0 %v435_v7 }
  0x10   :  { %396 = vmatprep.subr.bf16.mxu0 %v436_v8 }
  0x13   :  { %397 = vmatpush3.bf16.msra.mxu0 %v437_v10 }
  0x14   :  { %398 = vmatprep.subr.bf16.mxu0 %v438_v11 }
  0x17   :  { %399 = vmatpush3.bf16.msra.mxu0 %v439_v12 }
  0x18   :  { %400 = vmatprep.subr.bf16.mxu0 %v440_v14 }
  0x1b   :  { %401 = vmatpush3.bf16.msra.mxu0 %v441_v18 }
  0x1c   :  { %402 = vmatprep.subr.bf16.mxu0 %v443_v19 }
  0x1f   :  { %403 = vmatpush3.bf16.msra.mxu0 %v444_v20 }
  0x22   :  { %240 = vmatmul.mubr.bf16.vlgmr.msra.gmra.mrb[0].mxu0 %v446_v21 }
  0x23   :  { %247 = vmatprep.mubr.bf16.mxu0 %v451_v22 }
  0x2a   :  { %248 = vmatmul.mubr.bf16.gmra.mrb[4].mxu0 %v453_v23 }
  0xe0   :  { %v426_v24 = vpop.f32.mrb[0].mxu1 }
  0xe1   :  { %v290_v25 = vpop.f32.mrb[1].mxu1 }
  0xe2   :  { %v427_v26 = vpop.f32.mrb[2].mxu1 }
  0xe3   :  { %v293_v27 = vpop.f32.mrb[3].mxu1 }
  0xf5   :  { %v404_v28 = vpop.f32.mrb[0].mxu0 }
  0xf6   :  { %v405_v29 = vpop.f32.mrb[1].mxu0 }
  0xf7   :  { %v406_v30 = vadd.f32 %v405_v29, %v404_v28  ;;  %v407_v31 = vpop.f32.mrb[2].mxu0 }
  0xf8   :  { %v408_v32 = vpop.f32.mrb[3].mxu0 }
  0xf9   :  { %v409_v34 = vadd.f32 %v408_v32, %v407_v31  ;;  %v291_v35 = vadd.f32 %v406_v30, %v290_v25 }
  0xfb   :  { %v312_v37 = vmul.f32 %v378_v33, %v291_v35  ;;  %v294_v38 = vadd.f32 %v409_v34, %v293_v27 }
  0xfd   :  { %v323_v39 = vadd.f32 %v379_v36, %v312_v37  ;;  %v313_v40 = vmul.f32 %v378_v33, %v294_v38  ;;  %v410_v41 = vpop.f32.mrb[4].mxu0 }
  0xfe   :  { %v411_v42 = vpop.f32.mrb[5].mxu0 }
  0xff   :  { %v384_v43 = vpack.c.bf16 %v323_v39, %v323_v39  ;;  %v324_v44 = vadd.f32 %v379_v36, %v313_v40  ;;  %v412_v45 = vadd.f32 %v411_v42, %v410_v41  ;;  %v413_v46 = vpop.f32.mrb[6].mxu0 }
 0x100   :  { %v414_v47 = vpop.f32.mrb[7].mxu0 }
 0x101   :  { %344 = vst.msk [vmem:[%s577_s4] sm:$0xf] %vm343_vm1, %v384_v43  ;;  %v385_v48 = vpack.c.bf16 %v324_v44, %v324_v44  ;;  %v299_v49 = vadd.f32 %v426_v24, %v412_v45  ;;  %v415_v50 = vadd.f32 %v414_v47, %v413_v46 }
 0x103   :  { %345 = vst.msk [vmem:[%s577_s4 + $0x4] sm:$0xf] %vm343_vm1, %v385_v48  ;;  %v314_v51 = vmul.f32 %v378_v33, %v299_v49  ;;  %v302_v52 = vadd.f32 %v427_v26, %v415_v50 }
 0x105   :  { %v325_v53 = vadd.f32 %v379_v36, %v314_v51  ;;  %v315_v54 = vmul.f32 %v378_v33, %v302_v52 }
 0x107   :  { %v386_v55 = vpack.c.bf16 %v325_v53, %v325_v53  ;;  %v326_v56 = vadd.f32 %v379_v36, %v315_v54 }
 0x109   :  { %346 = vst.msk [vmem:[%s577_s4 + $0x8] sm:$0xf] %vm343_vm1, %v386_v55  ;;  %v387_v57 = vpack.c.bf16 %v326_v56, %v326_v56 }
 0x10b   :  { %347 = vst.msk [vmem:[%s577_s4 + $0xc] sm:$0xf] %vm343_vm1, %v387_v57 }

// kernel: psmnet_forward.104
= control target key start
LH: loop header
LB: loop body
LE: loop exit
PB: predicated region body
PF: predicated region fallthrough
CT: control target
= control target key end

     0   :  { %vm1546_vm0 = vcmask 523264   ;;  %vm2376_vm1 = vcmask 257024   ;;  %s4271_s1 = inlined_call_operand.vmem [shape: bf16[1728,32], index: 1, kind: input, shape index: {}]   ;;  %s4272_s0 = inlined_call_operand.vmem [shape: bf16[128,1728], index: 0, kind: input, shape index: {}]   ;;  %s4273_s2 = inlined_call_operand.vmem [shape: f32[1,32], index: 2, kind: input, shape index: {}]   ;;  %s4274_s3 = inlined_call_operand.vmem [shape: f32[1,32], index: 3, kind: input, shape index: {}]   ;;  %s4275_s4 = inlined_call_operand.vmem [shape: bf16[128,32], index: 4, kind: output, shape index: {}]  }
   0x1   :  { %v3060_v0 = vld [vmem:[%s4271_s1 + $0x40] sm:$0xff]   ;;  %v3062_v2 = vld [vmem:[%s4271_s1 + $0x48] sm:$0xff]   ;;  %v3064_v4 = vld [vmem:[%s4271_s1 + $0x50] sm:$0xff]  }
   0x2   :  { %v3061_v1 = vld [vmem:[%s4271_s1] sm:$0xff]   ;;  %3043 = vmatprep.subr.bf16.mxu1 %v3060_v0  ;;  %2659 = vmatprep.subr.bf16.mxu0 %v3060_v0  ;;  %v3063_v3 = vld [vmem:[%s4271_s1 + $0x8] sm:$0xff]   ;;  %v3065_v5 = vld [vmem:[%s4271_s1 + $0x10] sm:$0xff]  }
   0x3   :  { %3051 = vmatpush3.bf16.msra.mxu1 %v3061_v1  ;;  %2660 = vmatpush3.bf16.msra.mxu0 %v3061_v1  ;;  %v3066_v6 = vld [vmem:[%s4271_s1 + $0x58] sm:$0xff]   ;;  %v3068_v8 = vld [vmem:[%s4271_s1 + $0x60] sm:$0xff]   ;;  %v3070_v10 = vld [vmem:[%s4271_s1 + $0x68] sm:$0xff]  }
   0x4   :  { %3044 = vmatprep.subr.bf16.mxu1 %v3062_v2  ;;  %2661 = vmatprep.subr.bf16.mxu0 %v3062_v2  ;;  %v3067_v7 = vld [vmem:[%s4271_s1 + $0x18] sm:$0xff]   ;;  %v3069_v9 = vld [vmem:[%s4271_s1 + $0x20] sm:$0xff]   ;;  %v3071_v12 = vld [vmem:[%s4271_s1 + $0x28] sm:$0xff]  }
   0x5   :  { %v3078_v11 = vld [vmem:[%s4272_s0 + $0x1c4] ss:$56 sps:$4 sm:$0xff]   ;;  %v3072_v14 = vld [vmem:[%s4271_s1 + $0x70] sm:$0xff]   ;;  %v3076_v19 = vld [vmem:[%s4272_s0 + $0x1c0] ss:$56 sps:$4 sm:$0xff]  }
   0x6   :  { %v3082_v13 = vld [vmem:[%s4272_s0 + $0x4] ss:$56 sps:$4 sm:$0xff]   ;;  %1635 = vmatprep.mubr.bf16.mxu1 %v3078_v11  ;;  %v3073_v15 = vld [vmem:[%s4271_s1 + $0x30] sm:$0xff]   ;;  %v3080_v20 = vld [vmem:[%s4272_s0] ss:$56 sps:$4 sm:$0xff]  }
   0x7   :  { %3052 = vmatpush3.bf16.msra.mxu1 %v3063_v3  ;;  %2662 = vmatpush3.bf16.msra.mxu0 %v3063_v3  ;;  %v3074_v16 = vld [vmem:[%s4271_s1 + $0x78] sm:$0xff]   ;;  %v3079_v18 = vld [vmem:[%s4271_s1 + $0xc0] sm:$0xff]   ;;  %v3086_v24 = vld [vmem:[%s4271_s1 + $0xc8] sm:$0xff]  }
   0x8   :  { %3045 = vmatprep.subr.bf16.mxu1 %v3064_v4  ;;  %2663 = vmatprep.subr.bf16.mxu0 %v3064_v4  ;;  %v3075_v17 = vld [vmem:[%s4271_s1 + $0x38] sm:$0xff]   ;;  %v3084_v21 = vld [vmem:[%s4271_s1 + $0x140] sm:$0xff]   ;;  %v3088_v25 = vld [vmem:[%s4271_s1 + $0x148] sm:$0xff]  }
   0x9   :  { %1603 = vmatprep.mubr.bf16.mxu0 %v3082_v13  ;;  %v3083_v22 = vld [vmem:[%s4271_s1 + $0x80] sm:$0xff]   ;;  %v3089_v26 = vld [vmem:[%s4272_s0 + $0x234] ss:$56 sps:$4 sm:$0xff]   ;;  %v3092_v31 = vld [vmem:[%s4272_s0 + $0x230] ss:$56 sps:$4 sm:$0xff]  }
   0xa   :  { %v3085_v23 = vld [vmem:[%s4271_s1 + $0x100] sm:$0xff]   ;;  %v3087_v27 = vld [vmem:[%s4271_s1 + $0x88] sm:$0xff]   ;;  %v3093_v30 = vld [vmem:[%s4271_s1 + $0xd0] sm:$0xff]  }
   0xb   :  { %3053 = vmatpush3.bf16.msra.mxu1 %v3065_v5  ;;  %2664 = vmatpush3.bf16.msra.mxu0 %v3065_v5  ;;  %v3094_v28 = vld [vmem:[%s4272_s0 + $0x74] ss:$56 sps:$4 sm:$0xff]   ;;  %v3097_v34 = vld [vmem:[%s4272_s0 + $0x70] ss:$56 sps:$4 sm:$0xff]   ;;  %v3100_v36 = vld [vmem:[%s4271_s1 + $0xd8] sm:$0xff]  }
   0xc   :  { %3046 = vmatprep.subr.bf16.mxu1 %v3066_v6  ;;  %2665 = vmatprep.subr.bf16.mxu0 %v3066_v6  ;;  %v3091_v29 = vld [vmem:[%s4271_s1 + $0x108] sm:$0xff]   ;;  %v3098_v32 = vld [vmem:[%s4271_s1 + $0x150] sm:$0xff]   ;;  %v3102_v37 = vld [vmem:[%s4271_s1 + $0x158] sm:$0xff]  }
   0xd   :  { %v3096_v33 = vld [vmem:[%s4271_s1 + $0x90] sm:$0xff]   ;;  %v3101_v38 = vld [vmem:[%s4271_s1 + $0x98] sm:$0xff]   ;;  %v3107_v42 = vld [vmem:[%s4271_s1 + $0xe0] sm:$0xff]  }
   0xe   :  { %v3099_v35 = vld [vmem:[%s4271_s1 + $0x110] sm:$0xff]   ;;  %v3103_v39 = vld [vmem:[%s4272_s0 + $0x2a4] ss:$56 sps:$4 sm:$0xff]   ;;  %v3106_v43 = vld [vmem:[%s4272_s0 + $0x2a0] ss:$56 sps:$4 sm:$0xff]  }
   0xf   :  { %3054 = vmatpush3.bf16.msra.mxu1 %v3067_v7  ;;  %2666 = vmatpush3.bf16.msra.mxu0 %v3067_v7  ;;  %v3108_v40 = vld [vmem:[%s4272_s0 + $0xe4] ss:$56 sps:$4 sm:$0xff]   ;;  %v3111_v46 = vld [vmem:[%s4272_s0 + $0xe0] ss:$56 sps:$4 sm:$0xff]   ;;  %v3114_v48 = vld [vmem:[%s4271_s1 + $0xe8] sm:$0xff]  }
  0x10   :  { %3047 = vmatprep.subr.bf16.mxu1 %v3068_v8  ;;  %2667 = vmatprep.subr.bf16.mxu0 %v3068_v8  ;;  %v3105_v41 = vld [vmem:[%s4271_s1 + $0x118] sm:$0xff]   ;;  %v3112_v44 = vld [vmem:[%s4271_s1 + $0x160] sm:$0xff]   ;;  %v3116_v49 = vld [vmem:[%s4271_s1 + $0x168] sm:$0xff]  }
  0x11   :  { %v3110_v45 = vld [vmem:[%s4271_s1 + $0xa0] sm:$0xff]   ;;  %v3115_v50 = vld [vmem:[%s4271_s1 + $0xa8] sm:$0xff]   ;;  %v3121_v55 = vld [vmem:[%s4271_s1 + $0xf0] sm:$0xff]  }
  0x12   :  { %v3113_v47 = vld [vmem:[%s4271_s1 + $0x120] sm:$0xff]   ;;  %v3117_v51 = vld [vmem:[%s4272_s0 + $0x314] ss:$56 sps:$4 sm:$0xff]   ;;  %v3120_v54 = vld [vmem:[%s4272_s0 + $0x310] ss:$56 sps:$4 sm:$0xff]  }
  0x13   :  { %3055 = vmatpush3.bf16.msra.mxu1 %v3069_v9  ;;  %2668 = vmatpush3.bf16.msra.mxu0 %v3069_v9  ;;  %v3119_v52 = vld [vmem:[%s4271_s1 + $0x128] sm:$0xff]   ;;  %v3124_v56 = vld [vmem:[%s4271_s1 + $0xb0] sm:$0xff]   ;;  %v3128_v60 = vld [vmem:[%s4271_s1 + $0xf8] sm:$0xff]  }
  0x14   :  { %3048 = vmatprep.subr.bf16.mxu1 %v3070_v10  ;;  %2669 = vmatprep.subr.bf16.mxu0 %v3070_v10  ;;  %v3122_v53 = vld [vmem:[%s4272_s0 + $0x154] ss:$56 sps:$4 sm:$0xff]   ;;  %v3125_v58 = vld [vmem:[%s4272_s0 + $0x150] ss:$56 sps:$4 sm:$0xff]   ;;  %v3130_v61 = vld [vmem:[%s4271_s1 + $0x178] sm:$0xff]  }
  0x15   :  { %v3126_v57 = vld [vmem:[%s4271_s1 + $0x170] sm:$0xff]   ;;  %v3129_v62 = vld [vmem:[%s4271_s1 + $0xb8] sm:$0xff]   ;;  %v3133_v63 = vld [vmem:[%s4272_s0 + $0xc] ss:$56 sps:$4 sm:$0xff]  }
  0x16   :  { %v3127_v59 = vld [vmem:[%s4271_s1 + $0x130] sm:$0xff]   ;;  %v3134_v0 = vld [vmem:[%s4271_s1 + $0x138] sm:$0xff]   ;;  %v3131_v1 = vld [vmem:[%s4272_s0 + $0x8] ss:$56 sps:$4 sm:$0xff]  }
  0x17   :  { %3056 = vmatpush3.bf16.msra.mxu1 %v3071_v12  ;;  %2670 = vmatpush3.bf16.msra.mxu0 %v3071_v12  ;;  %v3135_v2 = vld [vmem:[%s4271_s1 + $0x1c0] sm:$0xff]   ;;  %v3136_v3 = vld [vmem:[%s4272_s0 + $0x10] ss:$56 sps:$4 sm:$0xff]   ;;  %v3138_v4 = vld [vmem:[%s4272_s0 + $0x14] ss:$56 sps:$4 sm:$0xff]  }
  0x18   :  { %3049 = vmatprep.subr.bf16.mxu1 %v3072_v14  ;;  %2671 = vmatprep.subr.bf16.mxu0 %v3072_v14  ;;  %v3139_v5 = vld [vmem:[%s4271_s1 + $0x180] sm:$0xff]   ;;  %v3142_v8 = vld [vmem:[%s4272_s0 + $0x7c] ss:$56 sps:$4 sm:$0xff]   ;;  %v3145_v9 = vld [vmem:[%s4271_s1 + $0x1c8] sm:$0xff]  }
  0x19   :  { %v3140_v6 = vld [vmem:[%s4271_s1 + $0x240] sm:$0xff]   ;;  %v3144_v10 = vld [vmem:[%s4272_s0 + $0x78] ss:$56 sps:$4 sm:$0xff]   ;;  %v3148_v12 = vld [vmem:[%s4271_s1 + $0x188] sm:$0xff]  }
  0x1a   :  { %v3141_v7 = vld [vmem:[%s4271_s1 + $0x200] sm:$0xff]   ;;  %v3150_v14 = vld [vmem:[%s4271_s1 + $0x248] sm:$0xff]  }
  0x1b   :  { %3057 = vmatpush3.bf16.msra.mxu1 %v3073_v15  ;;  %2672 = vmatpush3.bf16.msra.mxu0 %v3073_v15  ;;  %v3146_v11 = vld [vmem:[%s4272_s0 + $0x84] ss:$56 sps:$4 sm:$0xff]   ;;  %v3149_v13 = vld [vmem:[%s4272_s0 + $0x80] ss:$56 sps:$4 sm:$0xff]   ;;  %v3151_v15 = vld [vmem:[%s4271_s1 + $0x208] sm:$0xff]  }
  0x1c   :  { %3050 = vmatprep.subr.bf16.mxu1 %v3074_v16  ;;  %2673 = vmatprep.subr.bf16.mxu0 %v3074_v16  ;;  %v3152_v16 = vld [vmem:[%s4272_s0 + $0xec] ss:$56 sps:$4 sm:$0xff]  }
  0x1f   :  { %3058 = vmatpush3.bf16.msra.mxu1 %v3075_v17  ;;  %2674 = vmatpush3.bf16.msra.mxu0 %v3075_v17  ;;  %v3155_v17 = vld [vmem:[%s4271_s1 + $0x1d0] sm:$0xff]  }
  0x20   :  { %2723 = vmatprep.subr.bf16.mxu1 %v3079_v18  ;;  %2787 = vmatprep.subr.bf16.mxu0 %v3084_v21  ;;  %v3156_v18 = vld [vmem:[%s4272_s0 + $0xf4] ss:$56 sps:$4 sm:$0xff]   ;;  %v3159_v21 = vld [vmem:[%s4272_s0 + $0xf0] ss:$56 sps:$4 sm:$0xff]  }
  0x22   :  { %1636 = vmatmul.mubr.bf16.vlgmr.msra.gmra.mrb[0].mxu1 %v3076_v19  ;;  %1604 = vmatmul.mubr.bf16.vlgmr.msra.gmra.mrb[0].mxu0 %v3080_v20  ;;  %v3154_v19 = vld [vmem:[%s4272_s0 + $0xe8] ss:$56 sps:$4 sm:$0xff]   ;;  %v3158_v20 = vld [vmem:[%s4271_s1 + $0x190] sm:$0xff]  }
  0x23   :  { %2724 = vmatpush3.bf16.msra.mxu1 %v3083_v22  ;;  %2788 = vmatpush3.bf16.msra.mxu0 %v3085_v23  ;;  %v3160_v22 = vld [vmem:[%s4271_s1 + $0x250] sm:$0xff]  }
  0x24   :  { %2725 = vmatprep.subr.bf16.mxu1 %v3086_v24  ;;  %2789 = vmatprep.subr.bf16.mxu0 %v3088_v25  ;;  %v3161_v23 = vld [vmem:[%s4271_s1 + $0x210] sm:$0xff]   ;;  %v3165_v25 = vld [vmem:[%s4271_s1 + $0x1d8] sm:$0xff]  }
  0x25   :  { %1643 = vmatprep.mubr.bf16.mxu1 %v3089_v26  ;;  %1611 = vmatprep.mubr.bf16.mxu0 %v3094_v28  ;;  %v3162_v24 = vld [vmem:[%s4272_s0 + $0x15c] ss:$56 sps:$4 sm:$0xff]   ;;  %v3164_v28 = vld [vmem:[%s4272_s0 + $0x158] ss:$56 sps:$4 sm:$0xff]  }
  0x26   :  { %v3166_v26 = vld [vmem:[%s4272_s0 + $0x164] ss:$56 sps:$4 sm:$0xff]  }
  0x27   :  { %2726 = vmatpush3.bf16.msra.mxu1 %v3087_v27  ;;  %2790 = vmatpush3.bf16.msra.mxu0 %v3091_v29  ;;  %v3168_v27 = vld [vmem:[%s4271_s1 + $0x198] sm:$0xff]  }
  0x28   :  { %2727 = vmatprep.subr.bf16.mxu1 %v3093_v30  ;;  %2791 = vmatprep.subr.bf16.mxu0 %v3098_v32  ;;  %v3170_v29 = vld [vmem:[%s4271_s1 + $0x258] sm:$0xff]   ;;  %v3172_v32 = vld [vmem:[%s4272_s0 + $0x1cc] ss:$56 sps:$4 sm:$0xff]  }
  0x29   :  { %v3171_v30 = vld [vmem:[%s4271_s1 + $0x218] sm:$0xff]  }
  0x2a   :  { %1644 = vmatmul.mubr.bf16.gmra.mrb[4].mxu1 %v3092_v31  ;;  %1612 = vmatmul.mubr.bf16.gmra.mrb[4].mxu0 %v3097_v34  ;;  %v3169_v31 = vld [vmem:[%s4272_s0 + $0x160] ss:$56 sps:$4 sm:$0xff]   ;;  %v3176_v34 = vld [vmem:[%s4272_s0 + $0x1d4] ss:$56 sps:$4 sm:$0xff]  }
  0x2b   :  { %2728 = vmatpush3.bf16.msra.mxu1 %v3096_v33  ;;  %2792 = vmatpush3.bf16.msra.mxu0 %v3099_v35  ;;  %v3175_v33 = vld [vmem:[%s4271_s1 + $0x1e0] sm:$0xff]  }
  0x2c   :  { %2729 = vmatprep.subr.bf16.mxu1 %v3100_v36  ;;  %2793 = vmatprep.subr.bf16.mxu0 %v3102_v37  ;;  %v3178_v35 = vld [vmem:[%s4271_s1 + $0x1a0] sm:$0xff]  }
  0x2d   :  { %1651 = vmatprep.mubr.bf16.mxu1 %v3103_v39  ;;  %1619 = vmatprep.mubr.bf16.mxu0 %v3108_v40  ;;  %v3180_v36 = vld [vmem:[%s4271_s1 + $0x260] sm:$0xff]   ;;  %v3179_v39 = vld [vmem:[%s4272_s0 + $0x1d0] ss:$56 sps:$4 sm:$0xff]   ;;  %v3182_v40 = vld [vmem:[%s4272_s0 + $0x23c] ss:$56 sps:$4 sm:$0xff]  }
  0x2e   :  { %v3181_v37 = vld [vmem:[%s4271_s1 + $0x220] sm:$0xff]  }
  0x2f   :  { %2730 = vmatpush3.bf16.msra.mxu1 %v3101_v38  ;;  %2794 = vmatpush3.bf16.msra.mxu0 %v3105_v41  ;;  %v3174_v38 = vld [vmem:[%s4272_s0 + $0x1c8] ss:$56 sps:$4 sm:$0xff]  }
  0x30   :  { %2731 = vmatprep.subr.bf16.mxu1 %v3107_v42  ;;  %2795 = vmatprep.subr.bf16.mxu0 %v3112_v44  ;;  %v3185_v41 = vld [vmem:[%s4271_s1 + $0x1e8] sm:$0xff]   ;;  %v3186_v42 = vld [vmem:[%s4272_s0 + $0x244] ss:$56 sps:$4 sm:$0xff]  }
  0x31   :  { %v3190_v44 = vld [vmem:[%s4271_s1 + $0x268] sm:$0xff]  }
  0x32   :  { %1652 = vmatmul.mubr.bf16.gmra.mrb[8].mxu1 %v3106_v43  ;;  %1620 = vmatmul.mubr.bf16.gmra.mrb[8].mxu0 %v3111_v46  ;;  %v3188_v43 = vld [vmem:[%s4271_s1 + $0x1a8] sm:$0xff]   ;;  %v3184_v46 = vld [vmem:[%s4272_s0 + $0x238] ss:$56 sps:$4 sm:$0xff]  }
  0x33   :  { %2732 = vmatpush3.bf16.msra.mxu1 %v3110_v45  ;;  %2796 = vmatpush3.bf16.msra.mxu0 %v3113_v47  ;;  %v3191_v45 = vld [vmem:[%s4271_s1 + $0x228] sm:$0xff]   ;;  %v3189_v47 = vld [vmem:[%s4272_s0 + $0x240] ss:$56 sps:$4 sm:$0xff]  }
  0x34   :  { %2733 = vmatprep.subr.bf16.mxu1 %v3114_v48  ;;  %2797 = vmatprep.subr.bf16.mxu0 %v3116_v49  ;;  %v3195_v48 = vld [vmem:[%s4271_s1 + $0x1f0] sm:$0xff]   ;;  %v3192_v49 = vld [vmem:[%s4272_s0 + $0x2ac] ss:$56 sps:$4 sm:$0xff]  }
  0x35   :  { %1659 = vmatprep.mubr.bf16.mxu1 %v3117_v51  ;;  %1627 = vmatprep.mubr.bf16.mxu0 %v3122_v53  ;;  %v3196_v51 = vld [vmem:[%s4272_s0 + $0x2b4] ss:$56 sps:$4 sm:$0xff]  }
  0x36   :  { %v3201_v53 = vld [vmem:[%s4271_s1 + $0x230] sm:$0xff]  }
  0x37   :  { %2734 = vmatpush3.bf16.msra.mxu1 %v3115_v50  ;;  %2798 = vmatpush3.bf16.msra.mxu0 %v3119_v52  ;;  %v3198_v50 = vld [vmem:[%s4271_s1 + $0x1b0] sm:$0xff]  }
  0x38   :  { %2735 = vmatprep.subr.bf16.mxu1 %v3121_v55  ;;  %2799 = vmatprep.subr.bf16.mxu0 %v3126_v57  ;;  %v3200_v52 = vld [vmem:[%s4271_s1 + $0x270] sm:$0xff]   ;;  %v3194_v55 = vld [vmem:[%s4272_s0 + $0x2a8] ss:$56 sps:$4 sm:$0xff]  }
  0x39   :  { %v3202_v57 = vld [vmem:[%s4272_s0 + $0x31c] ss:$56 sps:$4 sm:$0xff]  }
  0x3a   :  { %1660 = vmatmul.mubr.bf16.gmra.mrb[12].mxu1 %v3120_v54  ;;  %1628 = vmatmul.mubr.bf16.gmra.mrb[12].mxu0 %v3125_v58  ;;  %v3205_v54 = vld [vmem:[%s4271_s1 + $0x1f8] sm:$0xff]  }
  0x3b   :  { %2736 = vmatpush3.bf16.msra.mxu1 %v3124_v56  ;;  %2800 = vmatpush3.bf16.msra.mxu0 %v3127_v59  ;;  %v3199_v56 = vld [vmem:[%s4272_s0 + $0x2b0] ss:$56 sps:$4 sm:$0xff]   ;;  %v3206_v58 = vld [vmem:[%s4272_s0 + $0x324] ss:$56 sps:$4 sm:$0xff]  }
  0x3c   :  { %2737 = vmatprep.subr.bf16.mxu1 %v3128_v60  ;;  %2801 = vmatprep.subr.bf16.mxu0 %v3130_v61  ;;  %v3208_v59 = vld [vmem:[%s4271_s1 + $0x1b8] sm:$0xff]  }
  0x3d   :  { %1700 = vmatprep.mubr.bf16.mxu1 %v3133_v63  ;;  %1797 = vmatprep.mubr.bf16.mxu0 %v3138_v4  ;;  %v3210_v60 = vld [vmem:[%s4271_s1 + $0x278] sm:$0xff]   ;;  %v3336_v63 = vmov 0  }
  0x3e   :  { %v3211_v61 = vld [vmem:[%s4271_s1 + $0x238] sm:$0xff]  }
  0x3f   :  { %2738 = vmatpush3.bf16.msra.mxu1 %v3129_v62  ;;  %2802 = vmatpush3.bf16.msra.mxu0 %v3134_v0  ;;  %v3215_v62 = vld [vmem:[%s4271_s1 + $0x2c0] sm:$0xff]   ;;  %v3204_v0 = vld [vmem:[%s4272_s0 + $0x318] ss:$56 sps:$4 sm:$0xff]  }
  0x40   :  { %2851 = vmatprep.subr.bf16.mxu1 %v3135_v2  ;;  %2915 = vmatprep.subr.bf16.mxu0 %v3140_v6  ;;  %v3214_v2 = vld [vmem:[%s4272_s0 + $0x1c] ss:$56 sps:$4 sm:$0xff]   ;;  %v3212_v4 = vld [vmem:[%s4272_s0 + $0x18] ss:$56 sps:$4 sm:$0xff]   ;;  %v3219_v6 = vld [vmem:[%s4271_s1 + $0x280] sm:$0xff]  }
  0x42   :  { %1701 = vmatmul.mubr.bf16.vlgmr.msra.gmra.mrb[16].mxu1 %v3131_v1  ;;  %1798 = vmatmul.mubr.bf16.vlgmr.msra.gmra.mrb[16].mxu0 %v3136_v3  ;;  %v3209_v1 = vld [vmem:[%s4272_s0 + $0x320] ss:$56 sps:$4 sm:$0xff]   ;;  %v3218_v3 = vld [vmem:[%s4272_s0 + $0x24] ss:$56 sps:$4 sm:$0xff]  }
  0x43   :  { %2852 = vmatpush3.bf16.msra.mxu1 %v3139_v5  ;;  %2916 = vmatpush3.bf16.msra.mxu0 %v3141_v7  ;;  %v3216_v5 = vld [vmem:[%s4272_s0 + $0x20] ss:$56 sps:$4 sm:$0xff]  }
  0x44   :  { %1708 = vmatprep.mubr.bf16.mxu1 %v3142_v8  ;;  %2853 = vmatprep.subr.bf16.mxu1 %v3145_v9  ;;  %v3220_v7 = vld [vmem:[%s4271_s1 + $0x300] sm:$0xff]   ;;  %v3224_v9 = vld [vmem:[%s4271_s1 + $0x2c8] sm:$0xff]  }
  0x45   :  { %1805 = vmatprep.mubr.bf16.mxu0 %v3146_v11  ;;  %2917 = vmatprep.subr.bf16.mxu0 %v3150_v14  ;;  %v3221_v8 = vld [vmem:[%s4272_s0 + $0x8c] ss:$56 sps:$4 sm:$0xff]   ;;  %v3223_v14 = vld [vmem:[%s4272_s0 + $0x88] ss:$56 sps:$4 sm:$0xff]  }
  0x46   :  { %v3227_v11 = vld [vmem:[%s4271_s1 + $0x288] sm:$0xff]  }
  0x47   :  { %2854 = vmatpush3.bf16.msra.mxu1 %v3148_v12  ;;  %2918 = vmatpush3.bf16.msra.mxu0 %v3151_v15  ;;  %v3229_v12 = vld [vmem:[%s4271_s1 + $0x308] sm:$0xff]  }
  0x48   :  { %2855 = vmatprep.subr.bf16.mxu1 %v3155_v17  ;;  %2919 = vmatprep.subr.bf16.mxu0 %v3160_v22  ;;  %v3228_v15 = vld [vmem:[%s4272_s0 + $0x90] ss:$56 sps:$4 sm:$0xff]   ;;  %v3234_v17 = vld [vmem:[%s4272_s0 + $0x104] ss:$56 sps:$4 sm:$0xff]  }
  0x49   :  { %v3232_v22 = vld [vmem:[%s4272_s0 + $0xf8] ss:$56 sps:$4 sm:$0xff]  }
  0x4a   :  { %1709 = vmatmul.mubr.bf16.gmra.mrb[20].mxu1 %v3144_v10  ;;  %1806 = vmatmul.mubr.bf16.gmra.mrb[20].mxu0 %v3149_v13  ;;  %v3225_v10 = vld [vmem:[%s4272_s0 + $0x94] ss:$56 sps:$4 sm:$0xff]  }
  0x4b   :  { %1716 = vmatprep.mubr.bf16.mxu1 %v3152_v16  ;;  %1813 = vmatprep.mubr.bf16.mxu0 %v3156_v18  ;;  %v3233_v13 = vld [vmem:[%s4271_s1 + $0x2d0] sm:$0xff]  }
  0x4c   :  { %2856 = vmatpush3.bf16.msra.mxu1 %v3158_v20  ;;  %2920 = vmatpush3.bf16.msra.mxu0 %v3161_v23  ;;  %v3230_v16 = vld [vmem:[%s4272_s0 + $0xfc] ss:$56 sps:$4 sm:$0xff]   ;;  %v3238_v23 = vld [vmem:[%s4272_s0 + $0x100] ss:$56 sps:$4 sm:$0xff]  }
  0x4d   :  { %2857 = vmatprep.subr.bf16.mxu1 %v3165_v25  ;;  %2921 = vmatprep.subr.bf16.mxu0 %v3170_v29  ;;  %v3236_v18 = vld [vmem:[%s4271_s1 + $0x290] sm:$0xff]   ;;  %v3243_v20 = vld [vmem:[%s4271_s1 + $0x2d8] sm:$0xff]   ;;  %v3252_v25 = vld [vmem:[%s4271_s1 + $0x2e0] sm:$0xff]  }
  0x4e   :  { %v3255_v29 = vld [vmem:[%s4271_s1 + $0x2a0] sm:$0xff]  }
  0x50   :  { %2858 = vmatpush3.bf16.msra.mxu1 %v3168_v27  ;;  %2922 = vmatpush3.bf16.msra.mxu0 %v3171_v30  ;;  %v3244_v27 = vld [vmem:[%s4272_s0 + $0x174] ss:$56 sps:$4 sm:$0xff]  }
  0x51   :  { %2859 = vmatprep.subr.bf16.mxu1 %v3175_v33  ;;  %2923 = vmatprep.subr.bf16.mxu0 %v3180_v36  ;;  %v3262_v30 = vld [vmem:[%s4271_s1 + $0x2e8] sm:$0xff]   ;;  %v3253_v36 = vld [vmem:[%s4272_s0 + $0x1e4] ss:$56 sps:$4 sm:$0xff]  }
  0x52   :  { %1717 = vmatmul.mubr.bf16.gmra.mrb[24].mxu1 %v3154_v19  ;;  %1814 = vmatmul.mubr.bf16.gmra.mrb[24].mxu0 %v3159_v21  ;;  %v3237_v19 = vld [vmem:[%s4271_s1 + $0x310] sm:$0xff]   ;;  %v3239_v21 = vld [vmem:[%s4271_s1 + $0x318] sm:$0xff]  }
  0x53   :  { %1724 = vmatprep.mubr.bf16.mxu1 %v3162_v24  ;;  %1821 = vmatprep.mubr.bf16.mxu0 %v3166_v26  ;;  %v3246_v24 = vld [vmem:[%s4271_s1 + $0x298] sm:$0xff]   ;;  %v3240_v26 = vld [vmem:[%s4272_s0 + $0x16c] ss:$56 sps:$4 sm:$0xff]   ;;  %v3247_v33 = vld [vmem:[%s4272_s0 + $0x170] ss:$56 sps:$4 sm:$0xff]  }
  0x54   :  { %2860 = vmatpush3.bf16.msra.mxu1 %v3178_v35  ;;  %2924 = vmatpush3.bf16.msra.mxu0 %v3181_v37  ;;  %v3249_v35 = vld [vmem:[%s4272_s0 + $0x1dc] ss:$56 sps:$4 sm:$0xff]  }
  0x55   :  { %2861 = vmatprep.subr.bf16.mxu1 %v3185_v41  ;;  %2925 = vmatprep.subr.bf16.mxu0 %v3190_v44  ;;  %v3271_v37 = vld [vmem:[%s4271_s1 + $0x2f0] sm:$0xff]   ;;  %v3259_v44 = vld [vmem:[%s4272_s0 + $0x24c] ss:$56 sps:$4 sm:$0xff]  }
  0x56   :  { %v3251_v41 = vld [vmem:[%s4272_s0 + $0x1d8] ss:$56 sps:$4 sm:$0xff]  }
  0x58   :  { %2862 = vmatpush3.bf16.msra.mxu1 %v3188_v43  ;;  %2926 = vmatpush3.bf16.msra.mxu0 %v3191_v45  ;;  %v3281_v43 = vld [vmem:[%s4271_s1 + $0x2f8] sm:$0xff]  }
  0x59   :  { %2863 = vmatprep.subr.bf16.mxu1 %v3195_v48  ;;  %2927 = vmatprep.subr.bf16.mxu0 %v3200_v52  ;;  %v3284_v45 = vld [vmem:[%s4271_s1 + $0x2b8] sm:$0xff]   ;;  %v3277_v48 = vld [vmem:[%s4271_s1 + $0x348] sm:$0xff]  }
  0x5a   :  { %1725 = vmatmul.mubr.bf16.gmra.mrb[28].mxu1 %v3164_v28  ;;  %1822 = vmatmul.mubr.bf16.gmra.mrb[28].mxu0 %v3169_v31  ;;  %v3248_v28 = vld [vmem:[%s4271_s1 + $0x320] sm:$0xff]   ;;  %v3256_v31 = vld [vmem:[%s4271_s1 + $0x328] sm:$0xff]  }
  0x5b   :  { %1732 = vmatprep.mubr.bf16.mxu1 %v3172_v32  ;;  %1829 = vmatprep.mubr.bf16.mxu0 %v3176_v34  ;;  %v3242_v32 = vld [vmem:[%s4272_s0 + $0x168] ss:$56 sps:$4 sm:$0xff]   ;;  %v3272_v52 = vld [vmem:[%s4272_s0 + $0x2c4] ss:$56 sps:$4 sm:$0xff]  }
  0x5c   :  { %2864 = vmatpush3.bf16.msra.mxu1 %v3198_v50  ;;  %2928 = vmatpush3.bf16.msra.mxu0 %v3201_v53  ;;  %v3265_v34 = vld [vmem:[%s4271_s1 + $0x2a8] sm:$0xff]   ;;  %v3286_v53 = vld [vmem:[%s4271_s1 + $0x350] sm:$0xff]  }
  0x5d   :  { %2865 = vmatprep.subr.bf16.mxu1 %v3205_v54  ;;  %2929 = vmatprep.subr.bf16.mxu0 %v3210_v60  ;;  %v3266_v50 = vld [vmem:[%s4272_s0 + $0x250] ss:$56 sps:$4 sm:$0xff]   ;;  %v3290_v54 = vld [vmem:[%s4271_s1 + $0x358] sm:$0xff]  }
  0x5e   :  { %v3285_v60 = vld [vmem:[%s4272_s0 + $0x330] ss:$56 sps:$4 sm:$0xff]  }
  0x60   :  { %2866 = vmatpush3.bf16.msra.mxu1 %v3208_v59  ;;  %2930 = vmatpush3.bf16.msra.mxu0 %v3211_v61  ;;  %v3280_v59 = vld [vmem:[%s4272_s0 + $0x328] ss:$56 sps:$4 sm:$0xff]   ;;  %v3289_v61 = vld [vmem:[%s4272_s0 + $0x2c] ss:$56 sps:$4 sm:$0xff]  }
  0x61   :  { %2979 = vmatprep.subr.bf16.mxu1 %v3215_v62  ;;  %2153 = vmatprep.subr.bf16.mxu0 %v3336_v63  ;;  %v3293_v62 = vld [vmem:[%s4272_s0 + $0x34] ss:$56 sps:$4 sm:$0xff]  }
  0x62   :  { %1733 = vmatmul.mubr.bf16.gmra.mrb[32].mxu1 %v3174_v38  ;;  %1830 = vmatmul.mubr.bf16.gmra.mrb[32].mxu0 %v3179_v39  ;;  %v3258_v38 = vld [vmem:[%s4271_s1 + $0x330] sm:$0xff]  }
  0x63   :  { %1740 = vmatprep.mubr.bf16.mxu1 %v3182_v40  ;;  %1837 = vmatprep.mubr.bf16.mxu0 %v3186_v42  ;;  %v3274_v39 = vld [vmem:[%s4271_s1 + $0x2b0] sm:$0xff]   ;;  %v3267_v40 = vld [vmem:[%s4271_s1 + $0x338] sm:$0xff]  }
  0x64   :  { %v3257_v42 = vld [vmem:[%s4272_s0 + $0x1e0] ss:$56 sps:$4 sm:$0xff]  }
  0x6a   :  { %1741 = vmatmul.mubr.bf16.gmra.mrb[36].mxu1 %v3184_v46  ;;  %1838 = vmatmul.mubr.bf16.gmra.mrb[36].mxu0 %v3189_v47  ;;  %v3263_v46 = vld [vmem:[%s4272_s0 + $0x254] ss:$56 sps:$4 sm:$0xff]   ;;  %v3275_v47 = vld [vmem:[%s4271_s1 + $0x340] sm:$0xff]  }
  0x6b   :  { %1748 = vmatprep.mubr.bf16.mxu1 %v3192_v49  ;;  %1845 = vmatprep.mubr.bf16.mxu0 %v3196_v51  ;;  %v3261_v49 = vld [vmem:[%s4272_s0 + $0x248] ss:$56 sps:$4 sm:$0xff]   ;;  %v3268_v51 = vld [vmem:[%s4272_s0 + $0x2bc] ss:$56 sps:$4 sm:$0xff]  }
  0x72   :  { %1749 = vmatmul.mubr.bf16.gmra.mrb[40].mxu1 %v3194_v55  ;;  %1846 = vmatmul.mubr.bf16.gmra.mrb[40].mxu0 %v3199_v56  ;;  %v3270_v55 = vld [vmem:[%s4272_s0 + $0x2b8] ss:$56 sps:$4 sm:$0xff]  }
  0x73   :  { %1756 = vmatprep.mubr.bf16.mxu1 %v3202_v57  ;;  %1853 = vmatprep.mubr.bf16.mxu0 %v3206_v58  ;;  %v3276_v56 = vld [vmem:[%s4272_s0 + $0x2c0] ss:$56 sps:$4 sm:$0xff]   ;;  %v3278_v57 = vld [vmem:[%s4272_s0 + $0x32c] ss:$56 sps:$4 sm:$0xff]  }
  0x74   :  { %v3282_v58 = vld [vmem:[%s4272_s0 + $0x334] ss:$56 sps:$4 sm:$0xff]  }
  0x7a   :  { %1757 = vmatmul.mubr.bf16.gmra.mrb[44].mxu1 %v3204_v0  ;;  %1854 = vmatmul.mubr.bf16.gmra.mrb[44].mxu0 %v3209_v1  ;;  %v3291_v0 = vld [vmem:[%s4272_s0 + $0x30] ss:$56 sps:$4 sm:$0xff]   ;;  %v3294_v1 = vld [vmem:[%s4272_s0 + $0x9c] ss:$56 sps:$4 sm:$0xff]  }
  0x7b   :  { %1894 = vmatprep.mubr.bf16.mxu1 %v3214_v2  ;;  %1991 = vmatprep.mubr.bf16.mxu0 %v3218_v3  ;;  %v3297_v2 = vld [vmem:[%s4272_s0 + $0xa4] ss:$56 sps:$4 sm:$0xff]   ;;  %v3296_v3 = vld [vmem:[%s4272_s0 + $0x98] ss:$56 sps:$4 sm:$0xff]  }
  0x82   :  { %1895 = vmatmul.mubr.bf16.vlgmr.msra.gmra.mrb[48].mxu1 %v3212_v4  ;;  %1992 = vmatmul.mubr.bf16.vlgmr.msra.gmra.mrb[48].mxu0 %v3216_v5  ;;  %v3299_v4 = vld [vmem:[%s4272_s0 + $0xa0] ss:$56 sps:$4 sm:$0xff]   ;;  %v3300_v5 = vld [vmem:[%s4272_s0 + $0x10c] ss:$56 sps:$4 sm:$0xff]  }
  0x83   :  { %2980 = vmatpush3.bf16.msra.mxu1 %v3219_v6  ;;  %2154 = vmatpush1.bf16.msra.mxu0 %v3220_v7  ;;  %v3303_v6 = vld [vmem:[%s4272_s0 + $0x114] ss:$56 sps:$4 sm:$0xff]   ;;  %v3302_v7 = vld [vmem:[%s4272_s0 + $0x108] ss:$56 sps:$4 sm:$0xff]  }
  0x84   :  { %1902 = vmatprep.mubr.bf16.mxu1 %v3221_v8  ;;  %2981 = vmatprep.subr.bf16.mxu1 %v3224_v9  ;;  %v3305_v8 = vld [vmem:[%s4272_s0 + $0x110] ss:$56 sps:$4 sm:$0xff]   ;;  %v3306_v9 = vld [vmem:[%s4272_s0 + $0x17c] ss:$56 sps:$4 sm:$0xff]  }
  0x85   :  { %1999 = vmatprep.mubr.bf16.mxu0 %v3225_v10  ;;  %2155 = vmatprep.subr.bf16.mxu0 %v3336_v63  ;;  %v3309_v10 = vld [vmem:[%s4272_s0 + $0x184] ss:$56 sps:$4 sm:$0xff]  }
  0x87   :  { %2982 = vmatpush3.bf16.msra.mxu1 %v3227_v11  ;;  %2156 = vmatpush1.bf16.msra.mxu0 %v3229_v12  ;;  %v3308_v11 = vld [vmem:[%s4272_s0 + $0x178] ss:$56 sps:$4 sm:$0xff]  }
  0x88   :  { %2983 = vmatprep.subr.bf16.mxu1 %v3233_v13  ;;  %2157 = vmatprep.subr.bf16.mxu0 %v3336_v63  ;;  %v3311_v12 = vld [vmem:[%s4272_s0 + $0x180] ss:$56 sps:$4 sm:$0xff]   ;;  %v3312_v13 = vld [vmem:[%s4272_s0 + $0x1ec] ss:$56 sps:$4 sm:$0xff]  }
  0x8a   :  { %1903 = vmatmul.mubr.bf16.gmra.mrb[52].mxu1 %v3223_v14  ;;  %2000 = vmatmul.mubr.bf16.gmra.mrb[52].mxu0 %v3228_v15  ;;  %v3315_v14 = vld [vmem:[%s4272_s0 + $0x1f4] ss:$56 sps:$4 sm:$0xff]   ;;  %v3314_v15 = vld [vmem:[%s4272_s0 + $0x1e8] ss:$56 sps:$4 sm:$0xff]  }
  0x8b   :  { %1910 = vmatprep.mubr.bf16.mxu1 %v3230_v16  ;;  %2007 = vmatprep.mubr.bf16.mxu0 %v3234_v17  ;;  %v3317_v16 = vld [vmem:[%s4272_s0 + $0x1f0] ss:$56 sps:$4 sm:$0xff]   ;;  %v3318_v17 = vld [vmem:[%s4272_s0 + $0x25c] ss:$56 sps:$4 sm:$0xff]  }
  0x8c   :  { %2984 = vmatpush3.bf16.msra.mxu1 %v3236_v18  ;;  %2158 = vmatpush1.bf16.msra.mxu0 %v3237_v19  ;;  %v3321_v18 = vld [vmem:[%s4272_s0 + $0x264] ss:$56 sps:$4 sm:$0xff]   ;;  %v3320_v19 = vld [vmem:[%s4272_s0 + $0x258] ss:$56 sps:$4 sm:$0xff]  }
  0x8d   :  { %2159 = vmatprep.subr.bf16.mxu0 %v3336_v63  ;;  %2985 = vmatprep.subr.bf16.mxu1 %v3243_v20  ;;  %v3323_v20 = vld [vmem:[%s4272_s0 + $0x260] ss:$56 sps:$4 sm:$0xff]  }
  0x90   :  { %2160 = vmatpush1.bf16.msra.mxu0 %v3239_v21  ;;  %2986 = vmatpush3.bf16.msra.mxu1 %v3246_v24  ;;  %v3324_v21 = vld [vmem:[%s4272_s0 + $0x2cc] ss:$56 sps:$4 sm:$0xff]   ;;  %v3329_v24 = vld [vmem:[%s4272_s0 + $0x2d0] ss:$56 sps:$4 sm:$0xff]  }
  0x91   :  { %2161 = vmatprep.subr.bf16.mxu0 %v3336_v63  ;;  %2987 = vmatprep.subr.bf16.mxu1 %v3252_v25  ;;  %v3330_v25 = vld [vmem:[%s4272_s0 + $0x33c] ss:$56 sps:$4 sm:$0xff]  }
  0x92   :  { %1911 = vmatmul.mubr.bf16.gmra.mrb[56].mxu1 %v3232_v22  ;;  %2008 = vmatmul.mubr.bf16.gmra.mrb[56].mxu0 %v3238_v23  ;;  %v3327_v22 = vld [vmem:[%s4272_s0 + $0x2d4] ss:$56 sps:$4 sm:$0xff]   ;;  %v3326_v23 = vld [vmem:[%s4272_s0 + $0x2c8] ss:$56 sps:$4 sm:$0xff]  }
  0x93   :  { %1918 = vmatprep.mubr.bf16.mxu1 %v3240_v26  ;;  %2015 = vmatprep.mubr.bf16.mxu0 %v3244_v27  ;;  %v3333_v26 = vld [vmem:[%s4272_s0 + $0x344] ss:$56 sps:$4 sm:$0xff]  }
  0x94   :  { %2162 = vmatpush1.bf16.msra.mxu0 %v3248_v28  ;;  %2988 = vmatpush3.bf16.msra.mxu1 %v3255_v29 }
  0x95   :  { %2163 = vmatprep.subr.bf16.mxu0 %v3336_v63  ;;  %2989 = vmatprep.subr.bf16.mxu1 %v3262_v30 }
  0x98   :  { %2164 = vmatpush1.bf16.msra.mxu0 %v3256_v31  ;;  %2990 = vmatpush3.bf16.msra.mxu1 %v3265_v34  ;;  %v3332_v31 = vld [vmem:[%s4272_s0 + $0x338] ss:$56 sps:$4 sm:$0xff]  }
  0x99   :  { %2165 = vmatprep.subr.bf16.mxu0 %v3336_v63  ;;  %2991 = vmatprep.subr.bf16.mxu1 %v3271_v37 }
  0x9a   :  { %1919 = vmatmul.mubr.bf16.gmra.mrb[60].mxu1 %v3242_v32  ;;  %2016 = vmatmul.mubr.bf16.gmra.mrb[60].mxu0 %v3247_v33  ;;  %v3335_v32 = vld [vmem:[%s4272_s0 + $0x340] ss:$56 sps:$4 sm:$0xff]  }
  0x9b   :  { %1926 = vmatprep.mubr.bf16.mxu1 %v3249_v35  ;;  %2023 = vmatprep.mubr.bf16.mxu0 %v3253_v36 }
  0x9c   :  { %2166 = vmatpush1.bf16.msra.mxu0 %v3258_v38  ;;  %2992 = vmatpush3.bf16.msra.mxu1 %v3274_v39 }
  0x9d   :  { %2167 = vmatprep.subr.bf16.mxu0 %v3336_v63  ;;  %2993 = vmatprep.subr.bf16.mxu1 %v3281_v43 }
  0xa0   :  { %2168 = vmatpush1.bf16.msra.mxu0 %v3267_v40  ;;  %2994 = vmatpush3.bf16.msra.mxu1 %v3284_v45 }
  0xa1   :  { %2169 = vmatprep.subr.bf16.mxu0 %v3336_v63 }
  0xa2   :  { %1927 = vmatmul.mubr.bf16.gmra.mrb[64].mxu1 %v3251_v41  ;;  %2024 = vmatmul.mubr.bf16.gmra.mrb[64].mxu0 %v3257_v42 }
  0xa3   :  { %1934 = vmatprep.mubr.bf16.mxu1 %v3259_v44  ;;  %2031 = vmatprep.mubr.bf16.mxu0 %v3263_v46 }
  0xa4   :  { %2170 = vmatpush1.bf16.msra.mxu0 %v3275_v47 }
  0xa5   :  { %2171 = vmatprep.subr.bf16.mxu0 %v3336_v63 }
  0xa8   :  { %2172 = vmatpush1.bf16.msra.mxu0 %v3277_v48 }
  0xa9   :  { %2173 = vmatprep.subr.bf16.mxu0 %v3336_v63 }
  0xaa   :  { %1935 = vmatmul.mubr.bf16.gmra.mrb[68].mxu1 %v3261_v49  ;;  %2032 = vmatmul.mubr.bf16.gmra.mrb[68].mxu0 %v3266_v50 }
  0xab   :  { %1942 = vmatprep.mubr.bf16.mxu1 %v3268_v51  ;;  %2039 = vmatprep.mubr.bf16.mxu0 %v3272_v52 }
  0xac   :  { %2174 = vmatpush1.bf16.msra.mxu0 %v3286_v53 }
  0xad   :  { %2175 = vmatprep.subr.bf16.mxu0 %v3336_v63  ;;  %v3287_v63 = vld [vmem:[%s4272_s0 + $0x28] ss:$56 sps:$4 sm:$0xff]  }
  0xb0   :  { %2176 = vmatpush1.bf16.msra.mxu0 %v3290_v54 }
  0xb2   :  { %1943 = vmatmul.mubr.bf16.gmra.mrb[72].mxu1 %v3270_v55  ;;  %2040 = vmatmul.mubr.bf16.gmra.mrb[72].mxu0 %v3276_v56 }
  0xb3   :  { %1950 = vmatprep.mubr.bf16.mxu1 %v3278_v57  ;;  %2047 = vmatprep.mubr.bf16.mxu0 %v3282_v58 }
  0xba   :  { %1951 = vmatmul.mubr.bf16.gmra.mrb[76].mxu1 %v3280_v59  ;;  %2048 = vmatmul.mubr.bf16.gmra.mrb[76].mxu0 %v3285_v60 }
  0xbb   :  { %2088 = vmatprep.mubr.bf16.mxu1 %v3289_v61  ;;  %2617 = vmatprep.mubr.msk.bf16.mxu0 %vm1546_vm0, %v3293_v62 }
  0xc2   :  { %2089 = vmatmul.mubr.bf16.vlgmr.msra.gmra.mrb[80].mxu1 %v3287_v63  ;;  %2186 = vmatmul.mubr.bf16.vlgmr.msra.gmra.mrb[80].mxu0 %v3291_v0 }
  0xc3   :  { %2096 = vmatprep.mubr.bf16.mxu1 %v3294_v1  ;;  %2618 = vmatprep.mubr.msk.bf16.mxu0 %vm1546_vm0, %v3297_v2 }
  0xca   :  { %2097 = vmatmul.mubr.bf16.gmra.mrb[84].mxu1 %v3296_v3  ;;  %2194 = vmatmul.mubr.bf16.gmra.mrb[84].mxu0 %v3299_v4 }
  0xcb   :  { %2104 = vmatprep.mubr.bf16.mxu1 %v3300_v5  ;;  %2619 = vmatprep.mubr.msk.bf16.mxu0 %vm1546_vm0, %v3303_v6 }
  0xd2   :  { %2105 = vmatmul.mubr.bf16.gmra.mrb[88].mxu1 %v3302_v7  ;;  %2202 = vmatmul.mubr.bf16.gmra.mrb[88].mxu0 %v3305_v8 }
  0xd3   :  { %2112 = vmatprep.mubr.bf16.mxu1 %v3306_v9  ;;  %2620 = vmatprep.mubr.msk.bf16.mxu0 %vm1546_vm0, %v3309_v10 }
  0xda   :  { %2113 = vmatmul.mubr.bf16.gmra.mrb[92].mxu1 %v3308_v11  ;;  %2210 = vmatmul.mubr.bf16.gmra.mrb[92].mxu0 %v3311_v12 }
  0xdb   :  { %2120 = vmatprep.mubr.bf16.mxu1 %v3312_v13  ;;  %2621 = vmatprep.mubr.msk.bf16.mxu0 %vm1546_vm0, %v3315_v14 }
  0xe2   :  { %2121 = vmatmul.mubr.bf16.gmra.mrb[96].mxu1 %v3314_v15  ;;  %2218 = vmatmul.mubr.bf16.gmra.mrb[96].mxu0 %v3317_v16 }
  0xe3   :  { %2128 = vmatprep.mubr.bf16.mxu1 %v3318_v17  ;;  %2622 = vmatprep.mubr.msk.bf16.mxu0 %vm1546_vm0, %v3321_v18 }
  0xea   :  { %2129 = vmatmul.mubr.bf16.gmra.mrb[100].mxu1 %v3320_v19  ;;  %2226 = vmatmul.mubr.bf16.gmra.mrb[100].mxu0 %v3323_v20 }
  0xeb   :  { %2136 = vmatprep.mubr.bf16.mxu1 %v3324_v21  ;;  %2623 = vmatprep.mubr.msk.bf16.mxu0 %vm1546_vm0, %v3327_v22 }
  0xf2   :  { %2137 = vmatmul.mubr.bf16.gmra.mrb[104].mxu1 %v3326_v23  ;;  %2234 = vmatmul.mubr.bf16.gmra.mrb[104].mxu0 %v3329_v24 }
  0xf3   :  { %2144 = vmatprep.mubr.bf16.mxu1 %v3330_v25  ;;  %2624 = vmatprep.mubr.msk.bf16.mxu0 %vm1546_vm0, %v3333_v26 }
  0xf5   :  { %v2699_v27 = vpop.f32.mrb[0].mxu1  ;;  %v2675_v28 = vpop.f32.mrb[0].mxu0 }
  0xf6   :  { %v2700_v29 = vpop.f32.mrb[1].mxu1  ;;  %v2676_v30 = vpop.f32.mrb[1].mxu0 }
  0xf7   :  { %v4042_v33 = vadd.f32 %v2700_v29, %v2699_v27  ;;  %v2702_v34 = vpop.f32.mrb[2].mxu1  ;;  %v2677_v35 = vadd.f32 %v2676_v30, %v2675_v28  ;;  %v2678_v36 = vpop.f32.mrb[2].mxu0 }
  0xf8   :  { %v2703_v37 = vpop.f32.mrb[3].mxu1  ;;  %v2679_v38 = vpop.f32.mrb[3].mxu0 }
  0xf9   :  { %v4044_v39 = vadd.f32 %v2703_v37, %v2702_v34  ;;  %v2680_v40 = vadd.f32 %v2679_v38, %v2678_v36 }
  0xfa   :  { %2145 = vmatmul.mubr.bf16.gmra.mrb[108].mxu1 %v3332_v31  ;;  %2242 = vmatmul.mubr.bf16.gmra.mrb[108].mxu0 %v3335_v32 }
  0xfd   :  { %v2705_v41 = vpop.f32.mrb[4].mxu1  ;;  %v2681_v42 = vpop.f32.mrb[4].mxu0 }
  0xfe   :  { %v2706_v43 = vpop.f32.mrb[5].mxu1  ;;  %v2682_v44 = vpop.f32.mrb[5].mxu0 }
  0xff   :  { %v4046_v45 = vadd.f32 %v2706_v43, %v2705_v41  ;;  %v2708_v46 = vpop.f32.mrb[6].mxu1  ;;  %v2683_v47 = vadd.f32 %v2682_v44, %v2681_v42  ;;  %v2684_v48 = vpop.f32.mrb[6].mxu0 }
 0x100   :  { %v2709_v49 = vpop.f32.mrb[7].mxu1  ;;  %v2685_v50 = vpop.f32.mrb[7].mxu0 }
 0x101   :  { %v4048_v51 = vadd.f32 %v2709_v49, %v2708_v46  ;;  %v2686_v52 = vadd.f32 %v2685_v50, %v2684_v48 }
 0x105   :  { %v2711_v53 = vpop.f32.mrb[8].mxu1  ;;  %v2687_v54 = vpop.f32.mrb[8].mxu0 }
 0x106   :  { %v2712_v55 = vpop.f32.mrb[9].mxu1  ;;  %v2688_v56 = vpop.f32.mrb[9].mxu0 }
 0x107   :  { %v4050_v57 = vadd.f32 %v2712_v55, %v2711_v53  ;;  %v2714_v58 = vpop.f32.mrb[10].mxu1  ;;  %v2689_v59 = vadd.f32 %v2688_v56, %v2687_v54  ;;  %v2690_v60 = vpop.f32.mrb[10].mxu0 }
 0x108   :  { %v2715_v61 = vpop.f32.mrb[11].mxu1  ;;  %v2691_v62 = vpop.f32.mrb[11].mxu0 }
 0x109   :  { %v4052_v63 = vadd.f32 %v2715_v61, %v2714_v58  ;;  %v2692_v0 = vadd.f32 %v2691_v62, %v2690_v60 }
 0x10d   :  { %v2717_v1 = vpop.f32.mrb[12].mxu1  ;;  %v2693_v2 = vpop.f32.mrb[12].mxu0 }
 0x10e   :  { %v2718_v3 = vpop.f32.mrb[13].mxu1  ;;  %v2694_v4 = vpop.f32.mrb[13].mxu0 }
 0x10f   :  { %v4054_v5 = vadd.f32 %v2718_v3, %v2717_v1  ;;  %v2720_v6 = vpop.f32.mrb[14].mxu1  ;;  %v4056_v7 = vadd.f32 %v2694_v4, %v2693_v2  ;;  %v2696_v8 = vpop.f32.mrb[14].mxu0 }
 0x110   :  { %v2721_v9 = vpop.f32.mrb[15].mxu1  ;;  %v2697_v10 = vpop.f32.mrb[15].mxu0 }
 0x111   :  { %v4058_v11 = vadd.f32 %v2721_v9, %v2720_v6  ;;  %v2698_v12 = vadd.f32 %v2697_v10, %v2696_v8 }
 0x115   :  { %v2739_v13 = vpop.f32.mrb[16].mxu1  ;;  %v2803_v14 = vpop.f32.mrb[16].mxu0 }
 0x116   :  { %v2740_v15 = vpop.f32.mrb[17].mxu1  ;;  %v2804_v16 = vpop.f32.mrb[17].mxu0 }
 0x117   :  { %v2741_v17 = vadd.f32 %v2740_v15, %v2739_v13  ;;  %v2742_v18 = vpop.f32.mrb[18].mxu1  ;;  %v2805_v19 = vadd.f32 %v2804_v16, %v2803_v14  ;;  %v2806_v20 = vpop.f32.mrb[18].mxu0 }
 0x118   :  { %v2743_v21 = vpop.f32.mrb[19].mxu1  ;;  %v2807_v22 = vpop.f32.mrb[19].mxu0 }
 0x119   :  { %v1703_v23 = vadd.f32 %v2741_v17, %v2677_v35  ;;  %v2744_v24 = vadd.f32 %v2743_v21, %v2742_v18  ;;  %v2808_v25 = vadd.f32 %v2807_v22, %v2806_v20 }
 0x11b   :  { %v1706_v26 = vadd.f32 %v2744_v24, %v2680_v40  ;;  %v4060_v27 = vadd.f32 %v2805_v19, %v1703_v23 }
 0x11d   :  { %v4062_v28 = vadd.f32 %v2808_v25, %v1706_v26  ;;  %v2745_v29 = vpop.f32.mrb[20].mxu1  ;;  %v2809_v30 = vpop.f32.mrb[20].mxu0 }
 0x11e   :  { %v2746_v31 = vpop.f32.mrb[21].mxu1  ;;  %v2810_v32 = vpop.f32.mrb[21].mxu0 }
 0x11f   :  { %v2747_v34 = vadd.f32 %v2746_v31, %v2745_v29  ;;  %v2748_v36 = vpop.f32.mrb[22].mxu1  ;;  %v2811_v37 = vadd.f32 %v2810_v32, %v2809_v30  ;;  %v2812_v38 = vpop.f32.mrb[22].mxu0 }
 0x120   :  { %v2749_v41 = vpop.f32.mrb[23].mxu1  ;;  %v2813_v42 = vpop.f32.mrb[23].mxu0 }
 0x121   :  { %v1711_v43 = vadd.f32 %v2747_v34, %v2683_v47  ;;  %v2750_v44 = vadd.f32 %v2749_v41, %v2748_v36  ;;  %v2814_v35 = vadd.f32 %v2813_v42, %v2812_v38 }
 0x123   :  { %v1714_v46 = vadd.f32 %v2750_v44, %v2686_v52  ;;  %v4064_v48 = vadd.f32 %v2811_v37, %v1711_v43 }
 0x125   :  { %v4066_v40 = vadd.f32 %v2814_v35, %v1714_v46  ;;  %v2751_v49 = vpop.f32.mrb[24].mxu1  ;;  %v2815_v50 = vpop.f32.mrb[24].mxu0 }
 0x126   :  { %v2752_v53 = vpop.f32.mrb[25].mxu1  ;;  %v2816_v54 = vpop.f32.mrb[25].mxu0 }
 0x127   :  { %v2753_v55 = vadd.f32 %v2752_v53, %v2751_v49  ;;  %v2754_v56 = vpop.f32.mrb[26].mxu1  ;;  %v2817_v58 = vadd.f32 %v2816_v54, %v2815_v50  ;;  %v2818_v60 = vpop.f32.mrb[26].mxu0 }
 0x128   :  { %v2755_v61 = vpop.f32.mrb[27].mxu1  ;;  %v2819_v62 = vpop.f32.mrb[27].mxu0 }
 0x129   :  { %v1719_v1 = vadd.f32 %v2753_v55, %v2689_v59  ;;  %v2756_v2 = vadd.f32 %v2755_v61, %v2754_v56  ;;  %v2820_v47 = vadd.f32 %v2819_v62, %v2818_v60 }
 0x12b   :  { %v1722_v3 = vadd.f32 %v2756_v2, %v2692_v0  ;;  %v4068_v4 = vadd.f32 %v2817_v58, %v1719_v1 }
 0x12d   :  { %v4070_v52 = vadd.f32 %v2820_v47, %v1722_v3  ;;  %v2757_v6 = vpop.f32.mrb[28].mxu1  ;;  %v2821_v8 = vpop.f32.mrb[28].mxu0 }
 0x12e   :  { %v2758_v9 = vpop.f32.mrb[29].mxu1  ;;  %v2822_v10 = vpop.f32.mrb[29].mxu0 }
 0x12f   :  { %v2759_v13 = vadd.f32 %v2758_v9, %v2757_v6  ;;  %v2760_v14 = vpop.f32.mrb[30].mxu1  ;;  %v2823_v15 = vadd.f32 %v2822_v10, %v2821_v8  ;;  %v2824_v16 = vpop.f32.mrb[30].mxu0 }
 0x130   :  { %v2761_v17 = vpop.f32.mrb[31].mxu1  ;;  %v2825_v18 = vpop.f32.mrb[31].mxu0 }
 0x131   :  { %v1727_v19 = vadd.f32 %v2759_v13, %v4056_v7  ;;  %v2762_v59 = vadd.f32 %v2761_v17, %v2760_v14  ;;  %v2826_v20 = vadd.f32 %v2825_v18, %v2824_v16 }
 0x133   :  { %v1730_v21 = vadd.f32 %v2762_v59, %v2698_v12  ;;  %v4073_v0 = vadd.f32 %v2823_v15, %v1727_v19 }
 0x135   :  { %v4075_v22 = vadd.f32 %v2826_v20, %v1730_v21  ;;  %v2763_v23 = vpop.f32.mrb[32].mxu1  ;;  %v2827_v24 = vpop.f32.mrb[32].mxu0 }
 0x136   :  { %v2764_v25 = vpop.f32.mrb[33].mxu1  ;;  %v2828_v26 = vpop.f32.mrb[33].mxu0 }
 0x137   :  { %v2765_v29 = vadd.f32 %v2764_v25, %v2763_v23  ;;  %v2766_v30 = vpop.f32.mrb[34].mxu1  ;;  %v2829_v31 = vadd.f32 %v2828_v26, %v2827_v24  ;;  %v2830_v32 = vpop.f32.mrb[34].mxu0 }
 0x138   :  { %v2767_v34 = vpop.f32.mrb[35].mxu1  ;;  %v2831_v36 = vpop.f32.mrb[35].mxu0 }
 0x139   :  { %v1735_v37 = vadd.f32 %v2765_v29, %v4042_v33  ;;  %v2768_v7 = vadd.f32 %v2767_v34, %v2766_v30  ;;  %v2832_v38 = vadd.f32 %v2831_v36, %v2830_v32 }
 0x13b   :  { %v1738_v12 = vadd.f32 %v2768_v7, %v4044_v39  ;;  %v4079_v41 = vadd.f32 %v2829_v31, %v1735_v37 }
 0x13d   :  { %v4081_v42 = vadd.f32 %v2832_v38, %v1738_v12  ;;  %v2769_v43 = vpop.f32.mrb[36].mxu1  ;;  %v2833_v44 = vpop.f32.mrb[36].mxu0 }
 0x13e   :  { %v2770_v35 = vpop.f32.mrb[37].mxu1  ;;  %v2834_v46 = vpop.f32.mrb[37].mxu0 }
 0x13f   :  { %v2771_v49 = vadd.f32 %v2770_v35, %v2769_v43  ;;  %v2772_v50 = vpop.f32.mrb[38].mxu1  ;;  %v2835_v53 = vadd.f32 %v2834_v46, %v2833_v44  ;;  %v2836_v54 = vpop.f32.mrb[38].mxu0 }
 0x140   :  { %v2773_v55 = vpop.f32.mrb[39].mxu1  ;;  %v2837_v56 = vpop.f32.mrb[39].mxu0 }
 0x141   :  { %v1743_v33 = vadd.f32 %v2771_v49, %v4046_v45  ;;  %v2774_v58 = vadd.f32 %v2773_v55, %v2772_v50  ;;  %v2838_v60 = vadd.f32 %v2837_v56, %v2836_v54 }
 0x143   :  { %v1746_v39 = vadd.f32 %v2774_v58, %v4048_v51  ;;  %v4085_v61 = vadd.f32 %v2835_v53, %v1743_v33 }
 0x145   :  { %v4087_v62 = vadd.f32 %v2838_v60, %v1746_v39  ;;  %v2775_v1 = vpop.f32.mrb[40].mxu1  ;;  %v2839_v2 = vpop.f32.mrb[40].mxu0 }
 0x146   :  { %v2776_v47 = vpop.f32.mrb[41].mxu1  ;;  %v2840_v3 = vpop.f32.mrb[41].mxu0 }
 0x147   :  { %v2777_v6 = vadd.f32 %v2776_v47, %v2775_v1  ;;  %v2778_v8 = vpop.f32.mrb[42].mxu1  ;;  %v2841_v9 = vadd.f32 %v2840_v3, %v2839_v2  ;;  %v2842_v10 = vpop.f32.mrb[42].mxu0 }
 0x148   :  { %v2779_v13 = vpop.f32.mrb[43].mxu1  ;;  %v2843_v14 = vpop.f32.mrb[43].mxu0 }
 0x149   :  { %v1751_v45 = vadd.f32 %v2777_v6, %v4050_v57  ;;  %v2780_v15 = vadd.f32 %v2779_v13, %v2778_v8  ;;  %v2844_v16 = vadd.f32 %v2843_v14, %v2842_v10 }
 0x14b   :  { %v1754_v51 = vadd.f32 %v2780_v15, %v4052_v63  ;;  %v4091_v17 = vadd.f32 %v2841_v9, %v1751_v45 }
 0x14d   :  { %v4093_v18 = vadd.f32 %v2844_v16, %v1754_v51  ;;  %v2781_v19 = vpop.f32.mrb[44].mxu1  ;;  %v2845_v59 = vpop.f32.mrb[44].mxu0 }
 0x14e   :  { %v2782_v20 = vpop.f32.mrb[45].mxu1  ;;  %v2846_v21 = vpop.f32.mrb[45].mxu0 }
 0x14f   :  { %v2783_v23 = vadd.f32 %v2782_v20, %v2781_v19  ;;  %v2784_v24 = vpop.f32.mrb[46].mxu1  ;;  %v2847_v25 = vadd.f32 %v2846_v21, %v2845_v59  ;;  %v2848_v26 = vpop.f32.mrb[46].mxu0 }
 0x150   :  { %v2785_v29 = vpop.f32.mrb[47].mxu1  ;;  %v2849_v30 = vpop.f32.mrb[47].mxu0 }
 0x151   :  { %v1759_v57 = vadd.f32 %v2783_v23, %v4054_v5  ;;  %v2786_v31 = vadd.f32 %v2785_v29, %v2784_v24  ;;  %v2850_v32 = vadd.f32 %v2849_v30, %v2848_v26 }
 0x153   :  { %v1762_v63 = vadd.f32 %v2786_v31, %v4058_v11  ;;  %v4097_v34 = vadd.f32 %v2847_v25, %v1759_v57 }
 0x155   :  { %v4099_v36 = vadd.f32 %v2850_v32, %v1762_v63  ;;  %v2867_v37 = vpop.f32.mrb[48].mxu1  ;;  %v2931_v7 = vpop.f32.mrb[48].mxu0 }
 0x156   :  { %v2868_v38 = vpop.f32.mrb[49].mxu1  ;;  %v2932_v12 = vpop.f32.mrb[49].mxu0 }
 0x157   :  { %v2869_v43 = vadd.f32 %v2868_v38, %v2867_v37  ;;  %v2870_v44 = vpop.f32.mrb[50].mxu1  ;;  %v2933_v35 = vadd.f32 %v2932_v12, %v2931_v7  ;;  %v2934_v46 = vpop.f32.mrb[50].mxu0 }
 0x158   :  { %v2871_v49 = vpop.f32.mrb[51].mxu1  ;;  %v2935_v50 = vpop.f32.mrb[51].mxu0 }
 0x159   :  { %v1897_v5 = vadd.f32 %v2869_v43, %v4060_v27  ;;  %v2872_v53 = vadd.f32 %v2871_v49, %v2870_v44  ;;  %v2936_v54 = vadd.f32 %v2935_v50, %v2934_v46 }
 0x15b   :  { %v1900_v11 = vadd.f32 %v2872_v53, %v4062_v28  ;;  %v4103_v55 = vadd.f32 %v2933_v35, %v1897_v5 }
 0x15d   :  { %v4105_v56 = vadd.f32 %v2936_v54, %v1900_v11  ;;  %v2873_v33 = vpop.f32.mrb[52].mxu1  ;;  %v2937_v58 = vpop.f32.mrb[52].mxu0 }
 0x15e   :  { %v2874_v60 = vpop.f32.mrb[53].mxu1  ;;  %v2938_v39 = vpop.f32.mrb[53].mxu0 }
 0x15f   :  { %v2875_v1 = vadd.f32 %v2874_v60, %v2873_v33  ;;  %v2876_v2 = vpop.f32.mrb[54].mxu1  ;;  %v2939_v47 = vadd.f32 %v2938_v39, %v2937_v58  ;;  %v2940_v3 = vpop.f32.mrb[54].mxu0 }
 0x160   :  { %v2877_v6 = vpop.f32.mrb[55].mxu1  ;;  %v2941_v8 = vpop.f32.mrb[55].mxu0 }
 0x161   :  { %v1905_v27 = vadd.f32 %v2875_v1, %v4064_v48  ;;  %v2878_v9 = vadd.f32 %v2877_v6, %v2876_v2  ;;  %v2942_v10 = vadd.f32 %v2941_v8, %v2940_v3 }
 0x163   :  { %v1908_v28 = vadd.f32 %v2878_v9, %v4066_v40  ;;  %v4109_v13 = vadd.f32 %v2939_v47, %v1905_v27 }
 0x165   :  { %v4111_v14 = vadd.f32 %v2942_v10, %v1908_v28  ;;  %v2879_v45 = vpop.f32.mrb[56].mxu1  ;;  %v2943_v15 = vpop.f32.mrb[56].mxu0 }
 0x166   :  { %v2880_v16 = vpop.f32.mrb[57].mxu1  ;;  %v2944_v51 = vpop.f32.mrb[57].mxu0 }
 0x167   :  { %v2881_v19 = vadd.f32 %v2880_v16, %v2879_v45  ;;  %v2882_v59 = vpop.f32.mrb[58].mxu1  ;;  %v2945_v20 = vadd.f32 %v2944_v51, %v2943_v15  ;;  %v2946_v21 = vpop.f32.mrb[58].mxu0 }
 0x168   :  { %v2883_v23 = vpop.f32.mrb[59].mxu1  ;;  %v2947_v24 = vpop.f32.mrb[59].mxu0 }
 0x169   :  { %v1913_v48 = vadd.f32 %v2881_v19, %v4068_v4  ;;  %v2884_v25 = vadd.f32 %v2883_v23, %v2882_v59  ;;  %v2948_v26 = vadd.f32 %v2947_v24, %v2946_v21 }
 0x16b   :  { %v1916_v40 = vadd.f32 %v2884_v25, %v4070_v52  ;;  %v4115_v29 = vadd.f32 %v2945_v20, %v1913_v48 }
 0x16d   :  { %v4117_v30 = vadd.f32 %v2948_v26, %v1916_v40  ;;  %v2885_v57 = vpop.f32.mrb[60].mxu1  ;;  %v2949_v31 = vpop.f32.mrb[60].mxu0 }
 0x16e   :  { %v2886_v32 = vpop.f32.mrb[61].mxu1  ;;  %v2950_v63 = vpop.f32.mrb[61].mxu0 }
 0x16f   :  { %v2887_v37 = vadd.f32 %v2886_v32, %v2885_v57  ;;  %v2888_v7 = vpop.f32.mrb[62].mxu1  ;;  %v2951_v38 = vadd.f32 %v2950_v63, %v2949_v31  ;;  %v2952_v12 = vpop.f32.mrb[62].mxu0 }
 0x170   :  { %v2889_v43 = vpop.f32.mrb[63].mxu1  ;;  %v2953_v44 = vpop.f32.mrb[63].mxu0 }
 0x171   :  { %v1921_v4 = vadd.f32 %v2887_v37, %v4073_v0  ;;  %v2890_v35 = vadd.f32 %v2889_v43, %v2888_v7  ;;  %v2954_v46 = vadd.f32 %v2953_v44, %v2952_v12 }
 0x173   :  { %v1924_v52 = vadd.f32 %v2890_v35, %v4075_v22  ;;  %v4121_v49 = vadd.f32 %v2951_v38, %v1921_v4 }
 0x175   :  { %v4123_v50 = vadd.f32 %v2954_v46, %v1924_v52  ;;  %v2891_v5 = vpop.f32.mrb[64].mxu1  ;;  %v2955_v53 = vpop.f32.mrb[64].mxu0 }
 0x176   :  { %v2892_v54 = vpop.f32.mrb[65].mxu1  ;;  %v2956_v11 = vpop.f32.mrb[65].mxu0 }
 0x177   :  { %v2893_v33 = vadd.f32 %v2892_v54, %v2891_v5  ;;  %v2894_v58 = vpop.f32.mrb[66].mxu1  ;;  %v2957_v60 = vadd.f32 %v2956_v11, %v2955_v53  ;;  %v2958_v39 = vpop.f32.mrb[66].mxu0 }
 0x178   :  { %v2895_v1 = vpop.f32.mrb[67].mxu1  ;;  %v2959_v2 = vpop.f32.mrb[67].mxu0 }
 0x179   :  { %v1929_v0 = vadd.f32 %v2893_v33, %v4079_v41  ;;  %v2896_v47 = vadd.f32 %v2895_v1, %v2894_v58  ;;  %v2960_v3 = vadd.f32 %v2959_v2, %v2958_v39 }
 0x17b   :  { %v1932_v22 = vadd.f32 %v2896_v47, %v4081_v42  ;;  %v4127_v6 = vadd.f32 %v2957_v60, %v1929_v0 }
 0x17d   :  { %v4129_v8 = vadd.f32 %v2960_v3, %v1932_v22  ;;  %v2897_v27 = vpop.f32.mrb[68].mxu1  ;;  %v2961_v9 = vpop.f32.mrb[68].mxu0 }
 0x17e   :  { %v2898_v10 = vpop.f32.mrb[69].mxu1  ;;  %v2962_v28 = vpop.f32.mrb[69].mxu0 }
 0x17f   :  { %v2899_v45 = vadd.f32 %v2898_v10, %v2897_v27  ;;  %v2900_v15 = vpop.f32.mrb[70].mxu1  ;;  %v2963_v16 = vadd.f32 %v2962_v28, %v2961_v9  ;;  %v2964_v51 = vpop.f32.mrb[70].mxu0 }
 0x180   :  { %v2901_v19 = vpop.f32.mrb[71].mxu1  ;;  %v2965_v59 = vpop.f32.mrb[71].mxu0 }
 0x181   :  { %v1937_v41 = vadd.f32 %v2899_v45, %v4085_v61  ;;  %v2902_v20 = vadd.f32 %v2901_v19, %v2900_v15  ;;  %v2966_v21 = vadd.f32 %v2965_v59, %v2964_v51  ;;  %v4159_v19 = vld [vmem:[%s4274_s3] ss:$0 sm:$0xff] }
 0x183   :  { %v1940_v42 = vadd.f32 %v2902_v20, %v4087_v62  ;;  %v4133_v23 = vadd.f32 %v2963_v16, %v1937_v41 }
 0x185   :  { %v4135_v24 = vadd.f32 %v2966_v21, %v1940_v42  ;;  %v2903_v48 = vpop.f32.mrb[72].mxu1  ;;  %v2967_v25 = vpop.f32.mrb[72].mxu0 }
 0x186   :  { %v2904_v26 = vpop.f32.mrb[73].mxu1  ;;  %v2968_v40 = vpop.f32.mrb[73].mxu0 }
 0x187   :  { %v2905_v57 = vadd.f32 %v2904_v26, %v2903_v48  ;;  %v2906_v31 = vpop.f32.mrb[74].mxu1  ;;  %v2969_v32 = vadd.f32 %v2968_v40, %v2967_v25  ;;  %v2970_v63 = vpop.f32.mrb[74].mxu0 }
 0x188   :  { %v2907_v37 = vpop.f32.mrb[75].mxu1  ;;  %v2971_v7 = vpop.f32.mrb[75].mxu0 }
 0x189   :  { %v1945_v61 = vadd.f32 %v2905_v57, %v4091_v17  ;;  %v2908_v38 = vadd.f32 %v2907_v37, %v2906_v31  ;;  %v2972_v12 = vadd.f32 %v2971_v7, %v2970_v63 }
 0x18b   :  { %v1948_v62 = vadd.f32 %v2908_v38, %v4093_v18  ;;  %v4139_v43 = vadd.f32 %v2969_v32, %v1945_v61 }
 0x18d   :  { %v4141_v44 = vadd.f32 %v2972_v12, %v1948_v62  ;;  %v2909_v4 = vpop.f32.mrb[76].mxu1  ;;  %v2973_v35 = vpop.f32.mrb[76].mxu0 }
 0x18e   :  { %v2910_v46 = vpop.f32.mrb[77].mxu1  ;;  %v2974_v52 = vpop.f32.mrb[77].mxu0 }
 0x18f   :  { %v2911_v5 = vadd.f32 %v2910_v46, %v2909_v4  ;;  %v2912_v53 = vpop.f32.mrb[78].mxu1  ;;  %v2975_v54 = vadd.f32 %v2974_v52, %v2973_v35  ;;  %v2976_v11 = vpop.f32.mrb[78].mxu0 }
 0x190   :  { %v2913_v33 = vpop.f32.mrb[79].mxu1  ;;  %v2977_v58 = vpop.f32.mrb[79].mxu0 }
 0x191   :  { %v1953_v17 = vadd.f32 %v2911_v5, %v4097_v34  ;;  %v2914_v60 = vadd.f32 %v2913_v33, %v2912_v53  ;;  %v2978_v39 = vadd.f32 %v2977_v58, %v2976_v11 }
 0x193   :  { %v1956_v18 = vadd.f32 %v2914_v60, %v4099_v36  ;;  %v4145_v1 = vadd.f32 %v2975_v54, %v1953_v17  ;;  %v4153_v36 = vld [vmem:[%s4273_s2] ss:$0 sm:$0xff] }
 0x195   :  { %v4147_v2 = vadd.f32 %v2978_v39, %v1956_v18  ;;  %v2995_v0 = vpop.f32.mrb[80].mxu1  ;;  %v2187_v47 = vpop.f32.mrb[80].mxu0 }
 0x196   :  { %v2996_v3 = vpop.f32.mrb[81].mxu1  ;;  %v2189_v22 = vpop.f32.mrb[81].mxu0 }
 0x197   :  { %v2997_v27 = vadd.f32 %v2996_v3, %v2995_v0  ;;  %v2998_v9 = vpop.f32.mrb[82].mxu1  ;;  %v2190_v10 = vpop.f32.mrb[82].mxu0 }
 0x198   :  { %v2999_v28 = vpop.f32.mrb[83].mxu1  ;;  %v2192_v45 = vpop.f32.mrb[83].mxu0 }
 0x199   :  { %v3000_v15 = vadd.f32 %v2999_v28, %v2998_v9  ;;  %v2091_v34 = vadd.f32 %v2997_v27, %v4103_v55 }
 0x19b   :  { %v2188_v16 = vadd.f32 %v2187_v47, %v2091_v34  ;;  %v2094_v51 = vadd.f32 %v3000_v15, %v4105_v56 }
 0x19d   :  { %v2257_v59 = vmul.f32 %v4153_v36, %v2188_v16  ;;  %v2191_v41 = vadd.f32 %v2190_v10, %v2094_v51  ;;  %v3001_v20 = vpop.f32.mrb[84].mxu1  ;;  %v2195_v21 = vpop.f32.mrb[84].mxu0 }
 0x19e   :  { %v3002_v42 = vpop.f32.mrb[85].mxu1  ;;  %v2197_v55 = vpop.f32.mrb[85].mxu0 }
 0x19f   :  { %v2280_v48 = vadd.f32 %v4159_v19, %v2257_v59  ;;  %v2258_v25 = vmul.f32 %v4153_v36, %v2191_v41  ;;  %v3003_v26 = vadd.f32 %v3002_v42, %v3001_v20  ;;  %v3004_v40 = vpop.f32.mrb[86].mxu1  ;;  %v2198_v57 = vpop.f32.mrb[86].mxu0 }
 0x1a0   :  { %v3005_v56 = vpop.f32.mrb[87].mxu1  ;;  %v2200_v31 = vpop.f32.mrb[87].mxu0 }
 0x1a1   :  { %v2296_v32 = vmax.f32 %v2280_v48, 0.0  ;;  %v2281_v63 = vadd.f32 %v4159_v19, %v2258_v25  ;;  %v3006_v37 = vadd.f32 %v3005_v56, %v3004_v40  ;;  %v2099_v7 = vadd.f32 %v3003_v26, %v4109_v13 }
 0x1a3   :  { %v2643_v61 = vpack.c.bf16 %v2296_v32, %v2296_v32  ;;  %v2297_v38 = vmax.f32 %v2281_v63, 0.0  ;;  %v2196_v12 = vadd.f32 %v2195_v21, %v2099_v7  ;;  %v2102_v62 = vadd.f32 %v3006_v37, %v4111_v14 }
 0x1a5   :  { %2377 = vst.msk [vmem:[%s4275_s4] sm:$0xf] %vm2376_vm1, %v2643_v61  ;;  %v2644_v4 = vpack.c.bf16 %v2297_v38, %v2297_v38  ;;  %v2259_v35 = vmul.f32 %v4153_v36, %v2196_v12  ;;  %v2199_v46 = vadd.f32 %v2198_v57, %v2102_v62  ;;  %v3007_v52 = vpop.f32.mrb[88].mxu1  ;;  %v2203_v5 = vpop.f32.mrb[88].mxu0 }
 0x1a6   :  { %v3008_v53 = vpop.f32.mrb[89].mxu1  ;;  %v2205_v54 = vpop.f32.mrb[89].mxu0 }
 0x1a7   :  { %2378 = vst.msk [vmem:[%s4275_s4 + $0x4] sm:$0xf] %vm2376_vm1, %v2644_v4  ;;  %v2282_v13 = vadd.f32 %v4159_v19, %v2259_v35  ;;  %v2260_v14 = vmul.f32 %v4153_v36, %v2199_v46  ;;  %v3009_v11 = vadd.f32 %v3008_v53, %v3007_v52  ;;  %v3010_v33 = vpop.f32.mrb[90].mxu1  ;;  %v2206_v58 = vpop.f32.mrb[90].mxu0 }
 0x1a8   :  { %v3011_v17 = vpop.f32.mrb[91].mxu1  ;;  %v2208_v60 = vpop.f32.mrb[91].mxu0 }
 0x1a9   :  { %v2298_v39 = vmax.f32 %v2282_v13, 0.0  ;;  %v2283_v18 = vadd.f32 %v4159_v19, %v2260_v14  ;;  %v3012_v0 = vadd.f32 %v3011_v17, %v3010_v33  ;;  %v2107_v47 = vadd.f32 %v3009_v11, %v4115_v29 }
 0x1ab   :  { %v2645_v3 = vpack.c.bf16 %v2298_v39, %v2298_v39  ;;  %v2299_v22 = vmax.f32 %v2283_v18, 0.0  ;;  %v2204_v27 = vadd.f32 %v2203_v5, %v2107_v47  ;;  %v2110_v9 = vadd.f32 %v3012_v0, %v4117_v30 }
 0x1ad   :  { %2379 = vst.msk [vmem:[%s4275_s4 + $0x8] sm:$0xf] %vm2376_vm1, %v2645_v3  ;;  %v2646_v10 = vpack.c.bf16 %v2299_v22, %v2299_v22  ;;  %v2261_v28 = vmul.f32 %v4153_v36, %v2204_v27  ;;  %v2207_v45 = vadd.f32 %v2206_v58, %v2110_v9  ;;  %v3013_v15 = vpop.f32.mrb[92].mxu1  ;;  %v2211_v34 = vpop.f32.mrb[92].mxu0 }
 0x1ae   :  { %v3014_v16 = vpop.f32.mrb[93].mxu1  ;;  %v2213_v51 = vpop.f32.mrb[93].mxu0 }
 0x1af   :  { %2380 = vst.msk [vmem:[%s4275_s4 + $0xc] sm:$0xf] %vm2376_vm1, %v2646_v10  ;;  %v2284_v29 = vadd.f32 %v4159_v19, %v2261_v28  ;;  %v2262_v30 = vmul.f32 %v4153_v36, %v2207_v45  ;;  %v3015_v59 = vadd.f32 %v3014_v16, %v3013_v15  ;;  %v3016_v41 = vpop.f32.mrb[94].mxu1  ;;  %v2214_v20 = vpop.f32.mrb[94].mxu0 }
 0x1b0   :  { %v3017_v21 = vpop.f32.mrb[95].mxu1  ;;  %v2216_v42 = vpop.f32.mrb[95].mxu0 }
 0x1b1   :  { %v2300_v55 = vmax.f32 %v2284_v29, 0.0  ;;  %v2285_v48 = vadd.f32 %v4159_v19, %v2262_v30  ;;  %v3018_v25 = vadd.f32 %v3017_v21, %v3016_v41  ;;  %v2115_v26 = vadd.f32 %v3015_v59, %v4121_v49 }
 0x1b3   :  { %v2647_v40 = vpack.c.bf16 %v2300_v55, %v2300_v55  ;;  %v2301_v57 = vmax.f32 %v2285_v48, 0.0  ;;  %v2212_v56 = vadd.f32 %v2211_v34, %v2115_v26  ;;  %v2118_v31 = vadd.f32 %v3018_v25, %v4123_v50 }
 0x1b5   :  { %2381 = vst.msk [vmem:[%s4275_s4 + $0x10] sm:$0xf] %vm2376_vm1, %v2647_v40  ;;  %v2648_v32 = vpack.c.bf16 %v2301_v57, %v2301_v57  ;;  %v2263_v63 = vmul.f32 %v4153_v36, %v2212_v56  ;;  %v2215_v37 = vadd.f32 %v2214_v20, %v2118_v31  ;;  %v3019_v7 = vpop.f32.mrb[96].mxu1  ;;  %v2219_v61 = vpop.f32.mrb[96].mxu0 }
 0x1b6   :  { %v3020_v38 = vpop.f32.mrb[97].mxu1  ;;  %v2221_v12 = vpop.f32.mrb[97].mxu0 }
 0x1b7   :  { %2382 = vst.msk [vmem:[%s4275_s4 + $0x14] sm:$0xf] %vm2376_vm1, %v2648_v32  ;;  %v2286_v49 = vadd.f32 %v4159_v19, %v2263_v63  ;;  %v2264_v50 = vmul.f32 %v4153_v36, %v2215_v37  ;;  %v3021_v62 = vadd.f32 %v3020_v38, %v3019_v7  ;;  %v3022_v4 = vpop.f32.mrb[98].mxu1  ;;  %v2222_v35 = vpop.f32.mrb[98].mxu0 }
 0x1b8   :  { %v3023_v46 = vpop.f32.mrb[99].mxu1  ;;  %v2224_v52 = vpop.f32.mrb[99].mxu0 }
 0x1b9   :  { %v2302_v5 = vmax.f32 %v2286_v49, 0.0  ;;  %v2287_v53 = vadd.f32 %v4159_v19, %v2264_v50  ;;  %v3024_v54 = vadd.f32 %v3023_v46, %v3022_v4  ;;  %v2123_v13 = vadd.f32 %v3021_v62, %v4127_v6 }
 0x1bb   :  { %v2649_v14 = vpack.c.bf16 %v2302_v5, %v2302_v5  ;;  %v2303_v11 = vmax.f32 %v2287_v53, 0.0  ;;  %v2220_v33 = vadd.f32 %v2219_v61, %v2123_v13  ;;  %v2126_v58 = vadd.f32 %v3024_v54, %v4129_v8 }
 0x1bd   :  { %2383 = vst.msk [vmem:[%s4275_s4 + $0x18] sm:$0xf] %vm2376_vm1, %v2649_v14  ;;  %v2650_v17 = vpack.c.bf16 %v2303_v11, %v2303_v11  ;;  %v2265_v60 = vmul.f32 %v4153_v36, %v2220_v33  ;;  %v2223_v39 = vadd.f32 %v2222_v35, %v2126_v58  ;;  %v3025_v18 = vpop.f32.mrb[100].mxu1  ;;  %v2227_v0 = vpop.f32.mrb[100].mxu0 }
 0x1be   :  { %v3026_v47 = vpop.f32.mrb[101].mxu1  ;;  %v2229_v3 = vpop.f32.mrb[101].mxu0 }
 0x1bf   :  { %2384 = vst.msk [vmem:[%s4275_s4 + $0x1c] sm:$0xf] %vm2376_vm1, %v2650_v17  ;;  %v2288_v6 = vadd.f32 %v4159_v19, %v2265_v60  ;;  %v2266_v8 = vmul.f32 %v4153_v36, %v2223_v39  ;;  %v3027_v22 = vadd.f32 %v3026_v47, %v3025_v18  ;;  %v3028_v27 = vpop.f32.mrb[102].mxu1  ;;  %v2230_v9 = vpop.f32.mrb[102].mxu0 }
 0x1c0   :  { %v3029_v10 = vpop.f32.mrb[103].mxu1  ;;  %v2232_v28 = vpop.f32.mrb[103].mxu0 }
 0x1c1   :  { %v2304_v45 = vmax.f32 %v2288_v6, 0.0  ;;  %v2289_v15 = vadd.f32 %v4159_v19, %v2266_v8  ;;  %v3030_v34 = vadd.f32 %v3029_v10, %v3028_v27  ;;  %v2131_v16 = vadd.f32 %v3027_v22, %v4133_v23 }
 0x1c3   :  { %v2651_v51 = vpack.c.bf16 %v2304_v45, %v2304_v45  ;;  %v2305_v29 = vmax.f32 %v2289_v15, 0.0  ;;  %v2228_v30 = vadd.f32 %v2227_v0, %v2131_v16  ;;  %v2134_v59 = vadd.f32 %v3030_v34, %v4135_v24 }
 0x1c5   :  { %2385 = vst.msk [vmem:[%s4275_s4 + $0x20] sm:$0xf] %vm2376_vm1, %v2651_v51  ;;  %v2652_v41 = vpack.c.bf16 %v2305_v29, %v2305_v29  ;;  %v2267_v20 = vmul.f32 %v4153_v36, %v2228_v30  ;;  %v2231_v21 = vadd.f32 %v2230_v9, %v2134_v59  ;;  %v3031_v42 = vpop.f32.mrb[104].mxu1  ;;  %v2235_v55 = vpop.f32.mrb[104].mxu0 }
 0x1c6   :  { %v3032_v48 = vpop.f32.mrb[105].mxu1  ;;  %v2237_v25 = vpop.f32.mrb[105].mxu0 }
 0x1c7   :  { %2386 = vst.msk [vmem:[%s4275_s4 + $0x24] sm:$0xf] %vm2376_vm1, %v2652_v41  ;;  %v2290_v23 = vadd.f32 %v4159_v19, %v2267_v20  ;;  %v2268_v24 = vmul.f32 %v4153_v36, %v2231_v21  ;;  %v3033_v26 = vadd.f32 %v3032_v48, %v3031_v42  ;;  %v3034_v40 = vpop.f32.mrb[106].mxu1  ;;  %v2238_v57 = vpop.f32.mrb[106].mxu0 }
 0x1c8   :  { %v3035_v56 = vpop.f32.mrb[107].mxu1  ;;  %v2240_v31 = vpop.f32.mrb[107].mxu0 }
 0x1c9   :  { %v2306_v32 = vmax.f32 %v2290_v23, 0.0  ;;  %v2291_v63 = vadd.f32 %v4159_v19, %v2268_v24  ;;  %v3036_v37 = vadd.f32 %v3035_v56, %v3034_v40  ;;  %v2139_v7 = vadd.f32 %v3033_v26, %v4139_v43 }
 0x1cb   :  { %v2653_v61 = vpack.c.bf16 %v2306_v32, %v2306_v32  ;;  %v2307_v38 = vmax.f32 %v2291_v63, 0.0  ;;  %v2236_v12 = vadd.f32 %v2235_v55, %v2139_v7  ;;  %v2142_v49 = vadd.f32 %v3036_v37, %v4141_v44 }
 0x1cd   :  { %2387 = vst.msk [vmem:[%s4275_s4 + $0x28] sm:$0xf] %vm2376_vm1, %v2653_v61  ;;  %v2654_v50 = vpack.c.bf16 %v2307_v38, %v2307_v38  ;;  %v2269_v62 = vmul.f32 %v4153_v36, %v2236_v12  ;;  %v2239_v4 = vadd.f32 %v2238_v57, %v2142_v49  ;;  %v3037_v35 = vpop.f32.mrb[108].mxu1  ;;  %v2243_v46 = vpop.f32.mrb[108].mxu0 }
 0x1ce   :  { %v3038_v52 = vpop.f32.mrb[109].mxu1  ;;  %v2245_v5 = vpop.f32.mrb[109].mxu0 }
 0x1cf   :  { %2388 = vst.msk [vmem:[%s4275_s4 + $0x2c] sm:$0xf] %vm2376_vm1, %v2654_v50  ;;  %v2292_v43 = vadd.f32 %v4159_v19, %v2269_v62  ;;  %v2270_v44 = vmul.f32 %v4153_v36, %v2239_v4  ;;  %v3039_v53 = vadd.f32 %v3038_v52, %v3037_v35  ;;  %v3040_v54 = vpop.f32.mrb[110].mxu1  ;;  %v2246_v13 = vpop.f32.mrb[110].mxu0 }
 0x1d0   :  { %v3041_v14 = vpop.f32.mrb[111].mxu1  ;;  %v2248_v11 = vpop.f32.mrb[111].mxu0 }
 0x1d1   :  { %v2308_v33 = vmax.f32 %v2292_v43, 0.0  ;;  %v2293_v58 = vadd.f32 %v4159_v19, %v2270_v44  ;;  %v3042_v17 = vadd.f32 %v3041_v14, %v3040_v54  ;;  %v2147_v60 = vadd.f32 %v3039_v53, %v4145_v1 }
 0x1d3   :  { %v2655_v39 = vpack.c.bf16 %v2308_v33, %v2308_v33  ;;  %v2309_v18 = vmax.f32 %v2293_v58, 0.0  ;;  %v2244_v0 = vadd.f32 %v2243_v46, %v2147_v60  ;;  %v2150_v47 = vadd.f32 %v3042_v17, %v4147_v2 }
 0x1d5   :  { %2389 = vst.msk [vmem:[%s4275_s4 + $0x30] sm:$0xf] %vm2376_vm1, %v2655_v39  ;;  %v2656_v3 = vpack.c.bf16 %v2309_v18, %v2309_v18  ;;  %v2271_v6 = vmul.f32 %v4153_v36, %v2244_v0  ;;  %v2247_v8 = vadd.f32 %v2246_v13, %v2150_v47 }
 0x1d7   :  { %2390 = vst.msk [vmem:[%s4275_s4 + $0x34] sm:$0xf] %vm2376_vm1, %v2656_v3  ;;  %v2294_v1 = vadd.f32 %v4159_v19, %v2271_v6  ;;  %v2272_v22 = vmul.f32 %v4153_v36, %v2247_v8 }
 0x1d9   :  { %v2310_v27 = vmax.f32 %v2294_v1, 0.0  ;;  %v2295_v2 = vadd.f32 %v4159_v19, %v2272_v22 }
 0x1db   :  { %v2657_v9 = vpack.c.bf16 %v2310_v27, %v2310_v27  ;;  %v2311_v10 = vmax.f32 %v2295_v2, 0.0 }
 0x1dd   :  { %2391 = vst.msk [vmem:[%s4275_s4 + $0x38] sm:$0xf] %vm2376_vm1, %v2657_v9  ;;  %v2658_v28 = vpack.c.bf16 %v2311_v10, %v2311_v10 }
 0x1df   :  { %2392 = vst.msk [vmem:[%s4275_s4 + $0x3c] sm:$0xf] %vm2376_vm1, %v2658_v28 }

// kernel: psmnet_forward.105
= control target key start
LH: loop header
LB: loop body
LE: loop exit
PB: predicated region body
PF: predicated region fallthrough
CT: control target
= control target key end

     0   :  { %vm794_vm0 = vcmask 785408   ;;  %vm1333_vm1 = vcmask 257024   ;;  %s2415_s1 = inlined_call_operand.vmem [shape: bf16[864,32], index: 1, kind: input, shape index: {}]   ;;  %s2416_s0 = inlined_call_operand.vmem [shape: bf16[128,864], index: 0, kind: input, shape index: {}]   ;;  %s2417_s2 = inlined_call_operand.vmem [shape: f32[1,32], index: 2, kind: input, shape index: {}]   ;;  %s2418_s3 = inlined_call_operand.vmem [shape: f32[1,32], index: 3, kind: input, shape index: {}]   ;;  %s2419_s4 = inlined_call_operand.vmem [shape: bf16[128,32], index: 4, kind: output, shape index: {}]  }
   0x1   :  { %v1740_v0 = vld [vmem:[%s2415_s1 + $0x40] sm:$0xff]   ;;  %v1744_v4 = vld [vmem:[%s2415_s1 + $0x48] sm:$0xff]   ;;  %v1748_v8 = vld [vmem:[%s2415_s1 + $0x50] sm:$0xff]  }
   0x2   :  { %v1741_v1 = vld [vmem:[%s2415_s1 + $0xc0] sm:$0xff]   ;;  %1506 = vmatprep.subr.bf16.mxu0 %v1740_v0  ;;  %v1745_v5 = vld [vmem:[%s2415_s1 + $0xc8] sm:$0xff]   ;;  %v1749_v9 = vld [vmem:[%s2415_s1 + $0xd0] sm:$0xff]  }
   0x3   :  { %v1742_v2 = vld [vmem:[%s2415_s1] sm:$0xff]   ;;  %1570 = vmatprep.subr.bf16.mxu1 %v1741_v1  ;;  %v1746_v6 = vld [vmem:[%s2415_s1 + $0x8] sm:$0xff]   ;;  %v1750_v10 = vld [vmem:[%s2415_s1 + $0x10] sm:$0xff]  }
   0x4   :  { %v1743_v3 = vld [vmem:[%s2415_s1 + $0x80] sm:$0xff]   ;;  %1507 = vmatpush3.bf16.msra.mxu0 %v1742_v2  ;;  %v1747_v7 = vld [vmem:[%s2415_s1 + $0x88] sm:$0xff]   ;;  %v1751_v11 = vld [vmem:[%s2415_s1 + $0x90] sm:$0xff]  }
   0x5   :  { %1571 = vmatpush3.bf16.msra.mxu1 %v1743_v3  ;;  %1508 = vmatprep.subr.bf16.mxu0 %v1744_v4  ;;  %v1752_v12 = vld [vmem:[%s2415_s1 + $0x58] sm:$0xff]   ;;  %v1756_v16 = vld [vmem:[%s2415_s1 + $0x60] sm:$0xff]   ;;  %v1760_v20 = vld [vmem:[%s2415_s1 + $0x68] sm:$0xff]  }
   0x6   :  { %1572 = vmatprep.subr.bf16.mxu1 %v1745_v5  ;;  %v1753_v13 = vld [vmem:[%s2415_s1 + $0xd8] sm:$0xff]   ;;  %v1757_v17 = vld [vmem:[%s2415_s1 + $0xe0] sm:$0xff]   ;;  %v1761_v21 = vld [vmem:[%s2415_s1 + $0xe8] sm:$0xff]  }
   0x7   :  { %v1754_v14 = vld [vmem:[%s2415_s1 + $0x18] sm:$0xff]   ;;  %v1758_v18 = vld [vmem:[%s2415_s1 + $0x20] sm:$0xff]   ;;  %v1762_v22 = vld [vmem:[%s2415_s1 + $0x28] sm:$0xff]  }
   0x8   :  { %1509 = vmatpush3.bf16.msra.mxu0 %v1746_v6  ;;  %v1755_v15 = vld [vmem:[%s2415_s1 + $0x98] sm:$0xff]   ;;  %v1759_v19 = vld [vmem:[%s2415_s1 + $0xa0] sm:$0xff]   ;;  %v1763_v23 = vld [vmem:[%s2415_s1 + $0xa8] sm:$0xff]  }
   0x9   :  { %1573 = vmatpush3.bf16.msra.mxu1 %v1747_v7  ;;  %1510 = vmatprep.subr.bf16.mxu0 %v1748_v8  ;;  %v1764_v24 = vld [vmem:[%s2415_s1 + $0x70] sm:$0xff]   ;;  %v1768_v28 = vld [vmem:[%s2415_s1 + $0x78] sm:$0xff]   ;;  %v1774_v33 = vld [vmem:[%s2416_s0 + $0x4] ss:$28 sps:$4 sm:$0xff]  }
   0xa   :  { %1574 = vmatprep.subr.bf16.mxu1 %v1749_v9  ;;  %v1765_v25 = vld [vmem:[%s2415_s1 + $0xf0] sm:$0xff]   ;;  %v1769_v29 = vld [vmem:[%s2415_s1 + $0xf8] sm:$0xff]   ;;  %v1775_v34 = vld [vmem:[%s2416_s0 + $0x8] ss:$28 sps:$4 sm:$0xff]   ;;  %851 = vmatprep.mubr.bf16.mxu0 %v1774_v33 }
   0xb   :  { %v1766_v26 = vld [vmem:[%s2415_s1 + $0x30] sm:$0xff]   ;;  %v1770_v30 = vld [vmem:[%s2415_s1 + $0x38] sm:$0xff]   ;;  %v1777_v35 = vld [vmem:[%s2416_s0 + $0xc] ss:$28 sps:$4 sm:$0xff]  }
   0xc   :  { %1511 = vmatpush3.bf16.msra.mxu0 %v1750_v10  ;;  %v1767_v27 = vld [vmem:[%s2415_s1 + $0xb0] sm:$0xff]   ;;  %v1771_v31 = vld [vmem:[%s2415_s1 + $0xb8] sm:$0xff]   ;;  %v1778_v36 = vld [vmem:[%s2415_s1 + $0x140] sm:$0xff]   ;;  %948 = vmatprep.mubr.bf16.mxu1 %v1777_v35 }
   0xd   :  { %1575 = vmatpush3.bf16.msra.mxu1 %v1751_v11  ;;  %1512 = vmatprep.subr.bf16.mxu0 %v1752_v12  ;;  %v1772_v32 = vld [vmem:[%s2416_s0] ss:$28 sps:$4 sm:$0xff]   ;;  %v1784_v40 = vld [vmem:[%s2416_s0 + $0x38] ss:$28 sps:$4 sm:$0xff]   ;;  %v1786_v42 = vld [vmem:[%s2415_s1 + $0x148] sm:$0xff]  }
   0xe   :  { %1576 = vmatprep.subr.bf16.mxu1 %v1753_v13  ;;  %v1779_v37 = vld [vmem:[%s2415_s1 + $0x100] sm:$0xff]   ;;  %v1780_v38 = vld [vmem:[%s2416_s0 + $0x3c] ss:$28 sps:$4 sm:$0xff]   ;;  %v1787_v43 = vld [vmem:[%s2415_s1 + $0x108] sm:$0xff]  }
   0xf   :  { %v1782_v39 = vld [vmem:[%s2416_s0 + $0x44] ss:$28 sps:$4 sm:$0xff]   ;;  %v1788_v44 = vld [vmem:[%s2416_s0 + $0x74] ss:$28 sps:$4 sm:$0xff]   ;;  %v1790_v45 = vld [vmem:[%s2416_s0 + $0x7c] ss:$28 sps:$4 sm:$0xff]  }
  0x10   :  { %1513 = vmatpush3.bf16.msra.mxu0 %v1754_v14  ;;  %v1785_v41 = vld [vmem:[%s2416_s0 + $0x40] ss:$28 sps:$4 sm:$0xff]   ;;  %v1794_v46 = vld [vmem:[%s2415_s1 + $0x150] sm:$0xff]   ;;  %v1796_v50 = vld [vmem:[%s2416_s0 + $0xac] ss:$28 sps:$4 sm:$0xff]  }
  0x11   :  { %1577 = vmatpush3.bf16.msra.mxu1 %v1755_v15  ;;  %1514 = vmatprep.subr.bf16.mxu0 %v1756_v16  ;;  %v1795_v47 = vld [vmem:[%s2415_s1 + $0x110] sm:$0xff]   ;;  %v1802_v52 = vld [vmem:[%s2415_s1 + $0x158] sm:$0xff]   ;;  %v1800_v54 = vld [vmem:[%s2416_s0 + $0xa8] ss:$28 sps:$4 sm:$0xff]  }
  0x12   :  { %1578 = vmatprep.subr.bf16.mxu1 %v1757_v17  ;;  %v1792_v48 = vld [vmem:[%s2416_s0 + $0x70] ss:$28 sps:$4 sm:$0xff]   ;;  %v1793_v49 = vld [vmem:[%s2416_s0 + $0x78] ss:$28 sps:$4 sm:$0xff]   ;;  %v1810_v55 = vld [vmem:[%s2415_s1 + $0x160] sm:$0xff]  }
  0x13   :  { %v1798_v51 = vld [vmem:[%s2416_s0 + $0xb4] ss:$28 sps:$4 sm:$0xff]   ;;  %v1803_v53 = vld [vmem:[%s2415_s1 + $0x118] sm:$0xff]   ;;  %v1811_v57 = vld [vmem:[%s2415_s1 + $0x120] sm:$0xff]  }
  0x14   :  { %1515 = vmatpush3.bf16.msra.mxu0 %v1758_v18  ;;  %v1801_v56 = vld [vmem:[%s2416_s0 + $0xb0] ss:$28 sps:$4 sm:$0xff]   ;;  %v1812_v58 = vld [vmem:[%s2415_s1 + $0x180] sm:$0xff]   ;;  %v1813_v2 = vld [vmem:[%s2416_s0 + $0x11c] ss:$28 sps:$4 sm:$0xff]  }
  0x15   :  { %1579 = vmatpush3.bf16.msra.mxu1 %v1759_v19  ;;  %1516 = vmatprep.subr.bf16.mxu0 %v1760_v20  ;;  %v1804_v59 = vld [vmem:[%s2416_s0 + $0xe4] ss:$28 sps:$4 sm:$0xff]   ;;  %v1806_v60 = vld [vmem:[%s2416_s0 + $0xec] ss:$28 sps:$4 sm:$0xff]   ;;  %v1828_v4 = vld [vmem:[%s2415_s1 + $0x170] sm:$0xff]  }
  0x16   :  { %1580 = vmatprep.subr.bf16.mxu1 %v1761_v21  ;;  %v1819_v61 = vld [vmem:[%s2415_s1 + $0x168] sm:$0xff]   ;;  %v1808_v63 = vld [vmem:[%s2416_s0 + $0xe0] ss:$28 sps:$4 sm:$0xff]   ;;  %v1829_v5 = vld [vmem:[%s2415_s1 + $0x130] sm:$0xff]  }
  0x17   :  { %v1820_v62 = vld [vmem:[%s2415_s1 + $0x128] sm:$0xff]   ;;  %v1815_v3 = vld [vmem:[%s2416_s0 + $0x124] ss:$28 sps:$4 sm:$0xff]   ;;  %v1830_v6 = vld [vmem:[%s2415_s1 + $0x190] sm:$0xff]  }
  0x18   :  { %1517 = vmatpush3.bf16.msra.mxu0 %v1762_v22  ;;  %v1809_v0 = vld [vmem:[%s2416_s0 + $0xe8] ss:$28 sps:$4 sm:$0xff]   ;;  %v1817_v7 = vld [vmem:[%s2416_s0 + $0x118] ss:$28 sps:$4 sm:$0xff]   ;;  %v1818_v8 = vld [vmem:[%s2416_s0 + $0x120] ss:$28 sps:$4 sm:$0xff]  }
  0x19   :  { %1581 = vmatpush3.bf16.msra.mxu1 %v1763_v23  ;;  %1518 = vmatprep.subr.bf16.mxu0 %v1764_v24  ;;  %v1825_v1 = vld [vmem:[%s2415_s1 + $0x188] sm:$0xff]   ;;  %v1821_v9 = vld [vmem:[%s2416_s0 + $0x154] ss:$28 sps:$4 sm:$0xff]   ;;  %v1837_v10 = vld [vmem:[%s2415_s1 + $0x178] sm:$0xff]  }
  0x1a   :  { %1582 = vmatprep.subr.bf16.mxu1 %v1765_v25  ;;  %v1823_v11 = vld [vmem:[%s2416_s0 + $0x15c] ss:$28 sps:$4 sm:$0xff]   ;;  %v1840_v14 = vld [vmem:[%s2415_s1 + $0x1a0] sm:$0xff]   ;;  %v1844_v15 = vld [vmem:[%s2415_s1 + $0x1a8] sm:$0xff]  }
  0x1b   :  { %v1838_v12 = vld [vmem:[%s2415_s1 + $0x198] sm:$0xff]   ;;  %v1826_v16 = vld [vmem:[%s2416_s0 + $0x150] ss:$28 sps:$4 sm:$0xff]   ;;  %v1835_v20 = vld [vmem:[%s2416_s0 + $0x188] ss:$28 sps:$4 sm:$0xff]  }
  0x1c   :  { %1519 = vmatpush3.bf16.msra.mxu0 %v1766_v26  ;;  %v1839_v13 = vld [vmem:[%s2415_s1 + $0x138] sm:$0xff]   ;;  %v1831_v18 = vld [vmem:[%s2416_s0 + $0x18c] ss:$28 sps:$4 sm:$0xff]   ;;  %v1833_v19 = vld [vmem:[%s2416_s0 + $0x194] ss:$28 sps:$4 sm:$0xff]  }
  0x1d   :  { %1583 = vmatpush3.bf16.msra.mxu1 %v1767_v27  ;;  %1520 = vmatprep.subr.bf16.mxu0 %v1768_v28  ;;  %v1827_v17 = vld [vmem:[%s2416_s0 + $0x158] ss:$28 sps:$4 sm:$0xff]   ;;  %v1836_v21 = vld [vmem:[%s2416_s0 + $0x190] ss:$28 sps:$4 sm:$0xff]   ;;  %v1853_v27 = vld [vmem:[%s2416_s0 + $0x88] ss:$28 sps:$4 sm:$0xff]  }
  0x1e   :  { %1584 = vmatprep.subr.bf16.mxu1 %v1769_v29  ;;  %v1843_v22 = vld [vmem:[%s2416_s0 + $0x14] ss:$28 sps:$4 sm:$0xff]   ;;  %v1847_v26 = vld [vmem:[%s2416_s0 + $0x4c] ss:$28 sps:$4 sm:$0xff]   ;;  %v1850_v29 = vld [vmem:[%s2416_s0 + $0x84] ss:$28 sps:$4 sm:$0xff]  }
  0x1f   :  { %v1845_v23 = vld [vmem:[%s2416_s0 + $0x18] ss:$28 sps:$4 sm:$0xff]   ;;  %v1841_v24 = vld [vmem:[%s2416_s0 + $0x10] ss:$28 sps:$4 sm:$0xff]   ;;  %v1849_v28 = vld [vmem:[%s2416_s0 + $0x48] ss:$28 sps:$4 sm:$0xff]  }
  0x20   :  { %1521 = vmatpush3.bf16.msra.mxu0 %v1770_v30  ;;  %v1846_v25 = vld [vmem:[%s2416_s0 + $0x50] ss:$28 sps:$4 sm:$0xff]   ;;  %v1854_v30 = vld [vmem:[%s2416_s0 + $0xc0] ss:$28 sps:$4 sm:$0xff]   ;;  %v1869_v35 = vld [vmem:[%s2416_s0 + $0x168] ss:$28 sps:$4 sm:$0xff]  }
  0x21   :  { %1585 = vmatpush3.bf16.msra.mxu1 %v1771_v31  ;;  %1634 = vmatprep.subr.bf16.mxu0 %v1778_v36  ;;  %v1861_v31 = vld [vmem:[%s2416_s0 + $0xf8] ss:$28 sps:$4 sm:$0xff]  }
  0x22   :  { %1712 = vmatprep.subr.bf16.mxu1 %v1812_v58  ;;  %v1855_v33 = vld [vmem:[%s2416_s0 + $0xbc] ss:$28 sps:$4 sm:$0xff]  }
  0x23   :  { %852 = vmatmul.mubr.bf16.vlgmr.msra.gmra.mrb[0].mxu0 %v1772_v32  ;;  %v1852_v32 = vld [vmem:[%s2416_s0 + $0x80] ss:$28 sps:$4 sm:$0xff]   ;;  %v1857_v36 = vld [vmem:[%s2416_s0 + $0xb8] ss:$28 sps:$4 sm:$0xff]  }
  0x24   :  { %949 = vmatmul.mubr.bf16.vlgmr.msra.gmra.mrb[0].mxu1 %v1775_v34  ;;  %1635 = vmatpush3.bf16.msra.mxu0 %v1779_v37  ;;  %v1862_v34 = vld [vmem:[%s2416_s0 + $0x130] ss:$28 sps:$4 sm:$0xff]  }
  0x25   :  { %859 = vmatprep.mubr.bf16.mxu0 %v1780_v38  ;;  %956 = vmatprep.mubr.bf16.mxu1 %v1782_v39  ;;  %v1858_v37 = vld [vmem:[%s2416_s0 + $0xf4] ss:$28 sps:$4 sm:$0xff]   ;;  %v1870_v38 = vld [vmem:[%s2416_s0 + $0x1a0] ss:$28 sps:$4 sm:$0xff]  }
  0x26   :  { %1636 = vmatprep.subr.bf16.mxu0 %v1786_v42  ;;  %1713 = vmatpush3.bf16.msra.mxu1 %v1812_v58  ;;  %v1860_v39 = vld [vmem:[%s2416_s0 + $0xf0] ss:$28 sps:$4 sm:$0xff]   ;;  %v1866_v42 = vld [vmem:[%s2416_s0 + $0x164] ss:$28 sps:$4 sm:$0xff]  }
  0x27   :  { %1714 = vmatprep.subr.bf16.mxu1 %v1825_v1 }
  0x28   :  { %1637 = vmatpush3.bf16.msra.mxu0 %v1787_v43  ;;  %v1868_v43 = vld [vmem:[%s2416_s0 + $0x160] ss:$28 sps:$4 sm:$0xff]  }
  0x29   :  { %1638 = vmatprep.subr.bf16.mxu0 %v1794_v46 }
  0x2a   :  { %1715 = vmatpush3.bf16.msra.mxu1 %v1825_v1 }
  0x2b   :  { %860 = vmatmul.mubr.bf16.gmra.mrb[4].mxu0 %v1784_v40  ;;  %1716 = vmatprep.subr.bf16.mxu1 %v1830_v6  ;;  %v1863_v40 = vld [vmem:[%s2416_s0 + $0x12c] ss:$28 sps:$4 sm:$0xff]  }
  0x2c   :  { %957 = vmatmul.mubr.bf16.gmra.mrb[4].mxu1 %v1785_v41  ;;  %867 = vmatprep.mubr.bf16.mxu0 %v1788_v44  ;;  %v1865_v41 = vld [vmem:[%s2416_s0 + $0x128] ss:$28 sps:$4 sm:$0xff]   ;;  %v1871_v44 = vld [vmem:[%s2416_s0 + $0x19c] ss:$28 sps:$4 sm:$0xff]  }
  0x2d   :  { %964 = vmatprep.mubr.bf16.mxu1 %v1790_v45  ;;  %1639 = vmatpush3.bf16.msra.mxu0 %v1795_v47  ;;  %v1873_v45 = vld [vmem:[%s2416_s0 + $0x198] ss:$28 sps:$4 sm:$0xff]  }
  0x2e   :  { %1640 = vmatprep.subr.bf16.mxu0 %v1802_v52  ;;  %1717 = vmatpush3.bf16.msra.mxu1 %v1830_v6 }
  0x2f   :  { %1718 = vmatprep.subr.bf16.mxu1 %v1838_v12 }
  0x31   :  { %1641 = vmatpush3.bf16.msra.mxu0 %v1803_v53 }
  0x32   :  { %1642 = vmatprep.subr.bf16.mxu0 %v1810_v55  ;;  %1719 = vmatpush3.bf16.msra.mxu1 %v1838_v12 }
  0x33   :  { %868 = vmatmul.mubr.bf16.gmra.mrb[8].mxu0 %v1792_v48  ;;  %1720 = vmatprep.subr.bf16.mxu1 %v1840_v14 }
  0x34   :  { %965 = vmatmul.mubr.bf16.gmra.mrb[8].mxu1 %v1793_v49  ;;  %875 = vmatprep.mubr.bf16.mxu0 %v1796_v50 }
  0x35   :  { %972 = vmatprep.mubr.bf16.mxu1 %v1798_v51  ;;  %1643 = vmatpush3.bf16.msra.mxu0 %v1811_v57 }
  0x36   :  { %1644 = vmatprep.subr.bf16.mxu0 %v1819_v61  ;;  %1721 = vmatpush3.bf16.msra.mxu1 %v1840_v14 }
  0x37   :  { %1722 = vmatprep.subr.bf16.mxu1 %v1844_v15 }
  0x39   :  { %1645 = vmatpush3.bf16.msra.mxu0 %v1820_v62 }
  0x3a   :  { %1646 = vmatprep.subr.bf16.mxu0 %v1828_v4  ;;  %1723 = vmatpush3.bf16.msra.mxu1 %v1844_v15 }
  0x3b   :  { %876 = vmatmul.mubr.bf16.gmra.mrb[12].mxu0 %v1800_v54 }
  0x3c   :  { %973 = vmatmul.mubr.bf16.gmra.mrb[12].mxu1 %v1801_v56  ;;  %883 = vmatprep.mubr.bf16.mxu0 %v1804_v59 }
  0x3d   :  { %980 = vmatprep.mubr.bf16.mxu1 %v1806_v60  ;;  %1647 = vmatpush3.bf16.msra.mxu0 %v1829_v5 }
  0x3e   :  { %1648 = vmatprep.subr.bf16.mxu0 %v1837_v10 }
  0x41   :  { %1649 = vmatpush3.bf16.msra.mxu0 %v1839_v13 }
  0x43   :  { %884 = vmatmul.mubr.bf16.gmra.mrb[16].mxu0 %v1808_v63 }
  0x44   :  { %981 = vmatmul.mubr.bf16.gmra.mrb[16].mxu1 %v1809_v0  ;;  %891 = vmatprep.mubr.bf16.mxu0 %v1813_v2 }
  0x45   :  { %988 = vmatprep.mubr.bf16.mxu1 %v1815_v3 }
  0x4b   :  { %892 = vmatmul.mubr.bf16.gmra.mrb[20].mxu0 %v1817_v7 }
  0x4c   :  { %989 = vmatmul.mubr.bf16.gmra.mrb[20].mxu1 %v1818_v8  ;;  %899 = vmatprep.mubr.bf16.mxu0 %v1821_v9 }
  0x4d   :  { %996 = vmatprep.mubr.bf16.mxu1 %v1823_v11 }
  0x53   :  { %900 = vmatmul.mubr.bf16.gmra.mrb[24].mxu0 %v1826_v16 }
  0x54   :  { %997 = vmatmul.mubr.bf16.gmra.mrb[24].mxu1 %v1827_v17  ;;  %907 = vmatprep.mubr.bf16.mxu0 %v1831_v18 }
  0x55   :  { %1004 = vmatprep.mubr.bf16.mxu1 %v1833_v19 }
  0x5b   :  { %908 = vmatmul.mubr.bf16.gmra.mrb[28].mxu0 %v1835_v20 }
  0x5c   :  { %1005 = vmatmul.mubr.bf16.gmra.mrb[28].mxu1 %v1836_v21  ;;  %1045 = vmatprep.mubr.bf16.mxu0 %v1843_v22 }
  0x5d   :  { %1724 = vmatprep.mubr.msk.bf16.mxu1 %vm794_vm0, %v1845_v23 }
  0x63   :  { %1046 = vmatmul.mubr.bf16.vlgmr.msra.gmra.mrb[32].mxu0 %v1841_v24 }
  0x64   :  { %1725 = vmatmul.mubr.msk.bf16.vlgmr.msra.gmra.mrb[32].mxu1 %vm794_vm0, %v1846_v25  ;;  %1053 = vmatprep.mubr.bf16.mxu0 %v1847_v26 }
  0x65   :  { %1728 = vmatprep.mubr.msk.bf16.mxu1 %vm794_vm0, %v1853_v27 }
  0x6b   :  { %1054 = vmatmul.mubr.bf16.gmra.mrb[36].mxu0 %v1849_v28 }
  0x6c   :  { %1061 = vmatprep.mubr.bf16.mxu0 %v1850_v29  ;;  %1729 = vmatmul.mubr.msk.bf16.gmra.mrb[36].mxu1 %vm794_vm0, %v1854_v30 }
  0x6d   :  { %1732 = vmatprep.mubr.msk.bf16.mxu1 %vm794_vm0, %v1861_v31 }
  0x73   :  { %1062 = vmatmul.mubr.bf16.gmra.mrb[40].mxu0 %v1852_v32 }
  0x74   :  { %1069 = vmatprep.mubr.bf16.mxu0 %v1855_v33  ;;  %1733 = vmatmul.mubr.msk.bf16.gmra.mrb[40].mxu1 %vm794_vm0, %v1862_v34 }
  0x75   :  { %1736 = vmatprep.mubr.msk.bf16.mxu1 %vm794_vm0, %v1869_v35 }
  0x7b   :  { %1070 = vmatmul.mubr.bf16.gmra.mrb[44].mxu0 %v1857_v36 }
  0x7c   :  { %1077 = vmatprep.mubr.bf16.mxu0 %v1858_v37  ;;  %1737 = vmatmul.mubr.msk.bf16.gmra.mrb[44].mxu1 %vm794_vm0, %v1870_v38 }
  0x83   :  { %1078 = vmatmul.mubr.bf16.gmra.mrb[48].mxu0 %v1860_v39 }
  0x84   :  { %1085 = vmatprep.mubr.bf16.mxu0 %v1863_v40 }
  0x8b   :  { %1086 = vmatmul.mubr.bf16.gmra.mrb[52].mxu0 %v1865_v41 }
  0x8c   :  { %1093 = vmatprep.mubr.bf16.mxu0 %v1866_v42 }
  0x93   :  { %1094 = vmatmul.mubr.bf16.gmra.mrb[56].mxu0 %v1868_v43 }
  0x94   :  { %1101 = vmatprep.mubr.bf16.mxu0 %v1871_v44 }
  0x9b   :  { %1102 = vmatmul.mubr.bf16.gmra.mrb[60].mxu0 %v1873_v45 }
  0xf6   :  { %v1522_v46 = vpop.f32.mrb[0].mxu0 }
  0xf7   :  { %v1586_v47 = vpop.f32.mrb[0].mxu1  ;;  %v1523_v48 = vpop.f32.mrb[1].mxu0 }
  0xf8   :  { %v1524_v49 = vadd.f32 %v1523_v48, %v1522_v46  ;;  %v1587_v50 = vpop.f32.mrb[1].mxu1  ;;  %v1525_v51 = vpop.f32.mrb[2].mxu0 }
  0xf9   :  { %v1588_v52 = vadd.f32 %v1587_v50, %v1586_v47  ;;  %v1589_v53 = vpop.f32.mrb[2].mxu1  ;;  %v1526_v54 = vpop.f32.mrb[3].mxu0 }
  0xfa   :  { %v1527_v55 = vadd.f32 %v1526_v54, %v1525_v51  ;;  %v1590_v56 = vpop.f32.mrb[3].mxu1 }
  0xfb   :  { %v2237_v57 = vadd.f32 %v1588_v52, %v1524_v49  ;;  %v1591_v58 = vadd.f32 %v1590_v56, %v1589_v53 }
  0xfd   :  { %v2239_v59 = vadd.f32 %v1591_v58, %v1527_v55 }
  0xfe   :  { %v1528_v60 = vpop.f32.mrb[4].mxu0 }
  0xff   :  { %v1592_v61 = vpop.f32.mrb[4].mxu1  ;;  %v1529_v62 = vpop.f32.mrb[5].mxu0 }
 0x100   :  { %v1530_v63 = vadd.f32 %v1529_v62, %v1528_v60  ;;  %v1593_v0 = vpop.f32.mrb[5].mxu1  ;;  %v1531_v1 = vpop.f32.mrb[6].mxu0 }
 0x101   :  { %v1594_v2 = vadd.f32 %v1593_v0, %v1592_v61  ;;  %v1595_v3 = vpop.f32.mrb[6].mxu1  ;;  %v1532_v4 = vpop.f32.mrb[7].mxu0 }
 0x102   :  { %v1533_v5 = vadd.f32 %v1532_v4, %v1531_v1  ;;  %v1596_v6 = vpop.f32.mrb[7].mxu1 }
 0x103   :  { %v2241_v7 = vadd.f32 %v1594_v2, %v1530_v63  ;;  %v1597_v8 = vadd.f32 %v1596_v6, %v1595_v3 }
 0x105   :  { %v2243_v9 = vadd.f32 %v1597_v8, %v1533_v5 }
 0x106   :  { %v1534_v10 = vpop.f32.mrb[8].mxu0 }
 0x107   :  { %v1598_v11 = vpop.f32.mrb[8].mxu1  ;;  %v1535_v12 = vpop.f32.mrb[9].mxu0 }
 0x108   :  { %v1536_v13 = vadd.f32 %v1535_v12, %v1534_v10  ;;  %v1599_v14 = vpop.f32.mrb[9].mxu1  ;;  %v1537_v15 = vpop.f32.mrb[10].mxu0 }
 0x109   :  { %v1600_v16 = vadd.f32 %v1599_v14, %v1598_v11  ;;  %v1601_v17 = vpop.f32.mrb[10].mxu1  ;;  %v1538_v18 = vpop.f32.mrb[11].mxu0 }
 0x10a   :  { %v1539_v19 = vadd.f32 %v1538_v18, %v1537_v15  ;;  %v1602_v20 = vpop.f32.mrb[11].mxu1 }
 0x10b   :  { %v2245_v21 = vadd.f32 %v1600_v16, %v1536_v13  ;;  %v1603_v22 = vadd.f32 %v1602_v20, %v1601_v17 }
 0x10d   :  { %v2247_v23 = vadd.f32 %v1603_v22, %v1539_v19 }
 0x10e   :  { %v1540_v24 = vpop.f32.mrb[12].mxu0 }
 0x10f   :  { %v1604_v25 = vpop.f32.mrb[12].mxu1  ;;  %v1541_v26 = vpop.f32.mrb[13].mxu0 }
 0x110   :  { %v1542_v27 = vadd.f32 %v1541_v26, %v1540_v24  ;;  %v1605_v28 = vpop.f32.mrb[13].mxu1  ;;  %v1543_v29 = vpop.f32.mrb[14].mxu0 }
 0x111   :  { %v1606_v30 = vadd.f32 %v1605_v28, %v1604_v25  ;;  %v1607_v31 = vpop.f32.mrb[14].mxu1  ;;  %v1544_v32 = vpop.f32.mrb[15].mxu0 }
 0x112   :  { %v1545_v33 = vadd.f32 %v1544_v32, %v1543_v29  ;;  %v1608_v34 = vpop.f32.mrb[15].mxu1 }
 0x113   :  { %v2249_v35 = vadd.f32 %v1606_v30, %v1542_v27  ;;  %v1609_v36 = vadd.f32 %v1608_v34, %v1607_v31 }
 0x115   :  { %v2251_v37 = vadd.f32 %v1609_v36, %v1545_v33 }
 0x116   :  { %v1546_v38 = vpop.f32.mrb[16].mxu0 }
 0x117   :  { %v1610_v39 = vpop.f32.mrb[16].mxu1  ;;  %v1547_v40 = vpop.f32.mrb[17].mxu0 }
 0x118   :  { %v1548_v41 = vadd.f32 %v1547_v40, %v1546_v38  ;;  %v1611_v42 = vpop.f32.mrb[17].mxu1  ;;  %v1549_v43 = vpop.f32.mrb[18].mxu0 }
 0x119   :  { %v1612_v44 = vadd.f32 %v1611_v42, %v1610_v39  ;;  %v1613_v45 = vpop.f32.mrb[18].mxu1  ;;  %v1550_v46 = vpop.f32.mrb[19].mxu0 }
 0x11a   :  { %v1551_v47 = vadd.f32 %v1550_v46, %v1549_v43  ;;  %v1614_v48 = vpop.f32.mrb[19].mxu1 }
 0x11b   :  { %v2253_v49 = vadd.f32 %v1612_v44, %v1548_v41  ;;  %v1615_v50 = vadd.f32 %v1614_v48, %v1613_v45 }
 0x11d   :  { %v2255_v51 = vadd.f32 %v1615_v50, %v1551_v47  ;;  %v2273_v50 = vld [vmem:[%s2417_s2] ss:$0 sm:$0xff] }
 0x11e   :  { %v1552_v52 = vpop.f32.mrb[20].mxu0 }
 0x11f   :  { %v1616_v53 = vpop.f32.mrb[20].mxu1  ;;  %v1553_v54 = vpop.f32.mrb[21].mxu0 }
 0x120   :  { %v1554_v55 = vadd.f32 %v1553_v54, %v1552_v52  ;;  %v1617_v56 = vpop.f32.mrb[21].mxu1  ;;  %v1555_v58 = vpop.f32.mrb[22].mxu0  ;;  %v2279_v54 = vld [vmem:[%s2418_s3] ss:$0 sm:$0xff] }
 0x121   :  { %v1618_v60 = vadd.f32 %v1617_v56, %v1616_v53  ;;  %v1619_v61 = vpop.f32.mrb[22].mxu1  ;;  %v1556_v62 = vpop.f32.mrb[23].mxu0 }
 0x122   :  { %v1557_v63 = vadd.f32 %v1556_v62, %v1555_v58  ;;  %v1620_v0 = vpop.f32.mrb[23].mxu1 }
 0x123   :  { %v2257_v1 = vadd.f32 %v1618_v60, %v1554_v55  ;;  %v1621_v2 = vadd.f32 %v1620_v0, %v1619_v61 }
 0x125   :  { %v2259_v3 = vadd.f32 %v1621_v2, %v1557_v63 }
 0x126   :  { %v1558_v4 = vpop.f32.mrb[24].mxu0 }
 0x127   :  { %v1622_v5 = vpop.f32.mrb[24].mxu1  ;;  %v1559_v6 = vpop.f32.mrb[25].mxu0 }
 0x128   :  { %v1560_v8 = vadd.f32 %v1559_v6, %v1558_v4  ;;  %v1623_v10 = vpop.f32.mrb[25].mxu1  ;;  %v1561_v11 = vpop.f32.mrb[26].mxu0 }
 0x129   :  { %v1624_v12 = vadd.f32 %v1623_v10, %v1622_v5  ;;  %v1625_v13 = vpop.f32.mrb[26].mxu1  ;;  %v1562_v14 = vpop.f32.mrb[27].mxu0 }
 0x12a   :  { %v1563_v15 = vadd.f32 %v1562_v14, %v1561_v11  ;;  %v1626_v16 = vpop.f32.mrb[27].mxu1 }
 0x12b   :  { %v2261_v17 = vadd.f32 %v1624_v12, %v1560_v8  ;;  %v1627_v18 = vadd.f32 %v1626_v16, %v1625_v13 }
 0x12d   :  { %v2263_v19 = vadd.f32 %v1627_v18, %v1563_v15 }
 0x12e   :  { %v1564_v20 = vpop.f32.mrb[28].mxu0 }
 0x12f   :  { %v1628_v22 = vpop.f32.mrb[28].mxu1  ;;  %v1565_v24 = vpop.f32.mrb[29].mxu0 }
 0x130   :  { %v1566_v25 = vadd.f32 %v1565_v24, %v1564_v20  ;;  %v1629_v26 = vpop.f32.mrb[29].mxu1  ;;  %v1567_v27 = vpop.f32.mrb[30].mxu0 }
 0x131   :  { %v1630_v28 = vadd.f32 %v1629_v26, %v1628_v22  ;;  %v1631_v29 = vpop.f32.mrb[30].mxu1  ;;  %v1568_v30 = vpop.f32.mrb[31].mxu0 }
 0x132   :  { %v1569_v31 = vadd.f32 %v1568_v30, %v1567_v27  ;;  %v1632_v32 = vpop.f32.mrb[31].mxu1 }
 0x133   :  { %v2265_v33 = vadd.f32 %v1630_v28, %v1566_v25  ;;  %v1633_v34 = vadd.f32 %v1632_v32, %v1631_v29 }
 0x135   :  { %v2267_v36 = vadd.f32 %v1633_v34, %v1569_v31 }
 0x136   :  { %v1650_v38 = vpop.f32.mrb[32].mxu0 }
 0x137   :  { %v1651_v39 = vpop.f32.mrb[33].mxu0  ;;  %v1726_v40 = vpop.f32.mrb[32].mxu1 }
 0x138   :  { %v1652_v41 = vadd.f32 %v1651_v39, %v1650_v38  ;;  %v1653_v42 = vpop.f32.mrb[34].mxu0  ;;  %v1144_v43 = vpop.f32.mrb[33].mxu1 }
 0x139   :  { %v1654_v44 = vpop.f32.mrb[35].mxu0  ;;  %v1727_v45 = vpop.f32.mrb[34].mxu1 }
 0x13a   :  { %v1655_v46 = vadd.f32 %v1654_v44, %v1653_v42  ;;  %v1048_v47 = vadd.f32 %v1652_v41, %v2237_v57  ;;  %v1147_v48 = vpop.f32.mrb[35].mxu1 }
 0x13c   :  { %v1145_v52 = vadd.f32 %v1144_v43, %v1048_v47  ;;  %v1051_v53 = vadd.f32 %v1655_v46, %v2239_v59 }
 0x13e   :  { %v1214_v55 = vmul.f32 %v2273_v50, %v1145_v52  ;;  %v1148_v56 = vadd.f32 %v1147_v48, %v1051_v53  ;;  %v1656_v58 = vpop.f32.mrb[36].mxu0 }
 0x13f   :  { %v1657_v60 = vpop.f32.mrb[37].mxu0  ;;  %v2282_v57 = vpop.f32.mrb[36].mxu1 }
 0x140   :  { %v1237_v61 = vadd.f32 %v2279_v54, %v1214_v55  ;;  %v1215_v62 = vmul.f32 %v2273_v50, %v1148_v56  ;;  %v1658_v63 = vadd.f32 %v1657_v60, %v1656_v58  ;;  %v1659_v0 = vpop.f32.mrb[38].mxu0  ;;  %v1160_v2 = vpop.f32.mrb[37].mxu1 }
 0x141   :  { %v1660_v59 = vpop.f32.mrb[39].mxu0  ;;  %v2286_v4 = vpop.f32.mrb[38].mxu1 }
 0x142   :  { %v1253_v5 = vmax.f32 %v1237_v61, 0.0  ;;  %v1238_v6 = vadd.f32 %v2279_v54, %v1215_v62  ;;  %v1056_v8 = vadd.f32 %v1658_v63, %v2241_v7  ;;  %v1661_v10 = vadd.f32 %v1660_v59, %v1659_v0  ;;  %v1163_v11 = vpop.f32.mrb[39].mxu1 }
 0x144   :  { %v1490_v12 = vpack.c.bf16 %v1253_v5, %v1253_v5  ;;  %v1254_v13 = vmax.f32 %v1238_v6, 0.0  ;;  %v1153_v14 = vadd.f32 %v1726_v40, %v1056_v8  ;;  %v1059_v15 = vadd.f32 %v1661_v10, %v2243_v9 }
 0x146   :  { %1334 = vst.msk [vmem:[%s2419_s4] sm:$0xf] %vm1333_vm1, %v1490_v12  ;;  %v1491_v16 = vpack.c.bf16 %v1254_v13, %v1254_v13  ;;  %v1216_v18 = vmul.f32 %v2273_v50, %v1153_v14  ;;  %v1156_v20 = vadd.f32 %v1727_v45, %v1059_v15  ;;  %v1662_v22 = vpop.f32.mrb[40].mxu0 }
 0x147   :  { %v1663_v24 = vpop.f32.mrb[41].mxu0  ;;  %v2296_v7 = vpop.f32.mrb[40].mxu1 }
 0x148   :  { %1335 = vst.msk [vmem:[%s2419_s4 + $0x4] sm:$0xf] %vm1333_vm1, %v1491_v16  ;;  %v1239_v9 = vadd.f32 %v2279_v54, %v1216_v18  ;;  %v1217_v25 = vmul.f32 %v2273_v50, %v1156_v20  ;;  %v1664_v26 = vadd.f32 %v1663_v24, %v1662_v22  ;;  %v1665_v27 = vpop.f32.mrb[42].mxu0  ;;  %v1176_v28 = vpop.f32.mrb[41].mxu1 }
 0x149   :  { %v1666_v29 = vpop.f32.mrb[43].mxu0  ;;  %v2304_v30 = vpop.f32.mrb[42].mxu1 }
 0x14a   :  { %v1255_v31 = vmax.f32 %v1239_v9, 0.0  ;;  %v1240_v32 = vadd.f32 %v2279_v54, %v1217_v25  ;;  %v1667_v34 = vadd.f32 %v1666_v29, %v1665_v27  ;;  %v1064_v38 = vadd.f32 %v1664_v26, %v2245_v21  ;;  %v1179_v39 = vpop.f32.mrb[43].mxu1 }
 0x14c   :  { %v1492_v40 = vpack.c.bf16 %v1255_v31, %v1255_v31  ;;  %v1256_v41 = vmax.f32 %v1240_v32, 0.0  ;;  %v1161_v42 = vadd.f32 %v1160_v2, %v1064_v38  ;;  %v1067_v43 = vadd.f32 %v1667_v34, %v2247_v23 }
 0x14e   :  { %1336 = vst.msk [vmem:[%s2419_s4 + $0x8] sm:$0xf] %vm1333_vm1, %v1492_v40  ;;  %v1493_v44 = vpack.c.bf16 %v1256_v41, %v1256_v41  ;;  %v1218_v45 = vmul.f32 %v2273_v50, %v1161_v42  ;;  %v1164_v46 = vadd.f32 %v1163_v11, %v1067_v43  ;;  %v1668_v47 = vpop.f32.mrb[44].mxu0 }
 0x14f   :  { %v1669_v48 = vpop.f32.mrb[45].mxu0  ;;  %v2314_v52 = vpop.f32.mrb[44].mxu1 }
 0x150   :  { %1337 = vst.msk [vmem:[%s2419_s4 + $0xc] sm:$0xf] %vm1333_vm1, %v1493_v44  ;;  %v1241_v21 = vadd.f32 %v2279_v54, %v1218_v45  ;;  %v1219_v23 = vmul.f32 %v2273_v50, %v1164_v46  ;;  %v1670_v53 = vadd.f32 %v1669_v48, %v1668_v47  ;;  %v1671_v55 = vpop.f32.mrb[46].mxu0  ;;  %v2322_v56 = vpop.f32.mrb[45].mxu1 }
 0x151   :  { %v1672_v58 = vpop.f32.mrb[47].mxu0  ;;  %v2324_v60 = vpop.f32.mrb[46].mxu1 }
 0x152   :  { %v1257_v61 = vmax.f32 %v1241_v21, 0.0  ;;  %v1242_v62 = vadd.f32 %v2279_v54, %v1219_v23  ;;  %v1072_v63 = vadd.f32 %v1670_v53, %v2249_v35  ;;  %v1673_v0 = vadd.f32 %v1672_v58, %v1671_v55  ;;  %v2328_v2 = vpop.f32.mrb[47].mxu1 }
 0x154   :  { %v1494_v59 = vpack.c.bf16 %v1257_v61, %v1257_v61  ;;  %v1258_v5 = vmax.f32 %v1242_v62, 0.0  ;;  %v1169_v6 = vadd.f32 %v2282_v57, %v1072_v63  ;;  %v1075_v8 = vadd.f32 %v1673_v0, %v2251_v37 }
 0x156   :  { %1338 = vst.msk [vmem:[%s2419_s4 + $0x10] sm:$0xf] %vm1333_vm1, %v1494_v59  ;;  %v1495_v10 = vpack.c.bf16 %v1258_v5, %v1258_v5  ;;  %v1220_v11 = vmul.f32 %v2273_v50, %v1169_v6  ;;  %v1172_v12 = vadd.f32 %v2286_v4, %v1075_v8  ;;  %v1674_v35 = vpop.f32.mrb[48].mxu0 }
 0x157   :  { %v1675_v13 = vpop.f32.mrb[49].mxu0 }
 0x158   :  { %1339 = vst.msk [vmem:[%s2419_s4 + $0x14] sm:$0xf] %vm1333_vm1, %v1495_v10  ;;  %v1243_v57 = vadd.f32 %v2279_v54, %v1220_v11  ;;  %v1221_v37 = vmul.f32 %v2273_v50, %v1172_v12  ;;  %v1676_v14 = vadd.f32 %v1675_v13, %v1674_v35  ;;  %v1677_v15 = vpop.f32.mrb[50].mxu0 }
 0x159   :  { %v1678_v16 = vpop.f32.mrb[51].mxu0 }
 0x15a   :  { %v1259_v18 = vmax.f32 %v1243_v57, 0.0  ;;  %v1244_v20 = vadd.f32 %v2279_v54, %v1221_v37  ;;  %v1679_v22 = vadd.f32 %v1678_v16, %v1677_v15  ;;  %v1080_v4 = vadd.f32 %v1676_v14, %v2253_v49 }
 0x15c   :  { %v1496_v24 = vpack.c.bf16 %v1259_v18, %v1259_v18  ;;  %v1260_v9 = vmax.f32 %v1244_v20, 0.0  ;;  %v1177_v25 = vadd.f32 %v1176_v28, %v1080_v4  ;;  %v1083_v26 = vadd.f32 %v1679_v22, %v2255_v51 }
 0x15e   :  { %1340 = vst.msk [vmem:[%s2419_s4 + $0x18] sm:$0xf] %vm1333_vm1, %v1496_v24  ;;  %v1497_v27 = vpack.c.bf16 %v1260_v9, %v1260_v9  ;;  %v1222_v29 = vmul.f32 %v2273_v50, %v1177_v25  ;;  %v1180_v31 = vadd.f32 %v1179_v39, %v1083_v26  ;;  %v1680_v32 = vpop.f32.mrb[52].mxu0 }
 0x15f   :  { %v1681_v34 = vpop.f32.mrb[53].mxu0 }
 0x160   :  { %1341 = vst.msk [vmem:[%s2419_s4 + $0x1c] sm:$0xf] %vm1333_vm1, %v1497_v27  ;;  %v1245_v49 = vadd.f32 %v2279_v54, %v1222_v29  ;;  %v1223_v51 = vmul.f32 %v2273_v50, %v1180_v31  ;;  %v1682_v28 = vadd.f32 %v1681_v34, %v1680_v32  ;;  %v1683_v38 = vpop.f32.mrb[54].mxu0 }
 0x161   :  { %v1684_v40 = vpop.f32.mrb[55].mxu0 }
 0x162   :  { %v1261_v41 = vmax.f32 %v1245_v49, 0.0  ;;  %v1246_v42 = vadd.f32 %v2279_v54, %v1223_v51  ;;  %v1088_v43 = vadd.f32 %v1682_v28, %v2257_v1  ;;  %v1685_v39 = vadd.f32 %v1684_v40, %v1683_v38 }
 0x164   :  { %v1498_v44 = vpack.c.bf16 %v1261_v41, %v1261_v41  ;;  %v1262_v45 = vmax.f32 %v1246_v42, 0.0  ;;  %v1185_v46 = vadd.f32 %v2296_v7, %v1088_v43  ;;  %v1091_v47 = vadd.f32 %v1685_v39, %v2259_v3 }
 0x166   :  { %1342 = vst.msk [vmem:[%s2419_s4 + $0x20] sm:$0xf] %vm1333_vm1, %v1498_v44  ;;  %v1499_v48 = vpack.c.bf16 %v1262_v45, %v1262_v45  ;;  %v1224_v21 = vmul.f32 %v2273_v50, %v1185_v46  ;;  %v1188_v23 = vadd.f32 %v2304_v30, %v1091_v47  ;;  %v1686_v53 = vpop.f32.mrb[56].mxu0 }
 0x167   :  { %v1687_v55 = vpop.f32.mrb[57].mxu0 }
 0x168   :  { %1343 = vst.msk [vmem:[%s2419_s4 + $0x24] sm:$0xf] %vm1333_vm1, %v1499_v48  ;;  %v1247_v1 = vadd.f32 %v2279_v54, %v1224_v21  ;;  %v1225_v3 = vmul.f32 %v2273_v50, %v1188_v23  ;;  %v1688_v7 = vadd.f32 %v1687_v55, %v1686_v53  ;;  %v1689_v58 = vpop.f32.mrb[58].mxu0 }
 0x169   :  { %v1690_v61 = vpop.f32.mrb[59].mxu0 }
 0x16a   :  { %v1263_v62 = vmax.f32 %v1247_v1, 0.0  ;;  %v1248_v63 = vadd.f32 %v2279_v54, %v1225_v3  ;;  %v1691_v0 = vadd.f32 %v1690_v61, %v1689_v58  ;;  %v1096_v30 = vadd.f32 %v1688_v7, %v2261_v17 }
 0x16c   :  { %v1500_v59 = vpack.c.bf16 %v1263_v62, %v1263_v62  ;;  %v1264_v5 = vmax.f32 %v1248_v63, 0.0  ;;  %v1193_v6 = vadd.f32 %v2322_v56, %v1096_v30  ;;  %v1099_v8 = vadd.f32 %v1691_v0, %v2263_v19 }
 0x16e   :  { %1344 = vst.msk [vmem:[%s2419_s4 + $0x28] sm:$0xf] %vm1333_vm1, %v1500_v59  ;;  %v1501_v10 = vpack.c.bf16 %v1264_v5, %v1264_v5  ;;  %v1226_v11 = vmul.f32 %v2273_v50, %v1193_v6  ;;  %v1196_v12 = vadd.f32 %v2328_v2, %v1099_v8  ;;  %v1692_v35 = vpop.f32.mrb[60].mxu0 }
 0x16f   :  { %v1693_v13 = vpop.f32.mrb[61].mxu0 }
 0x170   :  { %1345 = vst.msk [vmem:[%s2419_s4 + $0x2c] sm:$0xf] %vm1333_vm1, %v1501_v10  ;;  %v1249_v17 = vadd.f32 %v2279_v54, %v1226_v11  ;;  %v1227_v19 = vmul.f32 %v2273_v50, %v1196_v12  ;;  %v1694_v56 = vadd.f32 %v1693_v13, %v1692_v35  ;;  %v1695_v57 = vpop.f32.mrb[62].mxu0 }
 0x171   :  { %v1696_v37 = vpop.f32.mrb[63].mxu0 }
 0x172   :  { %v1265_v14 = vmax.f32 %v1249_v17, 0.0  ;;  %v1250_v15 = vadd.f32 %v2279_v54, %v1227_v19  ;;  %v1104_v16 = vadd.f32 %v1694_v56, %v2265_v33  ;;  %v1697_v2 = vadd.f32 %v1696_v37, %v1695_v57 }
 0x174   :  { %v1502_v18 = vpack.c.bf16 %v1265_v14, %v1265_v14  ;;  %v1266_v20 = vmax.f32 %v1250_v15, 0.0  ;;  %v1201_v22 = vadd.f32 %v2314_v52, %v1104_v16  ;;  %v1107_v4 = vadd.f32 %v1697_v2, %v2267_v36 }
 0x176   :  { %1346 = vst.msk [vmem:[%s2419_s4 + $0x30] sm:$0xf] %vm1333_vm1, %v1502_v18  ;;  %v1503_v24 = vpack.c.bf16 %v1266_v20, %v1266_v20  ;;  %v1228_v9 = vmul.f32 %v2273_v50, %v1201_v22  ;;  %v1204_v25 = vadd.f32 %v2324_v60, %v1107_v4 }
 0x178   :  { %1347 = vst.msk [vmem:[%s2419_s4 + $0x34] sm:$0xf] %vm1333_vm1, %v1503_v24  ;;  %v1251_v33 = vadd.f32 %v2279_v54, %v1228_v9  ;;  %v1229_v52 = vmul.f32 %v2273_v50, %v1204_v25 }
 0x17a   :  { %v1267_v36 = vmax.f32 %v1251_v33, 0.0  ;;  %v1252_v26 = vadd.f32 %v2279_v54, %v1229_v52 }
 0x17c   :  { %v1504_v27 = vpack.c.bf16 %v1267_v36, %v1267_v36  ;;  %v1268_v29 = vmax.f32 %v1252_v26, 0.0 }
 0x17e   :  { %1348 = vst.msk [vmem:[%s2419_s4 + $0x38] sm:$0xf] %vm1333_vm1, %v1504_v27  ;;  %v1505_v60 = vpack.c.bf16 %v1268_v29, %v1268_v29 }
 0x180   :  { %1349 = vst.msk [vmem:[%s2419_s4 + $0x3c] sm:$0xf] %vm1333_vm1, %v1505_v60 }

// kernel: psmnet_forward.107
= control target key start
LH: loop header
LB: loop body
LE: loop exit
PB: predicated region body
PF: predicated region fallthrough
CT: control target
= control target key end

     0   :  { %vm797_vm0 = vcmask 785408   ;;  %vm1368_vm1 = vcmask 257024   ;;  %s2518_s1 = inlined_call_operand.vmem [shape: bf16[864,32], index: 1, kind: input, shape index: {}]   ;;  %s2519_s0 = inlined_call_operand.vmem [shape: bf16[128,864], index: 0, kind: input, shape index: {}]   ;;  %s2520_s2 = inlined_call_operand.vmem [shape: f32[1,32], index: 2, kind: input, shape index: {}]   ;;  %s2521_s4 = inlined_call_operand.vmem [shape: bf16[128,32], index: 4, kind: input, shape index: {}]   ;;  %s2522_s3 = inlined_call_operand.vmem [shape: f32[1,32], index: 3, kind: input, shape index: {}]   ;;  %s2523_s5 = inlined_call_operand.vmem [shape: bf16[128,32], index: 5, kind: output, shape index: {}]  }
   0x1   :  { %v1814_v0 = vld [vmem:[%s2518_s1 + $0x40] sm:$0xff]   ;;  %v1818_v4 = vld [vmem:[%s2518_s1 + $0x48] sm:$0xff]   ;;  %v1822_v8 = vld [vmem:[%s2518_s1 + $0x50] sm:$0xff]  }
   0x2   :  { %v1815_v1 = vld [vmem:[%s2518_s1 + $0xc0] sm:$0xff]   ;;  %1580 = vmatprep.subr.bf16.mxu0 %v1814_v0  ;;  %v1819_v5 = vld [vmem:[%s2518_s1 + $0xc8] sm:$0xff]   ;;  %v1823_v9 = vld [vmem:[%s2518_s1 + $0xd0] sm:$0xff]  }
   0x3   :  { %v1816_v2 = vld [vmem:[%s2518_s1] sm:$0xff]   ;;  %1644 = vmatprep.subr.bf16.mxu1 %v1815_v1  ;;  %v1820_v6 = vld [vmem:[%s2518_s1 + $0x8] sm:$0xff]   ;;  %v1824_v10 = vld [vmem:[%s2518_s1 + $0x10] sm:$0xff]  }
   0x4   :  { %v1817_v3 = vld [vmem:[%s2518_s1 + $0x80] sm:$0xff]   ;;  %1581 = vmatpush3.bf16.msra.mxu0 %v1816_v2  ;;  %v1821_v7 = vld [vmem:[%s2518_s1 + $0x88] sm:$0xff]   ;;  %v1825_v11 = vld [vmem:[%s2518_s1 + $0x90] sm:$0xff]  }
   0x5   :  { %1645 = vmatpush3.bf16.msra.mxu1 %v1817_v3  ;;  %1582 = vmatprep.subr.bf16.mxu0 %v1818_v4  ;;  %v1826_v12 = vld [vmem:[%s2518_s1 + $0x58] sm:$0xff]   ;;  %v1830_v16 = vld [vmem:[%s2518_s1 + $0x60] sm:$0xff]   ;;  %v1834_v20 = vld [vmem:[%s2518_s1 + $0x68] sm:$0xff]  }
   0x6   :  { %1646 = vmatprep.subr.bf16.mxu1 %v1819_v5  ;;  %v1827_v13 = vld [vmem:[%s2518_s1 + $0xd8] sm:$0xff]   ;;  %v1831_v17 = vld [vmem:[%s2518_s1 + $0xe0] sm:$0xff]   ;;  %v1835_v21 = vld [vmem:[%s2518_s1 + $0xe8] sm:$0xff]  }
   0x7   :  { %v1828_v14 = vld [vmem:[%s2518_s1 + $0x18] sm:$0xff]   ;;  %v1832_v18 = vld [vmem:[%s2518_s1 + $0x20] sm:$0xff]   ;;  %v1836_v22 = vld [vmem:[%s2518_s1 + $0x28] sm:$0xff]  }
   0x8   :  { %1583 = vmatpush3.bf16.msra.mxu0 %v1820_v6  ;;  %v1829_v15 = vld [vmem:[%s2518_s1 + $0x98] sm:$0xff]   ;;  %v1833_v19 = vld [vmem:[%s2518_s1 + $0xa0] sm:$0xff]   ;;  %v1837_v23 = vld [vmem:[%s2518_s1 + $0xa8] sm:$0xff]  }
   0x9   :  { %1647 = vmatpush3.bf16.msra.mxu1 %v1821_v7  ;;  %1584 = vmatprep.subr.bf16.mxu0 %v1822_v8  ;;  %v1838_v24 = vld [vmem:[%s2518_s1 + $0x70] sm:$0xff]   ;;  %v1842_v28 = vld [vmem:[%s2518_s1 + $0x78] sm:$0xff]   ;;  %v1848_v33 = vld [vmem:[%s2519_s0 + $0x4] ss:$28 sps:$4 sm:$0xff]  }
   0xa   :  { %1648 = vmatprep.subr.bf16.mxu1 %v1823_v9  ;;  %v1839_v25 = vld [vmem:[%s2518_s1 + $0xf0] sm:$0xff]   ;;  %v1843_v29 = vld [vmem:[%s2518_s1 + $0xf8] sm:$0xff]   ;;  %v1849_v34 = vld [vmem:[%s2519_s0 + $0x8] ss:$28 sps:$4 sm:$0xff]   ;;  %854 = vmatprep.mubr.bf16.mxu0 %v1848_v33 }
   0xb   :  { %v1840_v26 = vld [vmem:[%s2518_s1 + $0x30] sm:$0xff]   ;;  %v1844_v30 = vld [vmem:[%s2518_s1 + $0x38] sm:$0xff]   ;;  %v1851_v35 = vld [vmem:[%s2519_s0 + $0xc] ss:$28 sps:$4 sm:$0xff]  }
   0xc   :  { %1585 = vmatpush3.bf16.msra.mxu0 %v1824_v10  ;;  %v1841_v27 = vld [vmem:[%s2518_s1 + $0xb0] sm:$0xff]   ;;  %v1845_v31 = vld [vmem:[%s2518_s1 + $0xb8] sm:$0xff]   ;;  %v1852_v36 = vld [vmem:[%s2518_s1 + $0x140] sm:$0xff]   ;;  %951 = vmatprep.mubr.bf16.mxu1 %v1851_v35 }
   0xd   :  { %1649 = vmatpush3.bf16.msra.mxu1 %v1825_v11  ;;  %1586 = vmatprep.subr.bf16.mxu0 %v1826_v12  ;;  %v1846_v32 = vld [vmem:[%s2519_s0] ss:$28 sps:$4 sm:$0xff]   ;;  %v1858_v40 = vld [vmem:[%s2519_s0 + $0x38] ss:$28 sps:$4 sm:$0xff]   ;;  %v1860_v42 = vld [vmem:[%s2518_s1 + $0x148] sm:$0xff]  }
   0xe   :  { %1650 = vmatprep.subr.bf16.mxu1 %v1827_v13  ;;  %v1853_v37 = vld [vmem:[%s2518_s1 + $0x100] sm:$0xff]   ;;  %v1854_v38 = vld [vmem:[%s2519_s0 + $0x3c] ss:$28 sps:$4 sm:$0xff]   ;;  %v1861_v43 = vld [vmem:[%s2518_s1 + $0x108] sm:$0xff]  }
   0xf   :  { %v1856_v39 = vld [vmem:[%s2519_s0 + $0x44] ss:$28 sps:$4 sm:$0xff]   ;;  %v1862_v44 = vld [vmem:[%s2519_s0 + $0x74] ss:$28 sps:$4 sm:$0xff]   ;;  %v1864_v45 = vld [vmem:[%s2519_s0 + $0x7c] ss:$28 sps:$4 sm:$0xff]  }
  0x10   :  { %1587 = vmatpush3.bf16.msra.mxu0 %v1828_v14  ;;  %v1859_v41 = vld [vmem:[%s2519_s0 + $0x40] ss:$28 sps:$4 sm:$0xff]   ;;  %v1868_v46 = vld [vmem:[%s2518_s1 + $0x150] sm:$0xff]   ;;  %v1870_v50 = vld [vmem:[%s2519_s0 + $0xac] ss:$28 sps:$4 sm:$0xff]  }
  0x11   :  { %1651 = vmatpush3.bf16.msra.mxu1 %v1829_v15  ;;  %1588 = vmatprep.subr.bf16.mxu0 %v1830_v16  ;;  %v1869_v47 = vld [vmem:[%s2518_s1 + $0x110] sm:$0xff]   ;;  %v1876_v52 = vld [vmem:[%s2518_s1 + $0x158] sm:$0xff]   ;;  %v1874_v54 = vld [vmem:[%s2519_s0 + $0xa8] ss:$28 sps:$4 sm:$0xff]  }
  0x12   :  { %1652 = vmatprep.subr.bf16.mxu1 %v1831_v17  ;;  %v1866_v48 = vld [vmem:[%s2519_s0 + $0x70] ss:$28 sps:$4 sm:$0xff]   ;;  %v1867_v49 = vld [vmem:[%s2519_s0 + $0x78] ss:$28 sps:$4 sm:$0xff]   ;;  %v1884_v55 = vld [vmem:[%s2518_s1 + $0x160] sm:$0xff]  }
  0x13   :  { %v1872_v51 = vld [vmem:[%s2519_s0 + $0xb4] ss:$28 sps:$4 sm:$0xff]   ;;  %v1877_v53 = vld [vmem:[%s2518_s1 + $0x118] sm:$0xff]   ;;  %v1885_v57 = vld [vmem:[%s2518_s1 + $0x120] sm:$0xff]  }
  0x14   :  { %1589 = vmatpush3.bf16.msra.mxu0 %v1832_v18  ;;  %v1875_v56 = vld [vmem:[%s2519_s0 + $0xb0] ss:$28 sps:$4 sm:$0xff]   ;;  %v1886_v58 = vld [vmem:[%s2518_s1 + $0x180] sm:$0xff]   ;;  %v1887_v2 = vld [vmem:[%s2519_s0 + $0x11c] ss:$28 sps:$4 sm:$0xff]  }
  0x15   :  { %1653 = vmatpush3.bf16.msra.mxu1 %v1833_v19  ;;  %1590 = vmatprep.subr.bf16.mxu0 %v1834_v20  ;;  %v1878_v59 = vld [vmem:[%s2519_s0 + $0xe4] ss:$28 sps:$4 sm:$0xff]   ;;  %v1880_v60 = vld [vmem:[%s2519_s0 + $0xec] ss:$28 sps:$4 sm:$0xff]   ;;  %v1902_v4 = vld [vmem:[%s2518_s1 + $0x170] sm:$0xff]  }
  0x16   :  { %1654 = vmatprep.subr.bf16.mxu1 %v1835_v21  ;;  %v1893_v61 = vld [vmem:[%s2518_s1 + $0x168] sm:$0xff]   ;;  %v1882_v63 = vld [vmem:[%s2519_s0 + $0xe0] ss:$28 sps:$4 sm:$0xff]   ;;  %v1903_v5 = vld [vmem:[%s2518_s1 + $0x130] sm:$0xff]  }
  0x17   :  { %v1894_v62 = vld [vmem:[%s2518_s1 + $0x128] sm:$0xff]   ;;  %v1889_v3 = vld [vmem:[%s2519_s0 + $0x124] ss:$28 sps:$4 sm:$0xff]   ;;  %v1904_v6 = vld [vmem:[%s2518_s1 + $0x190] sm:$0xff]  }
  0x18   :  { %1591 = vmatpush3.bf16.msra.mxu0 %v1836_v22  ;;  %v1883_v0 = vld [vmem:[%s2519_s0 + $0xe8] ss:$28 sps:$4 sm:$0xff]   ;;  %v1891_v7 = vld [vmem:[%s2519_s0 + $0x118] ss:$28 sps:$4 sm:$0xff]   ;;  %v1892_v8 = vld [vmem:[%s2519_s0 + $0x120] ss:$28 sps:$4 sm:$0xff]  }
  0x19   :  { %1655 = vmatpush3.bf16.msra.mxu1 %v1837_v23  ;;  %1592 = vmatprep.subr.bf16.mxu0 %v1838_v24  ;;  %v1899_v1 = vld [vmem:[%s2518_s1 + $0x188] sm:$0xff]   ;;  %v1895_v9 = vld [vmem:[%s2519_s0 + $0x154] ss:$28 sps:$4 sm:$0xff]   ;;  %v1911_v10 = vld [vmem:[%s2518_s1 + $0x178] sm:$0xff]  }
  0x1a   :  { %1656 = vmatprep.subr.bf16.mxu1 %v1839_v25  ;;  %v1897_v11 = vld [vmem:[%s2519_s0 + $0x15c] ss:$28 sps:$4 sm:$0xff]   ;;  %v1914_v14 = vld [vmem:[%s2518_s1 + $0x1a0] sm:$0xff]   ;;  %v1918_v15 = vld [vmem:[%s2518_s1 + $0x1a8] sm:$0xff]  }
  0x1b   :  { %v1912_v12 = vld [vmem:[%s2518_s1 + $0x198] sm:$0xff]   ;;  %v1900_v16 = vld [vmem:[%s2519_s0 + $0x150] ss:$28 sps:$4 sm:$0xff]   ;;  %v1909_v20 = vld [vmem:[%s2519_s0 + $0x188] ss:$28 sps:$4 sm:$0xff]  }
  0x1c   :  { %1593 = vmatpush3.bf16.msra.mxu0 %v1840_v26  ;;  %v1913_v13 = vld [vmem:[%s2518_s1 + $0x138] sm:$0xff]   ;;  %v1905_v18 = vld [vmem:[%s2519_s0 + $0x18c] ss:$28 sps:$4 sm:$0xff]   ;;  %v1907_v19 = vld [vmem:[%s2519_s0 + $0x194] ss:$28 sps:$4 sm:$0xff]  }
  0x1d   :  { %1657 = vmatpush3.bf16.msra.mxu1 %v1841_v27  ;;  %1594 = vmatprep.subr.bf16.mxu0 %v1842_v28  ;;  %v1901_v17 = vld [vmem:[%s2519_s0 + $0x158] ss:$28 sps:$4 sm:$0xff]   ;;  %v1910_v21 = vld [vmem:[%s2519_s0 + $0x190] ss:$28 sps:$4 sm:$0xff]   ;;  %v1927_v27 = vld [vmem:[%s2519_s0 + $0x88] ss:$28 sps:$4 sm:$0xff]  }
  0x1e   :  { %1658 = vmatprep.subr.bf16.mxu1 %v1843_v29  ;;  %v1917_v22 = vld [vmem:[%s2519_s0 + $0x14] ss:$28 sps:$4 sm:$0xff]   ;;  %v1921_v26 = vld [vmem:[%s2519_s0 + $0x4c] ss:$28 sps:$4 sm:$0xff]   ;;  %v1924_v29 = vld [vmem:[%s2519_s0 + $0x84] ss:$28 sps:$4 sm:$0xff]  }
  0x1f   :  { %v1919_v23 = vld [vmem:[%s2519_s0 + $0x18] ss:$28 sps:$4 sm:$0xff]   ;;  %v1915_v24 = vld [vmem:[%s2519_s0 + $0x10] ss:$28 sps:$4 sm:$0xff]   ;;  %v1923_v28 = vld [vmem:[%s2519_s0 + $0x48] ss:$28 sps:$4 sm:$0xff]  }
  0x20   :  { %1595 = vmatpush3.bf16.msra.mxu0 %v1844_v30  ;;  %v1920_v25 = vld [vmem:[%s2519_s0 + $0x50] ss:$28 sps:$4 sm:$0xff]   ;;  %v1928_v30 = vld [vmem:[%s2519_s0 + $0xc0] ss:$28 sps:$4 sm:$0xff]   ;;  %v1943_v35 = vld [vmem:[%s2519_s0 + $0x168] ss:$28 sps:$4 sm:$0xff]  }
  0x21   :  { %1659 = vmatpush3.bf16.msra.mxu1 %v1845_v31  ;;  %1708 = vmatprep.subr.bf16.mxu0 %v1852_v36  ;;  %v1935_v31 = vld [vmem:[%s2519_s0 + $0xf8] ss:$28 sps:$4 sm:$0xff]  }
  0x22   :  { %1786 = vmatprep.subr.bf16.mxu1 %v1886_v58  ;;  %v1929_v33 = vld [vmem:[%s2519_s0 + $0xbc] ss:$28 sps:$4 sm:$0xff]  }
  0x23   :  { %855 = vmatmul.mubr.bf16.vlgmr.msra.gmra.mrb[0].mxu0 %v1846_v32  ;;  %v1926_v32 = vld [vmem:[%s2519_s0 + $0x80] ss:$28 sps:$4 sm:$0xff]   ;;  %v1931_v36 = vld [vmem:[%s2519_s0 + $0xb8] ss:$28 sps:$4 sm:$0xff]  }
  0x24   :  { %952 = vmatmul.mubr.bf16.vlgmr.msra.gmra.mrb[0].mxu1 %v1849_v34  ;;  %1709 = vmatpush3.bf16.msra.mxu0 %v1853_v37  ;;  %v1936_v34 = vld [vmem:[%s2519_s0 + $0x130] ss:$28 sps:$4 sm:$0xff]  }
  0x25   :  { %862 = vmatprep.mubr.bf16.mxu0 %v1854_v38  ;;  %959 = vmatprep.mubr.bf16.mxu1 %v1856_v39  ;;  %v1932_v37 = vld [vmem:[%s2519_s0 + $0xf4] ss:$28 sps:$4 sm:$0xff]   ;;  %v1944_v38 = vld [vmem:[%s2519_s0 + $0x1a0] ss:$28 sps:$4 sm:$0xff]  }
  0x26   :  { %1710 = vmatprep.subr.bf16.mxu0 %v1860_v42  ;;  %1787 = vmatpush3.bf16.msra.mxu1 %v1886_v58  ;;  %v1934_v39 = vld [vmem:[%s2519_s0 + $0xf0] ss:$28 sps:$4 sm:$0xff]   ;;  %v1940_v42 = vld [vmem:[%s2519_s0 + $0x164] ss:$28 sps:$4 sm:$0xff]  }
  0x27   :  { %1788 = vmatprep.subr.bf16.mxu1 %v1899_v1 }
  0x28   :  { %1711 = vmatpush3.bf16.msra.mxu0 %v1861_v43  ;;  %v1942_v43 = vld [vmem:[%s2519_s0 + $0x160] ss:$28 sps:$4 sm:$0xff]  }
  0x29   :  { %1712 = vmatprep.subr.bf16.mxu0 %v1868_v46 }
  0x2a   :  { %1789 = vmatpush3.bf16.msra.mxu1 %v1899_v1 }
  0x2b   :  { %863 = vmatmul.mubr.bf16.gmra.mrb[4].mxu0 %v1858_v40  ;;  %1790 = vmatprep.subr.bf16.mxu1 %v1904_v6  ;;  %v1937_v40 = vld [vmem:[%s2519_s0 + $0x12c] ss:$28 sps:$4 sm:$0xff]  }
  0x2c   :  { %960 = vmatmul.mubr.bf16.gmra.mrb[4].mxu1 %v1859_v41  ;;  %870 = vmatprep.mubr.bf16.mxu0 %v1862_v44  ;;  %v1939_v41 = vld [vmem:[%s2519_s0 + $0x128] ss:$28 sps:$4 sm:$0xff]   ;;  %v1945_v44 = vld [vmem:[%s2519_s0 + $0x19c] ss:$28 sps:$4 sm:$0xff]  }
  0x2d   :  { %967 = vmatprep.mubr.bf16.mxu1 %v1864_v45  ;;  %1713 = vmatpush3.bf16.msra.mxu0 %v1869_v47  ;;  %v1947_v45 = vld [vmem:[%s2519_s0 + $0x198] ss:$28 sps:$4 sm:$0xff]  }
  0x2e   :  { %1714 = vmatprep.subr.bf16.mxu0 %v1876_v52  ;;  %1791 = vmatpush3.bf16.msra.mxu1 %v1904_v6 }
  0x2f   :  { %1792 = vmatprep.subr.bf16.mxu1 %v1912_v12 }
  0x31   :  { %1715 = vmatpush3.bf16.msra.mxu0 %v1877_v53 }
  0x32   :  { %1716 = vmatprep.subr.bf16.mxu0 %v1884_v55  ;;  %1793 = vmatpush3.bf16.msra.mxu1 %v1912_v12 }
  0x33   :  { %871 = vmatmul.mubr.bf16.gmra.mrb[8].mxu0 %v1866_v48  ;;  %1794 = vmatprep.subr.bf16.mxu1 %v1914_v14 }
  0x34   :  { %968 = vmatmul.mubr.bf16.gmra.mrb[8].mxu1 %v1867_v49  ;;  %878 = vmatprep.mubr.bf16.mxu0 %v1870_v50 }
  0x35   :  { %975 = vmatprep.mubr.bf16.mxu1 %v1872_v51  ;;  %1717 = vmatpush3.bf16.msra.mxu0 %v1885_v57 }
  0x36   :  { %1718 = vmatprep.subr.bf16.mxu0 %v1893_v61  ;;  %1795 = vmatpush3.bf16.msra.mxu1 %v1914_v14 }
  0x37   :  { %1796 = vmatprep.subr.bf16.mxu1 %v1918_v15 }
  0x39   :  { %1719 = vmatpush3.bf16.msra.mxu0 %v1894_v62 }
  0x3a   :  { %1720 = vmatprep.subr.bf16.mxu0 %v1902_v4  ;;  %1797 = vmatpush3.bf16.msra.mxu1 %v1918_v15 }
  0x3b   :  { %879 = vmatmul.mubr.bf16.gmra.mrb[12].mxu0 %v1874_v54 }
  0x3c   :  { %976 = vmatmul.mubr.bf16.gmra.mrb[12].mxu1 %v1875_v56  ;;  %886 = vmatprep.mubr.bf16.mxu0 %v1878_v59 }
  0x3d   :  { %983 = vmatprep.mubr.bf16.mxu1 %v1880_v60  ;;  %1721 = vmatpush3.bf16.msra.mxu0 %v1903_v5 }
  0x3e   :  { %1722 = vmatprep.subr.bf16.mxu0 %v1911_v10 }
  0x41   :  { %1723 = vmatpush3.bf16.msra.mxu0 %v1913_v13 }
  0x43   :  { %887 = vmatmul.mubr.bf16.gmra.mrb[16].mxu0 %v1882_v63 }
  0x44   :  { %984 = vmatmul.mubr.bf16.gmra.mrb[16].mxu1 %v1883_v0  ;;  %894 = vmatprep.mubr.bf16.mxu0 %v1887_v2 }
  0x45   :  { %991 = vmatprep.mubr.bf16.mxu1 %v1889_v3 }
  0x4b   :  { %895 = vmatmul.mubr.bf16.gmra.mrb[20].mxu0 %v1891_v7 }
  0x4c   :  { %992 = vmatmul.mubr.bf16.gmra.mrb[20].mxu1 %v1892_v8  ;;  %902 = vmatprep.mubr.bf16.mxu0 %v1895_v9 }
  0x4d   :  { %999 = vmatprep.mubr.bf16.mxu1 %v1897_v11 }
  0x53   :  { %903 = vmatmul.mubr.bf16.gmra.mrb[24].mxu0 %v1900_v16 }
  0x54   :  { %1000 = vmatmul.mubr.bf16.gmra.mrb[24].mxu1 %v1901_v17  ;;  %910 = vmatprep.mubr.bf16.mxu0 %v1905_v18 }
  0x55   :  { %1007 = vmatprep.mubr.bf16.mxu1 %v1907_v19 }
  0x5b   :  { %911 = vmatmul.mubr.bf16.gmra.mrb[28].mxu0 %v1909_v20 }
  0x5c   :  { %1008 = vmatmul.mubr.bf16.gmra.mrb[28].mxu1 %v1910_v21  ;;  %1048 = vmatprep.mubr.bf16.mxu0 %v1917_v22 }
  0x5d   :  { %1798 = vmatprep.mubr.msk.bf16.mxu1 %vm797_vm0, %v1919_v23 }
  0x63   :  { %1049 = vmatmul.mubr.bf16.vlgmr.msra.gmra.mrb[32].mxu0 %v1915_v24 }
  0x64   :  { %1799 = vmatmul.mubr.msk.bf16.vlgmr.msra.gmra.mrb[32].mxu1 %vm797_vm0, %v1920_v25  ;;  %1056 = vmatprep.mubr.bf16.mxu0 %v1921_v26 }
  0x65   :  { %1802 = vmatprep.mubr.msk.bf16.mxu1 %vm797_vm0, %v1927_v27 }
  0x6b   :  { %1057 = vmatmul.mubr.bf16.gmra.mrb[36].mxu0 %v1923_v28 }
  0x6c   :  { %1064 = vmatprep.mubr.bf16.mxu0 %v1924_v29  ;;  %1803 = vmatmul.mubr.msk.bf16.gmra.mrb[36].mxu1 %vm797_vm0, %v1928_v30 }
  0x6d   :  { %1806 = vmatprep.mubr.msk.bf16.mxu1 %vm797_vm0, %v1935_v31 }
  0x73   :  { %1065 = vmatmul.mubr.bf16.gmra.mrb[40].mxu0 %v1926_v32 }
  0x74   :  { %1072 = vmatprep.mubr.bf16.mxu0 %v1929_v33  ;;  %1807 = vmatmul.mubr.msk.bf16.gmra.mrb[40].mxu1 %vm797_vm0, %v1936_v34 }
  0x75   :  { %1810 = vmatprep.mubr.msk.bf16.mxu1 %vm797_vm0, %v1943_v35 }
  0x7b   :  { %1073 = vmatmul.mubr.bf16.gmra.mrb[44].mxu0 %v1931_v36 }
  0x7c   :  { %1080 = vmatprep.mubr.bf16.mxu0 %v1932_v37  ;;  %1811 = vmatmul.mubr.msk.bf16.gmra.mrb[44].mxu1 %vm797_vm0, %v1944_v38 }
  0x83   :  { %1081 = vmatmul.mubr.bf16.gmra.mrb[48].mxu0 %v1934_v39 }
  0x84   :  { %1088 = vmatprep.mubr.bf16.mxu0 %v1937_v40 }
  0x8b   :  { %1089 = vmatmul.mubr.bf16.gmra.mrb[52].mxu0 %v1939_v41 }
  0x8c   :  { %1096 = vmatprep.mubr.bf16.mxu0 %v1940_v42 }
  0x93   :  { %1097 = vmatmul.mubr.bf16.gmra.mrb[56].mxu0 %v1942_v43 }
  0x94   :  { %1104 = vmatprep.mubr.bf16.mxu0 %v1945_v44 }
  0x9b   :  { %1105 = vmatmul.mubr.bf16.gmra.mrb[60].mxu0 %v1947_v45 }
  0xf6   :  { %v1596_v46 = vpop.f32.mrb[0].mxu0 }
  0xf7   :  { %v1660_v47 = vpop.f32.mrb[0].mxu1  ;;  %v1597_v48 = vpop.f32.mrb[1].mxu0 }
  0xf8   :  { %v1598_v49 = vadd.f32 %v1597_v48, %v1596_v46  ;;  %v1661_v50 = vpop.f32.mrb[1].mxu1  ;;  %v1599_v51 = vpop.f32.mrb[2].mxu0 }
  0xf9   :  { %v1662_v52 = vadd.f32 %v1661_v50, %v1660_v47  ;;  %v1663_v53 = vpop.f32.mrb[2].mxu1  ;;  %v1600_v54 = vpop.f32.mrb[3].mxu0 }
  0xfa   :  { %v1601_v55 = vadd.f32 %v1600_v54, %v1599_v51  ;;  %v1664_v56 = vpop.f32.mrb[3].mxu1 }
  0xfb   :  { %v2316_v57 = vadd.f32 %v1662_v52, %v1598_v49  ;;  %v1665_v58 = vadd.f32 %v1664_v56, %v1663_v53 }
  0xfd   :  { %v2318_v59 = vadd.f32 %v1665_v58, %v1601_v55 }
  0xfe   :  { %v1602_v60 = vpop.f32.mrb[4].mxu0 }
  0xff   :  { %v1666_v61 = vpop.f32.mrb[4].mxu1  ;;  %v1603_v62 = vpop.f32.mrb[5].mxu0 }
 0x100   :  { %v1604_v63 = vadd.f32 %v1603_v62, %v1602_v60  ;;  %v1667_v0 = vpop.f32.mrb[5].mxu1  ;;  %v1605_v1 = vpop.f32.mrb[6].mxu0 }
 0x101   :  { %v1668_v2 = vadd.f32 %v1667_v0, %v1666_v61  ;;  %v1669_v3 = vpop.f32.mrb[6].mxu1  ;;  %v1606_v4 = vpop.f32.mrb[7].mxu0 }
 0x102   :  { %v1607_v5 = vadd.f32 %v1606_v4, %v1605_v1  ;;  %v1670_v6 = vpop.f32.mrb[7].mxu1 }
 0x103   :  { %v2320_v7 = vadd.f32 %v1668_v2, %v1604_v63  ;;  %v1671_v8 = vadd.f32 %v1670_v6, %v1669_v3 }
 0x105   :  { %v2322_v9 = vadd.f32 %v1671_v8, %v1607_v5 }
 0x106   :  { %v1608_v10 = vpop.f32.mrb[8].mxu0 }
 0x107   :  { %v1672_v11 = vpop.f32.mrb[8].mxu1  ;;  %v1609_v12 = vpop.f32.mrb[9].mxu0 }
 0x108   :  { %v1610_v13 = vadd.f32 %v1609_v12, %v1608_v10  ;;  %v1673_v14 = vpop.f32.mrb[9].mxu1  ;;  %v1611_v15 = vpop.f32.mrb[10].mxu0 }
 0x109   :  { %v1674_v16 = vadd.f32 %v1673_v14, %v1672_v11  ;;  %v1675_v17 = vpop.f32.mrb[10].mxu1  ;;  %v1612_v18 = vpop.f32.mrb[11].mxu0 }
 0x10a   :  { %v1613_v19 = vadd.f32 %v1612_v18, %v1611_v15  ;;  %v1676_v20 = vpop.f32.mrb[11].mxu1 }
 0x10b   :  { %v2324_v21 = vadd.f32 %v1674_v16, %v1610_v13  ;;  %v1677_v22 = vadd.f32 %v1676_v20, %v1675_v17 }
 0x10d   :  { %v2326_v23 = vadd.f32 %v1677_v22, %v1613_v19 }
 0x10e   :  { %v1614_v24 = vpop.f32.mrb[12].mxu0 }
 0x10f   :  { %v1678_v25 = vpop.f32.mrb[12].mxu1  ;;  %v1615_v26 = vpop.f32.mrb[13].mxu0 }
 0x110   :  { %v1616_v27 = vadd.f32 %v1615_v26, %v1614_v24  ;;  %v1679_v28 = vpop.f32.mrb[13].mxu1  ;;  %v1617_v29 = vpop.f32.mrb[14].mxu0 }
 0x111   :  { %v1680_v30 = vadd.f32 %v1679_v28, %v1678_v25  ;;  %v1681_v31 = vpop.f32.mrb[14].mxu1  ;;  %v1618_v32 = vpop.f32.mrb[15].mxu0 }
 0x112   :  { %v1619_v33 = vadd.f32 %v1618_v32, %v1617_v29  ;;  %v1682_v34 = vpop.f32.mrb[15].mxu1 }
 0x113   :  { %v2328_v35 = vadd.f32 %v1680_v30, %v1616_v27  ;;  %v1683_v36 = vadd.f32 %v1682_v34, %v1681_v31 }
 0x115   :  { %v2330_v37 = vadd.f32 %v1683_v36, %v1619_v33 }
 0x116   :  { %v1620_v38 = vpop.f32.mrb[16].mxu0 }
 0x117   :  { %v1684_v39 = vpop.f32.mrb[16].mxu1  ;;  %v1621_v40 = vpop.f32.mrb[17].mxu0 }
 0x118   :  { %v1622_v41 = vadd.f32 %v1621_v40, %v1620_v38  ;;  %v1685_v42 = vpop.f32.mrb[17].mxu1  ;;  %v1623_v43 = vpop.f32.mrb[18].mxu0 }
 0x119   :  { %v1686_v44 = vadd.f32 %v1685_v42, %v1684_v39  ;;  %v1687_v45 = vpop.f32.mrb[18].mxu1  ;;  %v1624_v46 = vpop.f32.mrb[19].mxu0 }
 0x11a   :  { %v1625_v47 = vadd.f32 %v1624_v46, %v1623_v43  ;;  %v1688_v48 = vpop.f32.mrb[19].mxu1 }
 0x11b   :  { %v2332_v49 = vadd.f32 %v1686_v44, %v1622_v41  ;;  %v1689_v50 = vadd.f32 %v1688_v48, %v1687_v45 }
 0x11d   :  { %v2334_v51 = vadd.f32 %v1689_v50, %v1625_v47  ;;  %v2352_v50 = vld [vmem:[%s2520_s2] ss:$0 sm:$0xff] }
 0x11e   :  { %v1626_v52 = vpop.f32.mrb[20].mxu0 }
 0x11f   :  { %v1690_v53 = vpop.f32.mrb[20].mxu1  ;;  %v1627_v54 = vpop.f32.mrb[21].mxu0 }
 0x120   :  { %v1628_v55 = vadd.f32 %v1627_v54, %v1626_v52  ;;  %v1691_v56 = vpop.f32.mrb[21].mxu1  ;;  %v1629_v58 = vpop.f32.mrb[22].mxu0  ;;  %v1542_v52 = vld [vmem:[%s2521_s4] sm:$0xff]  }
 0x121   :  { %v1692_v60 = vadd.f32 %v1691_v56, %v1690_v53  ;;  %v1693_v61 = vpop.f32.mrb[22].mxu1  ;;  %v1630_v62 = vpop.f32.mrb[23].mxu0  ;;  %v1543_v56 = vunpack.c.l.bf16 %v1542_v52 }
 0x122   :  { %v1631_v63 = vadd.f32 %v1630_v62, %v1629_v58  ;;  %v1694_v0 = vpop.f32.mrb[23].mxu1 }
 0x123   :  { %v2336_v1 = vadd.f32 %v1692_v60, %v1628_v55  ;;  %v1695_v2 = vadd.f32 %v1694_v0, %v1693_v61  ;;  %v2361_v55 = vld [vmem:[%s2522_s3] ss:$0 sm:$0xff] }
 0x125   :  { %v2338_v3 = vadd.f32 %v1695_v2, %v1631_v63  ;;  %v1544_v2 = vunpack.c.h.bf16 %v1542_v52 }
 0x126   :  { %v1632_v4 = vpop.f32.mrb[24].mxu0 }
 0x127   :  { %v1696_v5 = vpop.f32.mrb[24].mxu1  ;;  %v1633_v6 = vpop.f32.mrb[25].mxu0 }
 0x128   :  { %v1634_v8 = vadd.f32 %v1633_v6, %v1632_v4  ;;  %v1697_v10 = vpop.f32.mrb[25].mxu1  ;;  %v1635_v11 = vpop.f32.mrb[26].mxu0 }
 0x129   :  { %v1698_v12 = vadd.f32 %v1697_v10, %v1696_v5  ;;  %v1699_v13 = vpop.f32.mrb[26].mxu1  ;;  %v1636_v14 = vpop.f32.mrb[27].mxu0 }
 0x12a   :  { %v1637_v15 = vadd.f32 %v1636_v14, %v1635_v11  ;;  %v1700_v16 = vpop.f32.mrb[27].mxu1 }
 0x12b   :  { %v2340_v17 = vadd.f32 %v1698_v12, %v1634_v8  ;;  %v1701_v18 = vadd.f32 %v1700_v16, %v1699_v13 }
 0x12d   :  { %v2342_v19 = vadd.f32 %v1701_v18, %v1637_v15  ;;  %v1573_v15 = vld [vmem:[%s2521_s4 + $0x8] sm:$0xff]  }
 0x12e   :  { %v1638_v20 = vpop.f32.mrb[28].mxu0 }
 0x12f   :  { %v1702_v22 = vpop.f32.mrb[28].mxu1  ;;  %v1639_v24 = vpop.f32.mrb[29].mxu0 }
 0x130   :  { %v1640_v25 = vadd.f32 %v1639_v24, %v1638_v20  ;;  %v1703_v26 = vpop.f32.mrb[29].mxu1  ;;  %v1641_v27 = vpop.f32.mrb[30].mxu0 }
 0x131   :  { %v1704_v28 = vadd.f32 %v1703_v26, %v1702_v22  ;;  %v1705_v29 = vpop.f32.mrb[30].mxu1  ;;  %v1642_v30 = vpop.f32.mrb[31].mxu0 }
 0x132   :  { %v1643_v31 = vadd.f32 %v1642_v30, %v1641_v27  ;;  %v1706_v32 = vpop.f32.mrb[31].mxu1 }
 0x133   :  { %v2344_v33 = vadd.f32 %v1704_v28, %v1640_v25  ;;  %v1707_v34 = vadd.f32 %v1706_v32, %v1705_v29  ;;  %v1547_v25 = vunpack.c.l.bf16 %v1573_v15 }
 0x135   :  { %v2346_v36 = vadd.f32 %v1707_v34, %v1643_v31  ;;  %v1548_v31 = vunpack.c.h.bf16 %v1573_v15  ;;  %v1575_v15 = vld [vmem:[%s2521_s4 + $0x18] sm:$0xff]  }
 0x136   :  { %v1724_v38 = vpop.f32.mrb[32].mxu0 }
 0x137   :  { %v1725_v39 = vpop.f32.mrb[33].mxu0  ;;  %v1800_v40 = vpop.f32.mrb[32].mxu1 }
 0x138   :  { %v1726_v41 = vadd.f32 %v1725_v39, %v1724_v38  ;;  %v1727_v42 = vpop.f32.mrb[34].mxu0  ;;  %v1147_v43 = vpop.f32.mrb[33].mxu1 }
 0x139   :  { %v1728_v44 = vpop.f32.mrb[35].mxu0  ;;  %v1801_v45 = vpop.f32.mrb[34].mxu1 }
 0x13a   :  { %v1729_v46 = vadd.f32 %v1728_v44, %v1727_v42  ;;  %v1051_v47 = vadd.f32 %v1726_v41, %v2316_v57  ;;  %v1150_v48 = vpop.f32.mrb[35].mxu1 }
 0x13c   :  { %v1148_v53 = vadd.f32 %v1147_v43, %v1051_v47  ;;  %v1054_v54 = vadd.f32 %v1729_v46, %v2318_v59  ;;  %v1574_v46 = vld [vmem:[%s2521_s4 + $0x10] sm:$0xff]  }
 0x13e   :  { %v1217_v57 = vmul.f32 %v2352_v50, %v1148_v53  ;;  %v1151_v58 = vadd.f32 %v1150_v48, %v1054_v54  ;;  %v1730_v60 = vpop.f32.mrb[36].mxu0 }
 0x13f   :  { %v1731_v61 = vpop.f32.mrb[37].mxu0  ;;  %v2364_v62 = vpop.f32.mrb[36].mxu1 }
 0x140   :  { %v1240_v63 = vadd.f32 %v2361_v55, %v1217_v57  ;;  %v1218_v0 = vmul.f32 %v2352_v50, %v1151_v58  ;;  %v1732_v4 = vadd.f32 %v1731_v61, %v1730_v60  ;;  %v1733_v59 = vpop.f32.mrb[38].mxu0  ;;  %v1163_v5 = vpop.f32.mrb[37].mxu1 }
 0x141   :  { %v1734_v6 = vpop.f32.mrb[39].mxu0  ;;  %v2368_v8 = vpop.f32.mrb[38].mxu1 }
 0x142   :  { %v1288_v10 = vadd.f32 %v1543_v56, %v1240_v63  ;;  %v1241_v11 = vadd.f32 %v2361_v55, %v1218_v0  ;;  %v1059_v12 = vadd.f32 %v1732_v4, %v2320_v7  ;;  %v1735_v13 = vadd.f32 %v1734_v6, %v1733_v59  ;;  %v1166_v14 = vpop.f32.mrb[39].mxu1 }
 0x143   :  { %v1551_v56 = vunpack.c.l.bf16 %v1574_v46  ;;  %v1552_v0 = vunpack.c.h.bf16 %v1574_v46 }
 0x144   :  { %v1525_v16 = vpack.c.bf16 %v1288_v10, %v1288_v10  ;;  %v1289_v18 = vadd.f32 %v1544_v2, %v1241_v11  ;;  %v1156_v20 = vadd.f32 %v1800_v40, %v1059_v12  ;;  %v1062_v22 = vadd.f32 %v1735_v13, %v2322_v9 }
 0x146   :  { %1369 = vst.msk [vmem:[%s2523_s5] sm:$0xf] %vm1368_vm1, %v1525_v16  ;;  %v1526_v24 = vpack.c.bf16 %v1289_v18, %v1289_v18  ;;  %v1219_v7 = vmul.f32 %v2352_v50, %v1156_v20  ;;  %v1159_v26 = vadd.f32 %v1801_v45, %v1062_v22  ;;  %v1736_v27 = vpop.f32.mrb[40].mxu0 }
 0x147   :  { %v1737_v28 = vpop.f32.mrb[41].mxu0  ;;  %v2381_v29 = vpop.f32.mrb[40].mxu1 }
 0x148   :  { %1370 = vst.msk [vmem:[%s2523_s5 + $0x4] sm:$0xf] %vm1368_vm1, %v1526_v24  ;;  %v1242_v9 = vadd.f32 %v2361_v55, %v1219_v7  ;;  %v1220_v30 = vmul.f32 %v2352_v50, %v1159_v26  ;;  %v1738_v32 = vadd.f32 %v1737_v28, %v1736_v27  ;;  %v1739_v34 = vpop.f32.mrb[42].mxu0  ;;  %v1179_v38 = vpop.f32.mrb[41].mxu1  ;;  %v1555_v7 = vunpack.c.l.bf16 %v1575_v15 }
 0x149   :  { %v1740_v39 = vpop.f32.mrb[43].mxu0  ;;  %v2389_v40 = vpop.f32.mrb[42].mxu1  ;;  %v1556_v28 = vunpack.c.h.bf16 %v1575_v15 }
 0x14a   :  { %v1290_v41 = vadd.f32 %v1547_v25, %v1242_v9  ;;  %v1243_v42 = vadd.f32 %v2361_v55, %v1220_v30  ;;  %v1741_v43 = vadd.f32 %v1740_v39, %v1739_v34  ;;  %v1067_v44 = vadd.f32 %v1738_v32, %v2324_v21  ;;  %v1182_v45 = vpop.f32.mrb[43].mxu1 }
 0x14c   :  { %v1527_v47 = vpack.c.bf16 %v1290_v41, %v1290_v41  ;;  %v1291_v48 = vadd.f32 %v1548_v31, %v1243_v42  ;;  %v1164_v52 = vadd.f32 %v1163_v5, %v1067_v44  ;;  %v1070_v53 = vadd.f32 %v1741_v43, %v2326_v23  ;;  %v1576_v41 = vld [vmem:[%s2521_s4 + $0x20] sm:$0xff]  }
 0x14e   :  { %1371 = vst.msk [vmem:[%s2523_s5 + $0x8] sm:$0xf] %vm1368_vm1, %v1527_v47  ;;  %v1528_v54 = vpack.c.bf16 %v1291_v48, %v1291_v48  ;;  %v1221_v57 = vmul.f32 %v2352_v50, %v1164_v52  ;;  %v1167_v21 = vadd.f32 %v1166_v14, %v1070_v53  ;;  %v1742_v58 = vpop.f32.mrb[44].mxu0  ;;  %v1559_v52 = vunpack.c.l.bf16 %v1576_v41 }
 0x14f   :  { %v1743_v60 = vpop.f32.mrb[45].mxu0  ;;  %v2402_v61 = vpop.f32.mrb[44].mxu1 }
 0x150   :  { %1372 = vst.msk [vmem:[%s2523_s5 + $0xc] sm:$0xf] %vm1368_vm1, %v1528_v54  ;;  %v1244_v23 = vadd.f32 %v2361_v55, %v1221_v57  ;;  %v1222_v63 = vmul.f32 %v2352_v50, %v1167_v21  ;;  %v1744_v2 = vadd.f32 %v1743_v60, %v1742_v58  ;;  %v1745_v4 = vpop.f32.mrb[46].mxu0  ;;  %v2410_v59 = vpop.f32.mrb[45].mxu1  ;;  %v1560_v57 = vunpack.c.h.bf16 %v1576_v41 }
 0x151   :  { %v1746_v5 = vpop.f32.mrb[47].mxu0  ;;  %v2412_v6 = vpop.f32.mrb[46].mxu1 }
 0x152   :  { %v1292_v10 = vadd.f32 %v1551_v56, %v1244_v23  ;;  %v1245_v11 = vadd.f32 %v2361_v55, %v1222_v63  ;;  %v1075_v12 = vadd.f32 %v1744_v2, %v2328_v35  ;;  %v1747_v13 = vadd.f32 %v1746_v5, %v1745_v4  ;;  %v2416_v14 = vpop.f32.mrb[47].mxu1 }
 0x154   :  { %v1529_v16 = vpack.c.bf16 %v1292_v10, %v1292_v10  ;;  %v1293_v18 = vadd.f32 %v1552_v0, %v1245_v11  ;;  %v1172_v20 = vadd.f32 %v2364_v62, %v1075_v12  ;;  %v1078_v22 = vadd.f32 %v1747_v13, %v2330_v37  ;;  %v1577_v0 = vld [vmem:[%s2521_s4 + $0x28] sm:$0xff]  }
 0x156   :  { %1373 = vst.msk [vmem:[%s2523_s5 + $0x10] sm:$0xf] %vm1368_vm1, %v1529_v16  ;;  %v1530_v24 = vpack.c.bf16 %v1293_v18, %v1293_v18  ;;  %v1223_v35 = vmul.f32 %v2352_v50, %v1172_v20  ;;  %v1175_v25 = vadd.f32 %v2368_v8, %v1078_v22  ;;  %v1748_v26 = vpop.f32.mrb[48].mxu0  ;;  %v1564_v18 = vunpack.c.h.bf16 %v1577_v0 }
 0x157   :  { %v1749_v27 = vpop.f32.mrb[49].mxu0 }
 0x158   :  { %1374 = vst.msk [vmem:[%s2523_s5 + $0x14] sm:$0xf] %vm1368_vm1, %v1530_v24  ;;  %v1246_v37 = vadd.f32 %v2361_v55, %v1223_v35  ;;  %v1224_v62 = vmul.f32 %v2352_v50, %v1175_v25  ;;  %v1750_v9 = vadd.f32 %v1749_v27, %v1748_v26  ;;  %v1751_v30 = vpop.f32.mrb[50].mxu0  ;;  %v1578_v26 = vld [vmem:[%s2521_s4 + $0x30] sm:$0xff]  }
 0x159   :  { %v1752_v31 = vpop.f32.mrb[51].mxu0 }
 0x15a   :  { %v1294_v32 = vadd.f32 %v1555_v7, %v1246_v37  ;;  %v1247_v34 = vadd.f32 %v2361_v55, %v1224_v62  ;;  %v1753_v39 = vadd.f32 %v1752_v31, %v1751_v30  ;;  %v1083_v8 = vadd.f32 %v1750_v9, %v2332_v49 }
 0x15b   :  { %v1567_v31 = vunpack.c.l.bf16 %v1578_v26 }
 0x15c   :  { %v1531_v42 = vpack.c.bf16 %v1294_v32, %v1294_v32  ;;  %v1295_v43 = vadd.f32 %v1556_v28, %v1247_v34  ;;  %v1180_v44 = vadd.f32 %v1179_v38, %v1083_v8  ;;  %v1086_v46 = vadd.f32 %v1753_v39, %v2334_v51 }
 0x15d   :  { %v1568_v39 = vunpack.c.h.bf16 %v1578_v26 }
 0x15e   :  { %1375 = vst.msk [vmem:[%s2523_s5 + $0x18] sm:$0xf] %vm1368_vm1, %v1531_v42  ;;  %v1532_v47 = vpack.c.bf16 %v1295_v43, %v1295_v43  ;;  %v1225_v48 = vmul.f32 %v2352_v50, %v1180_v44  ;;  %v1183_v53 = vadd.f32 %v1182_v45, %v1086_v46  ;;  %v1754_v49 = vpop.f32.mrb[52].mxu0 }
 0x15f   :  { %v1755_v54 = vpop.f32.mrb[53].mxu0 }
 0x160   :  { %1376 = vst.msk [vmem:[%s2523_s5 + $0x1c] sm:$0xf] %vm1368_vm1, %v1532_v47  ;;  %v1248_v38 = vadd.f32 %v2361_v55, %v1225_v48  ;;  %v1226_v51 = vmul.f32 %v2352_v50, %v1183_v53  ;;  %v1756_v56 = vadd.f32 %v1755_v54, %v1754_v49  ;;  %v1757_v21 = vpop.f32.mrb[54].mxu0  ;;  %v1579_v47 = vld [vmem:[%s2521_s4 + $0x38] sm:$0xff]  }
 0x161   :  { %v1758_v58 = vpop.f32.mrb[55].mxu0 }
 0x162   :  { %v1296_v60 = vadd.f32 %v1559_v52, %v1248_v38  ;;  %v1249_v23 = vadd.f32 %v2361_v55, %v1226_v51  ;;  %v1091_v45 = vadd.f32 %v1756_v56, %v2336_v1  ;;  %v1759_v63 = vadd.f32 %v1758_v58, %v1757_v21 }
 0x163   :  { %v1563_v1 = vunpack.c.l.bf16 %v1577_v0 }
 0x164   :  { %v1533_v2 = vpack.c.bf16 %v1296_v60, %v1296_v60  ;;  %v1297_v4 = vadd.f32 %v1560_v57, %v1249_v23  ;;  %v1188_v5 = vadd.f32 %v2381_v29, %v1091_v45  ;;  %v1094_v10 = vadd.f32 %v1759_v63, %v2338_v3 }
 0x165   :  { %v1572_v57 = vunpack.c.h.bf16 %v1579_v47 }
 0x166   :  { %1377 = vst.msk [vmem:[%s2523_s5 + $0x20] sm:$0xf] %vm1368_vm1, %v1533_v2  ;;  %v1534_v11 = vpack.c.bf16 %v1297_v4, %v1297_v4  ;;  %v1227_v12 = vmul.f32 %v2352_v50, %v1188_v5  ;;  %v1191_v13 = vadd.f32 %v2389_v40, %v1094_v10  ;;  %v1760_v15 = vpop.f32.mrb[56].mxu0 }
 0x167   :  { %v1761_v16 = vpop.f32.mrb[57].mxu0 }
 0x168   :  { %1378 = vst.msk [vmem:[%s2523_s5 + $0x24] sm:$0xf] %vm1368_vm1, %v1534_v11  ;;  %v1250_v3 = vadd.f32 %v2361_v55, %v1227_v12  ;;  %v1228_v29 = vmul.f32 %v2352_v50, %v1191_v13  ;;  %v1762_v20 = vadd.f32 %v1761_v16, %v1760_v15  ;;  %v1763_v22 = vpop.f32.mrb[58].mxu0 }
 0x169   :  { %v1764_v24 = vpop.f32.mrb[59].mxu0 }
 0x16a   :  { %v1298_v35 = vadd.f32 %v1563_v1, %v1250_v3  ;;  %v1251_v7 = vadd.f32 %v2361_v55, %v1228_v29  ;;  %v1765_v25 = vadd.f32 %v1764_v24, %v1763_v22  ;;  %v1099_v40 = vadd.f32 %v1762_v20, %v2340_v17 }
 0x16c   :  { %v1535_v27 = vpack.c.bf16 %v1298_v35, %v1298_v35  ;;  %v1299_v37 = vadd.f32 %v1564_v18, %v1251_v7  ;;  %v1196_v62 = vadd.f32 %v2410_v59, %v1099_v40  ;;  %v1102_v28 = vadd.f32 %v1765_v25, %v2342_v19 }
 0x16e   :  { %1379 = vst.msk [vmem:[%s2523_s5 + $0x28] sm:$0xf] %vm1368_vm1, %v1535_v27  ;;  %v1536_v9 = vpack.c.bf16 %v1299_v37, %v1299_v37  ;;  %v1229_v30 = vmul.f32 %v2352_v50, %v1196_v62  ;;  %v1199_v17 = vadd.f32 %v2416_v14, %v1102_v28  ;;  %v1766_v32 = vpop.f32.mrb[60].mxu0 }
 0x16f   :  { %v1767_v34 = vpop.f32.mrb[61].mxu0 }
 0x170   :  { %1380 = vst.msk [vmem:[%s2523_s5 + $0x2c] sm:$0xf] %vm1368_vm1, %v1536_v9  ;;  %v1252_v19 = vadd.f32 %v2361_v55, %v1229_v30  ;;  %v1230_v59 = vmul.f32 %v2352_v50, %v1199_v17  ;;  %v1768_v8 = vadd.f32 %v1767_v34, %v1766_v32  ;;  %v1769_v41 = vpop.f32.mrb[62].mxu0 }
 0x171   :  { %v1770_v42 = vpop.f32.mrb[63].mxu0 }
 0x172   :  { %v1300_v43 = vadd.f32 %v1567_v31, %v1252_v19  ;;  %v1253_v44 = vadd.f32 %v2361_v55, %v1230_v59  ;;  %v1107_v14 = vadd.f32 %v1768_v8, %v2344_v33  ;;  %v1771_v46 = vadd.f32 %v1770_v42, %v1769_v41 }
 0x173   :  { %v1571_v33 = vunpack.c.l.bf16 %v1579_v47 }
 0x174   :  { %v1537_v48 = vpack.c.bf16 %v1300_v43, %v1300_v43  ;;  %v1301_v52 = vadd.f32 %v1568_v39, %v1253_v44  ;;  %v1204_v53 = vadd.f32 %v2402_v61, %v1107_v14  ;;  %v1110_v49 = vadd.f32 %v1771_v46, %v2346_v36 }
 0x176   :  { %1381 = vst.msk [vmem:[%s2523_s5 + $0x30] sm:$0xf] %vm1368_vm1, %v1537_v48  ;;  %v1538_v54 = vpack.c.bf16 %v1301_v52, %v1301_v52  ;;  %v1231_v38 = vmul.f32 %v2352_v50, %v1204_v53  ;;  %v1207_v51 = vadd.f32 %v2412_v6, %v1110_v49 }
 0x178   :  { %1382 = vst.msk [vmem:[%s2523_s5 + $0x34] sm:$0xf] %vm1368_vm1, %v1538_v54  ;;  %v1254_v61 = vadd.f32 %v2361_v55, %v1231_v38  ;;  %v1232_v36 = vmul.f32 %v2352_v50, %v1207_v51 }
 0x17a   :  { %v1302_v56 = vadd.f32 %v1571_v33, %v1254_v61  ;;  %v1255_v21 = vadd.f32 %v2361_v55, %v1232_v36 }
 0x17c   :  { %v1539_v58 = vpack.c.bf16 %v1302_v56, %v1302_v56  ;;  %v1303_v60 = vadd.f32 %v1572_v57, %v1255_v21 }
 0x17e   :  { %1383 = vst.msk [vmem:[%s2523_s5 + $0x38] sm:$0xf] %vm1368_vm1, %v1539_v58  ;;  %v1540_v6 = vpack.c.bf16 %v1303_v60, %v1303_v60 }
 0x180   :  { %1384 = vst.msk [vmem:[%s2523_s5 + $0x3c] sm:$0xf] %vm1368_vm1, %v1540_v6 }

// kernel: psmnet_forward.108
= control target key start
LH: loop header
LB: loop body
LE: loop exit
PB: predicated region body
PF: predicated region fallthrough
CT: control target
= control target key end

     0   :  { %v919_v36 = vmov 0.0   ;;  %vm920_vm0 = vmmov 0   ;;  %vm493_vm1 = vcmask 785408   ;;  %vm689_vm2 = vcmask 519168   ;;  %s1141_s1 = inlined_call_operand.vmem [shape: bf16[864,64], index: 1, kind: input, shape index: {}]   ;;  %s1142_s0 = inlined_call_operand.vmem [shape: bf16[16,864], index: 0, kind: input, shape index: {}]   ;;  %s1143_s2 = inlined_call_operand.vmem [shape: f32[1,64], index: 2, kind: input, shape index: {}]   ;;  %s1144_s3 = inlined_call_operand.vmem [shape: f32[1,64], index: 3, kind: input, shape index: {}]   ;;  %s1145_s4 = inlined_call_operand.vmem [shape: bf16[16,64], index: 4, kind: output, shape index: {}]  }
   0x1   :  { %v855_v0 = vld [vmem:[%s1141_s1 + $0x40] sm:$0xff]   ;;  %v859_v4 = vld [vmem:[%s1141_s1 + $0x48] sm:$0xff]   ;;  %v863_v8 = vld [vmem:[%s1141_s1 + $0x50] sm:$0xff]  }
   0x2   :  { %v856_v1 = vld [vmem:[%s1141_s1 + $0xc0] sm:$0xff]   ;;  %764 = vmatprep.subr.bf16.mxu0 %v855_v0  ;;  %v860_v5 = vld [vmem:[%s1141_s1 + $0xc8] sm:$0xff]   ;;  %v864_v9 = vld [vmem:[%s1141_s1 + $0xd0] sm:$0xff]  }
   0x3   :  { %v857_v2 = vld [vmem:[%s1141_s1] sm:$0xff]   ;;  %786 = vmatprep.subr.bf16.mxu1 %v856_v1  ;;  %v861_v6 = vld [vmem:[%s1141_s1 + $0x8] sm:$0xff]   ;;  %v865_v10 = vld [vmem:[%s1141_s1 + $0x10] sm:$0xff]  }
   0x4   :  { %v858_v3 = vld [vmem:[%s1141_s1 + $0x80] sm:$0xff]   ;;  %765 = vmatpush3.bf16.msra.mxu0 %v857_v2  ;;  %v862_v7 = vld [vmem:[%s1141_s1 + $0x88] sm:$0xff]   ;;  %v866_v11 = vld [vmem:[%s1141_s1 + $0x90] sm:$0xff]  }
   0x5   :  { %787 = vmatpush3.bf16.msra.mxu1 %v858_v3  ;;  %766 = vmatprep.subr.bf16.mxu0 %v859_v4  ;;  %v867_v12 = vld [vmem:[%s1141_s1 + $0x58] sm:$0xff]   ;;  %v871_v16 = vld [vmem:[%s1141_s1 + $0x60] sm:$0xff]   ;;  %v875_v20 = vld [vmem:[%s1141_s1 + $0x68] sm:$0xff]  }
   0x6   :  { %788 = vmatprep.subr.bf16.mxu1 %v860_v5  ;;  %v868_v13 = vld [vmem:[%s1141_s1 + $0xd8] sm:$0xff]   ;;  %v872_v17 = vld [vmem:[%s1141_s1 + $0xe0] sm:$0xff]   ;;  %v876_v21 = vld [vmem:[%s1141_s1 + $0xe8] sm:$0xff]  }
   0x7   :  { %v869_v14 = vld [vmem:[%s1141_s1 + $0x18] sm:$0xff]   ;;  %v873_v18 = vld [vmem:[%s1141_s1 + $0x20] sm:$0xff]   ;;  %v877_v22 = vld [vmem:[%s1141_s1 + $0x28] sm:$0xff]  }
   0x8   :  { %767 = vmatpush3.bf16.msra.mxu0 %v861_v6  ;;  %v870_v15 = vld [vmem:[%s1141_s1 + $0x98] sm:$0xff]   ;;  %v874_v19 = vld [vmem:[%s1141_s1 + $0xa0] sm:$0xff]   ;;  %v878_v23 = vld [vmem:[%s1141_s1 + $0xa8] sm:$0xff]  }
   0x9   :  { %789 = vmatpush3.bf16.msra.mxu1 %v862_v7  ;;  %768 = vmatprep.subr.bf16.mxu0 %v863_v8  ;;  %v879_v24 = vld [vmem:[%s1141_s1 + $0x70] sm:$0xff]   ;;  %v883_v28 = vld [vmem:[%s1141_s1 + $0x78] sm:$0xff]   ;;  %v889_v33 = vld [vmem:[%s1142_s0 + $0x4] ss:$28 sps:$4 sm:$0xff]  }
   0xa   :  { %790 = vmatprep.subr.bf16.mxu1 %v864_v9  ;;  %v880_v25 = vld [vmem:[%s1141_s1 + $0xf0] sm:$0xff]   ;;  %v884_v29 = vld [vmem:[%s1141_s1 + $0xf8] sm:$0xff]   ;;  %v890_v34 = vld [vmem:[%s1142_s0 + $0x8] ss:$28 sps:$4 sm:$0xff]   ;;  %529 = vmatprep.mubr.bf16.mxu0 %v889_v33 }
   0xb   :  { %v881_v26 = vld [vmem:[%s1141_s1 + $0x30] sm:$0xff]   ;;  %v885_v30 = vld [vmem:[%s1141_s1 + $0x38] sm:$0xff]   ;;  %v892_v35 = vld [vmem:[%s1142_s0 + $0xc] ss:$28 sps:$4 sm:$0xff]  }
   0xc   :  { %769 = vmatpush3.bf16.msra.mxu0 %v865_v10  ;;  %v882_v27 = vld [vmem:[%s1141_s1 + $0xb0] sm:$0xff]   ;;  %v886_v31 = vld [vmem:[%s1141_s1 + $0xb8] sm:$0xff]   ;;  %v893_v37 = vld [vmem:[%s1141_s1 + $0x140] sm:$0xff]   ;;  %570 = vmatprep.mubr.bf16.mxu1 %v892_v35 }
   0xd   :  { %791 = vmatpush3.bf16.msra.mxu1 %v866_v11  ;;  %770 = vmatprep.subr.bf16.mxu0 %v867_v12  ;;  %v887_v32 = vld [vmem:[%s1142_s0] ss:$28 sps:$4 sm:$0xff]   ;;  %v895_v39 = vld [vmem:[%s1141_s1 + $0x148] sm:$0xff]   ;;  %v897_v41 = vld [vmem:[%s1141_s1 + $0x150] sm:$0xff]  }
   0xe   :  { %792 = vmatprep.subr.bf16.mxu1 %v868_v13  ;;  %v894_v38 = vld [vmem:[%s1141_s1 + $0x100] sm:$0xff]   ;;  %v896_v40 = vld [vmem:[%s1141_s1 + $0x108] sm:$0xff]   ;;  %v898_v43 = vld [vmem:[%s1141_s1 + $0x110] sm:$0xff]  }
   0xf   :  { %v899_v42 = vld [vmem:[%s1141_s1 + $0x180] sm:$0xff]   ;;  %v900_v44 = vld [vmem:[%s1141_s1 + $0x158] sm:$0xff]   ;;  %v902_v45 = vld [vmem:[%s1141_s1 + $0x188] sm:$0xff]  }
  0x10   :  { %771 = vmatpush3.bf16.msra.mxu0 %v869_v14  ;;  %v901_v46 = vld [vmem:[%s1141_s1 + $0x118] sm:$0xff]   ;;  %v903_v47 = vld [vmem:[%s1141_s1 + $0x160] sm:$0xff]   ;;  %v905_v48 = vld [vmem:[%s1141_s1 + $0x190] sm:$0xff]  }
  0x11   :  { %793 = vmatpush3.bf16.msra.mxu1 %v870_v15  ;;  %772 = vmatprep.subr.bf16.mxu0 %v871_v16  ;;  %v904_v49 = vld [vmem:[%s1141_s1 + $0x120] sm:$0xff]   ;;  %v906_v50 = vld [vmem:[%s1141_s1 + $0x168] sm:$0xff]   ;;  %v908_v51 = vld [vmem:[%s1141_s1 + $0x198] sm:$0xff]  }
  0x12   :  { %794 = vmatprep.subr.bf16.mxu1 %v872_v17  ;;  %v907_v52 = vld [vmem:[%s1141_s1 + $0x128] sm:$0xff]   ;;  %v909_v53 = vld [vmem:[%s1141_s1 + $0x170] sm:$0xff]   ;;  %v911_v54 = vld [vmem:[%s1141_s1 + $0x1a0] sm:$0xff]  }
  0x13   :  { %v916_v55 = vld [vmem:[%s1142_s0 + $0x14] ss:$28 sps:$4 sm:$0xff]   ;;  %v912_v57 = vld [vmem:[%s1141_s1 + $0x178] sm:$0xff]   ;;  %v917_v58 = vld [vmem:[%s1141_s1 + $0x1a8] sm:$0xff]  }
  0x14   :  { %773 = vmatpush3.bf16.msra.mxu0 %v873_v18  ;;  %v910_v56 = vld [vmem:[%s1141_s1 + $0x130] sm:$0xff]   ;;  %v913_v59 = vld [vmem:[%s1141_s1 + $0x138] sm:$0xff]  }
  0x15   :  { %795 = vmatpush3.bf16.msra.mxu1 %v874_v19  ;;  %774 = vmatprep.subr.bf16.mxu0 %v875_v20  ;;  %v918_v60 = vld [vmem:[%s1142_s0 + $0x18] ss:$28 sps:$4 sm:$0xff]   ;;  %v914_v61 = vld [vmem:[%s1142_s0 + $0x10] ss:$28 sps:$4 sm:$0xff]  }
  0x16   :  { %796 = vmatprep.subr.bf16.mxu1 %v876_v21 }
  0x18   :  { %775 = vmatpush3.bf16.msra.mxu0 %v877_v22 }
  0x19   :  { %797 = vmatpush3.bf16.msra.mxu1 %v878_v23  ;;  %776 = vmatprep.subr.bf16.mxu0 %v879_v24  ;;  %v758_v23 = vld [vmem:[%s1143_s2] ss:$0 sm:$0xff] }
  0x1a   :  { %798 = vmatprep.subr.bf16.mxu1 %v880_v25 }
  0x1c   :  { %777 = vmatpush3.bf16.msra.mxu0 %v881_v26  ;;  %v759_v26 = vld [vmem:[%s1144_s3] ss:$0 sm:$0xff] }
  0x1d   :  { %799 = vmatpush3.bf16.msra.mxu1 %v882_v27  ;;  %778 = vmatprep.subr.bf16.mxu0 %v883_v28 }
  0x1e   :  { %800 = vmatprep.subr.bf16.mxu1 %v884_v29 }
  0x20   :  { %779 = vmatpush3.bf16.msra.mxu0 %v885_v30 }
  0x21   :  { %801 = vmatpush3.bf16.msra.mxu1 %v886_v31  ;;  %808 = vmatprep.subr.bf16.mxu0 %v893_v37 }
  0x22   :  { %837 = vmatprep.subr.bf16.mxu1 %v919_v36 }
  0x23   :  { %530 = vmatmul.mubr.bf16.vlgmr.msra.gmra.mrb[0].mxu0 %v887_v32 }
  0x24   :  { %571 = vmatmul.mubr.bf16.vlgmr.msra.gmra.mrb[0].mxu1 %v890_v34  ;;  %809 = vmatpush3.bf16.msra.mxu0 %v894_v38 }
  0x25   :  { %849 = vmatprep.mubr.msk.bf16.mxu1 %vm920_vm0, %v919_v36  ;;  %810 = vmatprep.subr.bf16.mxu0 %v895_v39 }
  0x26   :  { %838 = vmatpush3.bf16.msra.mxu1 %v899_v42  ;;  %611 = vmatprep.mubr.bf16.mxu0 %v916_v55 }
  0x27   :  { %839 = vmatprep.subr.bf16.mxu1 %v919_v36 }
  0x28   :  { %811 = vmatpush3.bf16.msra.mxu0 %v896_v40 }
  0x29   :  { %812 = vmatprep.subr.bf16.mxu0 %v897_v41 }
  0x2a   :  { %840 = vmatpush3.bf16.msra.mxu1 %v902_v45 }
  0x2b   :  { %841 = vmatprep.subr.bf16.mxu1 %v919_v36 }
  0x2c   :  { %813 = vmatpush3.bf16.msra.mxu0 %v898_v43 }
  0x2d   :  { %814 = vmatprep.subr.bf16.mxu0 %v900_v44 }
  0x2e   :  { %842 = vmatpush3.bf16.msra.mxu1 %v905_v48 }
  0x2f   :  { %843 = vmatprep.subr.bf16.mxu1 %v919_v36 }
  0x30   :  { %815 = vmatpush3.bf16.msra.mxu0 %v901_v46 }
  0x31   :  { %816 = vmatprep.subr.bf16.mxu0 %v903_v47 }
  0x32   :  { %844 = vmatpush3.bf16.msra.mxu1 %v908_v51 }
  0x33   :  { %845 = vmatprep.subr.bf16.mxu1 %v919_v36 }
  0x34   :  { %817 = vmatpush3.bf16.msra.mxu0 %v904_v49 }
  0x35   :  { %818 = vmatprep.subr.bf16.mxu0 %v906_v50 }
  0x36   :  { %846 = vmatpush3.bf16.msra.mxu1 %v911_v54 }
  0x37   :  { %847 = vmatprep.subr.bf16.mxu1 %v919_v36 }
  0x38   :  { %819 = vmatpush3.bf16.msra.mxu0 %v907_v52 }
  0x39   :  { %820 = vmatprep.subr.bf16.mxu0 %v909_v53 }
  0x3a   :  { %848 = vmatpush3.bf16.msra.mxu1 %v917_v58 }
  0x3c   :  { %821 = vmatpush3.bf16.msra.mxu0 %v910_v56 }
  0x3d   :  { %822 = vmatprep.subr.bf16.mxu0 %v912_v57  ;;  %850 = vmatmul.mubr.msk.bf16.vlgmr.msra.gmra.mrb[4].mxu1 %vm493_vm1, %v918_v60 }
  0x40   :  { %823 = vmatpush3.bf16.msra.mxu0 %v913_v59 }
  0x43   :  { %612 = vmatmul.mubr.bf16.vlgmr.msra.gmra.mrb[4].mxu0 %v914_v61 }
  0xf6   :  { %v780_v62 = vpop.f32.mrb[0].mxu0 }
  0xf7   :  { %v802_v63 = vpop.f32.mrb[0].mxu1  ;;  %v781_v0 = vpop.f32.mrb[1].mxu0 }
  0xf8   :  { %v782_v1 = vadd.f32 %v781_v0, %v780_v62  ;;  %v803_v2 = vpop.f32.mrb[1].mxu1  ;;  %v783_v3 = vpop.f32.mrb[2].mxu0 }
  0xf9   :  { %v804_v4 = vadd.f32 %v803_v2, %v802_v63  ;;  %v805_v5 = vpop.f32.mrb[2].mxu1  ;;  %v784_v6 = vpop.f32.mrb[3].mxu0 }
  0xfa   :  { %v785_v7 = vadd.f32 %v784_v6, %v783_v3  ;;  %v806_v8 = vpop.f32.mrb[3].mxu1 }
  0xfb   :  { %v573_v9 = vadd.f32 %v804_v4, %v782_v1  ;;  %v807_v10 = vadd.f32 %v806_v8, %v805_v5 }
  0xfd   :  { %v576_v11 = vadd.f32 %v807_v10, %v785_v7 }
 0x110   :  { %v654_v12 = vpop.f32.mrb[4].mxu1 }
 0x111   :  { %v851_v13 = vpop.f32.mrb[5].mxu1 }
 0x112   :  { %v657_v14 = vpop.f32.mrb[6].mxu1 }
 0x113   :  { %v852_v16 = vpop.f32.mrb[7].mxu1 }
 0x116   :  { %v824_v15 = vpop.f32.mrb[4].mxu0 }
 0x117   :  { %v825_v17 = vpop.f32.mrb[5].mxu0 }
 0x118   :  { %v826_v18 = vadd.f32 %v825_v17, %v824_v15  ;;  %v827_v19 = vpop.f32.mrb[6].mxu0 }
 0x119   :  { %v828_v20 = vpop.f32.mrb[7].mxu0 }
 0x11a   :  { %v614_v21 = vadd.f32 %v826_v18, %v573_v9  ;;  %v829_v22 = vadd.f32 %v828_v20, %v827_v19 }
 0x11c   :  { %v655_v24 = vadd.f32 %v654_v12, %v614_v21  ;;  %v617_v25 = vadd.f32 %v829_v22, %v576_v11 }
 0x11e   :  { %v668_v27 = vmul.f32 %v758_v23, %v655_v24  ;;  %v658_v28 = vadd.f32 %v657_v14, %v617_v25 }
 0x120   :  { %v677_v29 = vadd.f32 %v759_v26, %v668_v27  ;;  %v669_v30 = vmul.f32 %v758_v23, %v658_v28 }
 0x122   :  { %v679_v31 = vmax.f32 %v677_v29, 0.0  ;;  %v678_v32 = vadd.f32 %v759_v26, %v669_v30 }
 0x124   :  { %v762_v33 = vpack.c.bf16 %v679_v31, %v679_v31  ;;  %v680_v34 = vmax.f32 %v678_v32, 0.0 }
 0x126   :  { %690 = vst.msk [vmem:[%s1145_s4] sm:$0xf] %vm689_vm2, %v762_v33  ;;  %v763_v35 = vpack.c.bf16 %v680_v34, %v680_v34 }
 0x128   :  { %691 = vst.msk [vmem:[%s1145_s4 + $0x4] sm:$0xf] %vm689_vm2, %v763_v35 }

// kernel: psmnet_forward.109
= control target key start
LH: loop header
LB: loop body
LE: loop exit
PB: predicated region body
PF: predicated region fallthrough
CT: control target
= control target key end

     0   :  { %vm965_vm0 = vcmask 523264   ;;  %vm1284_vm1 = vcmask 519168   ;;  %s2098_s1 = inlined_call_operand.vmem [shape: bf16[1728,64], index: 1, kind: input, shape index: {}]   ;;  %s2099_s0 = inlined_call_operand.vmem [shape: bf16[16,1728], index: 0, kind: input, shape index: {}]   ;;  %s2100_s2 = inlined_call_operand.vmem [shape: f32[1,64], index: 2, kind: input, shape index: {}]   ;;  %s2101_s3 = inlined_call_operand.vmem [shape: f32[1,64], index: 3, kind: input, shape index: {}]   ;;  %s2102_s4 = inlined_call_operand.vmem [shape: bf16[16,64], index: 4, kind: output, shape index: {}]  }
   0x1   :  { %v1553_v0 = vld [vmem:[%s2098_s1 + $0x40] sm:$0xff]   ;;  %v1555_v2 = vld [vmem:[%s2098_s1 + $0x48] sm:$0xff]   ;;  %v1557_v4 = vld [vmem:[%s2098_s1 + $0x50] sm:$0xff]  }
   0x2   :  { %v1554_v1 = vld [vmem:[%s2098_s1] sm:$0xff]   ;;  %1420 = vmatprep.subr.bf16.mxu1 %v1553_v0  ;;  %v1556_v3 = vld [vmem:[%s2098_s1 + $0x8] sm:$0xff]   ;;  %v1558_v5 = vld [vmem:[%s2098_s1 + $0x10] sm:$0xff]  }
   0x3   :  { %1421 = vmatpush3.bf16.msra.mxu1 %v1554_v1  ;;  %v1559_v6 = vld [vmem:[%s2098_s1 + $0x58] sm:$0xff]   ;;  %v1563_v8 = vld [vmem:[%s2098_s1 + $0x140] sm:$0xff]   ;;  %v1567_v12 = vld [vmem:[%s2098_s1 + $0x148] sm:$0xff]  }
   0x4   :  { %1422 = vmatprep.subr.bf16.mxu1 %v1555_v2  ;;  %v1560_v7 = vld [vmem:[%s2098_s1 + $0x18] sm:$0xff]   ;;  %v1564_v9 = vld [vmem:[%s2098_s1 + $0x100] sm:$0xff]   ;;  %1464 = vmatprep.subr.bf16.mxu0 %v1563_v8  ;;  %v1568_v13 = vld [vmem:[%s2098_s1 + $0x108] sm:$0xff]  }
   0x5   :  { %v1561_v10 = vld [vmem:[%s2098_s1 + $0x60] sm:$0xff]   ;;  %1465 = vmatpush3.bf16.msra.mxu0 %v1564_v9  ;;  %v1565_v14 = vld [vmem:[%s2098_s1 + $0x68] sm:$0xff]   ;;  %v1571_v16 = vld [vmem:[%s2098_s1 + $0x150] sm:$0xff]  }
   0x6   :  { %v1562_v11 = vld [vmem:[%s2098_s1 + $0x20] sm:$0xff]   ;;  %1466 = vmatprep.subr.bf16.mxu0 %v1567_v12  ;;  %v1566_v15 = vld [vmem:[%s2098_s1 + $0x28] sm:$0xff]   ;;  %v1572_v17 = vld [vmem:[%s2098_s1 + $0x110] sm:$0xff]  }
   0x7   :  { %1423 = vmatpush3.bf16.msra.mxu1 %v1556_v3  ;;  %v1569_v18 = vld [vmem:[%s2098_s1 + $0x70] sm:$0xff]   ;;  %v1575_v20 = vld [vmem:[%s2098_s1 + $0x158] sm:$0xff]   ;;  %v1580_v25 = vld [vmem:[%s2098_s1 + $0xc0] sm:$0xff]  }
   0x8   :  { %1424 = vmatprep.subr.bf16.mxu1 %v1557_v4  ;;  %v1570_v19 = vld [vmem:[%s2098_s1 + $0x30] sm:$0xff]   ;;  %v1573_v21 = vld [vmem:[%s2098_s1 + $0x78] sm:$0xff]   ;;  %v1582_v27 = vld [vmem:[%s2098_s1 + $0x160] sm:$0xff]  }
   0x9   :  { %1467 = vmatpush3.bf16.msra.mxu0 %v1568_v13  ;;  %v1578_v22 = vld [vmem:[%s2099_s0 + $0x4] ss:$56 sps:$4 sm:$0xff]   ;;  %v1576_v26 = vld [vmem:[%s2099_s0] ss:$56 sps:$4 sm:$0xff]   ;;  %v1584_v30 = vld [vmem:[%s2098_s1 + $0xc8] sm:$0xff]  }
   0xa   :  { %1468 = vmatprep.subr.bf16.mxu0 %v1571_v16  ;;  %v1579_v23 = vld [vmem:[%s2098_s1 + $0x118] sm:$0xff]   ;;  %1001 = vmatprep.mubr.bf16.mxu1 %v1578_v22  ;;  %v1583_v28 = vld [vmem:[%s2098_s1 + $0x120] sm:$0xff]   ;;  %v1586_v31 = vld [vmem:[%s2098_s1 + $0x168] sm:$0xff]  }
   0xb   :  { %1425 = vmatpush3.bf16.msra.mxu1 %v1558_v5  ;;  %v1574_v24 = vld [vmem:[%s2098_s1 + $0x38] sm:$0xff]   ;;  %v1581_v29 = vld [vmem:[%s2098_s1 + $0x80] sm:$0xff]   ;;  %v1587_v32 = vld [vmem:[%s2098_s1 + $0x128] sm:$0xff]  }
   0xc   :  { %1426 = vmatprep.subr.bf16.mxu1 %v1559_v6  ;;  %v1585_v33 = vld [vmem:[%s2098_s1 + $0x88] sm:$0xff]   ;;  %v1588_v34 = vld [vmem:[%s2098_s1 + $0xd0] sm:$0xff]   ;;  %v1592_v38 = vld [vmem:[%s2098_s1 + $0xd8] sm:$0xff]  }
   0xd   :  { %1469 = vmatpush3.bf16.msra.mxu0 %v1572_v17  ;;  %v1590_v35 = vld [vmem:[%s2098_s1 + $0x170] sm:$0xff]   ;;  %v1594_v39 = vld [vmem:[%s2098_s1 + $0x178] sm:$0xff]   ;;  %v1596_v42 = vld [vmem:[%s2098_s1 + $0xe0] sm:$0xff]   ;;  %v1682_v17 = vmov 0  }
   0xe   :  { %1470 = vmatprep.subr.bf16.mxu0 %v1575_v20  ;;  %v1591_v36 = vld [vmem:[%s2098_s1 + $0x130] sm:$0xff]   ;;  %v1595_v40 = vld [vmem:[%s2098_s1 + $0x138] sm:$0xff]   ;;  %v1601_v45 = vld [vmem:[%s2098_s1 + $0x240] sm:$0xff]  }
   0xf   :  { %1427 = vmatpush3.bf16.msra.mxu1 %v1560_v7  ;;  %v1589_v37 = vld [vmem:[%s2098_s1 + $0x90] sm:$0xff]   ;;  %v1593_v41 = vld [vmem:[%s2098_s1 + $0x98] sm:$0xff]   ;;  %v1602_v46 = vld [vmem:[%s2098_s1 + $0x200] sm:$0xff]  }
  0x10   :  { %1428 = vmatprep.subr.bf16.mxu1 %v1561_v10  ;;  %v1598_v43 = vld [vmem:[%s2099_s0 + $0x10] ss:$56 sps:$4 sm:$0xff]   ;;  %v1600_v44 = vld [vmem:[%s2099_s0 + $0x14] ss:$56 sps:$4 sm:$0xff]   ;;  %v1597_v47 = vld [vmem:[%s2098_s1 + $0xa0] sm:$0xff]  }
  0x11   :  { %1471 = vmatpush3.bf16.msra.mxu0 %v1579_v23  ;;  %1083 = vmatprep.mubr.bf16.mxu0 %v1600_v44  ;;  %v1603_v48 = vld [vmem:[%s2098_s1 + $0xe8] sm:$0xff]   ;;  %v1607_v52 = vld [vmem:[%s2098_s1 + $0xf0] sm:$0xff]   ;;  %v1611_v56 = vld [vmem:[%s2098_s1 + $0xf8] sm:$0xff]  }
  0x12   :  { %1472 = vmatprep.subr.bf16.mxu0 %v1582_v27  ;;  %v1605_v49 = vld [vmem:[%s2098_s1 + $0x248] sm:$0xff]   ;;  %v1609_v53 = vld [vmem:[%s2098_s1 + $0x250] sm:$0xff]   ;;  %v1613_v57 = vld [vmem:[%s2098_s1 + $0x258] sm:$0xff]  }
  0x13   :  { %1429 = vmatpush3.bf16.msra.mxu1 %v1562_v11  ;;  %v1606_v50 = vld [vmem:[%s2098_s1 + $0x208] sm:$0xff]   ;;  %v1610_v54 = vld [vmem:[%s2098_s1 + $0x210] sm:$0xff]   ;;  %v1612_v58 = vld [vmem:[%s2098_s1 + $0xb8] sm:$0xff]  }
  0x14   :  { %1430 = vmatprep.subr.bf16.mxu1 %v1565_v14  ;;  %v1604_v51 = vld [vmem:[%s2098_s1 + $0xa8] sm:$0xff]   ;;  %v1608_v55 = vld [vmem:[%s2098_s1 + $0xb0] sm:$0xff]   ;;  %v1617_v60 = vld [vmem:[%s2098_s1 + $0x218] sm:$0xff]  }
  0x15   :  { %1473 = vmatpush3.bf16.msra.mxu0 %v1583_v28  ;;  %v1616_v59 = vld [vmem:[%s2099_s0 + $0xc] ss:$56 sps:$4 sm:$0xff]   ;;  %v1614_v61 = vld [vmem:[%s2099_s0 + $0x8] ss:$56 sps:$4 sm:$0xff]   ;;  %v1626_v6 = vld [vmem:[%s2098_s1 + $0x1d0] sm:$0xff]  }
  0x16   :  { %1474 = vmatprep.subr.bf16.mxu0 %v1586_v31  ;;  %v1618_v62 = vld [vmem:[%s2098_s1 + $0x1c0] sm:$0xff]   ;;  %v1622_v2 = vld [vmem:[%s2098_s1 + $0x1c8] sm:$0xff]   ;;  %v1627_v7 = vld [vmem:[%s2098_s1 + $0x190] sm:$0xff]  }
  0x17   :  { %1431 = vmatpush3.bf16.msra.mxu1 %v1566_v15  ;;  %v1619_v63 = vld [vmem:[%s2098_s1 + $0x180] sm:$0xff]   ;;  %v1623_v3 = vld [vmem:[%s2098_s1 + $0x188] sm:$0xff]   ;;  %v1628_v8 = vld [vmem:[%s2098_s1 + $0x270] sm:$0xff]  }
  0x18   :  { %1432 = vmatprep.subr.bf16.mxu1 %v1569_v18  ;;  %v1620_v0 = vld [vmem:[%s2098_s1 + $0x260] sm:$0xff]   ;;  %v1624_v4 = vld [vmem:[%s2098_s1 + $0x268] sm:$0xff]   ;;  %v1629_v9 = vld [vmem:[%s2098_s1 + $0x230] sm:$0xff]  }
  0x19   :  { %1475 = vmatpush3.bf16.msra.mxu0 %v1587_v32  ;;  %v1621_v1 = vld [vmem:[%s2098_s1 + $0x220] sm:$0xff]   ;;  %v1625_v5 = vld [vmem:[%s2098_s1 + $0x228] sm:$0xff]   ;;  %v1630_v10 = vld [vmem:[%s2098_s1 + $0x1d8] sm:$0xff]  }
  0x1a   :  { %1476 = vmatprep.subr.bf16.mxu0 %v1590_v35  ;;  %v1631_v11 = vld [vmem:[%s2098_s1 + $0x198] sm:$0xff]   ;;  %v1634_v14 = vld [vmem:[%s2098_s1 + $0x1e0] sm:$0xff]   ;;  %v1640_v20 = vld [vmem:[%s2098_s1 + $0x1e8] sm:$0xff]  }
  0x1b   :  { %1433 = vmatpush3.bf16.msra.mxu1 %v1570_v19  ;;  %v1632_v12 = vld [vmem:[%s2098_s1 + $0x278] sm:$0xff]   ;;  %v1635_v15 = vld [vmem:[%s2098_s1 + $0x1a0] sm:$0xff]   ;;  %v1642_v22 = vld [vmem:[%s2098_s1 + $0x308] sm:$0xff]  }
  0x1c   :  { %1434 = vmatprep.subr.bf16.mxu1 %v1573_v21  ;;  %v1633_v13 = vld [vmem:[%s2098_s1 + $0x238] sm:$0xff]   ;;  %v1639_v19 = vld [vmem:[%s2098_s1 + $0x300] sm:$0xff]   ;;  %v1641_v21 = vld [vmem:[%s2098_s1 + $0x1a8] sm:$0xff]  }
  0x1d   :  { %1477 = vmatpush3.bf16.msra.mxu0 %v1591_v36  ;;  %v1636_v16 = vld [vmem:[%s2099_s0 + $0x20] ss:$56 sps:$4 sm:$0xff]   ;;  %v1638_v18 = vld [vmem:[%s2099_s0 + $0x24] ss:$56 sps:$4 sm:$0xff]   ;;  %v1643_v23 = vld [vmem:[%s2098_s1 + $0x1f0] sm:$0xff]  }
  0x1e   :  { %1478 = vmatprep.subr.bf16.mxu0 %v1594_v39  ;;  %v1650_v27 = vld [vmem:[%s2099_s0 + $0x1c] ss:$56 sps:$4 sm:$0xff]   ;;  %v1648_v31 = vld [vmem:[%s2099_s0 + $0x18] ss:$56 sps:$4 sm:$0xff]   ;;  %v1653_v32 = vld [vmem:[%s2098_s1 + $0x280] sm:$0xff]  }
  0x1f   :  { %1435 = vmatpush3.bf16.msra.mxu1 %v1574_v24  ;;  %v1644_v24 = vld [vmem:[%s2098_s1 + $0x1b0] sm:$0xff]   ;;  %v1647_v28 = vld [vmem:[%s2098_s1 + $0x1b8] sm:$0xff]   ;;  %v1656_v35 = vld [vmem:[%s2098_s1 + $0x288] sm:$0xff]  }
  0x20   :  { %1442 = vmatprep.subr.bf16.mxu1 %v1580_v25  ;;  %v1645_v25 = vld [vmem:[%s2098_s1 + $0x310] sm:$0xff]   ;;  %v1657_v36 = vld [vmem:[%s2098_s1 + $0x328] sm:$0xff]   ;;  %v1665_v44 = vld [vmem:[%s2098_s1 + $0x2a0] sm:$0xff]  }
  0x21   :  { %1479 = vmatpush3.bf16.msra.mxu0 %v1595_v40  ;;  %v1660_v39 = vld [vmem:[%s2098_s1 + $0x330] sm:$0xff]   ;;  %v1661_v40 = vld [vmem:[%s2098_s1 + $0x2d8] sm:$0xff]  }
  0x22   :  { %1002 = vmatmul.mubr.bf16.vlgmr.msra.gmra.mrb[0].mxu1 %v1576_v26  ;;  %1508 = vmatprep.subr.bf16.mxu0 %v1601_v45  ;;  %v1646_v26 = vld [vmem:[%s2098_s1 + $0x1f8] sm:$0xff]   ;;  %v1666_v45 = vld [vmem:[%s2098_s1 + $0x340] sm:$0xff]  }
  0x23   :  { %1443 = vmatpush3.bf16.msra.mxu1 %v1581_v29  ;;  %1042 = vmatprep.mubr.bf16.mxu1 %v1616_v59  ;;  %v1651_v29 = vld [vmem:[%s2098_s1 + $0x318] sm:$0xff]  }
  0x24   :  { %1444 = vmatprep.subr.bf16.mxu1 %v1584_v30  ;;  %1084 = vmatmul.mubr.bf16.vlgmr.msra.gmra.mrb[0].mxu0 %v1598_v43  ;;  %v1652_v30 = vld [vmem:[%s2098_s1 + $0x2c0] sm:$0xff]  }
  0x25   :  { %1509 = vmatpush3.bf16.msra.mxu0 %v1602_v46  ;;  %1165 = vmatprep.mubr.bf16.mxu0 %v1638_v18  ;;  %v1664_v43 = vld [vmem:[%s2098_s1 + $0x2e0] sm:$0xff]   ;;  %v1667_v46 = vld [vmem:[%s2098_s1 + $0x2e8] sm:$0xff]  }
  0x26   :  { %1510 = vmatprep.subr.bf16.mxu0 %v1605_v49  ;;  %v1677_v49 = vld [vmem:[%s2099_s0 + $0x2c] ss:$56 sps:$4 sm:$0xff]  }
  0x27   :  { %1445 = vmatpush3.bf16.msra.mxu1 %v1585_v33  ;;  %v1654_v33 = vld [vmem:[%s2098_s1 + $0x320] sm:$0xff]  }
  0x28   :  { %1446 = vmatprep.subr.bf16.mxu1 %v1588_v34  ;;  %v1655_v34 = vld [vmem:[%s2098_s1 + $0x2c8] sm:$0xff]  }
  0x29   :  { %1511 = vmatpush3.bf16.msra.mxu0 %v1606_v50  ;;  %v1670_v50 = vld [vmem:[%s2098_s1 + $0x2f0] sm:$0xff]  }
  0x2a   :  { %1512 = vmatprep.subr.bf16.mxu0 %v1609_v53  ;;  %v1672_v53 = vld [vmem:[%s2098_s1 + $0x350] sm:$0xff]  }
  0x2b   :  { %1447 = vmatpush3.bf16.msra.mxu1 %v1589_v37  ;;  %v1658_v37 = vld [vmem:[%s2098_s1 + $0x2d0] sm:$0xff]  }
  0x2c   :  { %1448 = vmatprep.subr.bf16.mxu1 %v1592_v38  ;;  %v1659_v38 = vld [vmem:[%s2098_s1 + $0x290] sm:$0xff]  }
  0x2d   :  { %1513 = vmatpush3.bf16.msra.mxu0 %v1610_v54  ;;  %v1673_v54 = vld [vmem:[%s2098_s1 + $0x2f8] sm:$0xff]  }
  0x2e   :  { %1514 = vmatprep.subr.bf16.mxu0 %v1613_v57  ;;  %v1675_v57 = vld [vmem:[%s2099_s0 + $0x28] ss:$56 sps:$4 sm:$0xff]  }
  0x2f   :  { %1449 = vmatpush3.bf16.msra.mxu1 %v1593_v41  ;;  %v1662_v41 = vld [vmem:[%s2098_s1 + $0x298] sm:$0xff]  }
  0x30   :  { %1450 = vmatprep.subr.bf16.mxu1 %v1596_v42  ;;  %v1663_v42 = vld [vmem:[%s2098_s1 + $0x338] sm:$0xff]  }
  0x31   :  { %1515 = vmatpush3.bf16.msra.mxu0 %v1617_v60 }
  0x32   :  { %1516 = vmatprep.subr.bf16.mxu0 %v1620_v0 }
  0x33   :  { %1451 = vmatpush3.bf16.msra.mxu1 %v1597_v47  ;;  %v1668_v47 = vld [vmem:[%s2098_s1 + $0x2a8] sm:$0xff]  }
  0x34   :  { %1452 = vmatprep.subr.bf16.mxu1 %v1603_v48  ;;  %v1669_v48 = vld [vmem:[%s2098_s1 + $0x348] sm:$0xff]  }
  0x35   :  { %1517 = vmatpush3.bf16.msra.mxu0 %v1621_v1 }
  0x36   :  { %1518 = vmatprep.subr.bf16.mxu0 %v1624_v4 }
  0x37   :  { %1453 = vmatpush3.bf16.msra.mxu1 %v1604_v51  ;;  %v1679_v51 = vld [vmem:[%s2099_s0 + $0x34] ss:$56 sps:$4 sm:$0xff]  }
  0x38   :  { %1454 = vmatprep.subr.bf16.mxu1 %v1607_v52  ;;  %v1671_v52 = vld [vmem:[%s2098_s1 + $0x2b0] sm:$0xff]  }
  0x39   :  { %1519 = vmatpush3.bf16.msra.mxu0 %v1625_v5 }
  0x3a   :  { %1520 = vmatprep.subr.bf16.mxu0 %v1628_v8 }
  0x3b   :  { %1455 = vmatpush3.bf16.msra.mxu1 %v1608_v55  ;;  %v1674_v55 = vld [vmem:[%s2098_s1 + $0x2b8] sm:$0xff]  }
  0x3c   :  { %1456 = vmatprep.subr.bf16.mxu1 %v1611_v56  ;;  %v1678_v56 = vld [vmem:[%s2098_s1 + $0x358] sm:$0xff]  }
  0x3d   :  { %1521 = vmatpush3.bf16.msra.mxu0 %v1629_v9 }
  0x3e   :  { %1522 = vmatprep.subr.bf16.mxu0 %v1632_v12 }
  0x3f   :  { %1457 = vmatpush3.bf16.msra.mxu1 %v1612_v58  ;;  %v1681_v58 = vld [vmem:[%s2099_s0 + $0x30] ss:$56 sps:$4 sm:$0xff]  }
  0x40   :  { %1486 = vmatprep.subr.bf16.mxu1 %v1618_v62 }
  0x41   :  { %1523 = vmatpush3.bf16.msra.mxu0 %v1633_v13 }
  0x42   :  { %1043 = vmatmul.mubr.bf16.vlgmr.msra.gmra.mrb[4].mxu1 %v1614_v61  ;;  %1215 = vmatprep.subr.bf16.mxu0 %v1682_v17 }
  0x43   :  { %1487 = vmatpush3.bf16.msra.mxu1 %v1619_v63  ;;  %1124 = vmatprep.mubr.bf16.mxu1 %v1650_v27 }
  0x44   :  { %1488 = vmatprep.subr.bf16.mxu1 %v1622_v2  ;;  %1166 = vmatmul.mubr.bf16.vlgmr.msra.gmra.mrb[4].mxu0 %v1636_v16 }
  0x45   :  { %1216 = vmatpush1.bf16.msra.mxu0 %v1639_v19  ;;  %1413 = vmatprep.mubr.msk.bf16.mxu0 %vm965_vm0, %v1679_v51 }
  0x46   :  { %1217 = vmatprep.subr.bf16.mxu0 %v1682_v17 }
  0x47   :  { %1489 = vmatpush3.bf16.msra.mxu1 %v1623_v3 }
  0x48   :  { %1490 = vmatprep.subr.bf16.mxu1 %v1626_v6 }
  0x49   :  { %1218 = vmatpush1.bf16.msra.mxu0 %v1642_v22 }
  0x4a   :  { %1219 = vmatprep.subr.bf16.mxu0 %v1682_v17 }
  0x4b   :  { %1491 = vmatpush3.bf16.msra.mxu1 %v1627_v7 }
  0x4c   :  { %1492 = vmatprep.subr.bf16.mxu1 %v1630_v10 }
  0x4d   :  { %1220 = vmatpush1.bf16.msra.mxu0 %v1645_v25 }
  0x4e   :  { %1221 = vmatprep.subr.bf16.mxu0 %v1682_v17 }
  0x4f   :  { %1493 = vmatpush3.bf16.msra.mxu1 %v1631_v11 }
  0x50   :  { %1494 = vmatprep.subr.bf16.mxu1 %v1634_v14 }
  0x51   :  { %1222 = vmatpush1.bf16.msra.mxu0 %v1651_v29 }
  0x52   :  { %1223 = vmatprep.subr.bf16.mxu0 %v1682_v17 }
  0x53   :  { %1495 = vmatpush3.bf16.msra.mxu1 %v1635_v15 }
  0x54   :  { %1496 = vmatprep.subr.bf16.mxu1 %v1640_v20 }
  0x55   :  { %1224 = vmatpush1.bf16.msra.mxu0 %v1654_v33 }
  0x56   :  { %1225 = vmatprep.subr.bf16.mxu0 %v1682_v17 }
  0x57   :  { %1497 = vmatpush3.bf16.msra.mxu1 %v1641_v21 }
  0x58   :  { %1498 = vmatprep.subr.bf16.mxu1 %v1643_v23 }
  0x59   :  { %1226 = vmatpush1.bf16.msra.mxu0 %v1657_v36 }
  0x5a   :  { %1227 = vmatprep.subr.bf16.mxu0 %v1682_v17 }
  0x5b   :  { %1499 = vmatpush3.bf16.msra.mxu1 %v1644_v24 }
  0x5c   :  { %1500 = vmatprep.subr.bf16.mxu1 %v1646_v26 }
  0x5d   :  { %1228 = vmatpush1.bf16.msra.mxu0 %v1660_v39 }
  0x5e   :  { %1229 = vmatprep.subr.bf16.mxu0 %v1682_v17 }
  0x5f   :  { %1501 = vmatpush3.bf16.msra.mxu1 %v1647_v28 }
  0x60   :  { %1530 = vmatprep.subr.bf16.mxu1 %v1652_v30 }
  0x61   :  { %1230 = vmatpush1.bf16.msra.mxu0 %v1663_v42 }
  0x62   :  { %1125 = vmatmul.mubr.bf16.vlgmr.msra.gmra.mrb[8].mxu1 %v1648_v31  ;;  %1231 = vmatprep.subr.bf16.mxu0 %v1682_v17 }
  0x63   :  { %1531 = vmatpush3.bf16.msra.mxu1 %v1653_v32  ;;  %1206 = vmatprep.mubr.bf16.mxu1 %v1677_v49 }
  0x64   :  { %1532 = vmatprep.subr.bf16.mxu1 %v1655_v34 }
  0x65   :  { %1232 = vmatpush1.bf16.msra.mxu0 %v1666_v45 }
  0x66   :  { %1233 = vmatprep.subr.bf16.mxu0 %v1682_v17 }
  0x67   :  { %1533 = vmatpush3.bf16.msra.mxu1 %v1656_v35 }
  0x68   :  { %1534 = vmatprep.subr.bf16.mxu1 %v1658_v37 }
  0x69   :  { %1234 = vmatpush1.bf16.msra.mxu0 %v1669_v48 }
  0x6a   :  { %1235 = vmatprep.subr.bf16.mxu0 %v1682_v17 }
  0x6b   :  { %1535 = vmatpush3.bf16.msra.mxu1 %v1659_v38 }
  0x6c   :  { %1536 = vmatprep.subr.bf16.mxu1 %v1661_v40 }
  0x6d   :  { %1236 = vmatpush1.bf16.msra.mxu0 %v1672_v53 }
  0x6e   :  { %1237 = vmatprep.subr.bf16.mxu0 %v1682_v17 }
  0x6f   :  { %1537 = vmatpush3.bf16.msra.mxu1 %v1662_v41 }
  0x70   :  { %1538 = vmatprep.subr.bf16.mxu1 %v1664_v43 }
  0x71   :  { %1238 = vmatpush1.bf16.msra.mxu0 %v1678_v56 }
  0x73   :  { %1539 = vmatpush3.bf16.msra.mxu1 %v1665_v44  ;;  %v1414_v44 = vld [vmem:[%s2100_s2] ss:$0 sm:$0xff] }
  0x74   :  { %1540 = vmatprep.subr.bf16.mxu1 %v1667_v46  ;;  %1248 = vmatmul.mubr.bf16.vlgmr.msra.gmra.mrb[8].mxu0 %v1681_v58 }
  0x77   :  { %1541 = vmatpush3.bf16.msra.mxu1 %v1668_v47  ;;  %v1415_v47 = vld [vmem:[%s2101_s3] ss:$0 sm:$0xff] }
  0x78   :  { %1542 = vmatprep.subr.bf16.mxu1 %v1670_v50 }
  0x7b   :  { %1543 = vmatpush3.bf16.msra.mxu1 %v1671_v52 }
  0x7c   :  { %1544 = vmatprep.subr.bf16.mxu1 %v1673_v54 }
  0x7f   :  { %1545 = vmatpush3.bf16.msra.mxu1 %v1674_v55 }
  0x82   :  { %1207 = vmatmul.mubr.bf16.vlgmr.msra.gmra.mrb[12].mxu1 %v1675_v57 }
  0xf5   :  { %v1436_v59 = vpop.f32.mrb[0].mxu1 }
  0xf6   :  { %v1437_v60 = vpop.f32.mrb[1].mxu1 }
  0xf7   :  { %v1438_v61 = vadd.f32 %v1437_v60, %v1436_v59  ;;  %v1439_v62 = vpop.f32.mrb[2].mxu1  ;;  %v1480_v1 = vpop.f32.mrb[0].mxu0 }
  0xf8   :  { %v1440_v63 = vpop.f32.mrb[3].mxu1  ;;  %v1481_v2 = vpop.f32.mrb[1].mxu0 }
  0xf9   :  { %v1441_v0 = vadd.f32 %v1440_v63, %v1439_v62  ;;  %v1482_v3 = vadd.f32 %v1481_v2, %v1480_v1  ;;  %v1483_v4 = vpop.f32.mrb[2].mxu0 }
  0xfa   :  { %v1484_v5 = vpop.f32.mrb[3].mxu0 }
  0xfb   :  { %v1485_v6 = vadd.f32 %v1484_v5, %v1483_v4 }
 0x115   :  { %v1458_v7 = vpop.f32.mrb[4].mxu1 }
 0x116   :  { %v1459_v8 = vpop.f32.mrb[5].mxu1 }
 0x117   :  { %v1460_v9 = vadd.f32 %v1459_v8, %v1458_v7  ;;  %v1461_v10 = vpop.f32.mrb[6].mxu1  ;;  %v1524_v17 = vpop.f32.mrb[4].mxu0 }
 0x118   :  { %v1462_v11 = vpop.f32.mrb[7].mxu1  ;;  %v1525_v18 = vpop.f32.mrb[5].mxu0 }
 0x119   :  { %v1045_v12 = vadd.f32 %v1460_v9, %v1438_v61  ;;  %v1463_v13 = vadd.f32 %v1462_v11, %v1461_v10  ;;  %v1526_v19 = vadd.f32 %v1525_v18, %v1524_v17  ;;  %v1527_v20 = vpop.f32.mrb[6].mxu0 }
 0x11a   :  { %v1528_v21 = vpop.f32.mrb[7].mxu0 }
 0x11b   :  { %v1048_v14 = vadd.f32 %v1463_v13, %v1441_v0  ;;  %v1086_v15 = vadd.f32 %v1482_v3, %v1045_v12  ;;  %v1529_v22 = vadd.f32 %v1528_v21, %v1527_v20 }
 0x11d   :  { %v1089_v16 = vadd.f32 %v1485_v6, %v1048_v14 }
 0x135   :  { %v1502_v23 = vpop.f32.mrb[8].mxu1 }
 0x136   :  { %v1503_v24 = vpop.f32.mrb[9].mxu1 }
 0x137   :  { %v1504_v25 = vadd.f32 %v1503_v24, %v1502_v23  ;;  %v1505_v26 = vpop.f32.mrb[10].mxu1 }
 0x138   :  { %v1506_v27 = vpop.f32.mrb[11].mxu1 }
 0x139   :  { %v1127_v28 = vadd.f32 %v1504_v25, %v1086_v15  ;;  %v1507_v29 = vadd.f32 %v1506_v27, %v1505_v26 }
 0x13b   :  { %v1130_v30 = vadd.f32 %v1507_v29, %v1089_v16  ;;  %v1168_v31 = vadd.f32 %v1526_v19, %v1127_v28 }
 0x13d   :  { %v1171_v32 = vadd.f32 %v1529_v22, %v1130_v30 }
 0x147   :  { %v1249_v34 = vpop.f32.mrb[8].mxu0 }
 0x148   :  { %v1251_v36 = vpop.f32.mrb[9].mxu0 }
 0x149   :  { %v1252_v39 = vpop.f32.mrb[10].mxu0 }
 0x14a   :  { %v1254_v41 = vpop.f32.mrb[11].mxu0 }
 0x155   :  { %v1546_v33 = vpop.f32.mrb[12].mxu1 }
 0x156   :  { %v1547_v35 = vpop.f32.mrb[13].mxu1 }
 0x157   :  { %v1548_v37 = vadd.f32 %v1547_v35, %v1546_v33  ;;  %v1549_v38 = vpop.f32.mrb[14].mxu1 }
 0x158   :  { %v1550_v40 = vpop.f32.mrb[15].mxu1 }
 0x159   :  { %v1209_v42 = vadd.f32 %v1548_v37, %v1168_v31  ;;  %v1551_v43 = vadd.f32 %v1550_v40, %v1549_v38 }
 0x15b   :  { %v1250_v45 = vadd.f32 %v1249_v34, %v1209_v42  ;;  %v1212_v46 = vadd.f32 %v1551_v43, %v1171_v32 }
 0x15d   :  { %v1263_v48 = vmul.f32 %v1414_v44, %v1250_v45  ;;  %v1253_v49 = vadd.f32 %v1252_v39, %v1212_v46 }
 0x15f   :  { %v1272_v50 = vadd.f32 %v1415_v47, %v1263_v48  ;;  %v1264_v51 = vmul.f32 %v1414_v44, %v1253_v49 }
 0x161   :  { %v1274_v52 = vmax.f32 %v1272_v50, 0.0  ;;  %v1273_v53 = vadd.f32 %v1415_v47, %v1264_v51 }
 0x163   :  { %v1418_v54 = vpack.c.bf16 %v1274_v52, %v1274_v52  ;;  %v1275_v55 = vmax.f32 %v1273_v53, 0.0 }
 0x165   :  { %1285 = vst.msk [vmem:[%s2102_s4] sm:$0xf] %vm1284_vm1, %v1418_v54  ;;  %v1419_v56 = vpack.c.bf16 %v1275_v55, %v1275_v55 }
 0x167   :  { %1286 = vst.msk [vmem:[%s2102_s4 + $0x4] sm:$0xf] %vm1284_vm1, %v1419_v56 }

// kernel: psmnet_forward.160
= control target key start
LH: loop header
LB: loop body
LE: loop exit
PB: predicated region body
PF: predicated region fallthrough
CT: control target
= control target key end

     0   :  { %v240_v1 = vmov 0.0   ;;  %vm241_vm0 = vmmov 0   ;;  %vm149_vm1 = vcmask 516096   ;;  %s316_s0 = inlined_call_operand.vmem [shape: bf16[8,2,1,1,1,64], index: 0, kind: input, shape index: {}, may-alias: {0,6}]   ;;  %s317_s1 = inlined_call_operand.vmem [shape: bf16[2,128], index: 1, kind: input, shape index: {}]   ;;  %s318_s2 = inlined_call_operand.vmem [shape: bf16[128,64], index: 2, kind: input, shape index: {}]   ;;  %s319_s3 = inlined_call_operand.vmem [shape: f32[1,64], index: 3, kind: input, shape index: {}]   ;;  %s320_s4 = inlined_call_operand.vmem [shape: f32[1,64], index: 4, kind: input, shape index: {}]   ;;  %s321_s5 = inlined_call_operand.vmem [shape: bf16[2,64], index: 5, kind: input, shape index: {}]   ;;  %s322_s6 = inlined_call_operand.vmem [shape: bf16[8,2,1,1,1,64], index: 6, kind: output, shape index: {}, may-alias: {0,6}]  }
   0x1   :  { %v232_v0 = vld [vmem:[%s318_s2] sm:$0xff]   ;;  %210 = vmatprep.subr.bf16.mxu0 %v240_v1  ;;  %v233_v2 = vld [vmem:[%s318_s2 + $0x8] sm:$0xff]   ;;  %226 = vmatprep.mubr.msk.bf16.mxu0 %vm241_vm0, %v240_v1  ;;  %v234_v3 = vld [vmem:[%s318_s2 + $0x10] sm:$0xff]  }
   0x2   :  { %211 = vmatpush3.bf16.msra.mxu0 %v232_v0  ;;  %v235_v4 = vld [vmem:[%s318_s2 + $0x18] sm:$0xff]   ;;  %v236_v5 = vld [vmem:[%s318_s2 + $0x20] sm:$0xff]   ;;  %v237_v6 = vld [vmem:[%s318_s2 + $0x28] sm:$0xff]  }
   0x3   :  { %212 = vmatprep.subr.bf16.mxu0 %v240_v1  ;;  %v238_v7 = vld [vmem:[%s318_s2 + $0x30] sm:$0xff]   ;;  %v239_v8 = vld [vmem:[%s318_s2 + $0x38] sm:$0xff]   ;;  %v23_v9 = vld [vmem:[%s317_s1] sm:$0x1] }
   0x4   :  { %v198_v10 = vld [vmem:[%s319_s3] ss:$0 sm:$0xff] }
   0x5   :  { %v144_v11 = vld [vmem:[%s321_s5] sm:$0x1] }
   0x6   :  { %213 = vmatpush3.bf16.msra.mxu0 %v233_v2  ;;  %v199_v13 = vld [vmem:[%s320_s4] ss:$0 sm:$0xff]  ;;  %v145_v15 = vunpack.c.l.bf16 %v144_v11 }
   0x7   :  { %214 = vmatprep.subr.bf16.mxu0 %v240_v1 }
   0xa   :  { %215 = vmatpush3.bf16.msra.mxu0 %v234_v3 }
   0xb   :  { %216 = vmatprep.subr.bf16.mxu0 %v240_v1 }
   0xe   :  { %217 = vmatpush3.bf16.msra.mxu0 %v235_v4 }
   0xf   :  { %218 = vmatprep.subr.bf16.mxu0 %v240_v1 }
  0x12   :  { %219 = vmatpush3.bf16.msra.mxu0 %v236_v5 }
  0x13   :  { %220 = vmatprep.subr.bf16.mxu0 %v240_v1 }
  0x16   :  { %221 = vmatpush3.bf16.msra.mxu0 %v237_v6 }
  0x17   :  { %222 = vmatprep.subr.bf16.mxu0 %v240_v1 }
  0x1a   :  { %223 = vmatpush3.bf16.msra.mxu0 %v238_v7 }
  0x1b   :  { %224 = vmatprep.subr.bf16.mxu0 %v240_v1 }
  0x1e   :  { %225 = vmatpush3.bf16.msra.mxu0 %v239_v8 }
  0x21   :  { %227 = vmatmul.mubr.bf16.vlgmr.msra.gmra.mrb[0].mxu0 %v23_v9 }
  0xf4   :  { %v122_v12 = vpop.f32.mrb[0].mxu0 }
  0xf5   :  { %v135_v14 = vmul.f32 %v198_v10, %v122_v12  ;;  %v228_v16 = vpop.f32.mrb[1].mxu0 }
  0xf6   :  { %v125_v17 = vpop.f32.mrb[2].mxu0 }
  0xf7   :  { %v143_v18 = vadd.f32 %v199_v13, %v135_v14  ;;  %v229_v19 = vpop.f32.mrb[3].mxu0 }
  0xf9   :  { %v146_v20 = vadd.f32 %v145_v15, %v143_v18 }
  0xfb   :  { %v147_v21 = vmax.f32 %v146_v20, 0.0 }
  0xfd   :  { %v148_v22 = vpack.c.bf16 %v147_v21, %v147_v21 }
  0xff   :  { %150 = vst.msk [vmem:[#allocation2] sm:$0x1] %vm149_vm1, %v148_v22 }
 0x106   :  { %v168_v23 = vld [vmem:[#allocation2] sm:$0x1] }
 0x107   :  { %200 = vst [vmem:[%s322_s6 + $0x1] sm:$0x1] %v168_v23 }

// kernel: psmnet_forward.112
= control target key start
LH: loop header
LB: loop body
LE: loop exit
PB: predicated region body
PF: predicated region fallthrough
CT: control target
= control target key end

     0   :  { %v155_v0 = vmov 0.0   ;;  %vm156_vm0 = vmmov 0   ;;  %vm54_vm1 = vcmask 523264   ;;  %vm119_vm2 = vcmask 516096   ;;  %s214_s1 = inlined_call_operand.vmem [shape: bf16[64,64], index: 1, kind: input, shape index: {}]   ;;  %s215_s0 = inlined_call_operand.vmem [shape: bf16[2,64], index: 0, kind: input, shape index: {}]   ;;  %s216_s2 = inlined_call_operand.vmem [shape: f32[1,64], index: 2, kind: input, shape index: {}]   ;;  %s217_s4 = inlined_call_operand.vmem [shape: bf16[2,64], index: 4, kind: input, shape index: {}]   ;;  %s218_s3 = inlined_call_operand.vmem [shape: f32[1,64], index: 3, kind: input, shape index: {}]   ;;  %s219_s5 = inlined_call_operand.vmem [shape: bf16[2,64], index: 5, kind: output, shape index: {}]  }
   0x1   :  { %137 = vmatprep.subr.bf16.mxu0 %v155_v0  ;;  %v151_v1 = vld [vmem:[%s214_s1] sm:$0xff]   ;;  %145 = vmatprep.mubr.msk.bf16.mxu0 %vm156_vm0, %v155_v0  ;;  %v152_v2 = vld [vmem:[%s214_s1 + $0x8] sm:$0xff]   ;;  %v153_v3 = vld [vmem:[%s214_s1 + $0x10] sm:$0xff]  }
   0x2   :  { %138 = vmatpush3.bf16.msra.mxu0 %v151_v1  ;;  %v154_v4 = vld [vmem:[%s214_s1 + $0x18] sm:$0xff]   ;;  %v21_v5 = vld [vmem:[%s215_s0] sm:$0x1] }
   0x3   :  { %139 = vmatprep.subr.bf16.mxu0 %v155_v0  ;;  %v130_v6 = vld [vmem:[%s216_s2] ss:$0 sm:$0xff] }
   0x4   :  { %v114_v7 = vld [vmem:[%s217_s4] sm:$0x1] }
   0x5   :  { %v131_v9 = vld [vmem:[%s218_s3] ss:$0 sm:$0xff]  ;;  %v115_v11 = vunpack.c.l.bf16 %v114_v7 }
   0x6   :  { %140 = vmatpush3.bf16.msra.mxu0 %v152_v2 }
   0x7   :  { %141 = vmatprep.subr.bf16.mxu0 %v155_v0 }
   0xa   :  { %142 = vmatpush3.bf16.msra.mxu0 %v153_v3 }
   0xb   :  { %143 = vmatprep.subr.bf16.mxu0 %v155_v0 }
   0xe   :  { %144 = vmatpush3.bf16.msra.mxu0 %v154_v4 }
  0x11   :  { %146 = vmatmul.mubr.msk.bf16.vlgmr.msra.gmra.mrb[0].mxu0 %vm54_vm1, %v21_v5 }
  0xe4   :  { %v92_v8 = vpop.f32.mrb[0].mxu0 }
  0xe5   :  { %v105_v10 = vmul.f32 %v130_v6, %v92_v8  ;;  %v147_v12 = vpop.f32.mrb[1].mxu0 }
  0xe6   :  { %v95_v13 = vpop.f32.mrb[2].mxu0 }
  0xe7   :  { %v113_v14 = vadd.f32 %v131_v9, %v105_v10  ;;  %v148_v15 = vpop.f32.mrb[3].mxu0 }
  0xe9   :  { %v116_v16 = vadd.f32 %v115_v11, %v113_v14 }
  0xeb   :  { %v117_v17 = vmax.f32 %v116_v16, 0.0 }
  0xed   :  { %v118_v18 = vpack.c.bf16 %v117_v17, %v117_v17 }
  0xef   :  { %120 = vst.msk [vmem:[%s219_s5] sm:$0x1] %vm119_vm2, %v118_v18 }

// kernel: psmnet_forward.159
= control target key start
LH: loop header
LB: loop body
LE: loop exit
PB: predicated region body
PF: predicated region fallthrough
CT: control target
= control target key end

     0   :  { %v240_v1 = vmov 0.0   ;;  %vm241_vm0 = vmmov 0   ;;  %vm149_vm1 = vcmask 516096   ;;  %s316_s0 = inlined_call_operand.vmem [shape: bf16[8,2,1,1,1,64], index: 0, kind: input, shape index: {}, may-alias: {0,6}]   ;;  %s317_s1 = inlined_call_operand.vmem [shape: bf16[2,128], index: 1, kind: input, shape index: {}]   ;;  %s318_s2 = inlined_call_operand.vmem [shape: bf16[128,64], index: 2, kind: input, shape index: {}]   ;;  %s319_s3 = inlined_call_operand.vmem [shape: f32[1,64], index: 3, kind: input, shape index: {}]   ;;  %s320_s4 = inlined_call_operand.vmem [shape: f32[1,64], index: 4, kind: input, shape index: {}]   ;;  %s321_s5 = inlined_call_operand.vmem [shape: bf16[2,64], index: 5, kind: input, shape index: {}]   ;;  %s322_s6 = inlined_call_operand.vmem [shape: bf16[8,2,1,1,1,64], index: 6, kind: output, shape index: {}, may-alias: {0,6}]  }
   0x1   :  { %v232_v0 = vld [vmem:[%s318_s2] sm:$0xff]   ;;  %210 = vmatprep.subr.bf16.mxu0 %v240_v1  ;;  %v233_v2 = vld [vmem:[%s318_s2 + $0x8] sm:$0xff]   ;;  %226 = vmatprep.mubr.msk.bf16.mxu0 %vm241_vm0, %v240_v1  ;;  %v234_v3 = vld [vmem:[%s318_s2 + $0x10] sm:$0xff]  }
   0x2   :  { %211 = vmatpush3.bf16.msra.mxu0 %v232_v0  ;;  %v235_v4 = vld [vmem:[%s318_s2 + $0x18] sm:$0xff]   ;;  %v236_v5 = vld [vmem:[%s318_s2 + $0x20] sm:$0xff]   ;;  %v237_v6 = vld [vmem:[%s318_s2 + $0x28] sm:$0xff]  }
   0x3   :  { %212 = vmatprep.subr.bf16.mxu0 %v240_v1  ;;  %v238_v7 = vld [vmem:[%s318_s2 + $0x30] sm:$0xff]   ;;  %v239_v8 = vld [vmem:[%s318_s2 + $0x38] sm:$0xff]   ;;  %v23_v9 = vld [vmem:[%s317_s1] sm:$0x1] }
   0x4   :  { %v198_v10 = vld [vmem:[%s319_s3] ss:$0 sm:$0xff] }
   0x5   :  { %v144_v11 = vld [vmem:[%s321_s5] sm:$0x1] }
   0x6   :  { %213 = vmatpush3.bf16.msra.mxu0 %v233_v2  ;;  %v199_v13 = vld [vmem:[%s320_s4] ss:$0 sm:$0xff]  ;;  %v145_v15 = vunpack.c.l.bf16 %v144_v11 }
   0x7   :  { %214 = vmatprep.subr.bf16.mxu0 %v240_v1 }
   0xa   :  { %215 = vmatpush3.bf16.msra.mxu0 %v234_v3 }
   0xb   :  { %216 = vmatprep.subr.bf16.mxu0 %v240_v1 }
   0xe   :  { %217 = vmatpush3.bf16.msra.mxu0 %v235_v4 }
   0xf   :  { %218 = vmatprep.subr.bf16.mxu0 %v240_v1 }
  0x12   :  { %219 = vmatpush3.bf16.msra.mxu0 %v236_v5 }
  0x13   :  { %220 = vmatprep.subr.bf16.mxu0 %v240_v1 }
  0x16   :  { %221 = vmatpush3.bf16.msra.mxu0 %v237_v6 }
  0x17   :  { %222 = vmatprep.subr.bf16.mxu0 %v240_v1 }
  0x1a   :  { %223 = vmatpush3.bf16.msra.mxu0 %v238_v7 }
  0x1b   :  { %224 = vmatprep.subr.bf16.mxu0 %v240_v1 }
  0x1e   :  { %225 = vmatpush3.bf16.msra.mxu0 %v239_v8 }
  0x21   :  { %227 = vmatmul.mubr.bf16.vlgmr.msra.gmra.mrb[0].mxu0 %v23_v9 }
  0xf4   :  { %v122_v12 = vpop.f32.mrb[0].mxu0 }
  0xf5   :  { %v135_v14 = vmul.f32 %v198_v10, %v122_v12  ;;  %v228_v16 = vpop.f32.mrb[1].mxu0 }
  0xf6   :  { %v125_v17 = vpop.f32.mrb[2].mxu0 }
  0xf7   :  { %v143_v18 = vadd.f32 %v199_v13, %v135_v14  ;;  %v229_v19 = vpop.f32.mrb[3].mxu0 }
  0xf9   :  { %v146_v20 = vadd.f32 %v145_v15, %v143_v18 }
  0xfb   :  { %v147_v21 = vmax.f32 %v146_v20, 0.0 }
  0xfd   :  { %v148_v22 = vpack.c.bf16 %v147_v21, %v147_v21 }
  0xff   :  { %150 = vst.msk [vmem:[#allocation2] sm:$0x1] %vm149_vm1, %v148_v22 }
 0x106   :  { %v168_v23 = vld [vmem:[#allocation2] sm:$0x1] }
 0x107   :  { %200 = vst [vmem:[%s322_s6 + $0x2] sm:$0x1] %v168_v23 }

// kernel: psmnet_forward.157
= control target key start
LH: loop header
LB: loop body
LE: loop exit
PB: predicated region body
PF: predicated region fallthrough
CT: control target
= control target key end

     0   :  { %v240_v1 = vmov 0.0   ;;  %vm241_vm0 = vmmov 0   ;;  %vm149_vm1 = vcmask 516096   ;;  %s316_s0 = inlined_call_operand.vmem [shape: bf16[8,2,1,1,1,64], index: 0, kind: input, shape index: {}, may-alias: {0,6}]   ;;  %s317_s1 = inlined_call_operand.vmem [shape: bf16[2,128], index: 1, kind: input, shape index: {}]   ;;  %s318_s2 = inlined_call_operand.vmem [shape: bf16[128,64], index: 2, kind: input, shape index: {}]   ;;  %s319_s3 = inlined_call_operand.vmem [shape: f32[1,64], index: 3, kind: input, shape index: {}]   ;;  %s320_s4 = inlined_call_operand.vmem [shape: f32[1,64], index: 4, kind: input, shape index: {}]   ;;  %s321_s5 = inlined_call_operand.vmem [shape: bf16[2,64], index: 5, kind: input, shape index: {}]   ;;  %s322_s6 = inlined_call_operand.vmem [shape: bf16[8,2,1,1,1,64], index: 6, kind: output, shape index: {}, may-alias: {0,6}]  }
   0x1   :  { %v232_v0 = vld [vmem:[%s318_s2] sm:$0xff]   ;;  %210 = vmatprep.subr.bf16.mxu0 %v240_v1  ;;  %v233_v2 = vld [vmem:[%s318_s2 + $0x8] sm:$0xff]   ;;  %226 = vmatprep.mubr.msk.bf16.mxu0 %vm241_vm0, %v240_v1  ;;  %v234_v3 = vld [vmem:[%s318_s2 + $0x10] sm:$0xff]  }
   0x2   :  { %211 = vmatpush3.bf16.msra.mxu0 %v232_v0  ;;  %v235_v4 = vld [vmem:[%s318_s2 + $0x18] sm:$0xff]   ;;  %v236_v5 = vld [vmem:[%s318_s2 + $0x20] sm:$0xff]   ;;  %v237_v6 = vld [vmem:[%s318_s2 + $0x28] sm:$0xff]  }
   0x3   :  { %212 = vmatprep.subr.bf16.mxu0 %v240_v1  ;;  %v238_v7 = vld [vmem:[%s318_s2 + $0x30] sm:$0xff]   ;;  %v239_v8 = vld [vmem:[%s318_s2 + $0x38] sm:$0xff]   ;;  %v23_v9 = vld [vmem:[%s317_s1] sm:$0x1] }
   0x4   :  { %v198_v10 = vld [vmem:[%s319_s3] ss:$0 sm:$0xff] }
   0x5   :  { %v144_v11 = vld [vmem:[%s321_s5] sm:$0x1] }
   0x6   :  { %213 = vmatpush3.bf16.msra.mxu0 %v233_v2  ;;  %v199_v13 = vld [vmem:[%s320_s4] ss:$0 sm:$0xff]  ;;  %v145_v15 = vunpack.c.l.bf16 %v144_v11 }
   0x7   :  { %214 = vmatprep.subr.bf16.mxu0 %v240_v1 }
   0xa   :  { %215 = vmatpush3.bf16.msra.mxu0 %v234_v3 }
   0xb   :  { %216 = vmatprep.subr.bf16.mxu0 %v240_v1 }
   0xe   :  { %217 = vmatpush3.bf16.msra.mxu0 %v235_v4 }
   0xf   :  { %218 = vmatprep.subr.bf16.mxu0 %v240_v1 }
  0x12   :  { %219 = vmatpush3.bf16.msra.mxu0 %v236_v5 }
  0x13   :  { %220 = vmatprep.subr.bf16.mxu0 %v240_v1 }
  0x16   :  { %221 = vmatpush3.bf16.msra.mxu0 %v237_v6 }
  0x17   :  { %222 = vmatprep.subr.bf16.mxu0 %v240_v1 }
  0x1a   :  { %223 = vmatpush3.bf16.msra.mxu0 %v238_v7 }
  0x1b   :  { %224 = vmatprep.subr.bf16.mxu0 %v240_v1 }
  0x1e   :  { %225 = vmatpush3.bf16.msra.mxu0 %v239_v8 }
  0x21   :  { %227 = vmatmul.mubr.bf16.vlgmr.msra.gmra.mrb[0].mxu0 %v23_v9 }
  0xf4   :  { %v122_v12 = vpop.f32.mrb[0].mxu0 }
  0xf5   :  { %v135_v14 = vmul.f32 %v198_v10, %v122_v12  ;;  %v228_v16 = vpop.f32.mrb[1].mxu0 }
  0xf6   :  { %v125_v17 = vpop.f32.mrb[2].mxu0 }
  0xf7   :  { %v143_v18 = vadd.f32 %v199_v13, %v135_v14  ;;  %v229_v19 = vpop.f32.mrb[3].mxu0 }
  0xf9   :  { %v146_v20 = vadd.f32 %v145_v15, %v143_v18 }
  0xfb   :  { %v147_v21 = vmax.f32 %v146_v20, 0.0 }
  0xfd   :  { %v148_v22 = vpack.c.bf16 %v147_v21, %v147_v21 }
  0xff   :  { %150 = vst.msk [vmem:[#allocation2] sm:$0x1] %vm149_vm1, %v148_v22 }
 0x106   :  { %v168_v23 = vld [vmem:[#allocation2] sm:$0x1] }
 0x107   :  { %200 = vst [vmem:[%s322_s6 + $0x4] sm:$0x1] %v168_v23 }

// kernel: psmnet_forward.110
= control target key start
LH: loop header
LB: loop body
LE: loop exit
PB: predicated region body
PF: predicated region fallthrough
CT: control target
= control target key end

     0   :  { %v1658_v11 = vmov 1966171168   ;;  %v242_v13 = vlaneseq  ;;  %vm995_vm0 = vcmask 523264   ;;  %vm1297_vm1 = vcmask 516096   ;;  %s2090_s1 = inlined_call_operand.vmem [shape: bf16[1728,64], index: 1, kind: input, shape index: {}]   ;;  %s2091_s0 = inlined_call_operand.vmem [shape: bf16[2,1728], index: 0, kind: input, shape index: {}]   ;;  %s2092_s2 = inlined_call_operand.vmem [shape: f32[1,64], index: 2, kind: input, shape index: {}]   ;;  %s2093_s3 = inlined_call_operand.vmem [shape: f32[1,64], index: 3, kind: input, shape index: {}]   ;;  %s2094_s4 = inlined_call_operand.vmem [shape: bf16[2,64], index: 4, kind: output, shape index: {}]  }
   0x1   :  { %v1548_v0 = vld [vmem:[%s2090_s1 + $0x40] sm:$0xff]   ;;  %v1550_v2 = vld [vmem:[%s2090_s1 + $0x48] sm:$0xff]   ;;  %v1552_v4 = vld [vmem:[%s2090_s1 + $0x50] sm:$0xff]   ;;  %v240_v12 = vunpack.c.l.s4 %v1658_v11 }
   0x2   :  { %v1549_v1 = vld [vmem:[%s2090_s1] sm:$0xff]   ;;  %1414 = vmatprep.subr.bf16.mxu1 %v1548_v0  ;;  %v1551_v3 = vld [vmem:[%s2090_s1 + $0x8] sm:$0xff]   ;;  %v1553_v5 = vld [vmem:[%s2090_s1 + $0x10] sm:$0xff]   ;;  %v243_v19 = vshrl.u32 %v242_v13, 7 }
   0x3   :  { %1415 = vmatpush3.bf16.msra.mxu1 %v1549_v1  ;;  %v1554_v6 = vld [vmem:[%s2090_s1 + $0x58] sm:$0xff]   ;;  %v1558_v8 = vld [vmem:[%s2090_s1 + $0x140] sm:$0xff]   ;;  %v1562_v15 = vld [vmem:[%s2090_s1 + $0x148] sm:$0xff]   ;;  %v241_v18 = vunpack.c.0.s8 %v240_v12 }
   0x4   :  { %1416 = vmatprep.subr.bf16.mxu1 %v1550_v2  ;;  %v1555_v7 = vld [vmem:[%s2090_s1 + $0x18] sm:$0xff]   ;;  %v1559_v9 = vld [vmem:[%s2090_s1 + $0x100] sm:$0xff]   ;;  %1458 = vmatprep.subr.bf16.mxu0 %v1558_v8  ;;  %v1563_v16 = vld [vmem:[%s2090_s1 + $0x108] sm:$0xff]  }
   0x5   :  { %v1556_v10 = vld [vmem:[%s2090_s1 + $0x60] sm:$0xff]   ;;  %1459 = vmatpush3.bf16.msra.mxu0 %v1559_v9  ;;  %v1560_v17 = vld [vmem:[%s2090_s1 + $0x68] sm:$0xff]   ;;  %v1566_v21 = vld [vmem:[%s2090_s1 + $0x150] sm:$0xff]   ;;  %v1742_v24 = vsub.s32 %v241_v18, %v243_v19 }
   0x6   :  { %v1557_v14 = vld [vmem:[%s2090_s1 + $0x20] sm:$0xff]   ;;  %1460 = vmatprep.subr.bf16.mxu0 %v1562_v15  ;;  %v1561_v20 = vld [vmem:[%s2090_s1 + $0x28] sm:$0xff]   ;;  %v1567_v22 = vld [vmem:[%s2090_s1 + $0x110] sm:$0xff]  }
   0x7   :  { %1417 = vmatpush3.bf16.msra.mxu1 %v1551_v3  ;;  %v1564_v23 = vld [vmem:[%s2090_s1 + $0x70] sm:$0xff]   ;;  %v1570_v26 = vld [vmem:[%s2090_s1 + $0x158] sm:$0xff]   ;;  %v18_v28 = vld [vmem:[%s2091_s0] sm:$0xff] }
   0x8   :  { %1418 = vmatprep.subr.bf16.mxu1 %v1552_v4  ;;  %v1565_v25 = vld [vmem:[%s2090_s1 + $0x30] sm:$0xff]   ;;  %v1568_v27 = vld [vmem:[%s2090_s1 + $0x78] sm:$0xff]   ;;  %v245_v29 = vrot.slane %v18_v28, %v1742_v24  ;;  %v238_v31 = vcombine.high %v18_v28, %v18_v28  ;;  %v1573_v34 = vld [vmem:[%s2090_s1 + $0xc0] sm:$0xff]  }
   0x9   :  { %1461 = vmatpush3.bf16.msra.mxu0 %v1563_v16  ;;  %v1572_v30 = vld [vmem:[%s2090_s1 + $0x118] sm:$0xff]   ;;  %v1575_v36 = vld [vmem:[%s2090_s1 + $0x160] sm:$0xff]   ;;  %v1777_v40 = vld [vmem:[%s2091_s0 + $0x8] sm:$0x3f] }
   0xa   :  { %1462 = vmatprep.subr.bf16.mxu0 %v1566_v21  ;;  %v1569_v32 = vld [vmem:[%s2090_s1 + $0x38] sm:$0xff]   ;;  %v253_v33 = vcombine.high %v245_v29, %v245_v29  ;;  %v252_v35 = vrot.slane %v238_v31, %v1742_v24  ;;  %v1576_v38 = vld [vmem:[%s2090_s1 + $0x120] sm:$0xff]   ;;  %v1783_v42 = vrot.slane %v245_v29, %v1742_v24  ;;  %v1577_v43 = vld [vmem:[%s2090_s1 + $0xc8] sm:$0xff]   ;;  %v1807_v50 = vrot.slane %v1777_v40, %v1742_v24 }
   0xb   :  { %1419 = vmatpush3.bf16.msra.mxu1 %v1553_v5  ;;  %v1574_v41 = vld [vmem:[%s2090_s1 + $0x80] sm:$0xff]   ;;  %v1579_v46 = vld [vmem:[%s2090_s1 + $0x168] sm:$0xff]   ;;  %v1581_v49 = vld [vmem:[%s2090_s1 + $0xd0] sm:$0xff]  }
   0xc   :  { %1420 = vmatprep.subr.bf16.mxu1 %v1554_v6  ;;  %v275_v37 = vrot.slane %v253_v33, %v1742_v24  ;;  %v254_v39 = vcombine.high %v252_v35, %v252_v35  ;;  %v1580_v47 = vld [vmem:[%s2090_s1 + $0x128] sm:$0xff]   ;;  %v1583_v51 = vld [vmem:[%s2090_s1 + $0x170] sm:$0xff]   ;;  %v1585_v54 = vld [vmem:[%s2090_s1 + $0xd8] sm:$0xff]   ;;  %v302_v55 = vcombine.high %v1807_v50, %v1807_v50  ;;  %v1833_v59 = vrot.slane %v252_v35, %v1742_v24 }
   0xd   :  { %1463 = vmatpush3.bf16.msra.mxu0 %v1567_v22  ;;  %v1578_v48 = vld [vmem:[%s2090_s1 + $0x88] sm:$0xff]   ;;  %v1584_v52 = vld [vmem:[%s2090_s1 + $0x130] sm:$0xff]   ;;  %v1587_v56 = vld [vmem:[%s2090_s1 + $0x178] sm:$0xff]   ;;  %v283_v18 = vcombine.high %v1783_v42, %v1783_v42 }
   0xe   :  { %1464 = vmatprep.subr.bf16.mxu0 %v1570_v26  ;;  %1031 = vmatprep.mubr.bf16.mxu1 %v275_v37  ;;  %v1789_v44 = vrot.slane %v254_v39, %v1742_v24  ;;  %v285_v45 = vcombine.high %v275_v37, %v275_v37  ;;  %v1582_v53 = vld [vmem:[%s2090_s1 + $0x90] sm:$0xff]   ;;  %v1588_v57 = vld [vmem:[%s2090_s1 + $0x138] sm:$0xff]   ;;  %v1589_v60 = vld [vmem:[%s2090_s1 + $0xe0] sm:$0xff]   ;;  %v1839_v61 = vrot.slane %v302_v55, %v1742_v24  ;;  %v1659_v37 = vmov 0  }
   0xf   :  { %1421 = vmatpush3.bf16.msra.mxu1 %v1555_v7  ;;  %v1586_v58 = vld [vmem:[%s2090_s1 + $0x98] sm:$0xff]   ;;  %v1592_v62 = vld [vmem:[%s2090_s1 + $0x240] sm:$0xff]   ;;  %v1594_v1 = vld [vmem:[%s2090_s1 + $0xe8] sm:$0xff]  }
  0x10   :  { %1422 = vmatprep.subr.bf16.mxu1 %v1556_v10  ;;  %1111 = vmatprep.mubr.bf16.mxu0 %v1789_v44  ;;  %v1593_v63 = vld [vmem:[%s2090_s1 + $0x200] sm:$0xff]   ;;  %v1596_v2 = vld [vmem:[%s2090_s1 + $0x248] sm:$0xff]   ;;  %v1598_v5 = vld [vmem:[%s2090_s1 + $0xf0] sm:$0xff]  }
  0x11   :  { %1465 = vmatpush3.bf16.msra.mxu0 %v1572_v30  ;;  %v1590_v0 = vld [vmem:[%s2090_s1 + $0xa0] sm:$0xff]   ;;  %v1597_v3 = vld [vmem:[%s2090_s1 + $0x208] sm:$0xff]   ;;  %v1600_v6 = vld [vmem:[%s2090_s1 + $0x250] sm:$0xff]  }
  0x12   :  { %1466 = vmatprep.subr.bf16.mxu0 %v1575_v36  ;;  %v1595_v4 = vld [vmem:[%s2090_s1 + $0xa8] sm:$0xff]   ;;  %v1601_v7 = vld [vmem:[%s2090_s1 + $0x210] sm:$0xff]   ;;  %v1602_v9 = vld [vmem:[%s2090_s1 + $0xf8] sm:$0xff]  }
  0x13   :  { %1423 = vmatpush3.bf16.msra.mxu1 %v1557_v14  ;;  %v1599_v8 = vld [vmem:[%s2090_s1 + $0xb0] sm:$0xff]   ;;  %v1604_v10 = vld [vmem:[%s2090_s1 + $0x258] sm:$0xff]   ;;  %v1606_v13 = vld [vmem:[%s2090_s1 + $0x1c0] sm:$0xff]  }
  0x14   :  { %1424 = vmatprep.subr.bf16.mxu1 %v1560_v17  ;;  %v1605_v11 = vld [vmem:[%s2090_s1 + $0x218] sm:$0xff]   ;;  %v1608_v14 = vld [vmem:[%s2090_s1 + $0x260] sm:$0xff]   ;;  %v287_v17 = vcombine.high %v1777_v40, %v1777_v40  ;;  %v1610_v19 = vld [vmem:[%s2090_s1 + $0x1c8] sm:$0xff]  }
  0x15   :  { %1467 = vmatpush3.bf16.msra.mxu0 %v1576_v38  ;;  %v1603_v12 = vld [vmem:[%s2090_s1 + $0xb8] sm:$0xff]   ;;  %v1609_v15 = vld [vmem:[%s2090_s1 + $0x220] sm:$0xff]   ;;  %v1612_v21 = vld [vmem:[%s2090_s1 + $0x268] sm:$0xff]  }
  0x16   :  { %1468 = vmatprep.subr.bf16.mxu0 %v1579_v46  ;;  %v1607_v16 = vld [vmem:[%s2090_s1 + $0x180] sm:$0xff]   ;;  %v1613_v22 = vld [vmem:[%s2090_s1 + $0x228] sm:$0xff]   ;;  %v1922_v26 = vrot.slane %v287_v17, %v1742_v24  ;;  %v1617_v28 = vld [vmem:[%s2090_s1 + $0x230] sm:$0xff]  }
  0x17   :  { %1425 = vmatpush3.bf16.msra.mxu1 %v1561_v20  ;;  %v286_v20 = vcombine.high %v1789_v44, %v1789_v44  ;;  %v1615_v29 = vld [vmem:[%s2090_s1 + $0x190] sm:$0xff]   ;;  %v1618_v30 = vld [vmem:[%s2090_s1 + $0x1d8] sm:$0xff]   ;;  %v1624_v38 = vld [vmem:[%s2090_s1 + $0x300] sm:$0xff]  }
  0x18   :  { %1426 = vmatprep.subr.bf16.mxu1 %v1564_v23  ;;  %v1611_v23 = vld [vmem:[%s2090_s1 + $0x188] sm:$0xff]   ;;  %v303_v31 = vcombine.high %v1922_v26, %v1922_v26  ;;  %v1621_v33 = vld [vmem:[%s2090_s1 + $0x238] sm:$0xff]   ;;  %v1622_v39 = vld [vmem:[%s2090_s1 + $0x1e0] sm:$0xff]  }
  0x19   :  { %1469 = vmatpush3.bf16.msra.mxu0 %v1580_v47  ;;  %v1619_v35 = vld [vmem:[%s2090_s1 + $0x198] sm:$0xff]   ;;  %v1627_v40 = vld [vmem:[%s2090_s1 + $0x308] sm:$0xff]   ;;  %v1629_v47 = vld [vmem:[%s2090_s1 + $0x1b0] sm:$0xff]  }
  0x1a   :  { %1470 = vmatprep.subr.bf16.mxu0 %v1583_v51  ;;  %v331_v36 = vrot.slane %v303_v31, %v1742_v24  ;;  %v1626_v44 = vld [vmem:[%s2090_s1 + $0x1a8] sm:$0xff]   ;;  %v1633_v46 = vld [vmem:[%s2090_s1 + $0x318] sm:$0xff]   ;;  %v1634_v51 = vld [vmem:[%s2090_s1 + $0x2c0] sm:$0xff]  }
  0x1b   :  { %1427 = vmatpush3.bf16.msra.mxu1 %v1565_v25  ;;  %v1614_v25 = vld [vmem:[%s2090_s1 + $0x1d0] sm:$0xff]   ;;  %v1637_v55 = vld [vmem:[%s2090_s1 + $0x2c8] sm:$0xff]  }
  0x1c   :  { %1428 = vmatprep.subr.bf16.mxu1 %v1568_v27  ;;  %v1616_v27 = vld [vmem:[%s2090_s1 + $0x270] sm:$0xff]  }
  0x1d   :  { %1471 = vmatpush3.bf16.msra.mxu0 %v1584_v52  ;;  %v284_v52 = vcombine.high %v1833_v59, %v1833_v59 }
  0x1e   :  { %1472 = vmatprep.subr.bf16.mxu0 %v1587_v56  ;;  %v333_v56 = vcombine.high %v1839_v61, %v1839_v61 }
  0x1f   :  { %1429 = vmatpush3.bf16.msra.mxu1 %v1569_v32  ;;  %v1620_v32 = vld [vmem:[%s2090_s1 + $0x278] sm:$0xff]  }
  0x20   :  { %1436 = vmatprep.subr.bf16.mxu1 %v1573_v34  ;;  %v1946_v34 = vrot.slane %v1807_v50, %v1742_v24  ;;  %v1632_v50 = vld [vmem:[%s2090_s1 + $0x1b8] sm:$0xff]  }
  0x21   :  { %1473 = vmatpush3.bf16.msra.mxu0 %v1588_v57  ;;  %v1642_v57 = vld [vmem:[%s2090_s1 + $0x330] sm:$0xff]  }
  0x22   :  { %1032 = vmatmul.mubr.bf16.vlgmr.msra.gmra.mrb[0].mxu1 %v1783_v42  ;;  %1502 = vmatprep.subr.bf16.mxu0 %v1592_v62  ;;  %v1625_v42 = vld [vmem:[%s2090_s1 + $0x1e8] sm:$0xff]   ;;  %v1643_v62 = vld [vmem:[%s2090_s1 + $0x2d8] sm:$0xff]  }
  0x23   :  { %1437 = vmatpush3.bf16.msra.mxu1 %v1574_v41  ;;  %1071 = vmatprep.mubr.bf16.mxu1 %v285_v45  ;;  %v1623_v41 = vld [vmem:[%s2090_s1 + $0x1a0] sm:$0xff]   ;;  %v1628_v45 = vld [vmem:[%s2090_s1 + $0x1f0] sm:$0xff]  }
  0x24   :  { %1438 = vmatprep.subr.bf16.mxu1 %v1577_v43  ;;  %1112 = vmatmul.mubr.bf16.vlgmr.msra.gmra.mrb[0].mxu0 %v1833_v59  ;;  %v1630_v43 = vld [vmem:[%s2090_s1 + $0x310] sm:$0xff]  }
  0x25   :  { %1503 = vmatpush3.bf16.msra.mxu0 %v1593_v63  ;;  %1191 = vmatprep.mubr.bf16.mxu0 %v1839_v61  ;;  %v1640_v59 = vld [vmem:[%s2090_s1 + $0x2d0] sm:$0xff]   ;;  %v1648_v63 = vld [vmem:[%s2090_s1 + $0x340] sm:$0xff]  }
  0x26   :  { %1504 = vmatprep.subr.bf16.mxu0 %v1596_v2  ;;  %v1641_v61 = vld [vmem:[%s2090_s1 + $0x290] sm:$0xff]   ;;  %v1651_v2 = vld [vmem:[%s2090_s1 + $0x348] sm:$0xff]  }
  0x27   :  { %1439 = vmatpush3.bf16.msra.mxu1 %v1578_v48  ;;  %v1631_v48 = vld [vmem:[%s2090_s1 + $0x1f8] sm:$0xff]  }
  0x28   :  { %1440 = vmatprep.subr.bf16.mxu1 %v1581_v49  ;;  %v1636_v49 = vld [vmem:[%s2090_s1 + $0x320] sm:$0xff]  }
  0x29   :  { %1505 = vmatpush3.bf16.msra.mxu0 %v1597_v3  ;;  %v1647_v3 = vld [vmem:[%s2090_s1 + $0x2a0] sm:$0xff]  }
  0x2a   :  { %1506 = vmatprep.subr.bf16.mxu0 %v1600_v6  ;;  %v1650_v6 = vld [vmem:[%s2090_s1 + $0x2a8] sm:$0xff]  }
  0x2b   :  { %1441 = vmatpush3.bf16.msra.mxu1 %v1582_v53  ;;  %v1639_v53 = vld [vmem:[%s2090_s1 + $0x328] sm:$0xff]  }
  0x2c   :  { %1442 = vmatprep.subr.bf16.mxu1 %v1585_v54  ;;  %v1635_v54 = vld [vmem:[%s2090_s1 + $0x280] sm:$0xff]  }
  0x2d   :  { %1507 = vmatpush3.bf16.msra.mxu0 %v1601_v7  ;;  %v1652_v7 = vld [vmem:[%s2090_s1 + $0x2f0] sm:$0xff]  }
  0x2e   :  { %1508 = vmatprep.subr.bf16.mxu0 %v1604_v10  ;;  %v1655_v10 = vld [vmem:[%s2090_s1 + $0x2f8] sm:$0xff]  }
  0x2f   :  { %1443 = vmatpush3.bf16.msra.mxu1 %v1586_v58  ;;  %v1638_v58 = vld [vmem:[%s2090_s1 + $0x288] sm:$0xff]  }
  0x30   :  { %1444 = vmatprep.subr.bf16.mxu1 %v1589_v60  ;;  %v1645_v60 = vld [vmem:[%s2090_s1 + $0x338] sm:$0xff]  }
  0x31   :  { %1509 = vmatpush3.bf16.msra.mxu0 %v1605_v11  ;;  %v317_v11 = vrot.slane %v1922_v26, %v1742_v24 }
  0x32   :  { %1510 = vmatprep.subr.bf16.mxu0 %v1608_v14 }
  0x33   :  { %1445 = vmatpush3.bf16.msra.mxu1 %v1590_v0  ;;  %v1644_v0 = vld [vmem:[%s2090_s1 + $0x298] sm:$0xff]  }
  0x34   :  { %1446 = vmatprep.subr.bf16.mxu1 %v1594_v1  ;;  %v1646_v1 = vld [vmem:[%s2090_s1 + $0x2e0] sm:$0xff]  }
  0x35   :  { %1511 = vmatpush3.bf16.msra.mxu0 %v1609_v15 }
  0x36   :  { %1512 = vmatprep.subr.bf16.mxu0 %v1612_v21 }
  0x37   :  { %1447 = vmatpush3.bf16.msra.mxu1 %v1595_v4  ;;  %v1649_v4 = vld [vmem:[%s2090_s1 + $0x2e8] sm:$0xff]  }
  0x38   :  { %1448 = vmatprep.subr.bf16.mxu1 %v1598_v5  ;;  %v1654_v5 = vld [vmem:[%s2090_s1 + $0x350] sm:$0xff]  }
  0x39   :  { %1513 = vmatpush3.bf16.msra.mxu0 %v1613_v22 }
  0x3a   :  { %1514 = vmatprep.subr.bf16.mxu0 %v1616_v27 }
  0x3b   :  { %1449 = vmatpush3.bf16.msra.mxu1 %v1599_v8  ;;  %v1657_v8 = vld [vmem:[%s2090_s1 + $0x358] sm:$0xff]  }
  0x3c   :  { %1450 = vmatprep.subr.bf16.mxu1 %v1602_v9  ;;  %v1653_v9 = vld [vmem:[%s2090_s1 + $0x2b0] sm:$0xff]  }
  0x3d   :  { %1515 = vmatpush3.bf16.msra.mxu0 %v1617_v28 }
  0x3e   :  { %1516 = vmatprep.subr.bf16.mxu0 %v1620_v32 }
  0x3f   :  { %1451 = vmatpush3.bf16.msra.mxu1 %v1603_v12  ;;  %v1656_v12 = vld [vmem:[%s2090_s1 + $0x2b8] sm:$0xff]  }
  0x40   :  { %1480 = vmatprep.subr.bf16.mxu1 %v1606_v13  ;;  %v332_v13 = vcombine.high %v1946_v34, %v1946_v34 }
  0x41   :  { %1517 = vmatpush3.bf16.msra.mxu0 %v1621_v33 }
  0x42   :  { %1072 = vmatmul.mubr.bf16.vlgmr.msra.gmra.mrb[4].mxu1 %v283_v18  ;;  %1239 = vmatprep.subr.bf16.mxu0 %v1659_v37 }
  0x43   :  { %1481 = vmatpush3.bf16.msra.mxu1 %v1607_v16  ;;  %1151 = vmatprep.mubr.bf16.mxu1 %v286_v20 }
  0x44   :  { %1482 = vmatprep.subr.bf16.mxu1 %v1610_v19  ;;  %1192 = vmatmul.mubr.bf16.vlgmr.msra.gmra.mrb[4].mxu0 %v1946_v34 }
  0x45   :  { %1240 = vmatpush1.bf16.msra.mxu0 %v1624_v38  ;;  %1411 = vmatprep.mubr.msk.bf16.mxu0 %vm995_vm0, %v331_v36 }
  0x46   :  { %1241 = vmatprep.subr.bf16.mxu0 %v1659_v37 }
  0x47   :  { %1483 = vmatpush3.bf16.msra.mxu1 %v1611_v23 }
  0x48   :  { %1484 = vmatprep.subr.bf16.mxu1 %v1614_v25 }
  0x49   :  { %1242 = vmatpush1.bf16.msra.mxu0 %v1627_v40 }
  0x4a   :  { %1243 = vmatprep.subr.bf16.mxu0 %v1659_v37 }
  0x4b   :  { %1485 = vmatpush3.bf16.msra.mxu1 %v1615_v29 }
  0x4c   :  { %1486 = vmatprep.subr.bf16.mxu1 %v1618_v30 }
  0x4d   :  { %1244 = vmatpush1.bf16.msra.mxu0 %v1630_v43 }
  0x4e   :  { %1245 = vmatprep.subr.bf16.mxu0 %v1659_v37 }
  0x4f   :  { %1487 = vmatpush3.bf16.msra.mxu1 %v1619_v35 }
  0x50   :  { %1488 = vmatprep.subr.bf16.mxu1 %v1622_v39 }
  0x51   :  { %1246 = vmatpush1.bf16.msra.mxu0 %v1633_v46 }
  0x52   :  { %1247 = vmatprep.subr.bf16.mxu0 %v1659_v37 }
  0x53   :  { %1489 = vmatpush3.bf16.msra.mxu1 %v1623_v41 }
  0x54   :  { %1490 = vmatprep.subr.bf16.mxu1 %v1625_v42 }
  0x55   :  { %1248 = vmatpush1.bf16.msra.mxu0 %v1636_v49 }
  0x56   :  { %1249 = vmatprep.subr.bf16.mxu0 %v1659_v37 }
  0x57   :  { %1491 = vmatpush3.bf16.msra.mxu1 %v1626_v44 }
  0x58   :  { %1492 = vmatprep.subr.bf16.mxu1 %v1628_v45 }
  0x59   :  { %1250 = vmatpush1.bf16.msra.mxu0 %v1639_v53  ;;  %v1412_v53 = vld [vmem:[%s2092_s2] ss:$0 sm:$0xff] }
  0x5a   :  { %1251 = vmatprep.subr.bf16.mxu0 %v1659_v37 }
  0x5b   :  { %1493 = vmatpush3.bf16.msra.mxu1 %v1629_v47 }
  0x5c   :  { %1494 = vmatprep.subr.bf16.mxu1 %v1631_v48 }
  0x5d   :  { %1252 = vmatpush1.bf16.msra.mxu0 %v1642_v57 }
  0x5e   :  { %1253 = vmatprep.subr.bf16.mxu0 %v1659_v37 }
  0x5f   :  { %1495 = vmatpush3.bf16.msra.mxu1 %v1632_v50 }
  0x60   :  { %1524 = vmatprep.subr.bf16.mxu1 %v1634_v51 }
  0x61   :  { %1254 = vmatpush1.bf16.msra.mxu0 %v1645_v60 }
  0x62   :  { %1152 = vmatmul.mubr.bf16.vlgmr.msra.gmra.mrb[8].mxu1 %v284_v52  ;;  %1255 = vmatprep.subr.bf16.mxu0 %v1659_v37 }
  0x63   :  { %1525 = vmatpush3.bf16.msra.mxu1 %v1635_v54  ;;  %1231 = vmatprep.mubr.bf16.mxu1 %v333_v56 }
  0x64   :  { %1526 = vmatprep.subr.bf16.mxu1 %v1637_v55  ;;  %v1413_v55 = vld [vmem:[%s2093_s3] ss:$0 sm:$0xff] }
  0x65   :  { %1256 = vmatpush1.bf16.msra.mxu0 %v1648_v63 }
  0x66   :  { %1257 = vmatprep.subr.bf16.mxu0 %v1659_v37 }
  0x67   :  { %1527 = vmatpush3.bf16.msra.mxu1 %v1638_v58 }
  0x68   :  { %1528 = vmatprep.subr.bf16.mxu1 %v1640_v59 }
  0x69   :  { %1258 = vmatpush1.bf16.msra.mxu0 %v1651_v2 }
  0x6a   :  { %1259 = vmatprep.subr.bf16.mxu0 %v1659_v37 }
  0x6b   :  { %1529 = vmatpush3.bf16.msra.mxu1 %v1641_v61 }
  0x6c   :  { %1530 = vmatprep.subr.bf16.mxu1 %v1643_v62 }
  0x6d   :  { %1260 = vmatpush1.bf16.msra.mxu0 %v1654_v5 }
  0x6e   :  { %1261 = vmatprep.subr.bf16.mxu0 %v1659_v37 }
  0x6f   :  { %1531 = vmatpush3.bf16.msra.mxu1 %v1644_v0 }
  0x70   :  { %1532 = vmatprep.subr.bf16.mxu1 %v1646_v1 }
  0x71   :  { %1262 = vmatpush1.bf16.msra.mxu0 %v1657_v8 }
  0x73   :  { %1533 = vmatpush3.bf16.msra.mxu1 %v1647_v3 }
  0x74   :  { %1534 = vmatprep.subr.bf16.mxu1 %v1649_v4  ;;  %1272 = vmatmul.mubr.bf16.vlgmr.msra.gmra.mrb[8].mxu0 %v317_v11 }
  0x77   :  { %1535 = vmatpush3.bf16.msra.mxu1 %v1650_v6 }
  0x78   :  { %1536 = vmatprep.subr.bf16.mxu1 %v1652_v7 }
  0x7b   :  { %1537 = vmatpush3.bf16.msra.mxu1 %v1653_v9 }
  0x7c   :  { %1538 = vmatprep.subr.bf16.mxu1 %v1655_v10 }
  0x7f   :  { %1539 = vmatpush3.bf16.msra.mxu1 %v1656_v12 }
  0x82   :  { %1232 = vmatmul.mubr.bf16.vlgmr.msra.gmra.mrb[12].mxu1 %v332_v13 }
  0xf5   :  { %v1430_v14 = vpop.f32.mrb[0].mxu1 }
  0xf6   :  { %v1431_v15 = vpop.f32.mrb[1].mxu1 }
  0xf7   :  { %v1432_v16 = vadd.f32 %v1431_v15, %v1430_v14  ;;  %v1433_v17 = vpop.f32.mrb[2].mxu1  ;;  %v1474_v19 = vpop.f32.mrb[0].mxu0 }
  0xf8   :  { %v1434_v18 = vpop.f32.mrb[3].mxu1  ;;  %v1475_v24 = vpop.f32.mrb[1].mxu0 }
  0xf9   :  { %v1476_v20 = vadd.f32 %v1475_v24, %v1474_v19  ;;  %v1477_v21 = vpop.f32.mrb[2].mxu0 }
  0xfa   :  { %v1478_v22 = vpop.f32.mrb[3].mxu0 }
 0x115   :  { %v1452_v23 = vpop.f32.mrb[4].mxu1 }
 0x116   :  { %v1453_v25 = vpop.f32.mrb[5].mxu1 }
 0x117   :  { %v1454_v26 = vadd.f32 %v1453_v25, %v1452_v23  ;;  %v1455_v27 = vpop.f32.mrb[6].mxu1  ;;  %v1518_v31 = vpop.f32.mrb[4].mxu0 }
 0x118   :  { %v1456_v28 = vpop.f32.mrb[7].mxu1  ;;  %v1519_v32 = vpop.f32.mrb[5].mxu0 }
 0x119   :  { %v1074_v29 = vadd.f32 %v1454_v26, %v1432_v16  ;;  %v1520_v33 = vadd.f32 %v1519_v32, %v1518_v31  ;;  %v1521_v34 = vpop.f32.mrb[6].mxu0 }
 0x11a   :  { %v1522_v35 = vpop.f32.mrb[7].mxu0 }
 0x11b   :  { %v1114_v30 = vadd.f32 %v1476_v20, %v1074_v29 }
 0x135   :  { %v1496_v36 = vpop.f32.mrb[8].mxu1 }
 0x136   :  { %v1497_v37 = vpop.f32.mrb[9].mxu1 }
 0x137   :  { %v1498_v38 = vadd.f32 %v1497_v37, %v1496_v36  ;;  %v1499_v39 = vpop.f32.mrb[10].mxu1 }
 0x138   :  { %v1500_v40 = vpop.f32.mrb[11].mxu1 }
 0x139   :  { %v1154_v41 = vadd.f32 %v1498_v38, %v1114_v30 }
 0x13b   :  { %v1194_v42 = vadd.f32 %v1520_v33, %v1154_v41 }
 0x147   :  { %v1273_v43 = vpop.f32.mrb[8].mxu0 }
 0x148   :  { %v1275_v44 = vpop.f32.mrb[9].mxu0 }
 0x149   :  { %v1276_v45 = vpop.f32.mrb[10].mxu0 }
 0x14a   :  { %v1277_v46 = vpop.f32.mrb[11].mxu0 }
 0x155   :  { %v1540_v47 = vpop.f32.mrb[12].mxu1 }
 0x156   :  { %v1541_v48 = vpop.f32.mrb[13].mxu1 }
 0x157   :  { %v1542_v49 = vadd.f32 %v1541_v48, %v1540_v47  ;;  %v1543_v50 = vpop.f32.mrb[14].mxu1 }
 0x158   :  { %v1544_v51 = vpop.f32.mrb[15].mxu1 }
 0x159   :  { %v1234_v52 = vadd.f32 %v1542_v49, %v1194_v42 }
 0x15b   :  { %v1274_v54 = vadd.f32 %v1273_v43, %v1234_v52 }
 0x15d   :  { %v1286_v56 = vmul.f32 %v1412_v53, %v1274_v54 }
 0x15f   :  { %v1294_v57 = vadd.f32 %v1413_v55, %v1286_v56 }
 0x161   :  { %v1295_v58 = vmax.f32 %v1294_v57, 0.0 }
 0x163   :  { %v1296_v59 = vpack.c.bf16 %v1295_v58, %v1295_v58 }
 0x165   :  { %1298 = vst.msk [vmem:[%s2094_s4] sm:$0x1] %vm1297_vm1, %v1296_v59 }

// kernel: psmnet_forward.158
= control target key start
LH: loop header
LB: loop body
LE: loop exit
PB: predicated region body
PF: predicated region fallthrough
CT: control target
= control target key end

     0   :  { %v68_v9 = vlaneseq  ;;  %v338_v13 = vmov 1966171168   ;;  %vm238_vm0 = vcmask 516096   ;;  %s437_s0 = inlined_call_operand.vmem [shape: bf16[8,2,1,1,1,64], index: 0, kind: input, shape index: {}, may-alias: {0,6}]   ;;  %s438_s1 = inlined_call_operand.vmem [shape: bf16[2,256], index: 1, kind: input, shape index: {}]   ;;  %s439_s2 = inlined_call_operand.vmem [shape: bf16[256,64], index: 2, kind: input, shape index: {}]   ;;  %s440_s3 = inlined_call_operand.vmem [shape: f32[1,64], index: 3, kind: input, shape index: {}]   ;;  %s441_s4 = inlined_call_operand.vmem [shape: f32[1,64], index: 4, kind: input, shape index: {}]   ;;  %s442_s5 = inlined_call_operand.vmem [shape: bf16[2,64], index: 5, kind: input, shape index: {}]   ;;  %s443_s6 = inlined_call_operand.vmem [shape: bf16[8,2,1,1,1,64], index: 6, kind: output, shape index: {}, may-alias: {0,6}]  }
   0x1   :  { %v322_v0 = vld [vmem:[%s439_s2 + $0x40] sm:$0xff]   ;;  %v324_v2 = vld [vmem:[%s439_s2 + $0x48] sm:$0xff]   ;;  %v326_v4 = vld [vmem:[%s439_s2 + $0x50] sm:$0xff]   ;;  %v66_v14 = vunpack.c.l.s4 %v338_v13 }
   0x2   :  { %v323_v1 = vld [vmem:[%s439_s2] sm:$0xff]   ;;  %299 = vmatprep.subr.bf16.mxu0 %v322_v0  ;;  %v325_v3 = vld [vmem:[%s439_s2 + $0x8] sm:$0xff]   ;;  %v327_v5 = vld [vmem:[%s439_s2 + $0x10] sm:$0xff]   ;;  %v69_v15 = vshrl.u32 %v68_v9, 7 }
   0x3   :  { %300 = vmatpush3.bf16.msra.mxu0 %v323_v1  ;;  %v328_v6 = vld [vmem:[%s439_s2 + $0x58] sm:$0xff]   ;;  %v330_v8 = vld [vmem:[%s439_s2 + $0x60] sm:$0xff]   ;;  %v332_v11 = vld [vmem:[%s439_s2 + $0x68] sm:$0xff]   ;;  %v67_v18 = vunpack.c.0.s8 %v66_v14 }
   0x4   :  { %301 = vmatprep.subr.bf16.mxu0 %v324_v2  ;;  %v329_v7 = vld [vmem:[%s439_s2 + $0x18] sm:$0xff]   ;;  %v331_v10 = vld [vmem:[%s439_s2 + $0x20] sm:$0xff]   ;;  %v333_v16 = vld [vmem:[%s439_s2 + $0x28] sm:$0xff]  }
   0x5   :  { %v279_v12 = vld.sshfl [vmem:[%s438_s1] sm:$0x11 pattern:$0x75316420]  ;;  %v334_v19 = vld [vmem:[%s439_s2 + $0x70] sm:$0xff]   ;;  %v70_v20 = vsub.s32 %v67_v18, %v69_v15  ;;  %v336_v23 = vld [vmem:[%s439_s2 + $0x78] sm:$0xff]  }
   0x6   :  { %v64_v17 = vcombine.high %v279_v12, %v279_v12  ;;  %v335_v21 = vld [vmem:[%s439_s2 + $0x30] sm:$0xff]   ;;  %v337_v24 = vld [vmem:[%s439_s2 + $0x38] sm:$0xff]   ;;  %v296_v28 = vld [vmem:[%s440_s3] ss:$0 sm:$0xff] }
   0x7   :  { %302 = vmatpush3.bf16.msra.mxu0 %v325_v3  ;;  %v71_v25 = vrot.slane %v279_v12, %v70_v20  ;;  %v233_v29 = vld [vmem:[%s442_s5] sm:$0x1] }
   0x8   :  { %303 = vmatprep.subr.bf16.mxu0 %v326_v4  ;;  %v78_v22 = vrot.slane %v64_v17, %v70_v20  ;;  %v297_v32 = vld [vmem:[%s441_s4] ss:$0 sm:$0xff]  ;;  %v234_v35 = vunpack.c.l.bf16 %v233_v29 }
   0xa   :  { %209 = vmatprep.mubr.bf16.mxu0 %v78_v22 }
   0xb   :  { %304 = vmatpush3.bf16.msra.mxu0 %v327_v5 }
   0xc   :  { %305 = vmatprep.subr.bf16.mxu0 %v328_v6 }
   0xf   :  { %306 = vmatpush3.bf16.msra.mxu0 %v329_v7 }
  0x10   :  { %307 = vmatprep.subr.bf16.mxu0 %v330_v8 }
  0x13   :  { %308 = vmatpush3.bf16.msra.mxu0 %v331_v10 }
  0x14   :  { %309 = vmatprep.subr.bf16.mxu0 %v332_v11 }
  0x17   :  { %310 = vmatpush3.bf16.msra.mxu0 %v333_v16 }
  0x18   :  { %311 = vmatprep.subr.bf16.mxu0 %v334_v19 }
  0x1b   :  { %312 = vmatpush3.bf16.msra.mxu0 %v335_v21 }
  0x1c   :  { %313 = vmatprep.subr.bf16.mxu0 %v336_v23 }
  0x1f   :  { %314 = vmatpush3.bf16.msra.mxu0 %v337_v24 }
  0x22   :  { %210 = vmatmul.mubr.bf16.vlgmr.msra.gmra.mrb[0].mxu0 %v71_v25 }
  0xf5   :  { %v315_v26 = vpop.f32.mrb[0].mxu0 }
  0xf6   :  { %v316_v27 = vpop.f32.mrb[1].mxu0 }
  0xf7   :  { %v317_v30 = vadd.f32 %v316_v27, %v315_v26  ;;  %v318_v31 = vpop.f32.mrb[2].mxu0 }
  0xf8   :  { %v319_v33 = vpop.f32.mrb[3].mxu0 }
  0xf9   :  { %v224_v34 = vmul.f32 %v317_v30, %v296_v28 }
  0xfb   :  { %v232_v36 = vadd.f32 %v297_v32, %v224_v34 }
  0xfd   :  { %v235_v37 = vadd.f32 %v234_v35, %v232_v36 }
  0xff   :  { %v236_v38 = vmax.f32 %v235_v37, 0.0 }
 0x101   :  { %v237_v39 = vpack.c.bf16 %v236_v38, %v236_v38 }
 0x103   :  { %239 = vst.msk [vmem:[#allocation2] sm:$0x1] %vm238_vm0, %v237_v39 }
 0x10a   :  { %v257_v40 = vld [vmem:[#allocation2] sm:$0x1] }
 0x10b   :  { %298 = vst [vmem:[%s443_s6 + $0x3] sm:$0x1] %v257_v40 }

// kernel: psmnet_forward.156
= control target key start
LH: loop header
LB: loop body
LE: loop exit
PB: predicated region body
PF: predicated region fallthrough
CT: control target
= control target key end

     0   :  { %v68_v9 = vlaneseq  ;;  %v338_v13 = vmov 1966171168   ;;  %vm238_vm0 = vcmask 516096   ;;  %s437_s0 = inlined_call_operand.vmem [shape: bf16[8,2,1,1,1,64], index: 0, kind: input, shape index: {}, may-alias: {0,6}]   ;;  %s438_s1 = inlined_call_operand.vmem [shape: bf16[2,256], index: 1, kind: input, shape index: {}]   ;;  %s439_s2 = inlined_call_operand.vmem [shape: bf16[256,64], index: 2, kind: input, shape index: {}]   ;;  %s440_s3 = inlined_call_operand.vmem [shape: f32[1,64], index: 3, kind: input, shape index: {}]   ;;  %s441_s4 = inlined_call_operand.vmem [shape: f32[1,64], index: 4, kind: input, shape index: {}]   ;;  %s442_s5 = inlined_call_operand.vmem [shape: bf16[2,64], index: 5, kind: input, shape index: {}]   ;;  %s443_s6 = inlined_call_operand.vmem [shape: bf16[8,2,1,1,1,64], index: 6, kind: output, shape index: {}, may-alias: {0,6}]  }
   0x1   :  { %v322_v0 = vld [vmem:[%s439_s2 + $0x40] sm:$0xff]   ;;  %v324_v2 = vld [vmem:[%s439_s2 + $0x48] sm:$0xff]   ;;  %v326_v4 = vld [vmem:[%s439_s2 + $0x50] sm:$0xff]   ;;  %v66_v14 = vunpack.c.l.s4 %v338_v13 }
   0x2   :  { %v323_v1 = vld [vmem:[%s439_s2] sm:$0xff]   ;;  %299 = vmatprep.subr.bf16.mxu0 %v322_v0  ;;  %v325_v3 = vld [vmem:[%s439_s2 + $0x8] sm:$0xff]   ;;  %v327_v5 = vld [vmem:[%s439_s2 + $0x10] sm:$0xff]   ;;  %v69_v15 = vshrl.u32 %v68_v9, 7 }
   0x3   :  { %300 = vmatpush3.bf16.msra.mxu0 %v323_v1  ;;  %v328_v6 = vld [vmem:[%s439_s2 + $0x58] sm:$0xff]   ;;  %v330_v8 = vld [vmem:[%s439_s2 + $0x60] sm:$0xff]   ;;  %v332_v11 = vld [vmem:[%s439_s2 + $0x68] sm:$0xff]   ;;  %v67_v18 = vunpack.c.0.s8 %v66_v14 }
   0x4   :  { %301 = vmatprep.subr.bf16.mxu0 %v324_v2  ;;  %v329_v7 = vld [vmem:[%s439_s2 + $0x18] sm:$0xff]   ;;  %v331_v10 = vld [vmem:[%s439_s2 + $0x20] sm:$0xff]   ;;  %v333_v16 = vld [vmem:[%s439_s2 + $0x28] sm:$0xff]  }
   0x5   :  { %v279_v12 = vld.sshfl [vmem:[%s438_s1] sm:$0x11 pattern:$0x75316420]  ;;  %v334_v19 = vld [vmem:[%s439_s2 + $0x70] sm:$0xff]   ;;  %v70_v20 = vsub.s32 %v67_v18, %v69_v15  ;;  %v336_v23 = vld [vmem:[%s439_s2 + $0x78] sm:$0xff]  }
   0x6   :  { %v64_v17 = vcombine.high %v279_v12, %v279_v12  ;;  %v335_v21 = vld [vmem:[%s439_s2 + $0x30] sm:$0xff]   ;;  %v337_v24 = vld [vmem:[%s439_s2 + $0x38] sm:$0xff]   ;;  %v296_v28 = vld [vmem:[%s440_s3] ss:$0 sm:$0xff] }
   0x7   :  { %302 = vmatpush3.bf16.msra.mxu0 %v325_v3  ;;  %v71_v25 = vrot.slane %v279_v12, %v70_v20  ;;  %v233_v29 = vld [vmem:[%s442_s5] sm:$0x1] }
   0x8   :  { %303 = vmatprep.subr.bf16.mxu0 %v326_v4  ;;  %v78_v22 = vrot.slane %v64_v17, %v70_v20  ;;  %v297_v32 = vld [vmem:[%s441_s4] ss:$0 sm:$0xff]  ;;  %v234_v35 = vunpack.c.l.bf16 %v233_v29 }
   0xa   :  { %209 = vmatprep.mubr.bf16.mxu0 %v78_v22 }
   0xb   :  { %304 = vmatpush3.bf16.msra.mxu0 %v327_v5 }
   0xc   :  { %305 = vmatprep.subr.bf16.mxu0 %v328_v6 }
   0xf   :  { %306 = vmatpush3.bf16.msra.mxu0 %v329_v7 }
  0x10   :  { %307 = vmatprep.subr.bf16.mxu0 %v330_v8 }
  0x13   :  { %308 = vmatpush3.bf16.msra.mxu0 %v331_v10 }
  0x14   :  { %309 = vmatprep.subr.bf16.mxu0 %v332_v11 }
  0x17   :  { %310 = vmatpush3.bf16.msra.mxu0 %v333_v16 }
  0x18   :  { %311 = vmatprep.subr.bf16.mxu0 %v334_v19 }
  0x1b   :  { %312 = vmatpush3.bf16.msra.mxu0 %v335_v21 }
  0x1c   :  { %313 = vmatprep.subr.bf16.mxu0 %v336_v23 }
  0x1f   :  { %314 = vmatpush3.bf16.msra.mxu0 %v337_v24 }
  0x22   :  { %210 = vmatmul.mubr.bf16.vlgmr.msra.gmra.mrb[0].mxu0 %v71_v25 }
  0xf5   :  { %v315_v26 = vpop.f32.mrb[0].mxu0 }
  0xf6   :  { %v316_v27 = vpop.f32.mrb[1].mxu0 }
  0xf7   :  { %v317_v30 = vadd.f32 %v316_v27, %v315_v26  ;;  %v318_v31 = vpop.f32.mrb[2].mxu0 }
  0xf8   :  { %v319_v33 = vpop.f32.mrb[3].mxu0 }
  0xf9   :  { %v224_v34 = vmul.f32 %v317_v30, %v296_v28 }
  0xfb   :  { %v232_v36 = vadd.f32 %v297_v32, %v224_v34 }
  0xfd   :  { %v235_v37 = vadd.f32 %v234_v35, %v232_v36 }
  0xff   :  { %v236_v38 = vmax.f32 %v235_v37, 0.0 }
 0x101   :  { %v237_v39 = vpack.c.bf16 %v236_v38, %v236_v38 }
 0x103   :  { %239 = vst.msk [vmem:[#allocation2] sm:$0x1] %vm238_vm0, %v237_v39 }
 0x10a   :  { %v257_v40 = vld [vmem:[#allocation2] sm:$0x1] }
 0x10b   :  { %298 = vst [vmem:[%s443_s6 + $0x5] sm:$0x1] %v257_v40 }

// kernel: psmnet_forward.155
= control target key start
LH: loop header
LB: loop body
LE: loop exit
PB: predicated region body
PF: predicated region fallthrough
CT: control target
= control target key end

     0   :  { %v68_v9 = vlaneseq  ;;  %v338_v13 = vmov 1966171168   ;;  %vm238_vm0 = vcmask 516096   ;;  %s437_s0 = inlined_call_operand.vmem [shape: bf16[8,2,1,1,1,64], index: 0, kind: input, shape index: {}, may-alias: {0,6}]   ;;  %s438_s1 = inlined_call_operand.vmem [shape: bf16[2,256], index: 1, kind: input, shape index: {}]   ;;  %s439_s2 = inlined_call_operand.vmem [shape: bf16[256,64], index: 2, kind: input, shape index: {}]   ;;  %s440_s3 = inlined_call_operand.vmem [shape: f32[1,64], index: 3, kind: input, shape index: {}]   ;;  %s441_s4 = inlined_call_operand.vmem [shape: f32[1,64], index: 4, kind: input, shape index: {}]   ;;  %s442_s5 = inlined_call_operand.vmem [shape: bf16[2,64], index: 5, kind: input, shape index: {}]   ;;  %s443_s6 = inlined_call_operand.vmem [shape: bf16[8,2,1,1,1,64], index: 6, kind: output, shape index: {}, may-alias: {0,6}]  }
   0x1   :  { %v322_v0 = vld [vmem:[%s439_s2 + $0x40] sm:$0xff]   ;;  %v324_v2 = vld [vmem:[%s439_s2 + $0x48] sm:$0xff]   ;;  %v326_v4 = vld [vmem:[%s439_s2 + $0x50] sm:$0xff]   ;;  %v66_v14 = vunpack.c.l.s4 %v338_v13 }
   0x2   :  { %v323_v1 = vld [vmem:[%s439_s2] sm:$0xff]   ;;  %299 = vmatprep.subr.bf16.mxu0 %v322_v0  ;;  %v325_v3 = vld [vmem:[%s439_s2 + $0x8] sm:$0xff]   ;;  %v327_v5 = vld [vmem:[%s439_s2 + $0x10] sm:$0xff]   ;;  %v69_v15 = vshrl.u32 %v68_v9, 7 }
   0x3   :  { %300 = vmatpush3.bf16.msra.mxu0 %v323_v1  ;;  %v328_v6 = vld [vmem:[%s439_s2 + $0x58] sm:$0xff]   ;;  %v330_v8 = vld [vmem:[%s439_s2 + $0x60] sm:$0xff]   ;;  %v332_v11 = vld [vmem:[%s439_s2 + $0x68] sm:$0xff]   ;;  %v67_v18 = vunpack.c.0.s8 %v66_v14 }
   0x4   :  { %301 = vmatprep.subr.bf16.mxu0 %v324_v2  ;;  %v329_v7 = vld [vmem:[%s439_s2 + $0x18] sm:$0xff]   ;;  %v331_v10 = vld [vmem:[%s439_s2 + $0x20] sm:$0xff]   ;;  %v333_v16 = vld [vmem:[%s439_s2 + $0x28] sm:$0xff]  }
   0x5   :  { %v279_v12 = vld.sshfl [vmem:[%s438_s1] sm:$0x11 pattern:$0x75316420]  ;;  %v334_v19 = vld [vmem:[%s439_s2 + $0x70] sm:$0xff]   ;;  %v70_v20 = vsub.s32 %v67_v18, %v69_v15  ;;  %v336_v23 = vld [vmem:[%s439_s2 + $0x78] sm:$0xff]  }
   0x6   :  { %v64_v17 = vcombine.high %v279_v12, %v279_v12  ;;  %v335_v21 = vld [vmem:[%s439_s2 + $0x30] sm:$0xff]   ;;  %v337_v24 = vld [vmem:[%s439_s2 + $0x38] sm:$0xff]   ;;  %v296_v28 = vld [vmem:[%s440_s3] ss:$0 sm:$0xff] }
   0x7   :  { %302 = vmatpush3.bf16.msra.mxu0 %v325_v3  ;;  %v71_v25 = vrot.slane %v279_v12, %v70_v20  ;;  %v233_v29 = vld [vmem:[%s442_s5] sm:$0x1] }
   0x8   :  { %303 = vmatprep.subr.bf16.mxu0 %v326_v4  ;;  %v78_v22 = vrot.slane %v64_v17, %v70_v20  ;;  %v297_v32 = vld [vmem:[%s441_s4] ss:$0 sm:$0xff]  ;;  %v234_v35 = vunpack.c.l.bf16 %v233_v29 }
   0xa   :  { %209 = vmatprep.mubr.bf16.mxu0 %v78_v22 }
   0xb   :  { %304 = vmatpush3.bf16.msra.mxu0 %v327_v5 }
   0xc   :  { %305 = vmatprep.subr.bf16.mxu0 %v328_v6 }
   0xf   :  { %306 = vmatpush3.bf16.msra.mxu0 %v329_v7 }
  0x10   :  { %307 = vmatprep.subr.bf16.mxu0 %v330_v8 }
  0x13   :  { %308 = vmatpush3.bf16.msra.mxu0 %v331_v10 }
  0x14   :  { %309 = vmatprep.subr.bf16.mxu0 %v332_v11 }
  0x17   :  { %310 = vmatpush3.bf16.msra.mxu0 %v333_v16 }
  0x18   :  { %311 = vmatprep.subr.bf16.mxu0 %v334_v19 }
  0x1b   :  { %312 = vmatpush3.bf16.msra.mxu0 %v335_v21 }
  0x1c   :  { %313 = vmatprep.subr.bf16.mxu0 %v336_v23 }
  0x1f   :  { %314 = vmatpush3.bf16.msra.mxu0 %v337_v24 }
  0x22   :  { %210 = vmatmul.mubr.bf16.vlgmr.msra.gmra.mrb[0].mxu0 %v71_v25 }
  0xf5   :  { %v315_v26 = vpop.f32.mrb[0].mxu0 }
  0xf6   :  { %v316_v27 = vpop.f32.mrb[1].mxu0 }
  0xf7   :  { %v317_v30 = vadd.f32 %v316_v27, %v315_v26  ;;  %v318_v31 = vpop.f32.mrb[2].mxu0 }
  0xf8   :  { %v319_v33 = vpop.f32.mrb[3].mxu0 }
  0xf9   :  { %v224_v34 = vmul.f32 %v317_v30, %v296_v28 }
  0xfb   :  { %v232_v36 = vadd.f32 %v297_v32, %v224_v34 }
  0xfd   :  { %v235_v37 = vadd.f32 %v234_v35, %v232_v36 }
  0xff   :  { %v236_v38 = vmax.f32 %v235_v37, 0.0 }
 0x101   :  { %v237_v39 = vpack.c.bf16 %v236_v38, %v236_v38 }
 0x103   :  { %239 = vst.msk [vmem:[#allocation2] sm:$0x1] %vm238_vm0, %v237_v39 }
 0x10a   :  { %v257_v40 = vld [vmem:[#allocation2] sm:$0x1] }
 0x10b   :  { %298 = vst [vmem:[%s443_s6 + $0x6] sm:$0x1] %v257_v40 }

// kernel: psmnet_forward.154
= control target key start
LH: loop header
LB: loop body
LE: loop exit
PB: predicated region body
PF: predicated region fallthrough
CT: control target
= control target key end

     0   :  { %v100_v30 = vlaneseq  ;;  %v564_v34 = vmov 1966171168   ;;  %vm410_vm0 = vcmask 516096   ;;  %s711_s0 = inlined_call_operand.vmem [shape: bf16[8,2,1,1,1,64], index: 0, kind: input, shape index: {}, may-alias: {0,6}]   ;;  %s712_s1 = inlined_call_operand.vmem [shape: bf16[2,512], index: 1, kind: input, shape index: {}]   ;;  %s713_s2 = inlined_call_operand.vmem [shape: bf16[512,64], index: 2, kind: input, shape index: {}]   ;;  %s714_s3 = inlined_call_operand.vmem [shape: f32[1,64], index: 3, kind: input, shape index: {}]   ;;  %s715_s4 = inlined_call_operand.vmem [shape: f32[1,64], index: 4, kind: input, shape index: {}]   ;;  %s716_s5 = inlined_call_operand.vmem [shape: bf16[2,64], index: 5, kind: input, shape index: {}]   ;;  %s717_s6 = inlined_call_operand.vmem [shape: bf16[8,2,1,1,1,64], index: 6, kind: output, shape index: {}, may-alias: {0,6}]  }
   0x1   :  { %v532_v0 = vld [vmem:[%s713_s2 + $0x40] sm:$0xff]   ;;  %v536_v4 = vld [vmem:[%s713_s2 + $0x48] sm:$0xff]   ;;  %v540_v8 = vld [vmem:[%s713_s2 + $0x50] sm:$0xff]   ;;  %v98_v35 = vunpack.c.l.s4 %v564_v34 }
   0x2   :  { %v533_v1 = vld [vmem:[%s713_s2 + $0xc0] sm:$0xff]   ;;  %487 = vmatprep.subr.bf16.mxu0 %v532_v0  ;;  %v537_v5 = vld [vmem:[%s713_s2 + $0xc8] sm:$0xff]   ;;  %v541_v9 = vld [vmem:[%s713_s2 + $0xd0] sm:$0xff]   ;;  %v101_v36 = vshrl.u32 %v100_v30, 7 }
   0x3   :  { %v534_v2 = vld [vmem:[%s713_s2] sm:$0xff]   ;;  %509 = vmatprep.subr.bf16.mxu1 %v533_v1  ;;  %v538_v6 = vld [vmem:[%s713_s2 + $0x8] sm:$0xff]   ;;  %v542_v10 = vld [vmem:[%s713_s2 + $0x10] sm:$0xff]   ;;  %v99_v38 = vunpack.c.0.s8 %v98_v35 }
   0x4   :  { %v535_v3 = vld [vmem:[%s713_s2 + $0x80] sm:$0xff]   ;;  %488 = vmatpush3.bf16.msra.mxu0 %v534_v2  ;;  %v539_v7 = vld [vmem:[%s713_s2 + $0x88] sm:$0xff]   ;;  %v543_v11 = vld [vmem:[%s713_s2 + $0x90] sm:$0xff]  }
   0x5   :  { %510 = vmatpush3.bf16.msra.mxu1 %v535_v3  ;;  %489 = vmatprep.subr.bf16.mxu0 %v536_v4  ;;  %v544_v12 = vld [vmem:[%s713_s2 + $0x58] sm:$0xff]   ;;  %v548_v16 = vld [vmem:[%s713_s2 + $0x60] sm:$0xff]   ;;  %v552_v20 = vld [vmem:[%s713_s2 + $0x68] sm:$0xff]   ;;  %v102_v39 = vsub.s32 %v99_v38, %v101_v36 }
   0x6   :  { %511 = vmatprep.subr.bf16.mxu1 %v537_v5  ;;  %v545_v13 = vld [vmem:[%s713_s2 + $0xd8] sm:$0xff]   ;;  %v549_v17 = vld [vmem:[%s713_s2 + $0xe0] sm:$0xff]   ;;  %v553_v21 = vld [vmem:[%s713_s2 + $0xe8] sm:$0xff]  }
   0x7   :  { %v546_v14 = vld [vmem:[%s713_s2 + $0x18] sm:$0xff]   ;;  %v550_v18 = vld [vmem:[%s713_s2 + $0x20] sm:$0xff]   ;;  %v554_v22 = vld [vmem:[%s713_s2 + $0x28] sm:$0xff]  }
   0x8   :  { %490 = vmatpush3.bf16.msra.mxu0 %v538_v6  ;;  %v547_v15 = vld [vmem:[%s713_s2 + $0x98] sm:$0xff]   ;;  %v551_v19 = vld [vmem:[%s713_s2 + $0xa0] sm:$0xff]   ;;  %v555_v23 = vld [vmem:[%s713_s2 + $0xa8] sm:$0xff]  }
   0x9   :  { %512 = vmatpush3.bf16.msra.mxu1 %v539_v7  ;;  %491 = vmatprep.subr.bf16.mxu0 %v540_v8  ;;  %v556_v24 = vld [vmem:[%s713_s2 + $0x70] sm:$0xff]   ;;  %v560_v28 = vld [vmem:[%s713_s2 + $0x78] sm:$0xff]   ;;  %v451_v33 = vld.sshfl [vmem:[%s712_s1] sm:$0x33 pattern:$0x75316420] }
   0xa   :  { %513 = vmatprep.subr.bf16.mxu1 %v541_v9  ;;  %v557_v25 = vld [vmem:[%s713_s2 + $0xf0] sm:$0xff]   ;;  %v561_v29 = vld [vmem:[%s713_s2 + $0xf8] sm:$0xff]   ;;  %v96_v37 = vcombine.high %v451_v33, %v451_v33  ;;  %v103_v41 = vrot.slane %v451_v33, %v102_v39  ;;  %v484_v53 = vld [vmem:[%s714_s3] ss:$0 sm:$0xff] }
   0xb   :  { %v558_v26 = vld [vmem:[%s713_s2 + $0x30] sm:$0xff]   ;;  %v562_v31 = vld [vmem:[%s713_s2 + $0x38] sm:$0xff]   ;;  %v405_v54 = vld [vmem:[%s716_s5] sm:$0x1] }
   0xc   :  { %492 = vmatpush3.bf16.msra.mxu0 %v542_v10  ;;  %v559_v27 = vld [vmem:[%s713_s2 + $0xb0] sm:$0xff]   ;;  %v563_v32 = vld [vmem:[%s713_s2 + $0xb8] sm:$0xff]   ;;  %v110_v40 = vrot.slane %v96_v37, %v102_v39  ;;  %v111_v43 = vcombine.high %v103_v41, %v103_v41  ;;  %v485_v57 = vld [vmem:[%s715_s4] ss:$0 sm:$0xff]  ;;  %v406_v59 = vunpack.c.l.bf16 %v405_v54 }
   0xd   :  { %514 = vmatpush3.bf16.msra.mxu1 %v543_v11  ;;  %493 = vmatprep.subr.bf16.mxu0 %v544_v12 }
   0xe   :  { %515 = vmatprep.subr.bf16.mxu1 %v545_v13  ;;  %341 = vmatprep.mubr.bf16.mxu0 %v110_v40  ;;  %v112_v42 = vcombine.high %v110_v40, %v110_v40 }
  0x10   :  { %494 = vmatpush3.bf16.msra.mxu0 %v546_v14  ;;  %381 = vmatprep.mubr.bf16.mxu1 %v112_v42 }
  0x11   :  { %516 = vmatpush3.bf16.msra.mxu1 %v547_v15  ;;  %495 = vmatprep.subr.bf16.mxu0 %v548_v16 }
  0x12   :  { %517 = vmatprep.subr.bf16.mxu1 %v549_v17 }
  0x14   :  { %496 = vmatpush3.bf16.msra.mxu0 %v550_v18 }
  0x15   :  { %518 = vmatpush3.bf16.msra.mxu1 %v551_v19  ;;  %497 = vmatprep.subr.bf16.mxu0 %v552_v20 }
  0x16   :  { %519 = vmatprep.subr.bf16.mxu1 %v553_v21 }
  0x18   :  { %498 = vmatpush3.bf16.msra.mxu0 %v554_v22 }
  0x19   :  { %520 = vmatpush3.bf16.msra.mxu1 %v555_v23  ;;  %499 = vmatprep.subr.bf16.mxu0 %v556_v24 }
  0x1a   :  { %521 = vmatprep.subr.bf16.mxu1 %v557_v25 }
  0x1c   :  { %500 = vmatpush3.bf16.msra.mxu0 %v558_v26 }
  0x1d   :  { %522 = vmatpush3.bf16.msra.mxu1 %v559_v27  ;;  %501 = vmatprep.subr.bf16.mxu0 %v560_v28 }
  0x1e   :  { %523 = vmatprep.subr.bf16.mxu1 %v561_v29 }
  0x20   :  { %502 = vmatpush3.bf16.msra.mxu0 %v562_v31 }
  0x21   :  { %524 = vmatpush3.bf16.msra.mxu1 %v563_v32 }
  0x23   :  { %342 = vmatmul.mubr.bf16.vlgmr.msra.gmra.mrb[0].mxu0 %v103_v41 }
  0x24   :  { %382 = vmatmul.mubr.bf16.vlgmr.msra.gmra.mrb[0].mxu1 %v111_v43 }
  0xf6   :  { %v503_v44 = vpop.f32.mrb[0].mxu0 }
  0xf7   :  { %v504_v45 = vpop.f32.mrb[1].mxu0  ;;  %v525_v46 = vpop.f32.mrb[0].mxu1 }
  0xf8   :  { %v505_v47 = vadd.f32 %v504_v45, %v503_v44  ;;  %v506_v48 = vpop.f32.mrb[2].mxu0  ;;  %v526_v49 = vpop.f32.mrb[1].mxu1 }
  0xf9   :  { %v507_v50 = vpop.f32.mrb[3].mxu0  ;;  %v527_v51 = vadd.f32 %v526_v49, %v525_v46  ;;  %v528_v52 = vpop.f32.mrb[2].mxu1 }
  0xfa   :  { %v529_v55 = vpop.f32.mrb[3].mxu1 }
  0xfb   :  { %v384_v56 = vadd.f32 %v527_v51, %v505_v47 }
  0xfd   :  { %v396_v58 = vmul.f32 %v484_v53, %v384_v56 }
  0xff   :  { %v404_v60 = vadd.f32 %v485_v57, %v396_v58 }
 0x101   :  { %v407_v61 = vadd.f32 %v406_v59, %v404_v60 }
 0x103   :  { %v408_v62 = vmax.f32 %v407_v61, 0.0 }
 0x105   :  { %v409_v63 = vpack.c.bf16 %v408_v62, %v408_v62 }
 0x107   :  { %411 = vst.msk [vmem:[#allocation2] sm:$0x1] %vm410_vm0, %v409_v63 }
 0x10e   :  { %v429_v0 = vld [vmem:[#allocation2] sm:$0x1] }
 0x10f   :  { %486 = vst [vmem:[%s717_s6 + $0x7] sm:$0x1] %v429_v0 }

// kernel: psmnet_forward.119
= control target key start
LH: loop header
LB: loop body
LE: loop exit
PB: predicated region body
PF: predicated region fallthrough
CT: control target
= control target key end

     0   :  { %vm234_vm0 = vcmask 257024   ;;  %s409_s1 = inlined_call_operand.vmem [shape: bf16[256,32], index: 1, kind: input, shape index: {}]   ;;  %s410_s0 = inlined_call_operand.vmem [shape: bf16[16,256], index: 0, kind: input, shape index: {}]   ;;  %s411_s2 = inlined_call_operand.vmem [shape: f32[1,32], index: 2, kind: input, shape index: {}]   ;;  %s412_s4 = inlined_call_operand.vmem [shape: bf16[16,32], index: 4, kind: input, shape index: {}]   ;;  %s413_s3 = inlined_call_operand.vmem [shape: f32[1,32], index: 3, kind: input, shape index: {}]   ;;  %s414_s5 = inlined_call_operand.vmem [shape: bf16[16,32], index: 5, kind: output, shape index: {}]  }
   0x1   :  { %v291_v0 = vld [vmem:[%s409_s1 + $0x40] sm:$0xff]   ;;  %v293_v2 = vld [vmem:[%s409_s1 + $0x48] sm:$0xff]   ;;  %v295_v4 = vld [vmem:[%s409_s1 + $0x50] sm:$0xff]  }
   0x2   :  { %v292_v1 = vld [vmem:[%s409_s1] sm:$0xff]   ;;  %269 = vmatprep.subr.bf16.mxu0 %v291_v0  ;;  %v294_v3 = vld [vmem:[%s409_s1 + $0x8] sm:$0xff]   ;;  %v296_v5 = vld [vmem:[%s409_s1 + $0x10] sm:$0xff]  }
   0x3   :  { %270 = vmatpush3.bf16.msra.mxu0 %v292_v1  ;;  %v297_v6 = vld [vmem:[%s409_s1 + $0x58] sm:$0xff]   ;;  %v299_v8 = vld [vmem:[%s409_s1 + $0x60] sm:$0xff]   ;;  %v301_v10 = vld [vmem:[%s409_s1 + $0x68] sm:$0xff]  }
   0x4   :  { %271 = vmatprep.subr.bf16.mxu0 %v293_v2  ;;  %v298_v7 = vld [vmem:[%s409_s1 + $0x18] sm:$0xff]   ;;  %v300_v9 = vld [vmem:[%s409_s1 + $0x20] sm:$0xff]   ;;  %v302_v12 = vld [vmem:[%s409_s1 + $0x28] sm:$0xff]  }
   0x5   :  { %v309_v11 = vld [vmem:[%s410_s0 + $0x4] ss:$8 sps:$4 sm:$0xff]   ;;  %v303_v13 = vld [vmem:[%s409_s1 + $0x70] sm:$0xff]   ;;  %v305_v15 = vld [vmem:[%s409_s1 + $0x78] sm:$0xff]  }
   0x6   :  { %193 = vmatprep.mubr.bf16.mxu0 %v309_v11  ;;  %v304_v14 = vld [vmem:[%s409_s1 + $0x30] sm:$0xff]   ;;  %v306_v16 = vld [vmem:[%s409_s1 + $0x38] sm:$0xff]   ;;  %v307_v17 = vld [vmem:[%s410_s0] ss:$8 sps:$4 sm:$0xff]  }
   0x7   :  { %272 = vmatpush3.bf16.msra.mxu0 %v294_v3  ;;  %v259_v20 = vld [vmem:[%s411_s2] ss:$0 sm:$0xff] }
   0x8   :  { %273 = vmatprep.subr.bf16.mxu0 %v295_v4  ;;  %v266_v21 = vld [vmem:[%s412_s4] sm:$0xff]  }
   0x9   :  { %v260_v24 = vld [vmem:[%s413_s3] ss:$0 sm:$0xff]  ;;  %v267_v27 = vunpack.c.l.bf16 %v266_v21  ;;  %v268_v31 = vunpack.c.h.bf16 %v266_v21 }
   0xb   :  { %274 = vmatpush3.bf16.msra.mxu0 %v296_v5 }
   0xc   :  { %275 = vmatprep.subr.bf16.mxu0 %v297_v6 }
   0xf   :  { %276 = vmatpush3.bf16.msra.mxu0 %v298_v7 }
  0x10   :  { %277 = vmatprep.subr.bf16.mxu0 %v299_v8 }
  0x13   :  { %278 = vmatpush3.bf16.msra.mxu0 %v300_v9 }
  0x14   :  { %279 = vmatprep.subr.bf16.mxu0 %v301_v10 }
  0x17   :  { %280 = vmatpush3.bf16.msra.mxu0 %v302_v12 }
  0x18   :  { %281 = vmatprep.subr.bf16.mxu0 %v303_v13 }
  0x1b   :  { %282 = vmatpush3.bf16.msra.mxu0 %v304_v14 }
  0x1c   :  { %283 = vmatprep.subr.bf16.mxu0 %v305_v15 }
  0x1f   :  { %284 = vmatpush3.bf16.msra.mxu0 %v306_v16 }
  0x22   :  { %194 = vmatmul.mubr.bf16.vlgmr.msra.gmra.mrb[0].mxu0 %v307_v17 }
  0xf5   :  { %v285_v18 = vpop.f32.mrb[0].mxu0 }
  0xf6   :  { %v286_v19 = vpop.f32.mrb[1].mxu0 }
  0xf7   :  { %v287_v22 = vadd.f32 %v286_v19, %v285_v18  ;;  %v288_v23 = vpop.f32.mrb[2].mxu0 }
  0xf8   :  { %v289_v25 = vpop.f32.mrb[3].mxu0 }
  0xf9   :  { %v209_v26 = vmul.f32 %v287_v22, %v259_v20  ;;  %v290_v28 = vadd.f32 %v289_v25, %v288_v23 }
  0xfb   :  { %v218_v29 = vadd.f32 %v260_v24, %v209_v26  ;;  %v210_v30 = vmul.f32 %v290_v28, %v259_v20 }
  0xfd   :  { %v224_v32 = vadd.f32 %v267_v27, %v218_v29  ;;  %v219_v33 = vadd.f32 %v260_v24, %v210_v30 }
  0xff   :  { %v263_v34 = vpack.c.bf16 %v224_v32, %v224_v32  ;;  %v225_v35 = vadd.f32 %v268_v31, %v219_v33 }
 0x101   :  { %235 = vst.msk [vmem:[%s414_s5] sm:$0xf] %vm234_vm0, %v263_v34  ;;  %v264_v36 = vpack.c.bf16 %v225_v35, %v225_v35 }
 0x103   :  { %236 = vst.msk [vmem:[%s414_s5 + $0x4] sm:$0xf] %vm234_vm0, %v264_v36 }

// kernel: psmnet_forward.120
= control target key start
LH: loop header
LB: loop body
LE: loop exit
PB: predicated region body
PF: predicated region fallthrough
CT: control target
= control target key end

     0   :  { %vm415_vm0 = vcmask 257024   ;;  %s703_s1 = inlined_call_operand.vmem [shape: bf16[512,32], index: 1, kind: input, shape index: {}]   ;;  %s704_s0 = inlined_call_operand.vmem [shape: bf16[16,512], index: 0, kind: input, shape index: {}]   ;;  %s705_s2 = inlined_call_operand.vmem [shape: f32[1,32], index: 2, kind: input, shape index: {}]   ;;  %s706_s4 = inlined_call_operand.vmem [shape: bf16[16,32], index: 4, kind: input, shape index: {}]   ;;  %s707_s3 = inlined_call_operand.vmem [shape: f32[1,32], index: 3, kind: input, shape index: {}]   ;;  %s708_s5 = inlined_call_operand.vmem [shape: bf16[16,32], index: 5, kind: output, shape index: {}]  }
   0x1   :  { %v512_v0 = vld [vmem:[%s703_s1 + $0x40] sm:$0xff]   ;;  %v516_v4 = vld [vmem:[%s703_s1 + $0x48] sm:$0xff]   ;;  %v520_v8 = vld [vmem:[%s703_s1 + $0x50] sm:$0xff]  }
   0x2   :  { %v513_v1 = vld [vmem:[%s703_s1 + $0xc0] sm:$0xff]   ;;  %468 = vmatprep.subr.bf16.mxu0 %v512_v0  ;;  %v517_v5 = vld [vmem:[%s703_s1 + $0xc8] sm:$0xff]   ;;  %v521_v9 = vld [vmem:[%s703_s1 + $0xd0] sm:$0xff]  }
   0x3   :  { %v514_v2 = vld [vmem:[%s703_s1] sm:$0xff]   ;;  %490 = vmatprep.subr.bf16.mxu1 %v513_v1  ;;  %v518_v6 = vld [vmem:[%s703_s1 + $0x8] sm:$0xff]   ;;  %v522_v10 = vld [vmem:[%s703_s1 + $0x10] sm:$0xff]  }
   0x4   :  { %v515_v3 = vld [vmem:[%s703_s1 + $0x80] sm:$0xff]   ;;  %469 = vmatpush3.bf16.msra.mxu0 %v514_v2  ;;  %v519_v7 = vld [vmem:[%s703_s1 + $0x88] sm:$0xff]   ;;  %v523_v11 = vld [vmem:[%s703_s1 + $0x90] sm:$0xff]  }
   0x5   :  { %491 = vmatpush3.bf16.msra.mxu1 %v515_v3  ;;  %470 = vmatprep.subr.bf16.mxu0 %v516_v4  ;;  %v524_v12 = vld [vmem:[%s703_s1 + $0x58] sm:$0xff]   ;;  %v528_v16 = vld [vmem:[%s703_s1 + $0x60] sm:$0xff]   ;;  %v532_v20 = vld [vmem:[%s703_s1 + $0x68] sm:$0xff]  }
   0x6   :  { %492 = vmatprep.subr.bf16.mxu1 %v517_v5  ;;  %v525_v13 = vld [vmem:[%s703_s1 + $0xd8] sm:$0xff]   ;;  %v529_v17 = vld [vmem:[%s703_s1 + $0xe0] sm:$0xff]   ;;  %v533_v21 = vld [vmem:[%s703_s1 + $0xe8] sm:$0xff]  }
   0x7   :  { %v526_v14 = vld [vmem:[%s703_s1 + $0x18] sm:$0xff]   ;;  %v530_v18 = vld [vmem:[%s703_s1 + $0x20] sm:$0xff]   ;;  %v534_v22 = vld [vmem:[%s703_s1 + $0x28] sm:$0xff]  }
   0x8   :  { %471 = vmatpush3.bf16.msra.mxu0 %v518_v6  ;;  %v527_v15 = vld [vmem:[%s703_s1 + $0x98] sm:$0xff]   ;;  %v531_v19 = vld [vmem:[%s703_s1 + $0xa0] sm:$0xff]   ;;  %v535_v23 = vld [vmem:[%s703_s1 + $0xa8] sm:$0xff]  }
   0x9   :  { %493 = vmatpush3.bf16.msra.mxu1 %v519_v7  ;;  %472 = vmatprep.subr.bf16.mxu0 %v520_v8  ;;  %v536_v24 = vld [vmem:[%s703_s1 + $0x70] sm:$0xff]   ;;  %v540_v28 = vld [vmem:[%s703_s1 + $0x78] sm:$0xff]   ;;  %v458_v45 = vld [vmem:[%s705_s2] ss:$0 sm:$0xff] }
   0xa   :  { %494 = vmatprep.subr.bf16.mxu1 %v521_v9  ;;  %v537_v25 = vld [vmem:[%s703_s1 + $0xf0] sm:$0xff]   ;;  %v541_v29 = vld [vmem:[%s703_s1 + $0xf8] sm:$0xff]   ;;  %v465_v46 = vld [vmem:[%s706_s4] sm:$0xff]  }
   0xb   :  { %v538_v26 = vld [vmem:[%s703_s1 + $0x30] sm:$0xff]   ;;  %v542_v30 = vld [vmem:[%s703_s1 + $0x38] sm:$0xff]   ;;  %v459_v51 = vld [vmem:[%s707_s3] ss:$0 sm:$0xff]  ;;  %v466_v53 = vunpack.c.l.bf16 %v465_v46  ;;  %v467_v57 = vunpack.c.h.bf16 %v465_v46 }
   0xc   :  { %473 = vmatpush3.bf16.msra.mxu0 %v522_v10  ;;  %v539_v27 = vld [vmem:[%s703_s1 + $0xb0] sm:$0xff]   ;;  %v543_v31 = vld [vmem:[%s703_s1 + $0xb8] sm:$0xff]  }
   0xd   :  { %495 = vmatpush3.bf16.msra.mxu1 %v523_v11  ;;  %474 = vmatprep.subr.bf16.mxu0 %v524_v12  ;;  %v544_v32 = vld [vmem:[%s704_s0] ss:$16 sps:$4 sm:$0xff]   ;;  %v546_v33 = vld [vmem:[%s704_s0 + $0x4] ss:$16 sps:$4 sm:$0xff]   ;;  %v547_v34 = vld [vmem:[%s704_s0 + $0x8] ss:$16 sps:$4 sm:$0xff]  }
   0xe   :  { %496 = vmatprep.subr.bf16.mxu1 %v525_v13  ;;  %v549_v35 = vld [vmem:[%s704_s0 + $0xc] ss:$16 sps:$4 sm:$0xff]   ;;  %333 = vmatprep.mubr.bf16.mxu0 %v546_v33 }
   0xf   :  { %374 = vmatprep.mubr.bf16.mxu1 %v549_v35 }
  0x10   :  { %475 = vmatpush3.bf16.msra.mxu0 %v526_v14 }
  0x11   :  { %497 = vmatpush3.bf16.msra.mxu1 %v527_v15  ;;  %476 = vmatprep.subr.bf16.mxu0 %v528_v16 }
  0x12   :  { %498 = vmatprep.subr.bf16.mxu1 %v529_v17 }
  0x14   :  { %477 = vmatpush3.bf16.msra.mxu0 %v530_v18 }
  0x15   :  { %499 = vmatpush3.bf16.msra.mxu1 %v531_v19  ;;  %478 = vmatprep.subr.bf16.mxu0 %v532_v20 }
  0x16   :  { %500 = vmatprep.subr.bf16.mxu1 %v533_v21 }
  0x18   :  { %479 = vmatpush3.bf16.msra.mxu0 %v534_v22 }
  0x19   :  { %501 = vmatpush3.bf16.msra.mxu1 %v535_v23  ;;  %480 = vmatprep.subr.bf16.mxu0 %v536_v24 }
  0x1a   :  { %502 = vmatprep.subr.bf16.mxu1 %v537_v25 }
  0x1c   :  { %481 = vmatpush3.bf16.msra.mxu0 %v538_v26 }
  0x1d   :  { %503 = vmatpush3.bf16.msra.mxu1 %v539_v27  ;;  %482 = vmatprep.subr.bf16.mxu0 %v540_v28 }
  0x1e   :  { %504 = vmatprep.subr.bf16.mxu1 %v541_v29 }
  0x20   :  { %483 = vmatpush3.bf16.msra.mxu0 %v542_v30 }
  0x21   :  { %505 = vmatpush3.bf16.msra.mxu1 %v543_v31 }
  0x23   :  { %334 = vmatmul.mubr.bf16.vlgmr.msra.gmra.mrb[0].mxu0 %v544_v32 }
  0x24   :  { %375 = vmatmul.mubr.bf16.vlgmr.msra.gmra.mrb[0].mxu1 %v547_v34 }
  0xf6   :  { %v484_v36 = vpop.f32.mrb[0].mxu0 }
  0xf7   :  { %v506_v37 = vpop.f32.mrb[0].mxu1  ;;  %v485_v38 = vpop.f32.mrb[1].mxu0 }
  0xf8   :  { %v486_v39 = vadd.f32 %v485_v38, %v484_v36  ;;  %v507_v40 = vpop.f32.mrb[1].mxu1  ;;  %v487_v41 = vpop.f32.mrb[2].mxu0 }
  0xf9   :  { %v508_v42 = vadd.f32 %v507_v40, %v506_v37  ;;  %v509_v43 = vpop.f32.mrb[2].mxu1  ;;  %v488_v44 = vpop.f32.mrb[3].mxu0 }
  0xfa   :  { %v489_v47 = vadd.f32 %v488_v44, %v487_v41  ;;  %v510_v48 = vpop.f32.mrb[3].mxu1 }
  0xfb   :  { %v377_v49 = vadd.f32 %v508_v42, %v486_v39  ;;  %v511_v50 = vadd.f32 %v510_v48, %v509_v43 }
  0xfd   :  { %v390_v52 = vmul.f32 %v458_v45, %v377_v49  ;;  %v380_v54 = vadd.f32 %v511_v50, %v489_v47 }
  0xff   :  { %v399_v55 = vadd.f32 %v459_v51, %v390_v52  ;;  %v391_v56 = vmul.f32 %v458_v45, %v380_v54 }
 0x101   :  { %v405_v58 = vadd.f32 %v466_v53, %v399_v55  ;;  %v400_v59 = vadd.f32 %v459_v51, %v391_v56 }
 0x103   :  { %v462_v60 = vpack.c.bf16 %v405_v58, %v405_v58  ;;  %v406_v61 = vadd.f32 %v467_v57, %v400_v59 }
 0x105   :  { %416 = vst.msk [vmem:[%s708_s5] sm:$0xf] %vm415_vm0, %v462_v60  ;;  %v463_v62 = vpack.c.bf16 %v406_v61, %v406_v61 }
 0x107   :  { %417 = vst.msk [vmem:[%s708_s5 + $0x4] sm:$0xf] %vm415_vm0, %v463_v62 }

// kernel: psmnet_forward.117
= control target key start
LH: loop header
LB: loop body
LE: loop exit
PB: predicated region body
PF: predicated region fallthrough
CT: control target
= control target key end

     0   :  { %v232_v0 = vmov 0.0   ;;  %vm233_vm0 = vmmov 0   ;;  %vm166_vm1 = vcmask 257024   ;;  %s306_s1 = inlined_call_operand.vmem [shape: bf16[128,32], index: 1, kind: input, shape index: {}]   ;;  %s307_s0 = inlined_call_operand.vmem [shape: bf16[16,128], index: 0, kind: input, shape index: {}]   ;;  %s308_s2 = inlined_call_operand.vmem [shape: f32[1,32], index: 2, kind: input, shape index: {}]   ;;  %s309_s4 = inlined_call_operand.vmem [shape: bf16[16,32], index: 4, kind: input, shape index: {}]   ;;  %s310_s3 = inlined_call_operand.vmem [shape: f32[1,32], index: 3, kind: input, shape index: {}]   ;;  %s311_s5 = inlined_call_operand.vmem [shape: bf16[16,32], index: 5, kind: output, shape index: {}]  }
   0x1   :  { %201 = vmatprep.subr.bf16.mxu0 %v232_v0  ;;  %v223_v1 = vld [vmem:[%s306_s1] sm:$0xff]   ;;  %217 = vmatprep.mubr.msk.bf16.mxu0 %vm233_vm0, %v232_v0  ;;  %v224_v2 = vld [vmem:[%s306_s1 + $0x8] sm:$0xff]   ;;  %v225_v3 = vld [vmem:[%s306_s1 + $0x10] sm:$0xff]  }
   0x2   :  { %202 = vmatpush3.bf16.msra.mxu0 %v223_v1  ;;  %v226_v4 = vld [vmem:[%s306_s1 + $0x18] sm:$0xff]   ;;  %v227_v5 = vld [vmem:[%s306_s1 + $0x20] sm:$0xff]   ;;  %v228_v6 = vld [vmem:[%s306_s1 + $0x28] sm:$0xff]  }
   0x3   :  { %203 = vmatprep.subr.bf16.mxu0 %v232_v0  ;;  %v229_v7 = vld [vmem:[%s306_s1 + $0x30] sm:$0xff]   ;;  %v230_v8 = vld [vmem:[%s306_s1 + $0x38] sm:$0xff]   ;;  %v231_v9 = vld [vmem:[%s307_s0] sm:$0xff]  }
   0x4   :  { %v182_v10 = vld [vmem:[%s308_s2] ss:$0 sm:$0xff] }
   0x5   :  { %v189_v11 = vld [vmem:[%s309_s4] sm:$0xff]  }
   0x6   :  { %204 = vmatpush3.bf16.msra.mxu0 %v224_v2  ;;  %v183_v13 = vld [vmem:[%s310_s3] ss:$0 sm:$0xff]  ;;  %v190_v15 = vunpack.c.l.bf16 %v189_v11  ;;  %v191_v20 = vunpack.c.h.bf16 %v189_v11 }
   0x7   :  { %205 = vmatprep.subr.bf16.mxu0 %v232_v0 }
   0xa   :  { %206 = vmatpush3.bf16.msra.mxu0 %v225_v3 }
   0xb   :  { %207 = vmatprep.subr.bf16.mxu0 %v232_v0 }
   0xe   :  { %208 = vmatpush3.bf16.msra.mxu0 %v226_v4 }
   0xf   :  { %209 = vmatprep.subr.bf16.mxu0 %v232_v0 }
  0x12   :  { %210 = vmatpush3.bf16.msra.mxu0 %v227_v5 }
  0x13   :  { %211 = vmatprep.subr.bf16.mxu0 %v232_v0 }
  0x16   :  { %212 = vmatpush3.bf16.msra.mxu0 %v228_v6 }
  0x17   :  { %213 = vmatprep.subr.bf16.mxu0 %v232_v0 }
  0x1a   :  { %214 = vmatpush3.bf16.msra.mxu0 %v229_v7 }
  0x1b   :  { %215 = vmatprep.subr.bf16.mxu0 %v232_v0 }
  0x1e   :  { %216 = vmatpush3.bf16.msra.mxu0 %v230_v8 }
  0x21   :  { %218 = vmatmul.mubr.bf16.vlgmr.msra.gmra.mrb[0].mxu0 %v231_v9 }
  0xf4   :  { %v127_v12 = vpop.f32.mrb[0].mxu0 }
  0xf5   :  { %v141_v14 = vmul.f32 %v182_v10, %v127_v12  ;;  %v219_v16 = vpop.f32.mrb[1].mxu0 }
  0xf6   :  { %v130_v17 = vpop.f32.mrb[2].mxu0 }
  0xf7   :  { %v150_v18 = vadd.f32 %v183_v13, %v141_v14  ;;  %v142_v19 = vmul.f32 %v182_v10, %v130_v17  ;;  %v220_v21 = vpop.f32.mrb[3].mxu0 }
  0xf9   :  { %v156_v22 = vadd.f32 %v190_v15, %v150_v18  ;;  %v151_v23 = vadd.f32 %v183_v13, %v142_v19 }
  0xfb   :  { %v186_v24 = vpack.c.bf16 %v156_v22, %v156_v22  ;;  %v157_v25 = vadd.f32 %v191_v20, %v151_v23 }
  0xfd   :  { %167 = vst.msk [vmem:[%s311_s5] sm:$0xf] %vm166_vm1, %v186_v24  ;;  %v187_v26 = vpack.c.bf16 %v157_v25, %v157_v25 }
  0xff   :  { %168 = vst.msk [vmem:[%s311_s5 + $0x4] sm:$0xf] %vm166_vm1, %v187_v26 }

// kernel: psmnet_forward.113
= control target key start
LH: loop header
LB: loop body
LE: loop exit
PB: predicated region body
PF: predicated region fallthrough
CT: control target
= control target key end

     0   :  { %v184_v0 = vmov 0.0   ;;  %vm185_vm0 = vmmov 0   ;;  %vm60_vm1 = vcmask 523264   ;;  %vm137_vm2 = vcmask 257024   ;;  %s246_s1 = inlined_call_operand.vmem [shape: bf16[64,32], index: 1, kind: input, shape index: {}]   ;;  %s247_s0 = inlined_call_operand.vmem [shape: bf16[16,64], index: 0, kind: input, shape index: {}]   ;;  %s248_s2 = inlined_call_operand.vmem [shape: f32[1,32], index: 2, kind: input, shape index: {}]   ;;  %s249_s4 = inlined_call_operand.vmem [shape: bf16[16,32], index: 4, kind: input, shape index: {}]   ;;  %s250_s3 = inlined_call_operand.vmem [shape: f32[1,32], index: 3, kind: input, shape index: {}]   ;;  %s251_s5 = inlined_call_operand.vmem [shape: bf16[16,32], index: 5, kind: output, shape index: {}]  }
   0x1   :  { %165 = vmatprep.subr.bf16.mxu0 %v184_v0  ;;  %v179_v1 = vld [vmem:[%s246_s1] sm:$0xff]   ;;  %173 = vmatprep.mubr.msk.bf16.mxu0 %vm185_vm0, %v184_v0  ;;  %v180_v2 = vld [vmem:[%s246_s1 + $0x8] sm:$0xff]   ;;  %v181_v3 = vld [vmem:[%s246_s1 + $0x10] sm:$0xff]  }
   0x2   :  { %166 = vmatpush3.bf16.msra.mxu0 %v179_v1  ;;  %v182_v4 = vld [vmem:[%s246_s1 + $0x18] sm:$0xff]   ;;  %v183_v5 = vld [vmem:[%s247_s0] sm:$0xff]  }
   0x3   :  { %167 = vmatprep.subr.bf16.mxu0 %v184_v0  ;;  %v150_v6 = vld [vmem:[%s248_s2] ss:$0 sm:$0xff] }
   0x4   :  { %v157_v7 = vld [vmem:[%s249_s4] sm:$0xff]  }
   0x5   :  { %v151_v9 = vld [vmem:[%s250_s3] ss:$0 sm:$0xff]  ;;  %v158_v11 = vunpack.c.l.bf16 %v157_v7  ;;  %v159_v16 = vunpack.c.h.bf16 %v157_v7 }
   0x6   :  { %168 = vmatpush3.bf16.msra.mxu0 %v180_v2 }
   0x7   :  { %169 = vmatprep.subr.bf16.mxu0 %v184_v0 }
   0xa   :  { %170 = vmatpush3.bf16.msra.mxu0 %v181_v3 }
   0xb   :  { %171 = vmatprep.subr.bf16.mxu0 %v184_v0 }
   0xe   :  { %172 = vmatpush3.bf16.msra.mxu0 %v182_v4 }
  0x11   :  { %174 = vmatmul.mubr.msk.bf16.vlgmr.msra.gmra.mrb[0].mxu0 %vm60_vm1, %v183_v5 }
  0xe4   :  { %v98_v8 = vpop.f32.mrb[0].mxu0 }
  0xe5   :  { %v112_v10 = vmul.f32 %v150_v6, %v98_v8  ;;  %v175_v12 = vpop.f32.mrb[1].mxu0 }
  0xe6   :  { %v101_v13 = vpop.f32.mrb[2].mxu0 }
  0xe7   :  { %v121_v14 = vadd.f32 %v151_v9, %v112_v10  ;;  %v113_v15 = vmul.f32 %v150_v6, %v101_v13  ;;  %v176_v17 = vpop.f32.mrb[3].mxu0 }
  0xe9   :  { %v127_v18 = vadd.f32 %v158_v11, %v121_v14  ;;  %v122_v19 = vadd.f32 %v151_v9, %v113_v15 }
  0xeb   :  { %v154_v20 = vpack.c.bf16 %v127_v18, %v127_v18  ;;  %v128_v21 = vadd.f32 %v159_v16, %v122_v19 }
  0xed   :  { %138 = vst.msk [vmem:[%s251_s5] sm:$0xf] %vm137_vm2, %v154_v20  ;;  %v155_v22 = vpack.c.bf16 %v128_v21, %v128_v21 }
  0xef   :  { %139 = vst.msk [vmem:[%s251_s5 + $0x4] sm:$0xf] %vm137_vm2, %v155_v22 }

// kernel: psmnet_forward.148
= control target key start
LH: loop header
LB: loop body
LE: loop exit
PB: predicated region body
PF: predicated region fallthrough
CT: control target
= control target key end

     0   :  { %vm798_vm0 = vcmask 785408   ;;  %vm1257_vm1 = vcmask 7168   ;;  %s2292_s1 = inlined_call_operand.vmem [shape: bf16[864,1], index: 1, kind: input, shape index: {}]   ;;  %s2293_s0 = inlined_call_operand.vmem [shape: bf16[128,864], index: 0, kind: input, shape index: {}]   ;;  %s2294_s2 = inlined_call_operand.<no memory space> [shape: f32[1,1], index: 2, kind: input, shape index: {}]   ;;  %s2295_s3 = inlined_call_operand.<no memory space> [shape: f32[1,1], index: 3, kind: input, shape index: {}]   ;;  %s2296_s4 = inlined_call_operand.vmem [shape: f32[128,1], index: 4, kind: output, shape index: {}]  }
   0x1   :  { %v1632_v0 = vld [vmem:[%s2292_s1 + $0x40] sm:$0xff]   ;;  %v1636_v4 = vld [vmem:[%s2292_s1 + $0x48] sm:$0xff]   ;;  %v1640_v8 = vld [vmem:[%s2292_s1 + $0x50] sm:$0xff]  }
   0x2   :  { %v1633_v1 = vld [vmem:[%s2292_s1 + $0xc0] sm:$0xff]   ;;  %1398 = vmatprep.subr.bf16.mxu0 %v1632_v0  ;;  %v1637_v5 = vld [vmem:[%s2292_s1 + $0xc8] sm:$0xff]   ;;  %v1641_v9 = vld [vmem:[%s2292_s1 + $0xd0] sm:$0xff]  }
   0x3   :  { %v1634_v2 = vld [vmem:[%s2292_s1] sm:$0xff]   ;;  %1462 = vmatprep.subr.bf16.mxu1 %v1633_v1  ;;  %v1638_v6 = vld [vmem:[%s2292_s1 + $0x8] sm:$0xff]   ;;  %v1642_v10 = vld [vmem:[%s2292_s1 + $0x10] sm:$0xff]  }
   0x4   :  { %v1635_v3 = vld [vmem:[%s2292_s1 + $0x80] sm:$0xff]   ;;  %1399 = vmatpush3.bf16.msra.mxu0 %v1634_v2  ;;  %v1639_v7 = vld [vmem:[%s2292_s1 + $0x88] sm:$0xff]   ;;  %v1643_v11 = vld [vmem:[%s2292_s1 + $0x90] sm:$0xff]  }
   0x5   :  { %1463 = vmatpush3.bf16.msra.mxu1 %v1635_v3  ;;  %1400 = vmatprep.subr.bf16.mxu0 %v1636_v4  ;;  %v1644_v12 = vld [vmem:[%s2292_s1 + $0x58] sm:$0xff]   ;;  %v1648_v16 = vld [vmem:[%s2292_s1 + $0x60] sm:$0xff]   ;;  %v1652_v20 = vld [vmem:[%s2292_s1 + $0x68] sm:$0xff]  }
   0x6   :  { %1464 = vmatprep.subr.bf16.mxu1 %v1637_v5  ;;  %v1645_v13 = vld [vmem:[%s2292_s1 + $0xd8] sm:$0xff]   ;;  %v1649_v17 = vld [vmem:[%s2292_s1 + $0xe0] sm:$0xff]   ;;  %v1653_v21 = vld [vmem:[%s2292_s1 + $0xe8] sm:$0xff]  }
   0x7   :  { %v1646_v14 = vld [vmem:[%s2292_s1 + $0x18] sm:$0xff]   ;;  %v1650_v18 = vld [vmem:[%s2292_s1 + $0x20] sm:$0xff]   ;;  %v1654_v22 = vld [vmem:[%s2292_s1 + $0x28] sm:$0xff]  }
   0x8   :  { %1401 = vmatpush3.bf16.msra.mxu0 %v1638_v6  ;;  %v1647_v15 = vld [vmem:[%s2292_s1 + $0x98] sm:$0xff]   ;;  %v1651_v19 = vld [vmem:[%s2292_s1 + $0xa0] sm:$0xff]   ;;  %v1655_v23 = vld [vmem:[%s2292_s1 + $0xa8] sm:$0xff]  }
   0x9   :  { %1465 = vmatpush3.bf16.msra.mxu1 %v1639_v7  ;;  %1402 = vmatprep.subr.bf16.mxu0 %v1640_v8  ;;  %v1656_v24 = vld [vmem:[%s2292_s1 + $0x70] sm:$0xff]   ;;  %v1660_v28 = vld [vmem:[%s2292_s1 + $0x78] sm:$0xff]   ;;  %v1666_v33 = vld [vmem:[%s2293_s0 + $0x4] ss:$28 sps:$4 sm:$0xff]  }
   0xa   :  { %1466 = vmatprep.subr.bf16.mxu1 %v1641_v9  ;;  %v1657_v25 = vld [vmem:[%s2292_s1 + $0xf0] sm:$0xff]   ;;  %v1661_v29 = vld [vmem:[%s2292_s1 + $0xf8] sm:$0xff]   ;;  %v1667_v34 = vld [vmem:[%s2293_s0 + $0x8] ss:$28 sps:$4 sm:$0xff]   ;;  %855 = vmatprep.mubr.bf16.mxu0 %v1666_v33 }
   0xb   :  { %v1658_v26 = vld [vmem:[%s2292_s1 + $0x30] sm:$0xff]   ;;  %v1662_v30 = vld [vmem:[%s2292_s1 + $0x38] sm:$0xff]   ;;  %v1669_v35 = vld [vmem:[%s2293_s0 + $0xc] ss:$28 sps:$4 sm:$0xff]  }
   0xc   :  { %1403 = vmatpush3.bf16.msra.mxu0 %v1642_v10  ;;  %v1659_v27 = vld [vmem:[%s2292_s1 + $0xb0] sm:$0xff]   ;;  %v1663_v31 = vld [vmem:[%s2292_s1 + $0xb8] sm:$0xff]   ;;  %v1670_v36 = vld [vmem:[%s2292_s1 + $0x140] sm:$0xff]   ;;  %952 = vmatprep.mubr.bf16.mxu1 %v1669_v35 }
   0xd   :  { %1467 = vmatpush3.bf16.msra.mxu1 %v1643_v11  ;;  %1404 = vmatprep.subr.bf16.mxu0 %v1644_v12  ;;  %v1664_v32 = vld [vmem:[%s2293_s0] ss:$28 sps:$4 sm:$0xff]   ;;  %v1676_v40 = vld [vmem:[%s2293_s0 + $0x38] ss:$28 sps:$4 sm:$0xff]   ;;  %v1678_v42 = vld [vmem:[%s2292_s1 + $0x148] sm:$0xff]  }
   0xe   :  { %1468 = vmatprep.subr.bf16.mxu1 %v1645_v13  ;;  %v1671_v37 = vld [vmem:[%s2292_s1 + $0x100] sm:$0xff]   ;;  %v1672_v38 = vld [vmem:[%s2293_s0 + $0x3c] ss:$28 sps:$4 sm:$0xff]   ;;  %v1679_v43 = vld [vmem:[%s2292_s1 + $0x108] sm:$0xff]  }
   0xf   :  { %v1674_v39 = vld [vmem:[%s2293_s0 + $0x44] ss:$28 sps:$4 sm:$0xff]   ;;  %v1680_v44 = vld [vmem:[%s2293_s0 + $0x74] ss:$28 sps:$4 sm:$0xff]   ;;  %v1682_v45 = vld [vmem:[%s2293_s0 + $0x7c] ss:$28 sps:$4 sm:$0xff]  }
  0x10   :  { %1405 = vmatpush3.bf16.msra.mxu0 %v1646_v14  ;;  %v1677_v41 = vld [vmem:[%s2293_s0 + $0x40] ss:$28 sps:$4 sm:$0xff]   ;;  %v1686_v46 = vld [vmem:[%s2292_s1 + $0x150] sm:$0xff]   ;;  %v1688_v50 = vld [vmem:[%s2293_s0 + $0xac] ss:$28 sps:$4 sm:$0xff]  }
  0x11   :  { %1469 = vmatpush3.bf16.msra.mxu1 %v1647_v15  ;;  %1406 = vmatprep.subr.bf16.mxu0 %v1648_v16  ;;  %v1687_v47 = vld [vmem:[%s2292_s1 + $0x110] sm:$0xff]   ;;  %v1694_v52 = vld [vmem:[%s2292_s1 + $0x158] sm:$0xff]   ;;  %v1692_v54 = vld [vmem:[%s2293_s0 + $0xa8] ss:$28 sps:$4 sm:$0xff]  }
  0x12   :  { %1470 = vmatprep.subr.bf16.mxu1 %v1649_v17  ;;  %v1684_v48 = vld [vmem:[%s2293_s0 + $0x70] ss:$28 sps:$4 sm:$0xff]   ;;  %v1685_v49 = vld [vmem:[%s2293_s0 + $0x78] ss:$28 sps:$4 sm:$0xff]   ;;  %v1702_v55 = vld [vmem:[%s2292_s1 + $0x160] sm:$0xff]  }
  0x13   :  { %v1690_v51 = vld [vmem:[%s2293_s0 + $0xb4] ss:$28 sps:$4 sm:$0xff]   ;;  %v1695_v53 = vld [vmem:[%s2292_s1 + $0x118] sm:$0xff]   ;;  %v1703_v57 = vld [vmem:[%s2292_s1 + $0x120] sm:$0xff]  }
  0x14   :  { %1407 = vmatpush3.bf16.msra.mxu0 %v1650_v18  ;;  %v1693_v56 = vld [vmem:[%s2293_s0 + $0xb0] ss:$28 sps:$4 sm:$0xff]   ;;  %v1704_v58 = vld [vmem:[%s2292_s1 + $0x180] sm:$0xff]   ;;  %v1705_v2 = vld [vmem:[%s2293_s0 + $0x11c] ss:$28 sps:$4 sm:$0xff]  }
  0x15   :  { %1471 = vmatpush3.bf16.msra.mxu1 %v1651_v19  ;;  %1408 = vmatprep.subr.bf16.mxu0 %v1652_v20  ;;  %v1696_v59 = vld [vmem:[%s2293_s0 + $0xe4] ss:$28 sps:$4 sm:$0xff]   ;;  %v1698_v60 = vld [vmem:[%s2293_s0 + $0xec] ss:$28 sps:$4 sm:$0xff]   ;;  %v1720_v4 = vld [vmem:[%s2292_s1 + $0x170] sm:$0xff]  }
  0x16   :  { %1472 = vmatprep.subr.bf16.mxu1 %v1653_v21  ;;  %v1711_v61 = vld [vmem:[%s2292_s1 + $0x168] sm:$0xff]   ;;  %v1700_v63 = vld [vmem:[%s2293_s0 + $0xe0] ss:$28 sps:$4 sm:$0xff]   ;;  %v1721_v5 = vld [vmem:[%s2292_s1 + $0x130] sm:$0xff]  }
  0x17   :  { %v1712_v62 = vld [vmem:[%s2292_s1 + $0x128] sm:$0xff]   ;;  %v1707_v3 = vld [vmem:[%s2293_s0 + $0x124] ss:$28 sps:$4 sm:$0xff]   ;;  %v1722_v6 = vld [vmem:[%s2292_s1 + $0x190] sm:$0xff]  }
  0x18   :  { %1409 = vmatpush3.bf16.msra.mxu0 %v1654_v22  ;;  %v1701_v0 = vld [vmem:[%s2293_s0 + $0xe8] ss:$28 sps:$4 sm:$0xff]   ;;  %v1709_v7 = vld [vmem:[%s2293_s0 + $0x118] ss:$28 sps:$4 sm:$0xff]   ;;  %v1710_v8 = vld [vmem:[%s2293_s0 + $0x120] ss:$28 sps:$4 sm:$0xff]  }
  0x19   :  { %1473 = vmatpush3.bf16.msra.mxu1 %v1655_v23  ;;  %1410 = vmatprep.subr.bf16.mxu0 %v1656_v24  ;;  %v1717_v1 = vld [vmem:[%s2292_s1 + $0x188] sm:$0xff]   ;;  %v1713_v9 = vld [vmem:[%s2293_s0 + $0x154] ss:$28 sps:$4 sm:$0xff]   ;;  %v1729_v10 = vld [vmem:[%s2292_s1 + $0x178] sm:$0xff]  }
  0x1a   :  { %1474 = vmatprep.subr.bf16.mxu1 %v1657_v25  ;;  %v1715_v11 = vld [vmem:[%s2293_s0 + $0x15c] ss:$28 sps:$4 sm:$0xff]   ;;  %v1732_v14 = vld [vmem:[%s2292_s1 + $0x1a0] sm:$0xff]   ;;  %v1736_v15 = vld [vmem:[%s2292_s1 + $0x1a8] sm:$0xff]  }
  0x1b   :  { %v1730_v12 = vld [vmem:[%s2292_s1 + $0x198] sm:$0xff]   ;;  %v1718_v16 = vld [vmem:[%s2293_s0 + $0x150] ss:$28 sps:$4 sm:$0xff]   ;;  %v1727_v20 = vld [vmem:[%s2293_s0 + $0x188] ss:$28 sps:$4 sm:$0xff]  }
  0x1c   :  { %1411 = vmatpush3.bf16.msra.mxu0 %v1658_v26  ;;  %v1731_v13 = vld [vmem:[%s2292_s1 + $0x138] sm:$0xff]   ;;  %v1723_v18 = vld [vmem:[%s2293_s0 + $0x18c] ss:$28 sps:$4 sm:$0xff]   ;;  %v1725_v19 = vld [vmem:[%s2293_s0 + $0x194] ss:$28 sps:$4 sm:$0xff]  }
  0x1d   :  { %1475 = vmatpush3.bf16.msra.mxu1 %v1659_v27  ;;  %1412 = vmatprep.subr.bf16.mxu0 %v1660_v28  ;;  %v1719_v17 = vld [vmem:[%s2293_s0 + $0x158] ss:$28 sps:$4 sm:$0xff]   ;;  %v1728_v21 = vld [vmem:[%s2293_s0 + $0x190] ss:$28 sps:$4 sm:$0xff]   ;;  %v1745_v27 = vld [vmem:[%s2293_s0 + $0x88] ss:$28 sps:$4 sm:$0xff]  }
  0x1e   :  { %1476 = vmatprep.subr.bf16.mxu1 %v1661_v29  ;;  %v1735_v22 = vld [vmem:[%s2293_s0 + $0x14] ss:$28 sps:$4 sm:$0xff]   ;;  %v1739_v26 = vld [vmem:[%s2293_s0 + $0x4c] ss:$28 sps:$4 sm:$0xff]   ;;  %v1742_v29 = vld [vmem:[%s2293_s0 + $0x84] ss:$28 sps:$4 sm:$0xff]  }
  0x1f   :  { %v1737_v23 = vld [vmem:[%s2293_s0 + $0x18] ss:$28 sps:$4 sm:$0xff]   ;;  %v1733_v24 = vld [vmem:[%s2293_s0 + $0x10] ss:$28 sps:$4 sm:$0xff]   ;;  %v1741_v28 = vld [vmem:[%s2293_s0 + $0x48] ss:$28 sps:$4 sm:$0xff]  }
  0x20   :  { %1413 = vmatpush3.bf16.msra.mxu0 %v1662_v30  ;;  %v1738_v25 = vld [vmem:[%s2293_s0 + $0x50] ss:$28 sps:$4 sm:$0xff]   ;;  %v1746_v30 = vld [vmem:[%s2293_s0 + $0xc0] ss:$28 sps:$4 sm:$0xff]   ;;  %v1761_v35 = vld [vmem:[%s2293_s0 + $0x168] ss:$28 sps:$4 sm:$0xff]  }
  0x21   :  { %1477 = vmatpush3.bf16.msra.mxu1 %v1663_v31  ;;  %1526 = vmatprep.subr.bf16.mxu0 %v1670_v36  ;;  %v1753_v31 = vld [vmem:[%s2293_s0 + $0xf8] ss:$28 sps:$4 sm:$0xff]  }
  0x22   :  { %1604 = vmatprep.subr.bf16.mxu1 %v1704_v58  ;;  %v1747_v33 = vld [vmem:[%s2293_s0 + $0xbc] ss:$28 sps:$4 sm:$0xff]  }
  0x23   :  { %856 = vmatmul.mubr.bf16.vlgmr.msra.gmra.mrb[0].mxu0 %v1664_v32  ;;  %v1744_v32 = vld [vmem:[%s2293_s0 + $0x80] ss:$28 sps:$4 sm:$0xff]   ;;  %v1749_v36 = vld [vmem:[%s2293_s0 + $0xb8] ss:$28 sps:$4 sm:$0xff]  }
  0x24   :  { %953 = vmatmul.mubr.bf16.vlgmr.msra.gmra.mrb[0].mxu1 %v1667_v34  ;;  %1527 = vmatpush3.bf16.msra.mxu0 %v1671_v37  ;;  %v1754_v34 = vld [vmem:[%s2293_s0 + $0x130] ss:$28 sps:$4 sm:$0xff]  }
  0x25   :  { %863 = vmatprep.mubr.bf16.mxu0 %v1672_v38  ;;  %960 = vmatprep.mubr.bf16.mxu1 %v1674_v39  ;;  %v1750_v37 = vld [vmem:[%s2293_s0 + $0xf4] ss:$28 sps:$4 sm:$0xff]   ;;  %v1762_v38 = vld [vmem:[%s2293_s0 + $0x1a0] ss:$28 sps:$4 sm:$0xff]  }
  0x26   :  { %1528 = vmatprep.subr.bf16.mxu0 %v1678_v42  ;;  %1605 = vmatpush3.bf16.msra.mxu1 %v1704_v58  ;;  %v1752_v39 = vld [vmem:[%s2293_s0 + $0xf0] ss:$28 sps:$4 sm:$0xff]   ;;  %v1758_v42 = vld [vmem:[%s2293_s0 + $0x164] ss:$28 sps:$4 sm:$0xff]  }
  0x27   :  { %1606 = vmatprep.subr.bf16.mxu1 %v1717_v1 }
  0x28   :  { %1529 = vmatpush3.bf16.msra.mxu0 %v1679_v43  ;;  %v1760_v43 = vld [vmem:[%s2293_s0 + $0x160] ss:$28 sps:$4 sm:$0xff]  }
  0x29   :  { %1530 = vmatprep.subr.bf16.mxu0 %v1686_v46  ;;  %v9_v46 = vstv %s2294_s2 }
  0x2a   :  { %1607 = vmatpush3.bf16.msra.mxu1 %v1717_v1  ;;  %10 = vst [vmem:[#allocation2] sm:$0x1] %v9_v46 }
  0x2b   :  { %864 = vmatmul.mubr.bf16.gmra.mrb[4].mxu0 %v1676_v40  ;;  %1608 = vmatprep.subr.bf16.mxu1 %v1722_v6  ;;  %v1755_v40 = vld [vmem:[%s2293_s0 + $0x12c] ss:$28 sps:$4 sm:$0xff]  }
  0x2c   :  { %961 = vmatmul.mubr.bf16.gmra.mrb[4].mxu1 %v1677_v41  ;;  %871 = vmatprep.mubr.bf16.mxu0 %v1680_v44  ;;  %v1757_v41 = vld [vmem:[%s2293_s0 + $0x128] ss:$28 sps:$4 sm:$0xff]   ;;  %v1763_v44 = vld [vmem:[%s2293_s0 + $0x19c] ss:$28 sps:$4 sm:$0xff]  }
  0x2d   :  { %968 = vmatprep.mubr.bf16.mxu1 %v1682_v45  ;;  %1531 = vmatpush3.bf16.msra.mxu0 %v1687_v47  ;;  %v1765_v45 = vld [vmem:[%s2293_s0 + $0x198] ss:$28 sps:$4 sm:$0xff]   ;;  %v11_v47 = vstv %s2295_s3 }
  0x2e   :  { %1532 = vmatprep.subr.bf16.mxu0 %v1694_v52  ;;  %1609 = vmatpush3.bf16.msra.mxu1 %v1722_v6  ;;  %12 = vst [vmem:[#allocation3] sm:$0x1] %v11_v47 }
  0x2f   :  { %1610 = vmatprep.subr.bf16.mxu1 %v1730_v12 }
  0x31   :  { %1533 = vmatpush3.bf16.msra.mxu0 %v1695_v53 }
  0x32   :  { %1534 = vmatprep.subr.bf16.mxu0 %v1702_v55  ;;  %1611 = vmatpush3.bf16.msra.mxu1 %v1730_v12 }
  0x33   :  { %872 = vmatmul.mubr.bf16.gmra.mrb[8].mxu0 %v1684_v48  ;;  %1612 = vmatprep.subr.bf16.mxu1 %v1732_v14 }
  0x34   :  { %969 = vmatmul.mubr.bf16.gmra.mrb[8].mxu1 %v1685_v49  ;;  %879 = vmatprep.mubr.bf16.mxu0 %v1688_v50 }
  0x35   :  { %976 = vmatprep.mubr.bf16.mxu1 %v1690_v51  ;;  %1535 = vmatpush3.bf16.msra.mxu0 %v1703_v57 }
  0x36   :  { %1536 = vmatprep.subr.bf16.mxu0 %v1711_v61  ;;  %1613 = vmatpush3.bf16.msra.mxu1 %v1732_v14 }
  0x37   :  { %1614 = vmatprep.subr.bf16.mxu1 %v1736_v15 }
  0x39   :  { %1537 = vmatpush3.bf16.msra.mxu0 %v1712_v62 }
  0x3a   :  { %1538 = vmatprep.subr.bf16.mxu0 %v1720_v4  ;;  %1615 = vmatpush3.bf16.msra.mxu1 %v1736_v15 }
  0x3b   :  { %880 = vmatmul.mubr.bf16.gmra.mrb[12].mxu0 %v1692_v54 }
  0x3c   :  { %977 = vmatmul.mubr.bf16.gmra.mrb[12].mxu1 %v1693_v56  ;;  %887 = vmatprep.mubr.bf16.mxu0 %v1696_v59 }
  0x3d   :  { %984 = vmatprep.mubr.bf16.mxu1 %v1698_v60  ;;  %1539 = vmatpush3.bf16.msra.mxu0 %v1721_v5 }
  0x3e   :  { %1540 = vmatprep.subr.bf16.mxu0 %v1729_v10 }
  0x41   :  { %1541 = vmatpush3.bf16.msra.mxu0 %v1731_v13 }
  0x43   :  { %888 = vmatmul.mubr.bf16.gmra.mrb[16].mxu0 %v1700_v63 }
  0x44   :  { %985 = vmatmul.mubr.bf16.gmra.mrb[16].mxu1 %v1701_v0  ;;  %895 = vmatprep.mubr.bf16.mxu0 %v1705_v2 }
  0x45   :  { %992 = vmatprep.mubr.bf16.mxu1 %v1707_v3 }
  0x4b   :  { %896 = vmatmul.mubr.bf16.gmra.mrb[20].mxu0 %v1709_v7 }
  0x4c   :  { %993 = vmatmul.mubr.bf16.gmra.mrb[20].mxu1 %v1710_v8  ;;  %903 = vmatprep.mubr.bf16.mxu0 %v1713_v9 }
  0x4d   :  { %1000 = vmatprep.mubr.bf16.mxu1 %v1715_v11 }
  0x53   :  { %904 = vmatmul.mubr.bf16.gmra.mrb[24].mxu0 %v1718_v16 }
  0x54   :  { %1001 = vmatmul.mubr.bf16.gmra.mrb[24].mxu1 %v1719_v17  ;;  %911 = vmatprep.mubr.bf16.mxu0 %v1723_v18 }
  0x55   :  { %1008 = vmatprep.mubr.bf16.mxu1 %v1725_v19 }
  0x5b   :  { %912 = vmatmul.mubr.bf16.gmra.mrb[28].mxu0 %v1727_v20 }
  0x5c   :  { %1009 = vmatmul.mubr.bf16.gmra.mrb[28].mxu1 %v1728_v21  ;;  %1049 = vmatprep.mubr.bf16.mxu0 %v1735_v22 }
  0x5d   :  { %1616 = vmatprep.mubr.msk.bf16.mxu1 %vm798_vm0, %v1737_v23 }
  0x63   :  { %1050 = vmatmul.mubr.bf16.vlgmr.msra.gmra.mrb[32].mxu0 %v1733_v24 }
  0x64   :  { %1617 = vmatmul.mubr.msk.bf16.vlgmr.msra.gmra.mrb[32].mxu1 %vm798_vm0, %v1738_v25  ;;  %1057 = vmatprep.mubr.bf16.mxu0 %v1739_v26 }
  0x65   :  { %1620 = vmatprep.mubr.msk.bf16.mxu1 %vm798_vm0, %v1745_v27 }
  0x6b   :  { %1058 = vmatmul.mubr.bf16.gmra.mrb[36].mxu0 %v1741_v28 }
  0x6c   :  { %1065 = vmatprep.mubr.bf16.mxu0 %v1742_v29  ;;  %1621 = vmatmul.mubr.msk.bf16.gmra.mrb[36].mxu1 %vm798_vm0, %v1746_v30 }
  0x6d   :  { %1624 = vmatprep.mubr.msk.bf16.mxu1 %vm798_vm0, %v1753_v31 }
  0x73   :  { %1066 = vmatmul.mubr.bf16.gmra.mrb[40].mxu0 %v1744_v32 }
  0x74   :  { %1073 = vmatprep.mubr.bf16.mxu0 %v1747_v33  ;;  %1625 = vmatmul.mubr.msk.bf16.gmra.mrb[40].mxu1 %vm798_vm0, %v1754_v34 }
  0x75   :  { %1628 = vmatprep.mubr.msk.bf16.mxu1 %vm798_vm0, %v1761_v35 }
  0x7b   :  { %1074 = vmatmul.mubr.bf16.gmra.mrb[44].mxu0 %v1749_v36 }
  0x7c   :  { %1081 = vmatprep.mubr.bf16.mxu0 %v1750_v37  ;;  %1629 = vmatmul.mubr.msk.bf16.gmra.mrb[44].mxu1 %vm798_vm0, %v1762_v38 }
  0x83   :  { %1082 = vmatmul.mubr.bf16.gmra.mrb[48].mxu0 %v1752_v39 }
  0x84   :  { %1089 = vmatprep.mubr.bf16.mxu0 %v1755_v40 }
  0x8b   :  { %1090 = vmatmul.mubr.bf16.gmra.mrb[52].mxu0 %v1757_v41 }
  0x8c   :  { %1097 = vmatprep.mubr.bf16.mxu0 %v1758_v42 }
  0x93   :  { %1098 = vmatmul.mubr.bf16.gmra.mrb[56].mxu0 %v1760_v43 }
  0x94   :  { %1105 = vmatprep.mubr.bf16.mxu0 %v1763_v44 }
  0x9b   :  { %1106 = vmatmul.mubr.bf16.gmra.mrb[60].mxu0 %v1765_v45 }
  0xf6   :  { %v1414_v48 = vpop.f32.mrb[0].mxu0 }
  0xf7   :  { %v1478_v49 = vpop.f32.mrb[0].mxu1  ;;  %v1415_v50 = vpop.f32.mrb[1].mxu0 }
  0xf8   :  { %v1416_v51 = vadd.f32 %v1415_v50, %v1414_v48  ;;  %v1479_v52 = vpop.f32.mrb[1].mxu1  ;;  %v1417_v53 = vpop.f32.mrb[2].mxu0 }
  0xf9   :  { %v1480_v54 = vadd.f32 %v1479_v52, %v1478_v49  ;;  %v1481_v55 = vpop.f32.mrb[2].mxu1  ;;  %v1418_v56 = vpop.f32.mrb[3].mxu0 }
  0xfa   :  { %v1419_v57 = vadd.f32 %v1418_v56, %v1417_v53  ;;  %v1482_v58 = vpop.f32.mrb[3].mxu1 }
  0xfb   :  { %v2135_v59 = vadd.f32 %v1480_v54, %v1416_v51  ;;  %v1483_v60 = vadd.f32 %v1482_v58, %v1481_v55 }
  0xfd   :  { %v2137_v61 = vadd.f32 %v1483_v60, %v1419_v57 }
  0xfe   :  { %v1420_v62 = vpop.f32.mrb[4].mxu0 }
  0xff   :  { %v1484_v63 = vpop.f32.mrb[4].mxu1  ;;  %v1421_v0 = vpop.f32.mrb[5].mxu0 }
 0x100   :  { %v1422_v1 = vadd.f32 %v1421_v0, %v1420_v62  ;;  %v1485_v2 = vpop.f32.mrb[5].mxu1  ;;  %v1423_v3 = vpop.f32.mrb[6].mxu0 }
 0x101   :  { %v1486_v4 = vadd.f32 %v1485_v2, %v1484_v63  ;;  %v1487_v5 = vpop.f32.mrb[6].mxu1  ;;  %v1424_v6 = vpop.f32.mrb[7].mxu0 }
 0x102   :  { %v1425_v7 = vadd.f32 %v1424_v6, %v1423_v3  ;;  %v1488_v8 = vpop.f32.mrb[7].mxu1 }
 0x103   :  { %v2139_v9 = vadd.f32 %v1486_v4, %v1422_v1  ;;  %v1489_v10 = vadd.f32 %v1488_v8, %v1487_v5 }
 0x105   :  { %v2141_v11 = vadd.f32 %v1489_v10, %v1425_v7 }
 0x106   :  { %v1426_v12 = vpop.f32.mrb[8].mxu0 }
 0x107   :  { %v1490_v13 = vpop.f32.mrb[8].mxu1  ;;  %v1427_v14 = vpop.f32.mrb[9].mxu0 }
 0x108   :  { %v1428_v15 = vadd.f32 %v1427_v14, %v1426_v12  ;;  %v1491_v16 = vpop.f32.mrb[9].mxu1  ;;  %v1429_v17 = vpop.f32.mrb[10].mxu0 }
 0x109   :  { %v1492_v18 = vadd.f32 %v1491_v16, %v1490_v13  ;;  %v1493_v19 = vpop.f32.mrb[10].mxu1  ;;  %v1430_v20 = vpop.f32.mrb[11].mxu0 }
 0x10a   :  { %v1431_v21 = vadd.f32 %v1430_v20, %v1429_v17  ;;  %v1494_v22 = vpop.f32.mrb[11].mxu1 }
 0x10b   :  { %v2143_v23 = vadd.f32 %v1492_v18, %v1428_v15  ;;  %v1495_v24 = vadd.f32 %v1494_v22, %v1493_v19 }
 0x10d   :  { %v2145_v25 = vadd.f32 %v1495_v24, %v1431_v21 }
 0x10e   :  { %v1432_v26 = vpop.f32.mrb[12].mxu0 }
 0x10f   :  { %v1496_v27 = vpop.f32.mrb[12].mxu1  ;;  %v1433_v28 = vpop.f32.mrb[13].mxu0 }
 0x110   :  { %v1434_v29 = vadd.f32 %v1433_v28, %v1432_v26  ;;  %v1497_v30 = vpop.f32.mrb[13].mxu1  ;;  %v1435_v31 = vpop.f32.mrb[14].mxu0 }
 0x111   :  { %v1498_v32 = vadd.f32 %v1497_v30, %v1496_v27  ;;  %v1499_v33 = vpop.f32.mrb[14].mxu1  ;;  %v1436_v34 = vpop.f32.mrb[15].mxu0 }
 0x112   :  { %v1437_v35 = vadd.f32 %v1436_v34, %v1435_v31  ;;  %v1500_v36 = vpop.f32.mrb[15].mxu1 }
 0x113   :  { %v2147_v37 = vadd.f32 %v1498_v32, %v1434_v29  ;;  %v1501_v38 = vadd.f32 %v1500_v36, %v1499_v33 }
 0x115   :  { %v2149_v39 = vadd.f32 %v1501_v38, %v1437_v35 }
 0x116   :  { %v1438_v40 = vpop.f32.mrb[16].mxu0 }
 0x117   :  { %v1502_v41 = vpop.f32.mrb[16].mxu1  ;;  %v1439_v42 = vpop.f32.mrb[17].mxu0 }
 0x118   :  { %v1440_v43 = vadd.f32 %v1439_v42, %v1438_v40  ;;  %v1503_v44 = vpop.f32.mrb[17].mxu1  ;;  %v1441_v45 = vpop.f32.mrb[18].mxu0 }
 0x119   :  { %v1504_v46 = vadd.f32 %v1503_v44, %v1502_v41  ;;  %v1505_v47 = vpop.f32.mrb[18].mxu1  ;;  %v1442_v48 = vpop.f32.mrb[19].mxu0 }
 0x11a   :  { %v1443_v49 = vadd.f32 %v1442_v48, %v1441_v45  ;;  %v1506_v50 = vpop.f32.mrb[19].mxu1 }
 0x11b   :  { %v2151_v51 = vadd.f32 %v1504_v46, %v1440_v43  ;;  %v1507_v52 = vadd.f32 %v1506_v50, %v1505_v47 }
 0x11d   :  { %v2153_v53 = vadd.f32 %v1507_v52, %v1443_v49  ;;  %v2168_v52 = vld [vmem:[#allocation2] ss:$0 sm:$0xff] }
 0x11e   :  { %v1444_v54 = vpop.f32.mrb[20].mxu0 }
 0x11f   :  { %v1508_v55 = vpop.f32.mrb[20].mxu1  ;;  %v1445_v56 = vpop.f32.mrb[21].mxu0 }
 0x120   :  { %v1446_v57 = vadd.f32 %v1445_v56, %v1444_v54  ;;  %v1509_v58 = vpop.f32.mrb[21].mxu1  ;;  %v1447_v60 = vpop.f32.mrb[22].mxu0  ;;  %v2171_v56 = vld [vmem:[#allocation3] ss:$0 sm:$0xff] }
 0x121   :  { %v1510_v62 = vadd.f32 %v1509_v58, %v1508_v55  ;;  %v1511_v63 = vpop.f32.mrb[22].mxu1  ;;  %v1448_v0 = vpop.f32.mrb[23].mxu0 }
 0x122   :  { %v1449_v1 = vadd.f32 %v1448_v0, %v1447_v60  ;;  %v1512_v2 = vpop.f32.mrb[23].mxu1 }
 0x123   :  { %v2155_v3 = vadd.f32 %v1510_v62, %v1446_v57  ;;  %v1513_v4 = vadd.f32 %v1512_v2, %v1511_v63 }
 0x125   :  { %v2157_v5 = vadd.f32 %v1513_v4, %v1449_v1 }
 0x126   :  { %v1450_v6 = vpop.f32.mrb[24].mxu0 }
 0x127   :  { %v1514_v7 = vpop.f32.mrb[24].mxu1  ;;  %v1451_v8 = vpop.f32.mrb[25].mxu0 }
 0x128   :  { %v1452_v10 = vadd.f32 %v1451_v8, %v1450_v6  ;;  %v1515_v12 = vpop.f32.mrb[25].mxu1  ;;  %v1453_v13 = vpop.f32.mrb[26].mxu0 }
 0x129   :  { %v1516_v14 = vadd.f32 %v1515_v12, %v1514_v7  ;;  %v1517_v15 = vpop.f32.mrb[26].mxu1  ;;  %v1454_v16 = vpop.f32.mrb[27].mxu0 }
 0x12a   :  { %v1455_v17 = vadd.f32 %v1454_v16, %v1453_v13  ;;  %v1518_v18 = vpop.f32.mrb[27].mxu1 }
 0x12b   :  { %v2159_v19 = vadd.f32 %v1516_v14, %v1452_v10  ;;  %v1519_v20 = vadd.f32 %v1518_v18, %v1517_v15 }
 0x12d   :  { %v2161_v21 = vadd.f32 %v1519_v20, %v1455_v17 }
 0x12e   :  { %v1456_v22 = vpop.f32.mrb[28].mxu0 }
 0x12f   :  { %v1520_v24 = vpop.f32.mrb[28].mxu1  ;;  %v1457_v26 = vpop.f32.mrb[29].mxu0 }
 0x130   :  { %v1458_v27 = vadd.f32 %v1457_v26, %v1456_v22  ;;  %v1521_v28 = vpop.f32.mrb[29].mxu1  ;;  %v1459_v29 = vpop.f32.mrb[30].mxu0 }
 0x131   :  { %v1522_v30 = vadd.f32 %v1521_v28, %v1520_v24  ;;  %v1523_v31 = vpop.f32.mrb[30].mxu1  ;;  %v1460_v32 = vpop.f32.mrb[31].mxu0 }
 0x132   :  { %v1461_v33 = vadd.f32 %v1460_v32, %v1459_v29  ;;  %v1524_v34 = vpop.f32.mrb[31].mxu1 }
 0x133   :  { %v2163_v35 = vadd.f32 %v1522_v30, %v1458_v27  ;;  %v1525_v36 = vadd.f32 %v1524_v34, %v1523_v31 }
 0x135   :  { %v2165_v38 = vadd.f32 %v1525_v36, %v1461_v33 }
 0x136   :  { %v1542_v40 = vpop.f32.mrb[32].mxu0 }
 0x137   :  { %v1543_v41 = vpop.f32.mrb[33].mxu0  ;;  %v1618_v42 = vpop.f32.mrb[32].mxu1 }
 0x138   :  { %v1544_v43 = vadd.f32 %v1543_v41, %v1542_v40  ;;  %v1545_v44 = vpop.f32.mrb[34].mxu0  ;;  %v1148_v45 = vpop.f32.mrb[33].mxu1 }
 0x139   :  { %v1546_v46 = vpop.f32.mrb[35].mxu0  ;;  %v1619_v47 = vpop.f32.mrb[34].mxu1 }
 0x13a   :  { %v1547_v48 = vadd.f32 %v1546_v46, %v1545_v44  ;;  %v1052_v49 = vadd.f32 %v1544_v43, %v2135_v59  ;;  %v1151_v50 = vpop.f32.mrb[35].mxu1 }
 0x13c   :  { %v1149_v54 = vadd.f32 %v1148_v45, %v1052_v49  ;;  %v1055_v55 = vadd.f32 %v1547_v48, %v2137_v61 }
 0x13e   :  { %v1218_v57 = vmul.f32 %v2168_v52, %v1149_v54  ;;  %v1152_v58 = vadd.f32 %v1151_v50, %v1055_v55  ;;  %v1548_v60 = vpop.f32.mrb[36].mxu0 }
 0x13f   :  { %v1549_v62 = vpop.f32.mrb[37].mxu0  ;;  %v1622_v63 = vpop.f32.mrb[36].mxu1 }
 0x140   :  { %v1241_v0 = vadd.f32 %v2171_v56, %v1218_v57  ;;  %v1219_v1 = vmul.f32 %v2168_v52, %v1152_v58  ;;  %v1550_v59 = vadd.f32 %v1549_v62, %v1548_v60  ;;  %v1551_v2 = vpop.f32.mrb[38].mxu0  ;;  %v1164_v4 = vpop.f32.mrb[37].mxu1 }
 0x141   :  { %v1552_v6 = vpop.f32.mrb[39].mxu0  ;;  %v1623_v7 = vpop.f32.mrb[38].mxu1 }
 0x142   :  { %1258 = vst.msk [vmem:[%s2296_s4] sm:$0xff] %vm1257_vm1, %v1241_v0  ;;  %v1242_v61 = vadd.f32 %v2171_v56, %v1219_v1  ;;  %v1060_v8 = vadd.f32 %v1550_v59, %v2139_v9  ;;  %v1553_v10 = vadd.f32 %v1552_v6, %v1551_v2  ;;  %v1167_v12 = vpop.f32.mrb[39].mxu1 }
 0x144   :  { %1259 = vst.msk [vmem:[%s2296_s4 + $0x8] sm:$0xff] %vm1257_vm1, %v1242_v61  ;;  %v1157_v13 = vadd.f32 %v1618_v42, %v1060_v8  ;;  %v1063_v14 = vadd.f32 %v1553_v10, %v2141_v11 }
 0x146   :  { %v1220_v15 = vmul.f32 %v2168_v52, %v1157_v13  ;;  %v1160_v16 = vadd.f32 %v1619_v47, %v1063_v14  ;;  %v1554_v17 = vpop.f32.mrb[40].mxu0 }
 0x147   :  { %v1555_v18 = vpop.f32.mrb[41].mxu0  ;;  %v2188_v20 = vpop.f32.mrb[40].mxu1 }
 0x148   :  { %v1243_v22 = vadd.f32 %v2171_v56, %v1220_v15  ;;  %v1221_v9 = vmul.f32 %v2168_v52, %v1160_v16  ;;  %v1556_v24 = vadd.f32 %v1555_v18, %v1554_v17  ;;  %v1557_v26 = vpop.f32.mrb[42].mxu0  ;;  %v1180_v27 = vpop.f32.mrb[41].mxu1 }
 0x149   :  { %v1558_v28 = vpop.f32.mrb[43].mxu0  ;;  %v1627_v29 = vpop.f32.mrb[42].mxu1 }
 0x14a   :  { %1260 = vst.msk [vmem:[%s2296_s4 + $0x10] sm:$0xff] %vm1257_vm1, %v1243_v22  ;;  %v1244_v11 = vadd.f32 %v2171_v56, %v1221_v9  ;;  %v1559_v30 = vadd.f32 %v1558_v28, %v1557_v26  ;;  %v1068_v31 = vadd.f32 %v1556_v24, %v2143_v23  ;;  %v1183_v32 = vpop.f32.mrb[43].mxu1 }
 0x14c   :  { %1261 = vst.msk [vmem:[%s2296_s4 + $0x18] sm:$0xff] %vm1257_vm1, %v1244_v11  ;;  %v1165_v33 = vadd.f32 %v1164_v4, %v1068_v31  ;;  %v1071_v34 = vadd.f32 %v1559_v30, %v2145_v25 }
 0x14e   :  { %v1222_v36 = vmul.f32 %v2168_v52, %v1165_v33  ;;  %v1168_v40 = vadd.f32 %v1167_v12, %v1071_v34  ;;  %v1560_v41 = vpop.f32.mrb[44].mxu0 }
 0x14f   :  { %v1561_v42 = vpop.f32.mrb[45].mxu0  ;;  %v2204_v43 = vpop.f32.mrb[44].mxu1 }
 0x150   :  { %v1245_v44 = vadd.f32 %v2171_v56, %v1222_v36  ;;  %v1223_v23 = vmul.f32 %v2168_v52, %v1168_v40  ;;  %v1562_v45 = vadd.f32 %v1561_v42, %v1560_v41  ;;  %v1563_v46 = vpop.f32.mrb[46].mxu0  ;;  %v1196_v47 = vpop.f32.mrb[45].mxu1 }
 0x151   :  { %v1564_v48 = vpop.f32.mrb[47].mxu0  ;;  %v2208_v49 = vpop.f32.mrb[46].mxu1 }
 0x152   :  { %1262 = vst.msk [vmem:[%s2296_s4 + $0x20] sm:$0xff] %vm1257_vm1, %v1245_v44  ;;  %v1246_v25 = vadd.f32 %v2171_v56, %v1223_v23  ;;  %v1076_v50 = vadd.f32 %v1562_v45, %v2147_v37  ;;  %v1565_v54 = vadd.f32 %v1564_v48, %v1563_v46  ;;  %v1199_v55 = vpop.f32.mrb[47].mxu1 }
 0x154   :  { %1263 = vst.msk [vmem:[%s2296_s4 + $0x28] sm:$0xff] %vm1257_vm1, %v1246_v25  ;;  %v1173_v57 = vadd.f32 %v1622_v63, %v1076_v50  ;;  %v1079_v58 = vadd.f32 %v1565_v54, %v2149_v39 }
 0x156   :  { %v1224_v60 = vmul.f32 %v2168_v52, %v1173_v57  ;;  %v1176_v62 = vadd.f32 %v1623_v7, %v1079_v58  ;;  %v1566_v0 = vpop.f32.mrb[48].mxu0 }
 0x157   :  { %v1567_v1 = vpop.f32.mrb[49].mxu0 }
 0x158   :  { %v1247_v59 = vadd.f32 %v2171_v56, %v1224_v60  ;;  %v1225_v2 = vmul.f32 %v2168_v52, %v1176_v62  ;;  %v1568_v37 = vadd.f32 %v1567_v1, %v1566_v0  ;;  %v1569_v4 = vpop.f32.mrb[50].mxu0 }
 0x159   :  { %v1570_v6 = vpop.f32.mrb[51].mxu0 }
 0x15a   :  { %1264 = vst.msk [vmem:[%s2296_s4 + $0x30] sm:$0xff] %vm1257_vm1, %v1247_v59  ;;  %v1248_v63 = vadd.f32 %v2171_v56, %v1225_v2  ;;  %v1571_v39 = vadd.f32 %v1570_v6, %v1569_v4  ;;  %v1084_v61 = vadd.f32 %v1568_v37, %v2151_v51 }
 0x15c   :  { %1265 = vst.msk [vmem:[%s2296_s4 + $0x38] sm:$0xff] %vm1257_vm1, %v1248_v63  ;;  %v1181_v7 = vadd.f32 %v1180_v27, %v1084_v61  ;;  %v1087_v8 = vadd.f32 %v1571_v39, %v2153_v53 }
 0x15e   :  { %v1226_v10 = vmul.f32 %v2168_v52, %v1181_v7  ;;  %v1184_v12 = vadd.f32 %v1183_v32, %v1087_v8  ;;  %v1572_v13 = vpop.f32.mrb[52].mxu0 }
 0x15f   :  { %v1573_v14 = vpop.f32.mrb[53].mxu0 }
 0x160   :  { %v1249_v15 = vadd.f32 %v2171_v56, %v1226_v10  ;;  %v1227_v16 = vmul.f32 %v2168_v52, %v1184_v12  ;;  %v1574_v17 = vadd.f32 %v1573_v14, %v1572_v13  ;;  %v1575_v18 = vpop.f32.mrb[54].mxu0 }
 0x161   :  { %v1576_v51 = vpop.f32.mrb[55].mxu0 }
 0x162   :  { %1266 = vst.msk [vmem:[%s2296_s4 + $0x40] sm:$0xff] %vm1257_vm1, %v1249_v15  ;;  %v1250_v22 = vadd.f32 %v2171_v56, %v1227_v16  ;;  %v1092_v53 = vadd.f32 %v1574_v17, %v2155_v3  ;;  %v1577_v9 = vadd.f32 %v1576_v51, %v1575_v18 }
 0x164   :  { %1267 = vst.msk [vmem:[%s2296_s4 + $0x48] sm:$0xff] %vm1257_vm1, %v1250_v22  ;;  %v1189_v24 = vadd.f32 %v2188_v20, %v1092_v53  ;;  %v1095_v26 = vadd.f32 %v1577_v9, %v2157_v5 }
 0x166   :  { %v1228_v27 = vmul.f32 %v2168_v52, %v1189_v24  ;;  %v1192_v28 = vadd.f32 %v1627_v29, %v1095_v26  ;;  %v1578_v11 = vpop.f32.mrb[56].mxu0 }
 0x167   :  { %v1579_v30 = vpop.f32.mrb[57].mxu0 }
 0x168   :  { %v1251_v31 = vadd.f32 %v2171_v56, %v1228_v27  ;;  %v1229_v32 = vmul.f32 %v2168_v52, %v1192_v28  ;;  %v1580_v3 = vadd.f32 %v1579_v30, %v1578_v11  ;;  %v1581_v33 = vpop.f32.mrb[58].mxu0 }
 0x169   :  { %v1582_v34 = vpop.f32.mrb[59].mxu0 }
 0x16a   :  { %1268 = vst.msk [vmem:[%s2296_s4 + $0x50] sm:$0xff] %vm1257_vm1, %v1251_v31  ;;  %v1252_v20 = vadd.f32 %v2171_v56, %v1229_v32  ;;  %v1583_v5 = vadd.f32 %v1582_v34, %v1581_v33  ;;  %v1100_v36 = vadd.f32 %v1580_v3, %v2159_v19 }
 0x16c   :  { %1269 = vst.msk [vmem:[%s2296_s4 + $0x58] sm:$0xff] %vm1257_vm1, %v1252_v20  ;;  %v1197_v29 = vadd.f32 %v1196_v47, %v1100_v36  ;;  %v1103_v40 = vadd.f32 %v1583_v5, %v2161_v21 }
 0x16e   :  { %v1230_v41 = vmul.f32 %v2168_v52, %v1197_v29  ;;  %v1200_v42 = vadd.f32 %v1199_v55, %v1103_v40  ;;  %v1584_v44 = vpop.f32.mrb[60].mxu0 }
 0x16f   :  { %v1585_v23 = vpop.f32.mrb[61].mxu0 }
 0x170   :  { %v1253_v45 = vadd.f32 %v2171_v56, %v1230_v41  ;;  %v1231_v46 = vmul.f32 %v2168_v52, %v1200_v42  ;;  %v1586_v48 = vadd.f32 %v1585_v23, %v1584_v44  ;;  %v1587_v25 = vpop.f32.mrb[62].mxu0 }
 0x171   :  { %v1588_v19 = vpop.f32.mrb[63].mxu0 }
 0x172   :  { %1270 = vst.msk [vmem:[%s2296_s4 + $0x60] sm:$0xff] %vm1257_vm1, %v1253_v45  ;;  %v1254_v47 = vadd.f32 %v2171_v56, %v1231_v46  ;;  %v1108_v21 = vadd.f32 %v1586_v48, %v2163_v35  ;;  %v1589_v50 = vadd.f32 %v1588_v19, %v1587_v25 }
 0x174   :  { %1271 = vst.msk [vmem:[%s2296_s4 + $0x68] sm:$0xff] %vm1257_vm1, %v1254_v47  ;;  %v1205_v54 = vadd.f32 %v2204_v43, %v1108_v21  ;;  %v1111_v55 = vadd.f32 %v1589_v50, %v2165_v38 }
 0x176   :  { %v1232_v57 = vmul.f32 %v2168_v52, %v1205_v54  ;;  %v1208_v58 = vadd.f32 %v2208_v49, %v1111_v55 }
 0x178   :  { %v1255_v60 = vadd.f32 %v2171_v56, %v1232_v57  ;;  %v1233_v62 = vmul.f32 %v2168_v52, %v1208_v58 }
 0x17a   :  { %1272 = vst.msk [vmem:[%s2296_s4 + $0x70] sm:$0xff] %vm1257_vm1, %v1255_v60  ;;  %v1256_v35 = vadd.f32 %v2171_v56, %v1233_v62 }
 0x17c   :  { %1273 = vst.msk [vmem:[%s2296_s4 + $0x78] sm:$0xff] %vm1257_vm1, %v1256_v35 }

// kernel: psmnet_forward.122
= control target key start
LH: loop header
LB: loop body
LE: loop exit
PB: predicated region body
PF: predicated region fallthrough
CT: control target
= control target key end

     0   :  { %vm968_vm0 = vcmask 523264   ;;  %vm1293_vm1 = vcmask 519168   ;;  %s2119_s1 = inlined_call_operand.vmem [shape: bf16[1728,64], index: 1, kind: input, shape index: {}]   ;;  %s2120_s0 = inlined_call_operand.vmem [shape: bf16[16,1728], index: 0, kind: input, shape index: {}]   ;;  %s2121_s2 = inlined_call_operand.vmem [shape: f32[1,64], index: 2, kind: input, shape index: {}]   ;;  %s2122_s4 = inlined_call_operand.vmem [shape: bf16[16,64], index: 4, kind: input, shape index: {}]   ;;  %s2123_s3 = inlined_call_operand.vmem [shape: f32[1,64], index: 3, kind: input, shape index: {}]   ;;  %s2124_s5 = inlined_call_operand.vmem [shape: bf16[16,64], index: 5, kind: output, shape index: {}]  }
   0x1   :  { %v1566_v0 = vld [vmem:[%s2119_s1 + $0x40] sm:$0xff]   ;;  %v1568_v2 = vld [vmem:[%s2119_s1 + $0x48] sm:$0xff]   ;;  %v1570_v4 = vld [vmem:[%s2119_s1 + $0x50] sm:$0xff]  }
   0x2   :  { %v1567_v1 = vld [vmem:[%s2119_s1] sm:$0xff]   ;;  %1433 = vmatprep.subr.bf16.mxu1 %v1566_v0  ;;  %v1569_v3 = vld [vmem:[%s2119_s1 + $0x8] sm:$0xff]   ;;  %v1571_v5 = vld [vmem:[%s2119_s1 + $0x10] sm:$0xff]  }
   0x3   :  { %1434 = vmatpush3.bf16.msra.mxu1 %v1567_v1  ;;  %v1572_v6 = vld [vmem:[%s2119_s1 + $0x58] sm:$0xff]   ;;  %v1576_v8 = vld [vmem:[%s2119_s1 + $0x140] sm:$0xff]   ;;  %v1580_v12 = vld [vmem:[%s2119_s1 + $0x148] sm:$0xff]  }
   0x4   :  { %1435 = vmatprep.subr.bf16.mxu1 %v1568_v2  ;;  %v1573_v7 = vld [vmem:[%s2119_s1 + $0x18] sm:$0xff]   ;;  %v1577_v9 = vld [vmem:[%s2119_s1 + $0x100] sm:$0xff]   ;;  %1477 = vmatprep.subr.bf16.mxu0 %v1576_v8  ;;  %v1581_v13 = vld [vmem:[%s2119_s1 + $0x108] sm:$0xff]  }
   0x5   :  { %v1574_v10 = vld [vmem:[%s2119_s1 + $0x60] sm:$0xff]   ;;  %1478 = vmatpush3.bf16.msra.mxu0 %v1577_v9  ;;  %v1578_v14 = vld [vmem:[%s2119_s1 + $0x68] sm:$0xff]   ;;  %v1584_v16 = vld [vmem:[%s2119_s1 + $0x150] sm:$0xff]  }
   0x6   :  { %v1575_v11 = vld [vmem:[%s2119_s1 + $0x20] sm:$0xff]   ;;  %1479 = vmatprep.subr.bf16.mxu0 %v1580_v12  ;;  %v1579_v15 = vld [vmem:[%s2119_s1 + $0x28] sm:$0xff]   ;;  %v1585_v17 = vld [vmem:[%s2119_s1 + $0x110] sm:$0xff]  }
   0x7   :  { %1436 = vmatpush3.bf16.msra.mxu1 %v1569_v3  ;;  %v1582_v18 = vld [vmem:[%s2119_s1 + $0x70] sm:$0xff]   ;;  %v1588_v20 = vld [vmem:[%s2119_s1 + $0x158] sm:$0xff]   ;;  %v1593_v25 = vld [vmem:[%s2119_s1 + $0xc0] sm:$0xff]  }
   0x8   :  { %1437 = vmatprep.subr.bf16.mxu1 %v1570_v4  ;;  %v1583_v19 = vld [vmem:[%s2119_s1 + $0x30] sm:$0xff]   ;;  %v1586_v21 = vld [vmem:[%s2119_s1 + $0x78] sm:$0xff]   ;;  %v1595_v27 = vld [vmem:[%s2119_s1 + $0x160] sm:$0xff]  }
   0x9   :  { %1480 = vmatpush3.bf16.msra.mxu0 %v1581_v13  ;;  %v1591_v22 = vld [vmem:[%s2120_s0 + $0x4] ss:$56 sps:$4 sm:$0xff]   ;;  %v1589_v26 = vld [vmem:[%s2120_s0] ss:$56 sps:$4 sm:$0xff]   ;;  %v1597_v30 = vld [vmem:[%s2119_s1 + $0xc8] sm:$0xff]  }
   0xa   :  { %1481 = vmatprep.subr.bf16.mxu0 %v1584_v16  ;;  %v1592_v23 = vld [vmem:[%s2119_s1 + $0x118] sm:$0xff]   ;;  %1004 = vmatprep.mubr.bf16.mxu1 %v1591_v22  ;;  %v1596_v28 = vld [vmem:[%s2119_s1 + $0x120] sm:$0xff]   ;;  %v1599_v31 = vld [vmem:[%s2119_s1 + $0x168] sm:$0xff]  }
   0xb   :  { %1438 = vmatpush3.bf16.msra.mxu1 %v1571_v5  ;;  %v1587_v24 = vld [vmem:[%s2119_s1 + $0x38] sm:$0xff]   ;;  %v1594_v29 = vld [vmem:[%s2119_s1 + $0x80] sm:$0xff]   ;;  %v1600_v32 = vld [vmem:[%s2119_s1 + $0x128] sm:$0xff]  }
   0xc   :  { %1439 = vmatprep.subr.bf16.mxu1 %v1572_v6  ;;  %v1598_v33 = vld [vmem:[%s2119_s1 + $0x88] sm:$0xff]   ;;  %v1601_v34 = vld [vmem:[%s2119_s1 + $0xd0] sm:$0xff]   ;;  %v1605_v38 = vld [vmem:[%s2119_s1 + $0xd8] sm:$0xff]  }
   0xd   :  { %1482 = vmatpush3.bf16.msra.mxu0 %v1585_v17  ;;  %v1603_v35 = vld [vmem:[%s2119_s1 + $0x170] sm:$0xff]   ;;  %v1607_v39 = vld [vmem:[%s2119_s1 + $0x178] sm:$0xff]   ;;  %v1609_v42 = vld [vmem:[%s2119_s1 + $0xe0] sm:$0xff]   ;;  %v1695_v17 = vmov 0  }
   0xe   :  { %1483 = vmatprep.subr.bf16.mxu0 %v1588_v20  ;;  %v1604_v36 = vld [vmem:[%s2119_s1 + $0x130] sm:$0xff]   ;;  %v1608_v40 = vld [vmem:[%s2119_s1 + $0x138] sm:$0xff]   ;;  %v1614_v45 = vld [vmem:[%s2119_s1 + $0x240] sm:$0xff]  }
   0xf   :  { %1440 = vmatpush3.bf16.msra.mxu1 %v1573_v7  ;;  %v1602_v37 = vld [vmem:[%s2119_s1 + $0x90] sm:$0xff]   ;;  %v1606_v41 = vld [vmem:[%s2119_s1 + $0x98] sm:$0xff]   ;;  %v1615_v46 = vld [vmem:[%s2119_s1 + $0x200] sm:$0xff]  }
  0x10   :  { %1441 = vmatprep.subr.bf16.mxu1 %v1574_v10  ;;  %v1611_v43 = vld [vmem:[%s2120_s0 + $0x10] ss:$56 sps:$4 sm:$0xff]   ;;  %v1613_v44 = vld [vmem:[%s2120_s0 + $0x14] ss:$56 sps:$4 sm:$0xff]   ;;  %v1610_v47 = vld [vmem:[%s2119_s1 + $0xa0] sm:$0xff]  }
  0x11   :  { %1484 = vmatpush3.bf16.msra.mxu0 %v1592_v23  ;;  %1086 = vmatprep.mubr.bf16.mxu0 %v1613_v44  ;;  %v1616_v48 = vld [vmem:[%s2119_s1 + $0xe8] sm:$0xff]   ;;  %v1620_v52 = vld [vmem:[%s2119_s1 + $0xf0] sm:$0xff]   ;;  %v1624_v56 = vld [vmem:[%s2119_s1 + $0xf8] sm:$0xff]  }
  0x12   :  { %1485 = vmatprep.subr.bf16.mxu0 %v1595_v27  ;;  %v1618_v49 = vld [vmem:[%s2119_s1 + $0x248] sm:$0xff]   ;;  %v1622_v53 = vld [vmem:[%s2119_s1 + $0x250] sm:$0xff]   ;;  %v1626_v57 = vld [vmem:[%s2119_s1 + $0x258] sm:$0xff]  }
  0x13   :  { %1442 = vmatpush3.bf16.msra.mxu1 %v1575_v11  ;;  %v1619_v50 = vld [vmem:[%s2119_s1 + $0x208] sm:$0xff]   ;;  %v1623_v54 = vld [vmem:[%s2119_s1 + $0x210] sm:$0xff]   ;;  %v1625_v58 = vld [vmem:[%s2119_s1 + $0xb8] sm:$0xff]  }
  0x14   :  { %1443 = vmatprep.subr.bf16.mxu1 %v1578_v14  ;;  %v1617_v51 = vld [vmem:[%s2119_s1 + $0xa8] sm:$0xff]   ;;  %v1621_v55 = vld [vmem:[%s2119_s1 + $0xb0] sm:$0xff]   ;;  %v1630_v60 = vld [vmem:[%s2119_s1 + $0x218] sm:$0xff]  }
  0x15   :  { %1486 = vmatpush3.bf16.msra.mxu0 %v1596_v28  ;;  %v1629_v59 = vld [vmem:[%s2120_s0 + $0xc] ss:$56 sps:$4 sm:$0xff]   ;;  %v1627_v61 = vld [vmem:[%s2120_s0 + $0x8] ss:$56 sps:$4 sm:$0xff]   ;;  %v1639_v6 = vld [vmem:[%s2119_s1 + $0x1d0] sm:$0xff]  }
  0x16   :  { %1487 = vmatprep.subr.bf16.mxu0 %v1599_v31  ;;  %v1631_v62 = vld [vmem:[%s2119_s1 + $0x1c0] sm:$0xff]   ;;  %v1635_v2 = vld [vmem:[%s2119_s1 + $0x1c8] sm:$0xff]   ;;  %v1640_v7 = vld [vmem:[%s2119_s1 + $0x190] sm:$0xff]  }
  0x17   :  { %1444 = vmatpush3.bf16.msra.mxu1 %v1579_v15  ;;  %v1632_v63 = vld [vmem:[%s2119_s1 + $0x180] sm:$0xff]   ;;  %v1636_v3 = vld [vmem:[%s2119_s1 + $0x188] sm:$0xff]   ;;  %v1641_v8 = vld [vmem:[%s2119_s1 + $0x270] sm:$0xff]  }
  0x18   :  { %1445 = vmatprep.subr.bf16.mxu1 %v1582_v18  ;;  %v1633_v0 = vld [vmem:[%s2119_s1 + $0x260] sm:$0xff]   ;;  %v1637_v4 = vld [vmem:[%s2119_s1 + $0x268] sm:$0xff]   ;;  %v1642_v9 = vld [vmem:[%s2119_s1 + $0x230] sm:$0xff]  }
  0x19   :  { %1488 = vmatpush3.bf16.msra.mxu0 %v1600_v32  ;;  %v1634_v1 = vld [vmem:[%s2119_s1 + $0x220] sm:$0xff]   ;;  %v1638_v5 = vld [vmem:[%s2119_s1 + $0x228] sm:$0xff]   ;;  %v1643_v10 = vld [vmem:[%s2119_s1 + $0x1d8] sm:$0xff]  }
  0x1a   :  { %1489 = vmatprep.subr.bf16.mxu0 %v1603_v35  ;;  %v1644_v11 = vld [vmem:[%s2119_s1 + $0x198] sm:$0xff]   ;;  %v1647_v14 = vld [vmem:[%s2119_s1 + $0x1e0] sm:$0xff]   ;;  %v1653_v20 = vld [vmem:[%s2119_s1 + $0x1e8] sm:$0xff]  }
  0x1b   :  { %1446 = vmatpush3.bf16.msra.mxu1 %v1583_v19  ;;  %v1645_v12 = vld [vmem:[%s2119_s1 + $0x278] sm:$0xff]   ;;  %v1648_v15 = vld [vmem:[%s2119_s1 + $0x1a0] sm:$0xff]   ;;  %v1655_v22 = vld [vmem:[%s2119_s1 + $0x308] sm:$0xff]  }
  0x1c   :  { %1447 = vmatprep.subr.bf16.mxu1 %v1586_v21  ;;  %v1646_v13 = vld [vmem:[%s2119_s1 + $0x238] sm:$0xff]   ;;  %v1652_v19 = vld [vmem:[%s2119_s1 + $0x300] sm:$0xff]   ;;  %v1654_v21 = vld [vmem:[%s2119_s1 + $0x1a8] sm:$0xff]  }
  0x1d   :  { %1490 = vmatpush3.bf16.msra.mxu0 %v1604_v36  ;;  %v1649_v16 = vld [vmem:[%s2120_s0 + $0x20] ss:$56 sps:$4 sm:$0xff]   ;;  %v1651_v18 = vld [vmem:[%s2120_s0 + $0x24] ss:$56 sps:$4 sm:$0xff]   ;;  %v1656_v23 = vld [vmem:[%s2119_s1 + $0x1f0] sm:$0xff]  }
  0x1e   :  { %1491 = vmatprep.subr.bf16.mxu0 %v1607_v39  ;;  %v1663_v27 = vld [vmem:[%s2120_s0 + $0x1c] ss:$56 sps:$4 sm:$0xff]   ;;  %v1661_v31 = vld [vmem:[%s2120_s0 + $0x18] ss:$56 sps:$4 sm:$0xff]   ;;  %v1666_v32 = vld [vmem:[%s2119_s1 + $0x280] sm:$0xff]  }
  0x1f   :  { %1448 = vmatpush3.bf16.msra.mxu1 %v1587_v24  ;;  %v1657_v24 = vld [vmem:[%s2119_s1 + $0x1b0] sm:$0xff]   ;;  %v1660_v28 = vld [vmem:[%s2119_s1 + $0x1b8] sm:$0xff]   ;;  %v1669_v35 = vld [vmem:[%s2119_s1 + $0x288] sm:$0xff]  }
  0x20   :  { %1455 = vmatprep.subr.bf16.mxu1 %v1593_v25  ;;  %v1658_v25 = vld [vmem:[%s2119_s1 + $0x310] sm:$0xff]   ;;  %v1670_v36 = vld [vmem:[%s2119_s1 + $0x328] sm:$0xff]   ;;  %v1678_v44 = vld [vmem:[%s2119_s1 + $0x2a0] sm:$0xff]  }
  0x21   :  { %1492 = vmatpush3.bf16.msra.mxu0 %v1608_v40  ;;  %v1673_v39 = vld [vmem:[%s2119_s1 + $0x330] sm:$0xff]   ;;  %v1674_v40 = vld [vmem:[%s2119_s1 + $0x2d8] sm:$0xff]  }
  0x22   :  { %1005 = vmatmul.mubr.bf16.vlgmr.msra.gmra.mrb[0].mxu1 %v1589_v26  ;;  %1521 = vmatprep.subr.bf16.mxu0 %v1614_v45  ;;  %v1659_v26 = vld [vmem:[%s2119_s1 + $0x1f8] sm:$0xff]   ;;  %v1679_v45 = vld [vmem:[%s2119_s1 + $0x340] sm:$0xff]  }
  0x23   :  { %1456 = vmatpush3.bf16.msra.mxu1 %v1594_v29  ;;  %1045 = vmatprep.mubr.bf16.mxu1 %v1629_v59  ;;  %v1664_v29 = vld [vmem:[%s2119_s1 + $0x318] sm:$0xff]  }
  0x24   :  { %1457 = vmatprep.subr.bf16.mxu1 %v1597_v30  ;;  %1087 = vmatmul.mubr.bf16.vlgmr.msra.gmra.mrb[0].mxu0 %v1611_v43  ;;  %v1665_v30 = vld [vmem:[%s2119_s1 + $0x2c0] sm:$0xff]  }
  0x25   :  { %1522 = vmatpush3.bf16.msra.mxu0 %v1615_v46  ;;  %1168 = vmatprep.mubr.bf16.mxu0 %v1651_v18  ;;  %v1677_v43 = vld [vmem:[%s2119_s1 + $0x2e0] sm:$0xff]   ;;  %v1680_v46 = vld [vmem:[%s2119_s1 + $0x2e8] sm:$0xff]  }
  0x26   :  { %1523 = vmatprep.subr.bf16.mxu0 %v1618_v49  ;;  %v1690_v49 = vld [vmem:[%s2120_s0 + $0x2c] ss:$56 sps:$4 sm:$0xff]  }
  0x27   :  { %1458 = vmatpush3.bf16.msra.mxu1 %v1598_v33  ;;  %v1667_v33 = vld [vmem:[%s2119_s1 + $0x320] sm:$0xff]  }
  0x28   :  { %1459 = vmatprep.subr.bf16.mxu1 %v1601_v34  ;;  %v1668_v34 = vld [vmem:[%s2119_s1 + $0x2c8] sm:$0xff]  }
  0x29   :  { %1524 = vmatpush3.bf16.msra.mxu0 %v1619_v50  ;;  %v1683_v50 = vld [vmem:[%s2119_s1 + $0x2f0] sm:$0xff]  }
  0x2a   :  { %1525 = vmatprep.subr.bf16.mxu0 %v1622_v53  ;;  %v1685_v53 = vld [vmem:[%s2119_s1 + $0x350] sm:$0xff]  }
  0x2b   :  { %1460 = vmatpush3.bf16.msra.mxu1 %v1602_v37  ;;  %v1671_v37 = vld [vmem:[%s2119_s1 + $0x2d0] sm:$0xff]  }
  0x2c   :  { %1461 = vmatprep.subr.bf16.mxu1 %v1605_v38  ;;  %v1672_v38 = vld [vmem:[%s2119_s1 + $0x290] sm:$0xff]  }
  0x2d   :  { %1526 = vmatpush3.bf16.msra.mxu0 %v1623_v54  ;;  %v1686_v54 = vld [vmem:[%s2119_s1 + $0x2f8] sm:$0xff]  }
  0x2e   :  { %1527 = vmatprep.subr.bf16.mxu0 %v1626_v57  ;;  %v1688_v57 = vld [vmem:[%s2120_s0 + $0x28] ss:$56 sps:$4 sm:$0xff]  }
  0x2f   :  { %1462 = vmatpush3.bf16.msra.mxu1 %v1606_v41  ;;  %v1675_v41 = vld [vmem:[%s2119_s1 + $0x298] sm:$0xff]  }
  0x30   :  { %1463 = vmatprep.subr.bf16.mxu1 %v1609_v42  ;;  %v1676_v42 = vld [vmem:[%s2119_s1 + $0x338] sm:$0xff]  }
  0x31   :  { %1528 = vmatpush3.bf16.msra.mxu0 %v1630_v60 }
  0x32   :  { %1529 = vmatprep.subr.bf16.mxu0 %v1633_v0 }
  0x33   :  { %1464 = vmatpush3.bf16.msra.mxu1 %v1610_v47  ;;  %v1681_v47 = vld [vmem:[%s2119_s1 + $0x2a8] sm:$0xff]  }
  0x34   :  { %1465 = vmatprep.subr.bf16.mxu1 %v1616_v48  ;;  %v1682_v48 = vld [vmem:[%s2119_s1 + $0x348] sm:$0xff]  }
  0x35   :  { %1530 = vmatpush3.bf16.msra.mxu0 %v1634_v1 }
  0x36   :  { %1531 = vmatprep.subr.bf16.mxu0 %v1637_v4 }
  0x37   :  { %1466 = vmatpush3.bf16.msra.mxu1 %v1617_v51  ;;  %v1692_v51 = vld [vmem:[%s2120_s0 + $0x34] ss:$56 sps:$4 sm:$0xff]  }
  0x38   :  { %1467 = vmatprep.subr.bf16.mxu1 %v1620_v52  ;;  %v1684_v52 = vld [vmem:[%s2119_s1 + $0x2b0] sm:$0xff]  }
  0x39   :  { %1532 = vmatpush3.bf16.msra.mxu0 %v1638_v5 }
  0x3a   :  { %1533 = vmatprep.subr.bf16.mxu0 %v1641_v8 }
  0x3b   :  { %1468 = vmatpush3.bf16.msra.mxu1 %v1621_v55  ;;  %v1687_v55 = vld [vmem:[%s2119_s1 + $0x2b8] sm:$0xff]  }
  0x3c   :  { %1469 = vmatprep.subr.bf16.mxu1 %v1624_v56  ;;  %v1691_v56 = vld [vmem:[%s2119_s1 + $0x358] sm:$0xff]  }
  0x3d   :  { %1534 = vmatpush3.bf16.msra.mxu0 %v1642_v9 }
  0x3e   :  { %1535 = vmatprep.subr.bf16.mxu0 %v1645_v12 }
  0x3f   :  { %1470 = vmatpush3.bf16.msra.mxu1 %v1625_v58  ;;  %v1694_v58 = vld [vmem:[%s2120_s0 + $0x30] ss:$56 sps:$4 sm:$0xff]  }
  0x40   :  { %1499 = vmatprep.subr.bf16.mxu1 %v1631_v62 }
  0x41   :  { %1536 = vmatpush3.bf16.msra.mxu0 %v1646_v13 }
  0x42   :  { %1046 = vmatmul.mubr.bf16.vlgmr.msra.gmra.mrb[4].mxu1 %v1627_v61  ;;  %1218 = vmatprep.subr.bf16.mxu0 %v1695_v17 }
  0x43   :  { %1500 = vmatpush3.bf16.msra.mxu1 %v1632_v63  ;;  %1127 = vmatprep.mubr.bf16.mxu1 %v1663_v27 }
  0x44   :  { %1501 = vmatprep.subr.bf16.mxu1 %v1635_v2  ;;  %1169 = vmatmul.mubr.bf16.vlgmr.msra.gmra.mrb[4].mxu0 %v1649_v16 }
  0x45   :  { %1219 = vmatpush1.bf16.msra.mxu0 %v1652_v19  ;;  %1422 = vmatprep.mubr.msk.bf16.mxu0 %vm968_vm0, %v1692_v51 }
  0x46   :  { %1220 = vmatprep.subr.bf16.mxu0 %v1695_v17 }
  0x47   :  { %1502 = vmatpush3.bf16.msra.mxu1 %v1636_v3 }
  0x48   :  { %1503 = vmatprep.subr.bf16.mxu1 %v1639_v6 }
  0x49   :  { %1221 = vmatpush1.bf16.msra.mxu0 %v1655_v22 }
  0x4a   :  { %1222 = vmatprep.subr.bf16.mxu0 %v1695_v17 }
  0x4b   :  { %1504 = vmatpush3.bf16.msra.mxu1 %v1640_v7 }
  0x4c   :  { %1505 = vmatprep.subr.bf16.mxu1 %v1643_v10 }
  0x4d   :  { %1223 = vmatpush1.bf16.msra.mxu0 %v1658_v25 }
  0x4e   :  { %1224 = vmatprep.subr.bf16.mxu0 %v1695_v17 }
  0x4f   :  { %1506 = vmatpush3.bf16.msra.mxu1 %v1644_v11 }
  0x50   :  { %1507 = vmatprep.subr.bf16.mxu1 %v1647_v14 }
  0x51   :  { %1225 = vmatpush1.bf16.msra.mxu0 %v1664_v29 }
  0x52   :  { %1226 = vmatprep.subr.bf16.mxu0 %v1695_v17 }
  0x53   :  { %1508 = vmatpush3.bf16.msra.mxu1 %v1648_v15 }
  0x54   :  { %1509 = vmatprep.subr.bf16.mxu1 %v1653_v20 }
  0x55   :  { %1227 = vmatpush1.bf16.msra.mxu0 %v1667_v33 }
  0x56   :  { %1228 = vmatprep.subr.bf16.mxu0 %v1695_v17 }
  0x57   :  { %1510 = vmatpush3.bf16.msra.mxu1 %v1654_v21 }
  0x58   :  { %1511 = vmatprep.subr.bf16.mxu1 %v1656_v23 }
  0x59   :  { %1229 = vmatpush1.bf16.msra.mxu0 %v1670_v36 }
  0x5a   :  { %1230 = vmatprep.subr.bf16.mxu0 %v1695_v17 }
  0x5b   :  { %1512 = vmatpush3.bf16.msra.mxu1 %v1657_v24 }
  0x5c   :  { %1513 = vmatprep.subr.bf16.mxu1 %v1659_v26 }
  0x5d   :  { %1231 = vmatpush1.bf16.msra.mxu0 %v1673_v39 }
  0x5e   :  { %1232 = vmatprep.subr.bf16.mxu0 %v1695_v17 }
  0x5f   :  { %1514 = vmatpush3.bf16.msra.mxu1 %v1660_v28 }
  0x60   :  { %1543 = vmatprep.subr.bf16.mxu1 %v1665_v30 }
  0x61   :  { %1233 = vmatpush1.bf16.msra.mxu0 %v1676_v42 }
  0x62   :  { %1128 = vmatmul.mubr.bf16.vlgmr.msra.gmra.mrb[8].mxu1 %v1661_v31  ;;  %1234 = vmatprep.subr.bf16.mxu0 %v1695_v17 }
  0x63   :  { %1544 = vmatpush3.bf16.msra.mxu1 %v1666_v32  ;;  %1209 = vmatprep.mubr.bf16.mxu1 %v1690_v49 }
  0x64   :  { %1545 = vmatprep.subr.bf16.mxu1 %v1668_v34 }
  0x65   :  { %1235 = vmatpush1.bf16.msra.mxu0 %v1679_v45  ;;  %v1430_v45 = vld [vmem:[%s2122_s4] sm:$0xff]  }
  0x66   :  { %1236 = vmatprep.subr.bf16.mxu0 %v1695_v17 }
  0x67   :  { %1546 = vmatpush3.bf16.msra.mxu1 %v1669_v35 }
  0x68   :  { %1547 = vmatprep.subr.bf16.mxu1 %v1671_v37 }
  0x69   :  { %1237 = vmatpush1.bf16.msra.mxu0 %v1682_v48  ;;  %v1424_v48 = vld [vmem:[%s2123_s3] ss:$0 sm:$0xff] }
  0x6a   :  { %1238 = vmatprep.subr.bf16.mxu0 %v1695_v17 }
  0x6b   :  { %1548 = vmatpush3.bf16.msra.mxu1 %v1672_v38 }
  0x6c   :  { %1549 = vmatprep.subr.bf16.mxu1 %v1674_v40 }
  0x6d   :  { %1239 = vmatpush1.bf16.msra.mxu0 %v1685_v53 }
  0x6e   :  { %1240 = vmatprep.subr.bf16.mxu0 %v1695_v17 }
  0x6f   :  { %1550 = vmatpush3.bf16.msra.mxu1 %v1675_v41 }
  0x70   :  { %1551 = vmatprep.subr.bf16.mxu1 %v1677_v43 }
  0x71   :  { %1241 = vmatpush1.bf16.msra.mxu0 %v1691_v56 }
  0x73   :  { %1552 = vmatpush3.bf16.msra.mxu1 %v1678_v44  ;;  %v1423_v44 = vld [vmem:[%s2121_s2] ss:$0 sm:$0xff] }
  0x74   :  { %1553 = vmatprep.subr.bf16.mxu1 %v1680_v46  ;;  %1251 = vmatmul.mubr.bf16.vlgmr.msra.gmra.mrb[8].mxu0 %v1694_v58 }
  0x77   :  { %1554 = vmatpush3.bf16.msra.mxu1 %v1681_v47 }
  0x78   :  { %1555 = vmatprep.subr.bf16.mxu1 %v1683_v50  ;;  %v1431_v50 = vunpack.c.l.bf16 %v1430_v45 }
  0x7b   :  { %1556 = vmatpush3.bf16.msra.mxu1 %v1684_v52 }
  0x7c   :  { %1557 = vmatprep.subr.bf16.mxu1 %v1686_v54  ;;  %v1432_v54 = vunpack.c.h.bf16 %v1430_v45 }
  0x7f   :  { %1558 = vmatpush3.bf16.msra.mxu1 %v1687_v55 }
  0x82   :  { %1210 = vmatmul.mubr.bf16.vlgmr.msra.gmra.mrb[12].mxu1 %v1688_v57 }
  0xf5   :  { %v1449_v59 = vpop.f32.mrb[0].mxu1 }
  0xf6   :  { %v1450_v60 = vpop.f32.mrb[1].mxu1 }
  0xf7   :  { %v1451_v61 = vadd.f32 %v1450_v60, %v1449_v59  ;;  %v1452_v62 = vpop.f32.mrb[2].mxu1  ;;  %v1493_v1 = vpop.f32.mrb[0].mxu0 }
  0xf8   :  { %v1453_v63 = vpop.f32.mrb[3].mxu1  ;;  %v1494_v2 = vpop.f32.mrb[1].mxu0 }
  0xf9   :  { %v1454_v0 = vadd.f32 %v1453_v63, %v1452_v62  ;;  %v1495_v3 = vadd.f32 %v1494_v2, %v1493_v1  ;;  %v1496_v4 = vpop.f32.mrb[2].mxu0 }
  0xfa   :  { %v1497_v5 = vpop.f32.mrb[3].mxu0 }
  0xfb   :  { %v1498_v6 = vadd.f32 %v1497_v5, %v1496_v4 }
 0x115   :  { %v1471_v7 = vpop.f32.mrb[4].mxu1 }
 0x116   :  { %v1472_v8 = vpop.f32.mrb[5].mxu1 }
 0x117   :  { %v1473_v9 = vadd.f32 %v1472_v8, %v1471_v7  ;;  %v1474_v10 = vpop.f32.mrb[6].mxu1  ;;  %v1537_v17 = vpop.f32.mrb[4].mxu0 }
 0x118   :  { %v1475_v11 = vpop.f32.mrb[7].mxu1  ;;  %v1538_v18 = vpop.f32.mrb[5].mxu0 }
 0x119   :  { %v1048_v12 = vadd.f32 %v1473_v9, %v1451_v61  ;;  %v1476_v13 = vadd.f32 %v1475_v11, %v1474_v10  ;;  %v1539_v19 = vadd.f32 %v1538_v18, %v1537_v17  ;;  %v1540_v20 = vpop.f32.mrb[6].mxu0 }
 0x11a   :  { %v1541_v21 = vpop.f32.mrb[7].mxu0 }
 0x11b   :  { %v1051_v14 = vadd.f32 %v1476_v13, %v1454_v0  ;;  %v1089_v15 = vadd.f32 %v1495_v3, %v1048_v12  ;;  %v1542_v22 = vadd.f32 %v1541_v21, %v1540_v20 }
 0x11d   :  { %v1092_v16 = vadd.f32 %v1498_v6, %v1051_v14 }
 0x135   :  { %v1515_v23 = vpop.f32.mrb[8].mxu1 }
 0x136   :  { %v1516_v24 = vpop.f32.mrb[9].mxu1 }
 0x137   :  { %v1517_v25 = vadd.f32 %v1516_v24, %v1515_v23  ;;  %v1518_v26 = vpop.f32.mrb[10].mxu1 }
 0x138   :  { %v1519_v27 = vpop.f32.mrb[11].mxu1 }
 0x139   :  { %v1130_v28 = vadd.f32 %v1517_v25, %v1089_v15  ;;  %v1520_v29 = vadd.f32 %v1519_v27, %v1518_v26 }
 0x13b   :  { %v1133_v30 = vadd.f32 %v1520_v29, %v1092_v16  ;;  %v1171_v31 = vadd.f32 %v1539_v19, %v1130_v28 }
 0x13d   :  { %v1174_v32 = vadd.f32 %v1542_v22, %v1133_v30 }
 0x147   :  { %v1252_v34 = vpop.f32.mrb[8].mxu0 }
 0x148   :  { %v1254_v36 = vpop.f32.mrb[9].mxu0 }
 0x149   :  { %v1255_v39 = vpop.f32.mrb[10].mxu0 }
 0x14a   :  { %v1257_v41 = vpop.f32.mrb[11].mxu0 }
 0x155   :  { %v1559_v33 = vpop.f32.mrb[12].mxu1 }
 0x156   :  { %v1560_v35 = vpop.f32.mrb[13].mxu1 }
 0x157   :  { %v1561_v37 = vadd.f32 %v1560_v35, %v1559_v33  ;;  %v1562_v38 = vpop.f32.mrb[14].mxu1 }
 0x158   :  { %v1563_v40 = vpop.f32.mrb[15].mxu1 }
 0x159   :  { %v1212_v42 = vadd.f32 %v1561_v37, %v1171_v31  ;;  %v1564_v43 = vadd.f32 %v1563_v40, %v1562_v38 }
 0x15b   :  { %v1253_v46 = vadd.f32 %v1252_v34, %v1212_v42  ;;  %v1215_v47 = vadd.f32 %v1564_v43, %v1174_v32 }
 0x15d   :  { %v1266_v49 = vmul.f32 %v1423_v44, %v1253_v46  ;;  %v1256_v51 = vadd.f32 %v1255_v39, %v1215_v47 }
 0x15f   :  { %v1275_v52 = vadd.f32 %v1424_v48, %v1266_v49  ;;  %v1267_v53 = vmul.f32 %v1423_v44, %v1256_v51 }
 0x161   :  { %v1281_v55 = vadd.f32 %v1431_v50, %v1275_v52  ;;  %v1276_v56 = vadd.f32 %v1424_v48, %v1267_v53 }
 0x163   :  { %v1283_v57 = vmax.f32 %v1281_v55, 0.0  ;;  %v1282_v58 = vadd.f32 %v1432_v54, %v1276_v56 }
 0x165   :  { %v1427_v59 = vpack.c.bf16 %v1283_v57, %v1283_v57  ;;  %v1284_v60 = vmax.f32 %v1282_v58, 0.0 }
 0x167   :  { %1294 = vst.msk [vmem:[%s2124_s5] sm:$0xf] %vm1293_vm1, %v1427_v59  ;;  %v1428_v61 = vpack.c.bf16 %v1284_v60, %v1284_v60 }
 0x169   :  { %1295 = vst.msk [vmem:[%s2124_s5 + $0x4] sm:$0xf] %vm1293_vm1, %v1428_v61 }

// kernel: psmnet_forward.150
= control target key start
LH: loop header
LB: loop body
LE: loop exit
PB: predicated region body
PF: predicated region fallthrough
CT: control target
= control target key end

     0   :  { %vm801_vm0 = vcmask 785408   ;;  %vm1292_vm1 = vcmask 7168   ;;  %s2392_s1 = inlined_call_operand.vmem [shape: bf16[864,1], index: 1, kind: input, shape index: {}]   ;;  %s2393_s0 = inlined_call_operand.vmem [shape: bf16[128,864], index: 0, kind: input, shape index: {}]   ;;  %s2394_s2 = inlined_call_operand.<no memory space> [shape: f32[1,1], index: 2, kind: input, shape index: {}]   ;;  %s2395_s3 = inlined_call_operand.<no memory space> [shape: f32[1,1], index: 3, kind: input, shape index: {}]   ;;  %s2396_s4 = inlined_call_operand.vmem [shape: f32[128,1], index: 4, kind: input, shape index: {}]   ;;  %s2397_s5 = inlined_call_operand.vmem [shape: f32[128,1], index: 5, kind: output, shape index: {}]  }
   0x1   :  { %v1667_v0 = vld [vmem:[%s2392_s1 + $0x40] sm:$0xff]   ;;  %v1671_v4 = vld [vmem:[%s2392_s1 + $0x48] sm:$0xff]   ;;  %v1675_v8 = vld [vmem:[%s2392_s1 + $0x50] sm:$0xff]  }
   0x2   :  { %v1668_v1 = vld [vmem:[%s2392_s1 + $0xc0] sm:$0xff]   ;;  %1433 = vmatprep.subr.bf16.mxu0 %v1667_v0  ;;  %v1672_v5 = vld [vmem:[%s2392_s1 + $0xc8] sm:$0xff]   ;;  %v1676_v9 = vld [vmem:[%s2392_s1 + $0xd0] sm:$0xff]  }
   0x3   :  { %v1669_v2 = vld [vmem:[%s2392_s1] sm:$0xff]   ;;  %1497 = vmatprep.subr.bf16.mxu1 %v1668_v1  ;;  %v1673_v6 = vld [vmem:[%s2392_s1 + $0x8] sm:$0xff]   ;;  %v1677_v10 = vld [vmem:[%s2392_s1 + $0x10] sm:$0xff]  }
   0x4   :  { %v1670_v3 = vld [vmem:[%s2392_s1 + $0x80] sm:$0xff]   ;;  %1434 = vmatpush3.bf16.msra.mxu0 %v1669_v2  ;;  %v1674_v7 = vld [vmem:[%s2392_s1 + $0x88] sm:$0xff]   ;;  %v1678_v11 = vld [vmem:[%s2392_s1 + $0x90] sm:$0xff]  }
   0x5   :  { %1498 = vmatpush3.bf16.msra.mxu1 %v1670_v3  ;;  %1435 = vmatprep.subr.bf16.mxu0 %v1671_v4  ;;  %v1679_v12 = vld [vmem:[%s2392_s1 + $0x58] sm:$0xff]   ;;  %v1683_v16 = vld [vmem:[%s2392_s1 + $0x60] sm:$0xff]   ;;  %v1687_v20 = vld [vmem:[%s2392_s1 + $0x68] sm:$0xff]  }
   0x6   :  { %1499 = vmatprep.subr.bf16.mxu1 %v1672_v5  ;;  %v1680_v13 = vld [vmem:[%s2392_s1 + $0xd8] sm:$0xff]   ;;  %v1684_v17 = vld [vmem:[%s2392_s1 + $0xe0] sm:$0xff]   ;;  %v1688_v21 = vld [vmem:[%s2392_s1 + $0xe8] sm:$0xff]  }
   0x7   :  { %v1681_v14 = vld [vmem:[%s2392_s1 + $0x18] sm:$0xff]   ;;  %v1685_v18 = vld [vmem:[%s2392_s1 + $0x20] sm:$0xff]   ;;  %v1689_v22 = vld [vmem:[%s2392_s1 + $0x28] sm:$0xff]  }
   0x8   :  { %1436 = vmatpush3.bf16.msra.mxu0 %v1673_v6  ;;  %v1682_v15 = vld [vmem:[%s2392_s1 + $0x98] sm:$0xff]   ;;  %v1686_v19 = vld [vmem:[%s2392_s1 + $0xa0] sm:$0xff]   ;;  %v1690_v23 = vld [vmem:[%s2392_s1 + $0xa8] sm:$0xff]  }
   0x9   :  { %1500 = vmatpush3.bf16.msra.mxu1 %v1674_v7  ;;  %1437 = vmatprep.subr.bf16.mxu0 %v1675_v8  ;;  %v1691_v24 = vld [vmem:[%s2392_s1 + $0x70] sm:$0xff]   ;;  %v1695_v28 = vld [vmem:[%s2392_s1 + $0x78] sm:$0xff]   ;;  %v1701_v33 = vld [vmem:[%s2393_s0 + $0x4] ss:$28 sps:$4 sm:$0xff]  }
   0xa   :  { %1501 = vmatprep.subr.bf16.mxu1 %v1676_v9  ;;  %v1692_v25 = vld [vmem:[%s2392_s1 + $0xf0] sm:$0xff]   ;;  %v1696_v29 = vld [vmem:[%s2392_s1 + $0xf8] sm:$0xff]   ;;  %v1702_v34 = vld [vmem:[%s2393_s0 + $0x8] ss:$28 sps:$4 sm:$0xff]   ;;  %858 = vmatprep.mubr.bf16.mxu0 %v1701_v33 }
   0xb   :  { %v1693_v26 = vld [vmem:[%s2392_s1 + $0x30] sm:$0xff]   ;;  %v1697_v30 = vld [vmem:[%s2392_s1 + $0x38] sm:$0xff]   ;;  %v1704_v35 = vld [vmem:[%s2393_s0 + $0xc] ss:$28 sps:$4 sm:$0xff]  }
   0xc   :  { %1438 = vmatpush3.bf16.msra.mxu0 %v1677_v10  ;;  %v1694_v27 = vld [vmem:[%s2392_s1 + $0xb0] sm:$0xff]   ;;  %v1698_v31 = vld [vmem:[%s2392_s1 + $0xb8] sm:$0xff]   ;;  %v1705_v36 = vld [vmem:[%s2392_s1 + $0x140] sm:$0xff]   ;;  %955 = vmatprep.mubr.bf16.mxu1 %v1704_v35 }
   0xd   :  { %1502 = vmatpush3.bf16.msra.mxu1 %v1678_v11  ;;  %1439 = vmatprep.subr.bf16.mxu0 %v1679_v12  ;;  %v1699_v32 = vld [vmem:[%s2393_s0] ss:$28 sps:$4 sm:$0xff]   ;;  %v1711_v40 = vld [vmem:[%s2393_s0 + $0x38] ss:$28 sps:$4 sm:$0xff]   ;;  %v1713_v42 = vld [vmem:[%s2392_s1 + $0x148] sm:$0xff]  }
   0xe   :  { %1503 = vmatprep.subr.bf16.mxu1 %v1680_v13  ;;  %v1706_v37 = vld [vmem:[%s2392_s1 + $0x100] sm:$0xff]   ;;  %v1707_v38 = vld [vmem:[%s2393_s0 + $0x3c] ss:$28 sps:$4 sm:$0xff]   ;;  %v1714_v43 = vld [vmem:[%s2392_s1 + $0x108] sm:$0xff]  }
   0xf   :  { %v1709_v39 = vld [vmem:[%s2393_s0 + $0x44] ss:$28 sps:$4 sm:$0xff]   ;;  %v1715_v44 = vld [vmem:[%s2393_s0 + $0x74] ss:$28 sps:$4 sm:$0xff]   ;;  %v1717_v45 = vld [vmem:[%s2393_s0 + $0x7c] ss:$28 sps:$4 sm:$0xff]  }
  0x10   :  { %1440 = vmatpush3.bf16.msra.mxu0 %v1681_v14  ;;  %v1712_v41 = vld [vmem:[%s2393_s0 + $0x40] ss:$28 sps:$4 sm:$0xff]   ;;  %v1721_v46 = vld [vmem:[%s2392_s1 + $0x150] sm:$0xff]   ;;  %v1723_v50 = vld [vmem:[%s2393_s0 + $0xac] ss:$28 sps:$4 sm:$0xff]  }
  0x11   :  { %1504 = vmatpush3.bf16.msra.mxu1 %v1682_v15  ;;  %1441 = vmatprep.subr.bf16.mxu0 %v1683_v16  ;;  %v1722_v47 = vld [vmem:[%s2392_s1 + $0x110] sm:$0xff]   ;;  %v1729_v52 = vld [vmem:[%s2392_s1 + $0x158] sm:$0xff]   ;;  %v1727_v54 = vld [vmem:[%s2393_s0 + $0xa8] ss:$28 sps:$4 sm:$0xff]  }
  0x12   :  { %1505 = vmatprep.subr.bf16.mxu1 %v1684_v17  ;;  %v1719_v48 = vld [vmem:[%s2393_s0 + $0x70] ss:$28 sps:$4 sm:$0xff]   ;;  %v1720_v49 = vld [vmem:[%s2393_s0 + $0x78] ss:$28 sps:$4 sm:$0xff]   ;;  %v1737_v55 = vld [vmem:[%s2392_s1 + $0x160] sm:$0xff]  }
  0x13   :  { %v1725_v51 = vld [vmem:[%s2393_s0 + $0xb4] ss:$28 sps:$4 sm:$0xff]   ;;  %v1730_v53 = vld [vmem:[%s2392_s1 + $0x118] sm:$0xff]   ;;  %v1738_v57 = vld [vmem:[%s2392_s1 + $0x120] sm:$0xff]  }
  0x14   :  { %1442 = vmatpush3.bf16.msra.mxu0 %v1685_v18  ;;  %v1728_v56 = vld [vmem:[%s2393_s0 + $0xb0] ss:$28 sps:$4 sm:$0xff]   ;;  %v1739_v58 = vld [vmem:[%s2392_s1 + $0x180] sm:$0xff]   ;;  %v1740_v2 = vld [vmem:[%s2393_s0 + $0x11c] ss:$28 sps:$4 sm:$0xff]  }
  0x15   :  { %1506 = vmatpush3.bf16.msra.mxu1 %v1686_v19  ;;  %1443 = vmatprep.subr.bf16.mxu0 %v1687_v20  ;;  %v1731_v59 = vld [vmem:[%s2393_s0 + $0xe4] ss:$28 sps:$4 sm:$0xff]   ;;  %v1733_v60 = vld [vmem:[%s2393_s0 + $0xec] ss:$28 sps:$4 sm:$0xff]   ;;  %v1755_v4 = vld [vmem:[%s2392_s1 + $0x170] sm:$0xff]  }
  0x16   :  { %1507 = vmatprep.subr.bf16.mxu1 %v1688_v21  ;;  %v1746_v61 = vld [vmem:[%s2392_s1 + $0x168] sm:$0xff]   ;;  %v1735_v63 = vld [vmem:[%s2393_s0 + $0xe0] ss:$28 sps:$4 sm:$0xff]   ;;  %v1756_v5 = vld [vmem:[%s2392_s1 + $0x130] sm:$0xff]  }
  0x17   :  { %v1747_v62 = vld [vmem:[%s2392_s1 + $0x128] sm:$0xff]   ;;  %v1742_v3 = vld [vmem:[%s2393_s0 + $0x124] ss:$28 sps:$4 sm:$0xff]   ;;  %v1757_v6 = vld [vmem:[%s2392_s1 + $0x190] sm:$0xff]  }
  0x18   :  { %1444 = vmatpush3.bf16.msra.mxu0 %v1689_v22  ;;  %v1736_v0 = vld [vmem:[%s2393_s0 + $0xe8] ss:$28 sps:$4 sm:$0xff]   ;;  %v1744_v7 = vld [vmem:[%s2393_s0 + $0x118] ss:$28 sps:$4 sm:$0xff]   ;;  %v1745_v8 = vld [vmem:[%s2393_s0 + $0x120] ss:$28 sps:$4 sm:$0xff]  }
  0x19   :  { %1508 = vmatpush3.bf16.msra.mxu1 %v1690_v23  ;;  %1445 = vmatprep.subr.bf16.mxu0 %v1691_v24  ;;  %v1752_v1 = vld [vmem:[%s2392_s1 + $0x188] sm:$0xff]   ;;  %v1748_v9 = vld [vmem:[%s2393_s0 + $0x154] ss:$28 sps:$4 sm:$0xff]   ;;  %v1764_v10 = vld [vmem:[%s2392_s1 + $0x178] sm:$0xff]  }
  0x1a   :  { %1509 = vmatprep.subr.bf16.mxu1 %v1692_v25  ;;  %v1750_v11 = vld [vmem:[%s2393_s0 + $0x15c] ss:$28 sps:$4 sm:$0xff]   ;;  %v1767_v14 = vld [vmem:[%s2392_s1 + $0x1a0] sm:$0xff]   ;;  %v1771_v15 = vld [vmem:[%s2392_s1 + $0x1a8] sm:$0xff]  }
  0x1b   :  { %v1765_v12 = vld [vmem:[%s2392_s1 + $0x198] sm:$0xff]   ;;  %v1753_v16 = vld [vmem:[%s2393_s0 + $0x150] ss:$28 sps:$4 sm:$0xff]   ;;  %v1762_v20 = vld [vmem:[%s2393_s0 + $0x188] ss:$28 sps:$4 sm:$0xff]  }
  0x1c   :  { %1446 = vmatpush3.bf16.msra.mxu0 %v1693_v26  ;;  %v1766_v13 = vld [vmem:[%s2392_s1 + $0x138] sm:$0xff]   ;;  %v1758_v18 = vld [vmem:[%s2393_s0 + $0x18c] ss:$28 sps:$4 sm:$0xff]   ;;  %v1760_v19 = vld [vmem:[%s2393_s0 + $0x194] ss:$28 sps:$4 sm:$0xff]  }
  0x1d   :  { %1510 = vmatpush3.bf16.msra.mxu1 %v1694_v27  ;;  %1447 = vmatprep.subr.bf16.mxu0 %v1695_v28  ;;  %v1754_v17 = vld [vmem:[%s2393_s0 + $0x158] ss:$28 sps:$4 sm:$0xff]   ;;  %v1763_v21 = vld [vmem:[%s2393_s0 + $0x190] ss:$28 sps:$4 sm:$0xff]   ;;  %v1780_v27 = vld [vmem:[%s2393_s0 + $0x88] ss:$28 sps:$4 sm:$0xff]  }
  0x1e   :  { %1511 = vmatprep.subr.bf16.mxu1 %v1696_v29  ;;  %v1770_v22 = vld [vmem:[%s2393_s0 + $0x14] ss:$28 sps:$4 sm:$0xff]   ;;  %v1774_v26 = vld [vmem:[%s2393_s0 + $0x4c] ss:$28 sps:$4 sm:$0xff]   ;;  %v1777_v29 = vld [vmem:[%s2393_s0 + $0x84] ss:$28 sps:$4 sm:$0xff]  }
  0x1f   :  { %v1772_v23 = vld [vmem:[%s2393_s0 + $0x18] ss:$28 sps:$4 sm:$0xff]   ;;  %v1768_v24 = vld [vmem:[%s2393_s0 + $0x10] ss:$28 sps:$4 sm:$0xff]   ;;  %v1776_v28 = vld [vmem:[%s2393_s0 + $0x48] ss:$28 sps:$4 sm:$0xff]  }
  0x20   :  { %1448 = vmatpush3.bf16.msra.mxu0 %v1697_v30  ;;  %v1773_v25 = vld [vmem:[%s2393_s0 + $0x50] ss:$28 sps:$4 sm:$0xff]   ;;  %v1781_v30 = vld [vmem:[%s2393_s0 + $0xc0] ss:$28 sps:$4 sm:$0xff]   ;;  %v1796_v35 = vld [vmem:[%s2393_s0 + $0x168] ss:$28 sps:$4 sm:$0xff]  }
  0x21   :  { %1512 = vmatpush3.bf16.msra.mxu1 %v1698_v31  ;;  %1561 = vmatprep.subr.bf16.mxu0 %v1705_v36  ;;  %v1788_v31 = vld [vmem:[%s2393_s0 + $0xf8] ss:$28 sps:$4 sm:$0xff]  }
  0x22   :  { %1639 = vmatprep.subr.bf16.mxu1 %v1739_v58  ;;  %v1782_v33 = vld [vmem:[%s2393_s0 + $0xbc] ss:$28 sps:$4 sm:$0xff]  }
  0x23   :  { %859 = vmatmul.mubr.bf16.vlgmr.msra.gmra.mrb[0].mxu0 %v1699_v32  ;;  %v1779_v32 = vld [vmem:[%s2393_s0 + $0x80] ss:$28 sps:$4 sm:$0xff]   ;;  %v1784_v36 = vld [vmem:[%s2393_s0 + $0xb8] ss:$28 sps:$4 sm:$0xff]  }
  0x24   :  { %956 = vmatmul.mubr.bf16.vlgmr.msra.gmra.mrb[0].mxu1 %v1702_v34  ;;  %1562 = vmatpush3.bf16.msra.mxu0 %v1706_v37  ;;  %v1789_v34 = vld [vmem:[%s2393_s0 + $0x130] ss:$28 sps:$4 sm:$0xff]  }
  0x25   :  { %866 = vmatprep.mubr.bf16.mxu0 %v1707_v38  ;;  %963 = vmatprep.mubr.bf16.mxu1 %v1709_v39  ;;  %v1785_v37 = vld [vmem:[%s2393_s0 + $0xf4] ss:$28 sps:$4 sm:$0xff]   ;;  %v1797_v38 = vld [vmem:[%s2393_s0 + $0x1a0] ss:$28 sps:$4 sm:$0xff]  }
  0x26   :  { %1563 = vmatprep.subr.bf16.mxu0 %v1713_v42  ;;  %1640 = vmatpush3.bf16.msra.mxu1 %v1739_v58  ;;  %v1787_v39 = vld [vmem:[%s2393_s0 + $0xf0] ss:$28 sps:$4 sm:$0xff]   ;;  %v1793_v42 = vld [vmem:[%s2393_s0 + $0x164] ss:$28 sps:$4 sm:$0xff]  }
  0x27   :  { %1641 = vmatprep.subr.bf16.mxu1 %v1752_v1 }
  0x28   :  { %1564 = vmatpush3.bf16.msra.mxu0 %v1714_v43  ;;  %v1795_v43 = vld [vmem:[%s2393_s0 + $0x160] ss:$28 sps:$4 sm:$0xff]  }
  0x29   :  { %1565 = vmatprep.subr.bf16.mxu0 %v1721_v46  ;;  %v10_v46 = vstv %s2394_s2 }
  0x2a   :  { %1642 = vmatpush3.bf16.msra.mxu1 %v1752_v1  ;;  %11 = vst [vmem:[#allocation2] sm:$0x1] %v10_v46 }
  0x2b   :  { %867 = vmatmul.mubr.bf16.gmra.mrb[4].mxu0 %v1711_v40  ;;  %1643 = vmatprep.subr.bf16.mxu1 %v1757_v6  ;;  %v1790_v40 = vld [vmem:[%s2393_s0 + $0x12c] ss:$28 sps:$4 sm:$0xff]  }
  0x2c   :  { %964 = vmatmul.mubr.bf16.gmra.mrb[4].mxu1 %v1712_v41  ;;  %874 = vmatprep.mubr.bf16.mxu0 %v1715_v44  ;;  %v1792_v41 = vld [vmem:[%s2393_s0 + $0x128] ss:$28 sps:$4 sm:$0xff]   ;;  %v1798_v44 = vld [vmem:[%s2393_s0 + $0x19c] ss:$28 sps:$4 sm:$0xff]  }
  0x2d   :  { %971 = vmatprep.mubr.bf16.mxu1 %v1717_v45  ;;  %1566 = vmatpush3.bf16.msra.mxu0 %v1722_v47  ;;  %v1800_v45 = vld [vmem:[%s2393_s0 + $0x198] ss:$28 sps:$4 sm:$0xff]   ;;  %v12_v47 = vstv %s2395_s3 }
  0x2e   :  { %1567 = vmatprep.subr.bf16.mxu0 %v1729_v52  ;;  %1644 = vmatpush3.bf16.msra.mxu1 %v1757_v6  ;;  %13 = vst [vmem:[#allocation3] sm:$0x1] %v12_v47 }
  0x2f   :  { %1645 = vmatprep.subr.bf16.mxu1 %v1765_v12 }
  0x31   :  { %1568 = vmatpush3.bf16.msra.mxu0 %v1730_v53 }
  0x32   :  { %1569 = vmatprep.subr.bf16.mxu0 %v1737_v55  ;;  %1646 = vmatpush3.bf16.msra.mxu1 %v1765_v12 }
  0x33   :  { %875 = vmatmul.mubr.bf16.gmra.mrb[8].mxu0 %v1719_v48  ;;  %1647 = vmatprep.subr.bf16.mxu1 %v1767_v14 }
  0x34   :  { %972 = vmatmul.mubr.bf16.gmra.mrb[8].mxu1 %v1720_v49  ;;  %882 = vmatprep.mubr.bf16.mxu0 %v1723_v50 }
  0x35   :  { %979 = vmatprep.mubr.bf16.mxu1 %v1725_v51  ;;  %1570 = vmatpush3.bf16.msra.mxu0 %v1738_v57 }
  0x36   :  { %1571 = vmatprep.subr.bf16.mxu0 %v1746_v61  ;;  %1648 = vmatpush3.bf16.msra.mxu1 %v1767_v14 }
  0x37   :  { %1649 = vmatprep.subr.bf16.mxu1 %v1771_v15 }
  0x39   :  { %1572 = vmatpush3.bf16.msra.mxu0 %v1747_v62 }
  0x3a   :  { %1573 = vmatprep.subr.bf16.mxu0 %v1755_v4  ;;  %1650 = vmatpush3.bf16.msra.mxu1 %v1771_v15 }
  0x3b   :  { %883 = vmatmul.mubr.bf16.gmra.mrb[12].mxu0 %v1727_v54 }
  0x3c   :  { %980 = vmatmul.mubr.bf16.gmra.mrb[12].mxu1 %v1728_v56  ;;  %890 = vmatprep.mubr.bf16.mxu0 %v1731_v59 }
  0x3d   :  { %987 = vmatprep.mubr.bf16.mxu1 %v1733_v60  ;;  %1574 = vmatpush3.bf16.msra.mxu0 %v1756_v5 }
  0x3e   :  { %1575 = vmatprep.subr.bf16.mxu0 %v1764_v10 }
  0x41   :  { %1576 = vmatpush3.bf16.msra.mxu0 %v1766_v13 }
  0x43   :  { %891 = vmatmul.mubr.bf16.gmra.mrb[16].mxu0 %v1735_v63 }
  0x44   :  { %988 = vmatmul.mubr.bf16.gmra.mrb[16].mxu1 %v1736_v0  ;;  %898 = vmatprep.mubr.bf16.mxu0 %v1740_v2 }
  0x45   :  { %995 = vmatprep.mubr.bf16.mxu1 %v1742_v3 }
  0x4b   :  { %899 = vmatmul.mubr.bf16.gmra.mrb[20].mxu0 %v1744_v7 }
  0x4c   :  { %996 = vmatmul.mubr.bf16.gmra.mrb[20].mxu1 %v1745_v8  ;;  %906 = vmatprep.mubr.bf16.mxu0 %v1748_v9 }
  0x4d   :  { %1003 = vmatprep.mubr.bf16.mxu1 %v1750_v11 }
  0x53   :  { %907 = vmatmul.mubr.bf16.gmra.mrb[24].mxu0 %v1753_v16 }
  0x54   :  { %1004 = vmatmul.mubr.bf16.gmra.mrb[24].mxu1 %v1754_v17  ;;  %914 = vmatprep.mubr.bf16.mxu0 %v1758_v18 }
  0x55   :  { %1011 = vmatprep.mubr.bf16.mxu1 %v1760_v19 }
  0x5b   :  { %915 = vmatmul.mubr.bf16.gmra.mrb[28].mxu0 %v1762_v20 }
  0x5c   :  { %1012 = vmatmul.mubr.bf16.gmra.mrb[28].mxu1 %v1763_v21  ;;  %1052 = vmatprep.mubr.bf16.mxu0 %v1770_v22 }
  0x5d   :  { %1651 = vmatprep.mubr.msk.bf16.mxu1 %vm801_vm0, %v1772_v23 }
  0x63   :  { %1053 = vmatmul.mubr.bf16.vlgmr.msra.gmra.mrb[32].mxu0 %v1768_v24 }
  0x64   :  { %1652 = vmatmul.mubr.msk.bf16.vlgmr.msra.gmra.mrb[32].mxu1 %vm801_vm0, %v1773_v25  ;;  %1060 = vmatprep.mubr.bf16.mxu0 %v1774_v26 }
  0x65   :  { %1655 = vmatprep.mubr.msk.bf16.mxu1 %vm801_vm0, %v1780_v27 }
  0x6b   :  { %1061 = vmatmul.mubr.bf16.gmra.mrb[36].mxu0 %v1776_v28 }
  0x6c   :  { %1068 = vmatprep.mubr.bf16.mxu0 %v1777_v29  ;;  %1656 = vmatmul.mubr.msk.bf16.gmra.mrb[36].mxu1 %vm801_vm0, %v1781_v30 }
  0x6d   :  { %1659 = vmatprep.mubr.msk.bf16.mxu1 %vm801_vm0, %v1788_v31 }
  0x73   :  { %1069 = vmatmul.mubr.bf16.gmra.mrb[40].mxu0 %v1779_v32 }
  0x74   :  { %1076 = vmatprep.mubr.bf16.mxu0 %v1782_v33  ;;  %1660 = vmatmul.mubr.msk.bf16.gmra.mrb[40].mxu1 %vm801_vm0, %v1789_v34 }
  0x75   :  { %1663 = vmatprep.mubr.msk.bf16.mxu1 %vm801_vm0, %v1796_v35 }
  0x7b   :  { %1077 = vmatmul.mubr.bf16.gmra.mrb[44].mxu0 %v1784_v36 }
  0x7c   :  { %1084 = vmatprep.mubr.bf16.mxu0 %v1785_v37  ;;  %1664 = vmatmul.mubr.msk.bf16.gmra.mrb[44].mxu1 %vm801_vm0, %v1797_v38 }
  0x83   :  { %1085 = vmatmul.mubr.bf16.gmra.mrb[48].mxu0 %v1787_v39 }
  0x84   :  { %1092 = vmatprep.mubr.bf16.mxu0 %v1790_v40 }
  0x8b   :  { %1093 = vmatmul.mubr.bf16.gmra.mrb[52].mxu0 %v1792_v41 }
  0x8c   :  { %1100 = vmatprep.mubr.bf16.mxu0 %v1793_v42 }
  0x93   :  { %1101 = vmatmul.mubr.bf16.gmra.mrb[56].mxu0 %v1795_v43 }
  0x94   :  { %1108 = vmatprep.mubr.bf16.mxu0 %v1798_v44 }
  0x9b   :  { %1109 = vmatmul.mubr.bf16.gmra.mrb[60].mxu0 %v1800_v45 }
  0xf6   :  { %v1449_v48 = vpop.f32.mrb[0].mxu0 }
  0xf7   :  { %v1513_v49 = vpop.f32.mrb[0].mxu1  ;;  %v1450_v50 = vpop.f32.mrb[1].mxu0 }
  0xf8   :  { %v1451_v51 = vadd.f32 %v1450_v50, %v1449_v48  ;;  %v1514_v52 = vpop.f32.mrb[1].mxu1  ;;  %v1452_v53 = vpop.f32.mrb[2].mxu0 }
  0xf9   :  { %v1515_v54 = vadd.f32 %v1514_v52, %v1513_v49  ;;  %v1516_v55 = vpop.f32.mrb[2].mxu1  ;;  %v1453_v56 = vpop.f32.mrb[3].mxu0 }
  0xfa   :  { %v1454_v57 = vadd.f32 %v1453_v56, %v1452_v53  ;;  %v1517_v58 = vpop.f32.mrb[3].mxu1 }
  0xfb   :  { %v2175_v59 = vadd.f32 %v1515_v54, %v1451_v51  ;;  %v1518_v60 = vadd.f32 %v1517_v58, %v1516_v55 }
  0xfd   :  { %v2177_v61 = vadd.f32 %v1518_v60, %v1454_v57 }
  0xfe   :  { %v1455_v62 = vpop.f32.mrb[4].mxu0 }
  0xff   :  { %v1519_v63 = vpop.f32.mrb[4].mxu1  ;;  %v1456_v0 = vpop.f32.mrb[5].mxu0 }
 0x100   :  { %v1457_v1 = vadd.f32 %v1456_v0, %v1455_v62  ;;  %v1520_v2 = vpop.f32.mrb[5].mxu1  ;;  %v1458_v3 = vpop.f32.mrb[6].mxu0 }
 0x101   :  { %v1521_v4 = vadd.f32 %v1520_v2, %v1519_v63  ;;  %v1522_v5 = vpop.f32.mrb[6].mxu1  ;;  %v1459_v6 = vpop.f32.mrb[7].mxu0 }
 0x102   :  { %v1460_v7 = vadd.f32 %v1459_v6, %v1458_v3  ;;  %v1523_v8 = vpop.f32.mrb[7].mxu1 }
 0x103   :  { %v2179_v9 = vadd.f32 %v1521_v4, %v1457_v1  ;;  %v1524_v10 = vadd.f32 %v1523_v8, %v1522_v5 }
 0x105   :  { %v2181_v11 = vadd.f32 %v1524_v10, %v1460_v7 }
 0x106   :  { %v1461_v12 = vpop.f32.mrb[8].mxu0 }
 0x107   :  { %v1525_v13 = vpop.f32.mrb[8].mxu1  ;;  %v1462_v14 = vpop.f32.mrb[9].mxu0 }
 0x108   :  { %v1463_v15 = vadd.f32 %v1462_v14, %v1461_v12  ;;  %v1526_v16 = vpop.f32.mrb[9].mxu1  ;;  %v1464_v17 = vpop.f32.mrb[10].mxu0 }
 0x109   :  { %v1527_v18 = vadd.f32 %v1526_v16, %v1525_v13  ;;  %v1528_v19 = vpop.f32.mrb[10].mxu1  ;;  %v1465_v20 = vpop.f32.mrb[11].mxu0 }
 0x10a   :  { %v1466_v21 = vadd.f32 %v1465_v20, %v1464_v17  ;;  %v1529_v22 = vpop.f32.mrb[11].mxu1 }
 0x10b   :  { %v2183_v23 = vadd.f32 %v1527_v18, %v1463_v15  ;;  %v1530_v24 = vadd.f32 %v1529_v22, %v1528_v19 }
 0x10d   :  { %v2185_v25 = vadd.f32 %v1530_v24, %v1466_v21 }
 0x10e   :  { %v1467_v26 = vpop.f32.mrb[12].mxu0 }
 0x10f   :  { %v1531_v27 = vpop.f32.mrb[12].mxu1  ;;  %v1468_v28 = vpop.f32.mrb[13].mxu0 }
 0x110   :  { %v1469_v29 = vadd.f32 %v1468_v28, %v1467_v26  ;;  %v1532_v30 = vpop.f32.mrb[13].mxu1  ;;  %v1470_v31 = vpop.f32.mrb[14].mxu0 }
 0x111   :  { %v1533_v32 = vadd.f32 %v1532_v30, %v1531_v27  ;;  %v1534_v33 = vpop.f32.mrb[14].mxu1  ;;  %v1471_v34 = vpop.f32.mrb[15].mxu0 }
 0x112   :  { %v1472_v35 = vadd.f32 %v1471_v34, %v1470_v31  ;;  %v1535_v36 = vpop.f32.mrb[15].mxu1 }
 0x113   :  { %v2187_v37 = vadd.f32 %v1533_v32, %v1469_v29  ;;  %v1536_v38 = vadd.f32 %v1535_v36, %v1534_v33 }
 0x115   :  { %v2189_v39 = vadd.f32 %v1536_v38, %v1472_v35 }
 0x116   :  { %v1473_v40 = vpop.f32.mrb[16].mxu0 }
 0x117   :  { %v1537_v41 = vpop.f32.mrb[16].mxu1  ;;  %v1474_v42 = vpop.f32.mrb[17].mxu0 }
 0x118   :  { %v1475_v43 = vadd.f32 %v1474_v42, %v1473_v40  ;;  %v1538_v44 = vpop.f32.mrb[17].mxu1  ;;  %v1476_v45 = vpop.f32.mrb[18].mxu0 }
 0x119   :  { %v1539_v46 = vadd.f32 %v1538_v44, %v1537_v41  ;;  %v1540_v47 = vpop.f32.mrb[18].mxu1  ;;  %v1477_v48 = vpop.f32.mrb[19].mxu0 }
 0x11a   :  { %v1478_v49 = vadd.f32 %v1477_v48, %v1476_v45  ;;  %v1541_v50 = vpop.f32.mrb[19].mxu1 }
 0x11b   :  { %v2191_v51 = vadd.f32 %v1539_v46, %v1475_v43  ;;  %v1542_v52 = vadd.f32 %v1541_v50, %v1540_v47 }
 0x11d   :  { %v2193_v53 = vadd.f32 %v1542_v52, %v1478_v49  ;;  %v2208_v52 = vld [vmem:[#allocation2] ss:$0 sm:$0xff] }
 0x11e   :  { %v1479_v54 = vpop.f32.mrb[20].mxu0 }
 0x11f   :  { %v1543_v55 = vpop.f32.mrb[20].mxu1  ;;  %v1480_v56 = vpop.f32.mrb[21].mxu0 }
 0x120   :  { %v1481_v57 = vadd.f32 %v1480_v56, %v1479_v54  ;;  %v1544_v58 = vpop.f32.mrb[21].mxu1  ;;  %v1482_v60 = vpop.f32.mrb[22].mxu0  ;;  %v2211_v56 = vld [vmem:[#allocation3] ss:$0 sm:$0xff] }
 0x121   :  { %v1545_v62 = vadd.f32 %v1544_v58, %v1543_v55  ;;  %v1546_v63 = vpop.f32.mrb[22].mxu1  ;;  %v1483_v0 = vpop.f32.mrb[23].mxu0 }
 0x122   :  { %v1484_v1 = vadd.f32 %v1483_v0, %v1482_v60  ;;  %v1547_v2 = vpop.f32.mrb[23].mxu1 }
 0x123   :  { %v2195_v3 = vadd.f32 %v1545_v62, %v1481_v57  ;;  %v1548_v4 = vadd.f32 %v1547_v2, %v1546_v63  ;;  %v1260_v62 = vld [vmem:[%s2396_s4] sm:$0xff] }
 0x125   :  { %v2197_v5 = vadd.f32 %v1548_v4, %v1484_v1 }
 0x126   :  { %v1485_v6 = vpop.f32.mrb[24].mxu0 }
 0x127   :  { %v1549_v7 = vpop.f32.mrb[24].mxu1  ;;  %v1486_v8 = vpop.f32.mrb[25].mxu0 }
 0x128   :  { %v1487_v10 = vadd.f32 %v1486_v8, %v1485_v6  ;;  %v1550_v12 = vpop.f32.mrb[25].mxu1  ;;  %v1488_v13 = vpop.f32.mrb[26].mxu0  ;;  %v1261_v6 = vld [vmem:[%s2396_s4 + $0x8] sm:$0xff] }
 0x129   :  { %v1551_v14 = vadd.f32 %v1550_v12, %v1549_v7  ;;  %v1552_v15 = vpop.f32.mrb[26].mxu1  ;;  %v1489_v16 = vpop.f32.mrb[27].mxu0 }
 0x12a   :  { %v1490_v17 = vadd.f32 %v1489_v16, %v1488_v13  ;;  %v1553_v18 = vpop.f32.mrb[27].mxu1 }
 0x12b   :  { %v2199_v19 = vadd.f32 %v1551_v14, %v1487_v10  ;;  %v1554_v20 = vadd.f32 %v1553_v18, %v1552_v15 }
 0x12d   :  { %v2201_v21 = vadd.f32 %v1554_v20, %v1490_v17 }
 0x12e   :  { %v1491_v22 = vpop.f32.mrb[28].mxu0 }
 0x12f   :  { %v1555_v24 = vpop.f32.mrb[28].mxu1  ;;  %v1492_v26 = vpop.f32.mrb[29].mxu0 }
 0x130   :  { %v1493_v27 = vadd.f32 %v1492_v26, %v1491_v22  ;;  %v1556_v28 = vpop.f32.mrb[29].mxu1  ;;  %v1494_v29 = vpop.f32.mrb[30].mxu0 }
 0x131   :  { %v1557_v30 = vadd.f32 %v1556_v28, %v1555_v24  ;;  %v1558_v31 = vpop.f32.mrb[30].mxu1  ;;  %v1495_v32 = vpop.f32.mrb[31].mxu0  ;;  %v1262_v24 = vld [vmem:[%s2396_s4 + $0x10] sm:$0xff] }
 0x132   :  { %v1496_v33 = vadd.f32 %v1495_v32, %v1494_v29  ;;  %v1559_v34 = vpop.f32.mrb[31].mxu1  ;;  %v1263_v32 = vld [vmem:[%s2396_s4 + $0x18] sm:$0xff] }
 0x133   :  { %v2203_v35 = vadd.f32 %v1557_v30, %v1493_v27  ;;  %v1560_v36 = vadd.f32 %v1559_v34, %v1558_v31 }
 0x135   :  { %v2205_v38 = vadd.f32 %v1560_v36, %v1496_v33 }
 0x136   :  { %v1577_v40 = vpop.f32.mrb[32].mxu0 }
 0x137   :  { %v1578_v41 = vpop.f32.mrb[33].mxu0  ;;  %v1653_v42 = vpop.f32.mrb[32].mxu1 }
 0x138   :  { %v1579_v43 = vadd.f32 %v1578_v41, %v1577_v40  ;;  %v1580_v44 = vpop.f32.mrb[34].mxu0  ;;  %v1151_v45 = vpop.f32.mrb[33].mxu1 }
 0x139   :  { %v1581_v46 = vpop.f32.mrb[35].mxu0  ;;  %v1654_v47 = vpop.f32.mrb[34].mxu1 }
 0x13a   :  { %v1582_v48 = vadd.f32 %v1581_v46, %v1580_v44  ;;  %v1055_v49 = vadd.f32 %v1579_v43, %v2175_v59  ;;  %v1154_v50 = vpop.f32.mrb[35].mxu1 }
 0x13c   :  { %v1152_v54 = vadd.f32 %v1151_v45, %v1055_v49  ;;  %v1058_v55 = vadd.f32 %v1582_v48, %v2177_v61 }
 0x13e   :  { %v1221_v57 = vmul.f32 %v2208_v52, %v1152_v54  ;;  %v1155_v58 = vadd.f32 %v1154_v50, %v1058_v55  ;;  %v1583_v60 = vpop.f32.mrb[36].mxu0 }
 0x13f   :  { %v1584_v63 = vpop.f32.mrb[37].mxu0  ;;  %v2217_v0 = vpop.f32.mrb[36].mxu1 }
 0x140   :  { %v1244_v59 = vadd.f32 %v2211_v56, %v1221_v57  ;;  %v1222_v1 = vmul.f32 %v2208_v52, %v1155_v58  ;;  %v1585_v2 = vadd.f32 %v1584_v63, %v1583_v60  ;;  %v1586_v4 = vpop.f32.mrb[38].mxu0  ;;  %v1167_v61 = vpop.f32.mrb[37].mxu1 }
 0x141   :  { %v1587_v7 = vpop.f32.mrb[39].mxu0  ;;  %v1658_v8 = vpop.f32.mrb[38].mxu1 }
 0x142   :  { %v1276_v10 = vadd.f32 %v1260_v62, %v1244_v59  ;;  %v1245_v12 = vadd.f32 %v2211_v56, %v1222_v1  ;;  %v1063_v13 = vadd.f32 %v1585_v2, %v2179_v9  ;;  %v1588_v14 = vadd.f32 %v1587_v7, %v1586_v4  ;;  %v1170_v15 = vpop.f32.mrb[39].mxu1  ;;  %v1265_v62 = vld [vmem:[%s2396_s4 + $0x28] sm:$0xff] }
 0x144   :  { %1293 = vst.msk [vmem:[%s2397_s5] sm:$0xff] %vm1292_vm1, %v1276_v10  ;;  %v1277_v16 = vadd.f32 %v1261_v6, %v1245_v12  ;;  %v1160_v17 = vadd.f32 %v1653_v42, %v1063_v13  ;;  %v1066_v18 = vadd.f32 %v1588_v14, %v2181_v11 }
 0x146   :  { %1294 = vst.msk [vmem:[%s2397_s5 + $0x8] sm:$0xff] %vm1292_vm1, %v1277_v16  ;;  %v1223_v20 = vmul.f32 %v2208_v52, %v1160_v17  ;;  %v1163_v22 = vadd.f32 %v1654_v47, %v1066_v18  ;;  %v1589_v9 = vpop.f32.mrb[40].mxu0 }
 0x147   :  { %v1590_v26 = vpop.f32.mrb[41].mxu0  ;;  %v2239_v27 = vpop.f32.mrb[40].mxu1 }
 0x148   :  { %v1246_v28 = vadd.f32 %v2211_v56, %v1223_v20  ;;  %v1224_v11 = vmul.f32 %v2208_v52, %v1163_v22  ;;  %v1591_v29 = vadd.f32 %v1590_v26, %v1589_v9  ;;  %v1592_v30 = vpop.f32.mrb[42].mxu0  ;;  %v1183_v31 = vpop.f32.mrb[41].mxu1  ;;  %v1267_v20 = vld [vmem:[%s2396_s4 + $0x38] sm:$0xff] }
 0x149   :  { %v1593_v33 = vpop.f32.mrb[43].mxu0  ;;  %v2246_v34 = vpop.f32.mrb[42].mxu1 }
 0x14a   :  { %v1278_v36 = vadd.f32 %v1262_v24, %v1246_v28  ;;  %v1247_v40 = vadd.f32 %v2211_v56, %v1224_v11  ;;  %v1594_v41 = vadd.f32 %v1593_v33, %v1592_v30  ;;  %v1071_v42 = vadd.f32 %v1591_v29, %v2183_v23  ;;  %v1186_v43 = vpop.f32.mrb[43].mxu1  ;;  %v1264_v23 = vld [vmem:[%s2396_s4 + $0x20] sm:$0xff] }
 0x14c   :  { %1295 = vst.msk [vmem:[%s2397_s5 + $0x10] sm:$0xff] %vm1292_vm1, %v1278_v36  ;;  %v1279_v44 = vadd.f32 %v1263_v32, %v1247_v40  ;;  %v1168_v45 = vadd.f32 %v1167_v61, %v1071_v42  ;;  %v1074_v46 = vadd.f32 %v1594_v41, %v2185_v25  ;;  %v1269_v42 = vld [vmem:[%s2396_s4 + $0x48] sm:$0xff] }
 0x14e   :  { %1296 = vst.msk [vmem:[%s2397_s5 + $0x18] sm:$0xff] %vm1292_vm1, %v1279_v44  ;;  %v1225_v47 = vmul.f32 %v2208_v52, %v1168_v45  ;;  %v1171_v48 = vadd.f32 %v1170_v15, %v1074_v46  ;;  %v1595_v49 = vpop.f32.mrb[44].mxu0  ;;  %v1266_v15 = vld [vmem:[%s2396_s4 + $0x30] sm:$0xff] }
 0x14f   :  { %v1596_v50 = vpop.f32.mrb[45].mxu0  ;;  %v2263_v54 = vpop.f32.mrb[44].mxu1 }
 0x150   :  { %v1248_v55 = vadd.f32 %v2211_v56, %v1225_v47  ;;  %v1226_v25 = vmul.f32 %v2208_v52, %v1171_v48  ;;  %v1597_v57 = vadd.f32 %v1596_v50, %v1595_v49  ;;  %v1598_v58 = vpop.f32.mrb[46].mxu0  ;;  %v2267_v60 = vpop.f32.mrb[45].mxu1 }
 0x151   :  { %v1599_v63 = vpop.f32.mrb[47].mxu0  ;;  %v2272_v59 = vpop.f32.mrb[46].mxu1 }
 0x152   :  { %v1280_v1 = vadd.f32 %v1264_v23, %v1248_v55  ;;  %v1249_v2 = vadd.f32 %v2211_v56, %v1226_v25  ;;  %v1079_v4 = vadd.f32 %v1597_v57, %v2187_v37  ;;  %v1600_v61 = vadd.f32 %v1599_v63, %v1598_v58  ;;  %v2276_v6 = vpop.f32.mrb[47].mxu1  ;;  %v1270_v25 = vld [vmem:[%s2396_s4 + $0x50] sm:$0xff]  ;;  %v1271_v63 = vld [vmem:[%s2396_s4 + $0x58] sm:$0xff] }
 0x154   :  { %1297 = vst.msk [vmem:[%s2397_s5 + $0x20] sm:$0xff] %vm1292_vm1, %v1280_v1  ;;  %v1281_v7 = vadd.f32 %v1265_v62, %v1249_v2  ;;  %v1176_v10 = vadd.f32 %v2217_v0, %v1079_v4  ;;  %v1082_v12 = vadd.f32 %v1600_v61, %v2189_v39 }
 0x156   :  { %1298 = vst.msk [vmem:[%s2397_s5 + $0x28] sm:$0xff] %vm1292_vm1, %v1281_v7  ;;  %v1227_v37 = vmul.f32 %v2208_v52, %v1176_v10  ;;  %v1179_v13 = vadd.f32 %v1658_v8, %v1082_v12  ;;  %v1601_v14 = vpop.f32.mrb[48].mxu0 }
 0x157   :  { %v1602_v16 = vpop.f32.mrb[49].mxu0 }
 0x158   :  { %v1250_v17 = vadd.f32 %v2211_v56, %v1227_v37  ;;  %v1228_v0 = vmul.f32 %v2208_v52, %v1179_v13  ;;  %v1603_v18 = vadd.f32 %v1602_v16, %v1601_v14  ;;  %v1604_v39 = vpop.f32.mrb[50].mxu0  ;;  %v1272_v14 = vld [vmem:[%s2396_s4 + $0x60] sm:$0xff] }
 0x159   :  { %v1605_v22 = vpop.f32.mrb[51].mxu0 }
 0x15a   :  { %v1282_v9 = vadd.f32 %v1266_v15, %v1250_v17  ;;  %v1251_v8 = vadd.f32 %v2211_v56, %v1228_v0  ;;  %v1606_v24 = vadd.f32 %v1605_v22, %v1604_v39  ;;  %v1087_v26 = vadd.f32 %v1603_v18, %v2191_v51  ;;  %v1268_v51 = vld [vmem:[%s2396_s4 + $0x40] sm:$0xff]  ;;  %v1273_v0 = vld [vmem:[%s2396_s4 + $0x68] sm:$0xff] }
 0x15c   :  { %1299 = vst.msk [vmem:[%s2397_s5 + $0x30] sm:$0xff] %vm1292_vm1, %v1282_v9  ;;  %v1283_v28 = vadd.f32 %v1267_v20, %v1251_v8  ;;  %v1184_v11 = vadd.f32 %v1183_v31, %v1087_v26  ;;  %v1090_v29 = vadd.f32 %v1606_v24, %v2193_v53 }
 0x15e   :  { %1300 = vst.msk [vmem:[%s2397_s5 + $0x38] sm:$0xff] %vm1292_vm1, %v1283_v28  ;;  %v1229_v30 = vmul.f32 %v2208_v52, %v1184_v11  ;;  %v1187_v32 = vadd.f32 %v1186_v43, %v1090_v29  ;;  %v1607_v33 = vpop.f32.mrb[52].mxu0  ;;  %v1274_v28 = vld [vmem:[%s2396_s4 + $0x70] sm:$0xff] }
 0x15f   :  { %v1608_v36 = vpop.f32.mrb[53].mxu0 }
 0x160   :  { %v1252_v40 = vadd.f32 %v2211_v56, %v1229_v30  ;;  %v1230_v31 = vmul.f32 %v2208_v52, %v1187_v32  ;;  %v1609_v41 = vadd.f32 %v1608_v36, %v1607_v33  ;;  %v1610_v53 = vpop.f32.mrb[54].mxu0 }
 0x161   :  { %v1611_v44 = vpop.f32.mrb[55].mxu0 }
 0x162   :  { %v1284_v45 = vadd.f32 %v1268_v51, %v1252_v40  ;;  %v1253_v43 = vadd.f32 %v2211_v56, %v1230_v31  ;;  %v1095_v46 = vadd.f32 %v1609_v41, %v2195_v3  ;;  %v1612_v47 = vadd.f32 %v1611_v44, %v1610_v53 }
 0x164   :  { %1301 = vst.msk [vmem:[%s2397_s5 + $0x40] sm:$0xff] %vm1292_vm1, %v1284_v45  ;;  %v1285_v48 = vadd.f32 %v1269_v42, %v1253_v43  ;;  %v1192_v49 = vadd.f32 %v2239_v27, %v1095_v46  ;;  %v1098_v23 = vadd.f32 %v1612_v47, %v2197_v5 }
 0x166   :  { %1302 = vst.msk [vmem:[%s2397_s5 + $0x48] sm:$0xff] %vm1292_vm1, %v1285_v48  ;;  %v1231_v50 = vmul.f32 %v2208_v52, %v1192_v49  ;;  %v1195_v3 = vadd.f32 %v2246_v34, %v1098_v23  ;;  %v1613_v55 = vpop.f32.mrb[56].mxu0 }
 0x167   :  { %v1614_v57 = vpop.f32.mrb[57].mxu0 }
 0x168   :  { %v1254_v58 = vadd.f32 %v2211_v56, %v1231_v50  ;;  %v1232_v27 = vmul.f32 %v2208_v52, %v1195_v3  ;;  %v1615_v5 = vadd.f32 %v1614_v57, %v1613_v55  ;;  %v1616_v62 = vpop.f32.mrb[58].mxu0 }
 0x169   :  { %v1617_v1 = vpop.f32.mrb[59].mxu0 }
 0x16a   :  { %v1286_v2 = vadd.f32 %v1270_v25, %v1254_v58  ;;  %v1255_v34 = vadd.f32 %v2211_v56, %v1232_v27  ;;  %v1618_v4 = vadd.f32 %v1617_v1, %v1616_v62  ;;  %v1103_v61 = vadd.f32 %v1615_v5, %v2199_v19 }
 0x16c   :  { %1303 = vst.msk [vmem:[%s2397_s5 + $0x50] sm:$0xff] %vm1292_vm1, %v1286_v2  ;;  %v1287_v7 = vadd.f32 %v1271_v63, %v1255_v34  ;;  %v1200_v10 = vadd.f32 %v2267_v60, %v1103_v61  ;;  %v1106_v12 = vadd.f32 %v1618_v4, %v2201_v21 }
 0x16e   :  { %1304 = vst.msk [vmem:[%s2397_s5 + $0x58] sm:$0xff] %vm1292_vm1, %v1287_v7  ;;  %v1233_v37 = vmul.f32 %v2208_v52, %v1200_v10  ;;  %v1203_v13 = vadd.f32 %v2276_v6, %v1106_v12  ;;  %v1619_v19 = vpop.f32.mrb[60].mxu0 }
 0x16f   :  { %v1620_v15 = vpop.f32.mrb[61].mxu0 }
 0x170   :  { %v1256_v16 = vadd.f32 %v2211_v56, %v1233_v37  ;;  %v1234_v60 = vmul.f32 %v2208_v52, %v1203_v13  ;;  %v1621_v21 = vadd.f32 %v1620_v15, %v1619_v19  ;;  %v1622_v17 = vpop.f32.mrb[62].mxu0 }
 0x171   :  { %v1623_v18 = vpop.f32.mrb[63].mxu0 }
 0x172   :  { %v1288_v39 = vadd.f32 %v1272_v14, %v1256_v16  ;;  %v1257_v6 = vadd.f32 %v2211_v56, %v1234_v60  ;;  %v1111_v20 = vadd.f32 %v1621_v21, %v2203_v35  ;;  %v1624_v22 = vadd.f32 %v1623_v18, %v1622_v17 }
 0x174   :  { %1305 = vst.msk [vmem:[%s2397_s5 + $0x60] sm:$0xff] %vm1292_vm1, %v1288_v39  ;;  %v1289_v9 = vadd.f32 %v1273_v0, %v1257_v6  ;;  %v1208_v8 = vadd.f32 %v2263_v54, %v1111_v20  ;;  %v1114_v24 = vadd.f32 %v1624_v22, %v2205_v38  ;;  %v1275_v38 = vld [vmem:[%s2396_s4 + $0x78] sm:$0xff] }
 0x176   :  { %1306 = vst.msk [vmem:[%s2397_s5 + $0x68] sm:$0xff] %vm1292_vm1, %v1289_v9  ;;  %v1235_v26 = vmul.f32 %v2208_v52, %v1208_v8  ;;  %v1211_v35 = vadd.f32 %v2272_v59, %v1114_v24 }
 0x178   :  { %v1258_v11 = vadd.f32 %v2211_v56, %v1235_v26  ;;  %v1236_v29 = vmul.f32 %v2208_v52, %v1211_v35 }
 0x17a   :  { %v1290_v54 = vadd.f32 %v1274_v28, %v1258_v11  ;;  %v1259_v30 = vadd.f32 %v2211_v56, %v1236_v29 }
 0x17c   :  { %1307 = vst.msk [vmem:[%s2397_s5 + $0x70] sm:$0xff] %vm1292_vm1, %v1290_v54  ;;  %v1291_v59 = vadd.f32 %v1275_v38, %v1259_v30 }
 0x17e   :  { %1308 = vst.msk [vmem:[%s2397_s5 + $0x78] sm:$0xff] %vm1292_vm1, %v1291_v59 }

// kernel: psmnet_forward.153
= control target key start
LH: loop header
LB: loop body
LE: loop exit
PB: predicated region body
PF: predicated region fallthrough
CT: control target
= control target key end

     0   :  { %vm26_vm0 = vcmask 1043456   ;;  %v392_v2 = vmov 0.0   ;;  %vm19_vm1 = vcmask 31744   ;;  %v269_v41 = vlaneseq  ;;  %s431_s0 = inlined_call_operand.vmem [shape: f32[4,512], index: 0, kind: input, shape index: {}]   ;;  %s432_s1 = inlined_call_operand.vmem [shape: f32[16,4], index: 1, kind: input, shape index: {}]   ;;  %s433_s2 = inlined_call_operand.vmem [shape: f32[1,512], index: 2, kind: output, shape index: {}]  }
   0x1   :  { %v11_v0 = vld [vmem:[%s431_s0] sm:$0xff]  ;;  %v12_v1 = vld [vmem:[%s431_s0 + $0x8] sm:$0xff]  ;;  %99 = vmatprep.mubr.f32.mxu0 %v392_v2  ;;  %176 = vmatprep.mubr.f32.mxu1 %v392_v2 }
   0x2   :  { %v17_v3 = vcombine.high %v11_v0, %v11_v0  ;;  %v18_v4 = vcombine.high %v12_v1, %v12_v1  ;;  %v13_v5 = vld [vmem:[%s432_s1] sm:$0xff]  ;;  %v14_v6 = vld [vmem:[%s432_s1 + $0x8] sm:$0xff]  ;;  %v422_v56 = vshrl.u32 %v269_v41, 7  ;;  %vm349_vm2 = vcmp.lt.s32.totalorder %v269_v41, 512 }
   0x4   :  { %356 = vmatprep.subr.msk.mxu0 %vm26_vm0, %v17_v3  ;;  %360 = vmatprep.subr.msk.mxu1 %vm26_vm0, %v18_v4  ;;  %v271_v61 = vadd.s32 8, %v422_v56  ;;  %v272_v62 = vcvt.s32.f32 %v422_v56 }
   0x5   :  { %357 = vmatpush1.msk.msra.mxu0 %vm26_vm0, %v11_v0  ;;  %361 = vmatpush1.msk.msra.mxu1 %vm26_vm0, %v12_v1 }
   0x6   :  { %358 = vmatmul.mubr.msk.f32.vlgmr.msra.gmra.mrb[0].mxu0 %vm19_vm1, %v13_v5  ;;  %362 = vmatmul.mubr.msk.f32.vlgmr.msra.gmra.mrb[0].mxu1 %vm19_vm1, %v13_v5  ;;  %v273_v63 = vcvt.s32.f32 %v271_v61 }
   0x7   :  { %105 = vmatprep.mubr.f32.mxu0 %v392_v2  ;;  %182 = vmatprep.mubr.f32.mxu1 %v392_v2 }
   0xa   :  { %359 = vmatmul.mubr.msk.f32.gmra.mrb[2].mxu0 %vm19_vm1, %v14_v6  ;;  %363 = vmatmul.mubr.msk.f32.gmra.mrb[2].mxu1 %vm19_vm1, %v14_v6 }
  0xd9   :  { %v101_v7 = vpop.f32.mrb[0].mxu0  ;;  %v178_v8 = vpop.f32.mrb[0].mxu1 }
  0xda   :  { %v103_v9 = vpop.f32.mrb[1].mxu0  ;;  %v180_v10 = vpop.f32.mrb[1].mxu1 }
  0xdd   :  { %v107_v11 = vpop.f32.mrb[2].mxu0  ;;  %v184_v12 = vpop.f32.mrb[2].mxu1 }
  0xde   :  { %v189_v13 = vmax.f32 %v101_v7, %v107_v11  ;;  %v203_v14 = vmax.f32 %v178_v8, %v184_v12  ;;  %v109_v15 = vpop.f32.mrb[3].mxu0  ;;  %v186_v16 = vpop.f32.mrb[3].mxu1 }
  0xdf   :  { %v196_v17 = vmax.f32 %v103_v9, %v109_v15  ;;  %v210_v18 = vmax.f32 %v180_v10, %v186_v16 }
  0xe0   :  { %v190_v19 = vrot.slane %v189_v13, 4  ;;  %v204_v20 = vrot.slane %v203_v14, 4 }
  0xe1   :  { %v197_v21 = vrot.slane %v196_v17, 4  ;;  %v211_v22 = vrot.slane %v210_v18, 4 }
  0xe2   :  { %v191_v23 = vmax.f32 %v189_v13, %v190_v19  ;;  %v205_v24 = vmax.f32 %v203_v14, %v204_v20 }
  0xe3   :  { %v198_v25 = vmax.f32 %v196_v17, %v197_v21  ;;  %v212_v26 = vmax.f32 %v210_v18, %v211_v22 }
  0xe4   :  { %v192_v27 = vrot.slane %v191_v23, 2  ;;  %v206_v28 = vrot.slane %v205_v24, 2 }
  0xe5   :  { %v199_v29 = vrot.slane %v198_v25, 2  ;;  %v213_v30 = vrot.slane %v212_v26, 2 }
  0xe6   :  { %v193_v31 = vmax.f32 %v191_v23, %v192_v27  ;;  %v207_v32 = vmax.f32 %v205_v24, %v206_v28 }
  0xe7   :  { %v200_v33 = vmax.f32 %v198_v25, %v199_v29  ;;  %v214_v34 = vmax.f32 %v212_v26, %v213_v30 }
  0xe8   :  { %v194_v35 = vrot.slane %v193_v31, 1  ;;  %v208_v36 = vrot.slane %v207_v32, 1 }
  0xe9   :  { %v201_v37 = vrot.slane %v200_v33, 1  ;;  %v215_v38 = vrot.slane %v214_v34, 1 }
  0xea   :  { %v195_v39 = vmax.f32 %v193_v31, %v194_v35  ;;  %v209_v40 = vmax.f32 %v207_v32, %v208_v36 }
  0xeb   :  { %v202_v42 = vmax.f32 %v200_v33, %v201_v37  ;;  %v216_v43 = vmax.f32 %v214_v34, %v215_v38 }
  0xec   :  { %v217_v44 = vsub.f32 %v101_v7, %v195_v39  ;;  %v221_v45 = vsub.f32 %v107_v11, %v195_v39  ;;  %v219_v46 = vsub.f32 %v178_v8, %v209_v40  ;;  %v223_v47 = vsub.f32 %v184_v12, %v209_v40 }
  0xed   :  { %v218_v48 = vsub.f32 %v103_v9, %v202_v42  ;;  %v222_v49 = vsub.f32 %v109_v15, %v202_v42  ;;  %v220_v50 = vsub.f32 %v180_v10, %v216_v43  ;;  %v224_v51 = vsub.f32 %v186_v16, %v216_v43 }
  0xee   :  { %v225_v52 = vmul.f32 1.442695, %v217_v44  ;;  %v233_v53 = vmul.f32 1.442695, %v221_v45  ;;  %v229_v54 = vmul.f32 1.442695, %v219_v46 }
  0xef   :  { %v237_v55 = vmul.f32 1.442695, %v223_v47  ;;  %v227_v57 = vmul.f32 1.442695, %v218_v48  ;;  %v235_v58 = vmul.f32 1.442695, %v222_v49 }
  0xf0   :  { %368 = vpow2.f32 %v225_v52  ;;  %v231_v59 = vmul.f32 1.442695, %v220_v50  ;;  %v239_v60 = vmul.f32 1.442695, %v224_v51 }
  0xf1   :  { %370 = vpow2.f32 %v233_v53 }
  0xf2   :  { %372 = vpow2.f32 %v229_v54 }
  0xf3   :  { %374 = vpow2.f32 %v237_v55 }
  0xf4   :  { %376 = vpow2.f32 %v227_v57 }
  0xf5   :  { %378 = vpow2.f32 %v235_v58 }
  0xf6   :  { %380 = vpow2.f32 %v231_v59 }
  0xf7   :  { %382 = vpow2.f32 %v239_v60 }
  0xfa   :  { %v369_v0 = vpop.eup %368 }
  0xfb   :  { %v371_v1 = vpop.eup %370  ;;  %v274_v2 = vmul.f32 %v369_v0, %v272_v62 }
  0xfc   :  { %v373_v3 = vpop.eup %372  ;;  %v241_v4 = vadd.f32 %v371_v1, %v369_v0  ;;  %v278_v5 = vmul.f32 %v371_v1, %v273_v63 }
  0xfd   :  { %v375_v6 = vpop.eup %374  ;;  %v276_v7 = vmul.f32 %v373_v3, %v272_v62 }
  0xfe   :  { %v377_v8 = vpop.eup %376  ;;  %v242_v9 = vrot.slane %v241_v4, 4  ;;  %v282_v10 = vadd.f32 %v278_v5, %v274_v2  ;;  %v255_v11 = vadd.f32 %v375_v6, %v373_v3  ;;  %v280_v12 = vmul.f32 %v375_v6, %v273_v63 }
  0xff   :  { %v379_v13 = vpop.eup %378  ;;  %v275_v14 = vmul.f32 %v377_v8, %v272_v62  ;;  %v393_v3 = vmov 1966171168  }
 0x100   :  { %v381_v15 = vpop.eup %380  ;;  %v243_v16 = vadd.f32 %v242_v9, %v241_v4  ;;  %v283_v17 = vrot.slane %v282_v10, 4  ;;  %v256_v18 = vrot.slane %v255_v11, 4  ;;  %v296_v19 = vadd.f32 %v280_v12, %v276_v7 }
 0x101   :  { %v383_v20 = vpop.eup %382  ;;  %v248_v21 = vadd.f32 %v379_v13, %v377_v8  ;;  %v279_v22 = vmul.f32 %v379_v13, %v273_v63  ;;  %v277_v23 = vmul.f32 %v381_v15, %v272_v62  ;;  %v325_v4 = vunpack.c.l.s4 %v393_v3 }
 0x102   :  { %v244_v24 = vrot.slane %v243_v16, 2  ;;  %v284_v25 = vadd.f32 %v283_v17, %v282_v10  ;;  %v257_v26 = vadd.f32 %v256_v18, %v255_v11  ;;  %v297_v27 = vrot.slane %v296_v19, 4 }
 0x103   :  { %v249_v28 = vrot.slane %v248_v21, 4  ;;  %v289_v29 = vadd.f32 %v279_v22, %v275_v14  ;;  %v262_v30 = vadd.f32 %v383_v20, %v381_v15  ;;  %v281_v31 = vmul.f32 %v383_v20, %v273_v63 }
 0x104   :  { %v245_v32 = vadd.f32 %v244_v24, %v243_v16  ;;  %v258_v33 = vrot.slane %v257_v26, 2  ;;  %v298_v34 = vadd.f32 %v297_v27, %v296_v19  ;;  %v285_v42 = vrot.slane %v284_v25, 2 }
 0x105   :  { %v250_v35 = vadd.f32 %v249_v28, %v248_v21  ;;  %v290_v36 = vrot.slane %v289_v29, 4  ;;  %v263_v37 = vrot.slane %v262_v30, 4  ;;  %v303_v38 = vadd.f32 %v281_v31, %v277_v23 }
 0x106   :  { %v246_v39 = vrot.slane %v245_v32, 1  ;;  %v259_v40 = vadd.f32 %v258_v33, %v257_v26  ;;  %v299_v49 = vrot.slane %v298_v34, 2  ;;  %v286_v54 = vadd.f32 %v285_v42, %v284_v25 }
 0x107   :  { %v251_v43 = vrot.slane %v250_v35, 2  ;;  %v264_v44 = vadd.f32 %v263_v37, %v262_v30  ;;  %v304_v45 = vrot.slane %v303_v38, 4  ;;  %v291_v48 = vadd.f32 %v290_v36, %v289_v29 }
 0x108   :  { %v247_v46 = vadd.f32 %v246_v39, %v245_v32  ;;  %v260_v47 = vrot.slane %v259_v40, 1  ;;  %v300_v59 = vadd.f32 %v299_v49, %v298_v34  ;;  %v287_v63 = vrot.slane %v286_v54, 1 }
 0x109   :  { %v252_v50 = vadd.f32 %v251_v43, %v250_v35  ;;  %v265_v51 = vrot.slane %v264_v44, 2  ;;  %v305_v53 = vadd.f32 %v304_v45, %v303_v38  ;;  %v292_v58 = vrot.slane %v291_v48, 2 }
 0x10a   :  { %384 = vrcp.f32 %v247_v46  ;;  %v261_v52 = vadd.f32 %v260_v47, %v259_v40  ;;  %v301_v2 = vrot.slane %v300_v59, 1  ;;  %v288_v6 = vadd.f32 %v287_v63, %v286_v54 }
 0x10b   :  { %v253_v55 = vrot.slane %v252_v50, 1  ;;  %v266_v57 = vadd.f32 %v265_v51, %v264_v44  ;;  %v306_v62 = vrot.slane %v305_v53, 2  ;;  %v293_v1 = vadd.f32 %v292_v58, %v291_v48 }
 0x10c   :  { %386 = vrcp.f32 %v261_v52  ;;  %v302_v10 = vadd.f32 %v301_v2, %v300_v59  ;;  %v326_v12 = vunpack.c.0.s8 %v325_v4 }
 0x10d   :  { %v254_v60 = vadd.f32 %v253_v55, %v252_v50  ;;  %v267_v61 = vrot.slane %v266_v57, 1  ;;  %v307_v5 = vadd.f32 %v306_v62, %v305_v53  ;;  %v294_v8 = vrot.slane %v293_v1, 1 }
 0x10e   :  { %v329_v18 = vsub.s32 %v326_v12, %v422_v56 }
 0x10f   :  { %388 = vrcp.f32 %v254_v60  ;;  %v268_v0 = vadd.f32 %v267_v61, %v266_v57  ;;  %v308_v13 = vrot.slane %v307_v5, 1  ;;  %v295_v15 = vadd.f32 %v294_v8, %v293_v1 }
 0x111   :  { %390 = vrcp.f32 %v268_v0  ;;  %v309_v19 = vadd.f32 %v308_v13, %v307_v5 }
 0x114   :  { %v385_v7 = vpop.eup %384 }
 0x115   :  { %v311_v9 = vmul.f32 %v385_v7, %v288_v6 }
 0x116   :  { %v387_v11 = vpop.eup %386 }
 0x117   :  { %v315_v14 = vmul.f32 %v387_v11, %v302_v10 }
 0x119   :  { %v389_v16 = vpop.eup %388 }
 0x11a   :  { %v313_v17 = vmul.f32 %v389_v16, %v295_v15 }
 0x11b   :  { %v391_v20 = vpop.eup %390 }
 0x11c   :  { %v322_v21 = vcombine.low %v311_v9, %v313_v17  ;;  %v317_v22 = vmul.f32 %v391_v20, %v309_v19 }
 0x11e   :  { %v330_v23 = vrot.slane %v322_v21, %v329_v18  ;;  %v323_v24 = vcombine.low %v315_v14, %v317_v22 }
 0x120   :  { %v337_v25 = vrot.slane %v323_v24, %v329_v18 }
 0x122   :  { %v338_v26 = vcombine.low %v330_v23, %v337_v25 }
 0x124   :  { %v345_v27 = vrot.slane %v338_v26, %v329_v18 }
 0x126   :  { %351 = vst.msk [vmem:[%s433_s2] sm:$0xf] %vm349_vm2, %v345_v27 }

</bundles_post_ra>
